<compile_context>
chip_gen: v7x
topology: tpu7x:2x2x1
jax: 0.10.0
libtpu: 0.0.40
codegen_flags: <defaults>
</compile_context>

<pallas_src>
import functools
import math

import jax
import jax.numpy as jnp
from jax.experimental import pallas as pl
from jax.experimental.pallas import tpu as pltpu

LN_EPS = 1e-5
GELU_C = math.sqrt(2.0 / math.pi)


# ---------------------------------------------------------------------------
# Fused kernel: mel 1x1 conv + L x EncoderLayer, one batch per grid step.
# All activations are (C, W): channels on sublanes, time on lanes.
# ---------------------------------------------------------------------------
def encoder_kernel(x_ref, wm_ref, bm_ref, gam_ref, bet_ref,
                   w1_ref, b1_ref, wd_ref, bd_ref, w2_ref, b2_ref,
                   o_ref, *, true_t):
    H = o_ref.shape[1]
    W = o_ref.shape[2]              # padded time width (multiple of 128, >= true_t + 15)
    L = gam_ref.shape[0]
    KW = wd_ref.shape[2]            # 31
    PW = (KW - 1) // 2              # 15
    H2 = 2 * H

    # Static column-validity masks: columns >= true_t are sequence padding and are
    # forced to zero before every time-mixing conv (this is what makes the circular
    # lane rolls below equivalent to PyTorch's zero-padded convolutions).
    valid_h = jax.lax.broadcasted_iota(jnp.int32, (H, W), 1) < true_t
    valid_2h = jax.lax.broadcasted_iota(jnp.int32, (H2, W), 1) < true_t

    # --- mel: Conv1d(n_mels, H, kernel=1) == (H, M) @ (M, W) MXU matmul (bf16 in) ---
    x = x_ref[0]                                                  # (M, W) f32
    h = jnp.dot(wm_ref[...], x.astype(jnp.bfloat16),
                preferred_element_type=jnp.float32) + bm_ref[...]  # (H, W) f32

    for l in range(L):
        # --- TransposedLayerNorm over channels (sublane axis) ---
        mu = jnp.mean(h, axis=0, keepdims=True)
        xc = h - mu
        var = jnp.mean(xc * xc, axis=0, keepdims=True)
        xn = xc * jax.lax.rsqrt(var + LN_EPS) * gam_ref[l] + bet_ref[l]
        xn = jnp.where(valid_h, xn, 0.0)                          # zero the padding tail

        # --- Conv1d(H, 4H, kernel=3, padding=1): one (4H, 3H) @ (3H, W) matmul.
        # Neighbours via XLU lane rolls; wrap-around reads the zeroed tail.
        prev = pltpu.roll(xn, shift=1, axis=1)                    # xn[t-1]
        nxt = pltpu.roll(xn, shift=W - 1, axis=1)                 # xn[t+1]
        stacked = jnp.concatenate([prev, xn, nxt], axis=0)        # (3H, W), sublane concat
        y = jnp.dot(w1_ref[l], stacked.astype(jnp.bfloat16),
                    preferred_element_type=jnp.float32) + b1_ref[l]  # (4H, W)

        # --- GLU over channels: a * sigmoid(b) ---
        u = y[:H2, :] * jax.nn.sigmoid(y[H2:, :])                 # (2H, W)
        u = jnp.where(valid_2h, u, 0.0)                           # zero the padding tail

        # --- depthwise Conv1d(2H, 2H, kernel=31, padding=15, groups=2H) ---
        # 31 taps = XLU lane rolls (circular shifts land in the zero tail) + VPU FMA.
        wd_l = wd_ref[l]                                          # (2H, KW) f32
        z = u * wd_l[:, PW:PW + 1] + bd_ref[l]                    # centre tap
        for k in range(KW):
            if k == PW:
                continue
            z = z + pltpu.roll(u, shift=(PW - k) % W, axis=1) * wd_l[:, k:k + 1]

        # --- GELU (tanh approximation == nn.GELU(approximate='tanh')) ---
        z = 0.5 * z * (1.0 + jnp.tanh(GELU_C * (z + 0.044715 * z * z * z)))

        # --- Dropout(p) in eval mode: identity ---

        # --- Conv1d(2H, H, kernel=1) + residual (x + conv(x)) ---
        h = h + jnp.dot(w2_ref[l], z.astype(jnp.bfloat16),
                        preferred_element_type=jnp.float32) + b2_ref[l]

    o_ref[0] = h.astype(o_ref.dtype)


# ---------------------------------------------------------------------------
# Wrapper: PyTorch NCT in, NCT out.  No transposes; only lane padding of time.
# ---------------------------------------------------------------------------
def encoder_forward(x_nct, params):
    """x_nct: (B, n_mels, T) like PyTorch; returns (B, hidden, T)."""
    B, M, T = x_nct.shape
    H = params["wm"].shape[0]
    L = params["gamma"].shape[0]
    KW = params["wd"].shape[-1]
    PW = (KW - 1) // 2
    H2, H4 = 2 * H, 4 * H

    # Lane-pad the time axis: >= T+PW so circular rolls wrap into zeros, multiple of
    # 128 so every store / VPU op is lane-dense.
    W = ((T + PW + 127) // 128) * 128
    x_pad = jnp.pad(x_nct, ((0, 0), (0, 0), (0, W - T)))

    # PyTorch Conv1d layouts (Cout, Cin, K) -> kernel layouts (weight_norm pre-folded).
    wm = params["wm"][:, :, 0].astype(jnp.bfloat16)                      # (H, M)
    w1 = jnp.concatenate([params["w1"][..., k] for k in range(3)],
                         axis=-1).astype(jnp.bfloat16)                   # (L, 4H, 3H)
    wd = params["wd"][:, :, 0, :]                                        # (L, 2H, KW)
    w2 = params["w2"][..., 0].astype(jnp.bfloat16)                       # (L, H, 2H)
    bm = params["bm"][:, None]                                           # (H, 1)
    b1 = params["b1"][:, :, None]                                        # (L, 4H, 1)
    bd = params["bd"][:, :, None]                                        # (L, 2H, 1)
    b2 = params["b2"][:, :, None]                                        # (L, H, 1)
    gamma = params["gamma"][:, :, None]                                  # (L, H, 1)
    beta = params["beta"][:, :, None]                                    # (L, H, 1)

    kernel = functools.partial(encoder_kernel, true_t=T)

    y = pl.pallas_call(
        kernel,
        out_shape=jax.ShapeDtypeStruct((B, H, W), jnp.float32),
        grid_spec=pltpu.PrefetchScalarGridSpec(
            num_scalar_prefetch=0,
            grid=(B,),
            in_specs=[
                pl.BlockSpec((1, M, W), lambda b: (b, 0, 0)),         # x (C,T per batch)
                pl.BlockSpec((H, M), lambda b: (0, 0)),               # mel weight (bf16)
                pl.BlockSpec((H, 1), lambda b: (0, 0)),               # mel bias
                pl.BlockSpec((L, H, 1), lambda b: (0, 0, 0)),         # LN gamma
                pl.BlockSpec((L, H, 1), lambda b: (0, 0, 0)),         # LN beta
                pl.BlockSpec((L, H4, 3 * H), lambda b: (0, 0, 0)),    # conv3 weight (bf16)
                pl.BlockSpec((L, H4, 1), lambda b: (0, 0, 0)),        # conv3 bias
                pl.BlockSpec((L, H2, KW), lambda b: (0, 0, 0)),       # dwconv weight (f32)
                pl.BlockSpec((L, H2, 1), lambda b: (0, 0, 0)),        # dwconv bias
                pl.BlockSpec((L, H, H2), lambda b: (0, 0, 0)),        # conv1x1 weight (bf16)
                pl.BlockSpec((L, H, 1), lambda b: (0, 0, 0)),         # conv1x1 bias
            ],
            out_specs=pl.BlockSpec((1, H, W), lambda b: (b, 0, 0)),
        ),
        compiler_params=pltpu.CompilerParams(
            dimension_semantics=("parallel",),
            vmem_limit_bytes=32 * 1024 * 1024),
    )(x_pad, wm, bm, gamma, beta, w1, b1, wd, bd, w2, b2)

    return y[:, :, :T]


# ---------------------------------------------------------------------------
# Pure-JAX reference (same math incl. bf16 MXU operands) for correctness check.
# Operates in NCT with explicit zero padding (independent code path).
# ---------------------------------------------------------------------------
def encoder_ref(x_nct, params):
    bf, f32 = jnp.bfloat16, jnp.float32
    T = x_nct.shape[-1]
    h = jnp.einsum("hm,bmt->bht", params["wm"][:, :, 0].astype(bf),
                   x_nct.astype(bf), preferred_element_type=f32) \
        + params["bm"][None, :, None]
    L = params["gamma"].shape[0]
    KW = params["wd"].shape[-1]
    PW = (KW - 1) // 2
    H2 = params["wd"].shape[1]
    for l in range(L):
        mu = h.mean(axis=1, keepdims=True)
        var = ((h - mu) ** 2).mean(axis=1, keepdims=True)
        xn = (h - mu) * jax.lax.rsqrt(var + LN_EPS) \
            * params["gamma"][l][None, :, None] + params["beta"][l][None, :, None]
        xp = jnp.pad(xn, ((0, 0), (0, 0), (1, 1)))
        y = sum(jnp.einsum("oc,bct->bot", params["w1"][l, :, :, k].astype(bf),
                           xp[:, :, k:k + T].astype(bf), preferred_element_type=f32)
                for k in range(3)) + params["b1"][l][None, :, None]
        u = y[:, :H2] * jax.nn.sigmoid(y[:, H2:])
        up = jnp.pad(u, ((0, 0), (0, 0), (PW, PW)))
        z = sum(up[:, :, k:k + T] * params["wd"][l, :, 0, k][None, :, None]
                for k in range(KW)) + params["bd"][l][None, :, None]
        z = 0.5 * z * (1.0 + jnp.tanh(GELU_C * (z + 0.044715 * z ** 3)))
        h = h + jnp.einsum("oc,bct->bot", params["w2"][l, :, :, 0].astype(bf),
                           z.astype(bf), preferred_element_type=f32) \
              + params["b2"][l][None, :, None]
    return h


# ---------------------------------------------------------------------------
# Deterministic parameters in PyTorch Conv1d layouts (weight_norm pre-folded).
# ---------------------------------------------------------------------------
def make_params(key, n_mels, hidden, n_layers, kw=31):
    H, H2, H4 = hidden, hidden * 2, hidden * 4
    ks = jax.random.split(key, 10)
    s = 0.1
    return {
        "wm": s * jax.random.normal(ks[0], (H, n_mels, 1), jnp.float32),
        "bm": s * jax.random.normal(ks[1], (H,), jnp.float32),
        "gamma": 1.0 + s * jax.random.normal(ks[2], (n_layers, H), jnp.float32),
        "beta": s * jax.random.normal(ks[3], (n_layers, H), jnp.float32),
        "w1": s * jax.random.normal(ks[4], (n_layers, H4, H, 3), jnp.float32),
        "b1": s * jax.random.normal(ks[5], (n_layers, H4), jnp.float32),
        "wd": s * jax.random.normal(ks[6], (n_layers, H2, 1, kw), jnp.float32),
        "bd": s * jax.random.normal(ks[7], (n_layers, H2), jnp.float32),
        "w2": s * jax.random.normal(ks[8], (n_layers, H, H2, 1), jnp.float32),
        "b2": s * jax.random.normal(ks[9], (n_layers, H), jnp.float32),
    }


if __name__ == "__main__":
    B, n_mels, T = 2, 16, 16
    hidden, n_layers = 32, 2

    key = jax.random.PRNGKey(0)
    k_x, k_p = jax.random.split(key)
    x = jax.random.normal(k_x, (B, n_mels, T), jnp.float32)       # PyTorch NCT layout
    params = make_params(k_p, n_mels, hidden, n_layers)

    fwd = jax.jit(encoder_forward)
    out = jax.block_until_ready(fwd(x, params))
    ref = jax.block_until_ready(encoder_ref(x, params))

    assert out.shape == (B, hidden, T), out.shape
    max_err = float(jnp.max(jnp.abs(out - ref)))
    assert max_err < 5e-3, max_err
    print("KERNEL_OK")
</pallas_src>

<mosaic_0001>
module attributes {stable_mosaic.version = 11 : i64} {
  func.func @encoder_kernel(%arg0: i32, %arg1: memref<1x16x128xf32, #tpu.memory_space<vmem>>, %arg2: memref<32x16xbf16, #tpu.memory_space<vmem>>, %arg3: memref<32x1xf32, #tpu.memory_space<vmem>>, %arg4: memref<2x32x1xf32, #tpu.memory_space<vmem>>, %arg5: memref<2x32x1xf32, #tpu.memory_space<vmem>>, %arg6: memref<2x128x96xbf16, #tpu.memory_space<vmem>>, %arg7: memref<2x128x1xf32, #tpu.memory_space<vmem>>, %arg8: memref<2x64x31xf32, #tpu.memory_space<vmem>>, %arg9: memref<2x64x1xf32, #tpu.memory_space<vmem>>, %arg10: memref<2x32x64xbf16, #tpu.memory_space<vmem>>, %arg11: memref<2x32x1xf32, #tpu.memory_space<vmem>>, %arg12: memref<1x32x128xf32, #tpu.memory_space<vmem>>) attributes {dimension_semantics = [#tpu.dimension_semantics<parallel>], iteration_bounds = array<i64: 2>, scalar_prefetch = 0 : i64, scratch_operands = 0 : i64, tpu.core_type = #tpu.core_type<tc>, window_params = [{transform_indices = @transform_0, window_bounds = array<i64: 1, 16, 128>}, {pipeline_mode = #tpu.pipeline_mode<synchronous>, transform_indices = @transform_1, window_bounds = array<i64: 32, 16>}, {pipeline_mode = #tpu.pipeline_mode<synchronous>, transform_indices = @transform_2, window_bounds = array<i64: 32, 1>}, {pipeline_mode = #tpu.pipeline_mode<synchronous>, transform_indices = @transform_3, window_bounds = array<i64: 2, 32, 1>}, {pipeline_mode = #tpu.pipeline_mode<synchronous>, transform_indices = @transform_4, window_bounds = array<i64: 2, 32, 1>}, {pipeline_mode = #tpu.pipeline_mode<synchronous>, transform_indices = @transform_5, window_bounds = array<i64: 2, 128, 96>}, {pipeline_mode = #tpu.pipeline_mode<synchronous>, transform_indices = @transform_6, window_bounds = array<i64: 2, 128, 1>}, {pipeline_mode = #tpu.pipeline_mode<synchronous>, transform_indices = @transform_7, window_bounds = array<i64: 2, 64, 31>}, {pipeline_mode = #tpu.pipeline_mode<synchronous>, transform_indices = @transform_8, window_bounds = array<i64: 2, 64, 1>}, {pipeline_mode = #tpu.pipeline_mode<synchronous>, transform_indices = @transform_9, window_bounds = array<i64: 2, 32, 64>}, {pipeline_mode = #tpu.pipeline_mode<synchronous>, transform_indices = @transform_10, window_bounds = array<i64: 2, 32, 1>}, {transform_indices = @transform_11, window_bounds = array<i64: 1, 32, 128>}]} {
    %0 = tpu.iota {dimensions = array<i32: 1>} : vector<32x128xi32>
    %c16_i32 = arith.constant 16 : i32
    %1 = vector.broadcast %c16_i32 : i32 to vector<32x128xi32>
    %2 = arith.cmpi slt, %0, %1 : vector<32x128xi32>
    %3 = tpu.iota {dimensions = array<i32: 1>} : vector<64x128xi32>
    %c16_i32_0 = arith.constant 16 : i32
    %4 = vector.broadcast %c16_i32_0 : i32 to vector<64x128xi32>
    %5 = arith.cmpi slt, %3, %4 : vector<64x128xi32>
    %c0 = arith.constant 0 : index
    %c0_1 = arith.constant 0 : index
    %c0_2 = arith.constant 0 : index
    %6 = vector.load %arg1[%c0, %c0_1, %c0_2] : memref<1x16x128xf32, #tpu.memory_space<vmem>>, vector<1x16x128xf32>
    %7 = vector.shape_cast %6 : vector<1x16x128xf32> to vector<16x128xf32>
    %c0_3 = arith.constant 0 : index
    %c0_4 = arith.constant 0 : index
    %8 = vector.load %arg2[%c0_3, %c0_4] : memref<32x16xbf16, #tpu.memory_space<vmem>>, vector<32x16xbf16>
    %9 = arith.truncf %7 : vector<16x128xf32> to vector<16x128xbf16>
    %cst = arith.constant dense<0.000000e+00> : vector<32x128xf32>
    %10 = tpu.matmul %8, %9, %cst {dimension_numbers = #tpu.dot_dimension_numbers<[1], [0], [0], [1], [0, 0, 1, 1], [], []>} : vector<32x16xbf16>, vector<16x128xbf16>, vector<32x128xf32> -> vector<32x128xf32>
    %c0_5 = arith.constant 0 : index
    %c0_6 = arith.constant 0 : index
    %11 = vector.load %arg3[%c0_5, %c0_6] : memref<32x1xf32, #tpu.memory_space<vmem>>, vector<32x1xf32>
    %12 = vector.broadcast %11 : vector<32x1xf32> to vector<32x128xf32>
    %13 = arith.addf %10, %12 : vector<32x128xf32>
    %cst_7 = arith.constant dense<0.000000e+00> : vector<128xf32>
    %14 = vector.multi_reduction <add>, %13, %cst_7 [0] : vector<32x128xf32> to vector<128xf32>
    %15 = vector.shape_cast %14 : vector<128xf32> to vector<1x128xf32>
    %cst_8 = arith.constant 3.200000e+01 : f32
    %16 = vector.broadcast %cst_8 : f32 to vector<1x128xf32>
    %17 = arith.divf %15, %16 : vector<1x128xf32>
    %18 = vector.broadcast %17 : vector<1x128xf32> to vector<32x128xf32>
    %19 = arith.subf %13, %18 : vector<32x128xf32>
    %20 = arith.mulf %19, %19 : vector<32x128xf32>
    %cst_9 = arith.constant dense<0.000000e+00> : vector<128xf32>
    %21 = vector.multi_reduction <add>, %20, %cst_9 [0] : vector<32x128xf32> to vector<128xf32>
    %22 = vector.shape_cast %21 : vector<128xf32> to vector<1x128xf32>
    %cst_10 = arith.constant 3.200000e+01 : f32
    %23 = vector.broadcast %cst_10 : f32 to vector<1x128xf32>
    %24 = arith.divf %22, %23 : vector<1x128xf32>
    %cst_11 = arith.constant 9.99999974E-6 : f32
    %25 = vector.broadcast %cst_11 : f32 to vector<1x128xf32>
    %26 = arith.addf %24, %25 : vector<1x128xf32>
    %27 = math.rsqrt %26 : vector<1x128xf32>
    %28 = vector.broadcast %27 : vector<1x128xf32> to vector<32x128xf32>
    %29 = arith.mulf %19, %28 : vector<32x128xf32>
    %c0_12 = arith.constant 0 : index
    %c0_13 = arith.constant 0 : index
    %c0_14 = arith.constant 0 : index
    %30 = vector.load %arg4[%c0_12, %c0_13, %c0_14] : memref<2x32x1xf32, #tpu.memory_space<vmem>>, vector<1x32x1xf32>
    %31 = vector.shape_cast %30 : vector<1x32x1xf32> to vector<32x1xf32>
    %32 = vector.broadcast %31 : vector<32x1xf32> to vector<32x128xf32>
    %33 = arith.mulf %29, %32 : vector<32x128xf32>
    %c0_15 = arith.constant 0 : index
    %c0_16 = arith.constant 0 : index
    %c0_17 = arith.constant 0 : index
    %34 = vector.load %arg5[%c0_15, %c0_16, %c0_17] : memref<2x32x1xf32, #tpu.memory_space<vmem>>, vector<1x32x1xf32>
    %35 = vector.shape_cast %34 : vector<1x32x1xf32> to vector<32x1xf32>
    %36 = vector.broadcast %35 : vector<32x1xf32> to vector<32x128xf32>
    %37 = arith.addf %33, %36 : vector<32x128xf32>
    %cst_18 = arith.constant 0.000000e+00 : f32
    %38 = vector.broadcast %cst_18 : f32 to vector<32x128xf32>
    %39 = arith.select %2, %37, %38 : vector<32x128xi1>, vector<32x128xf32>
    %c1_i32 = arith.constant 1 : i32
    %40 = tpu.dynamic_rotate %39 by %c1_i32 dim 1 : vector<32x128xf32>, i32 -> vector<32x128xf32>
    %c127_i32 = arith.constant 127 : i32
    %41 = tpu.dynamic_rotate %39 by %c127_i32 dim 1 : vector<32x128xf32>, i32 -> vector<32x128xf32>
    %42 = tpu.concatenate %40, %39, %41 in 0 : vector<32x128xf32>, vector<32x128xf32>, vector<32x128xf32> -> vector<96x128xf32>
    %c0_19 = arith.constant 0 : index
    %c0_20 = arith.constant 0 : index
    %c0_21 = arith.constant 0 : index
    %43 = vector.load %arg6[%c0_19, %c0_20, %c0_21] : memref<2x128x96xbf16, #tpu.memory_space<vmem>>, vector<1x128x96xbf16>
    %44 = vector.shape_cast %43 : vector<1x128x96xbf16> to vector<128x96xbf16>
    %45 = arith.truncf %42 : vector<96x128xf32> to vector<96x128xbf16>
    %cst_22 = arith.constant dense<0.000000e+00> : vector<128x128xf32>
    %46 = tpu.matmul %44, %45, %cst_22 {dimension_numbers = #tpu.dot_dimension_numbers<[1], [0], [0], [1], [0, 0, 1, 1], [], []>} : vector<128x96xbf16>, vector<96x128xbf16>, vector<128x128xf32> -> vector<128x128xf32>
    %c0_23 = arith.constant 0 : index
    %c0_24 = arith.constant 0 : index
    %c0_25 = arith.constant 0 : index
    %47 = vector.load %arg7[%c0_23, %c0_24, %c0_25] : memref<2x128x1xf32, #tpu.memory_space<vmem>>, vector<1x128x1xf32>
    %48 = vector.shape_cast %47 : vector<1x128x1xf32> to vector<128x1xf32>
    %49 = vector.broadcast %48 : vector<128x1xf32> to vector<128x128xf32>
    %50 = arith.addf %46, %49 : vector<128x128xf32>
    %51 = vector.extract_strided_slice %50 {offsets = [0, 0], sizes = [64, 128], strides = [1, 1]} : vector<128x128xf32> to vector<64x128xf32>
    %52 = vector.extract_strided_slice %50 {offsets = [64, 0], sizes = [64, 128], strides = [1, 1]} : vector<128x128xf32> to vector<64x128xf32>
    %53 = arith.negf %52 : vector<64x128xf32>
    %54 = math.exp %53 : vector<64x128xf32>
    %cst_26 = arith.constant 1.000000e+00 : f32
    %55 = vector.broadcast %cst_26 : f32 to vector<64x128xf32>
    %56 = arith.addf %55, %54 : vector<64x128xf32>
    %57 = arith.divf %55, %56 : vector<64x128xf32>
    %58 = arith.mulf %51, %57 : vector<64x128xf32>
    %cst_27 = arith.constant 0.000000e+00 : f32
    %59 = vector.broadcast %cst_27 : f32 to vector<64x128xf32>
    %60 = arith.select %5, %58, %59 : vector<64x128xi1>, vector<64x128xf32>
    %c0_28 = arith.constant 0 : index
    %c0_29 = arith.constant 0 : index
    %c0_30 = arith.constant 0 : index
    %61 = vector.load %arg8[%c0_28, %c0_29, %c0_30] : memref<2x64x31xf32, #tpu.memory_space<vmem>>, vector<1x64x31xf32>
    %62 = vector.shape_cast %61 : vector<1x64x31xf32> to vector<64x31xf32>
    %63 = vector.extract_strided_slice %62 {offsets = [0, 15], sizes = [64, 1], strides = [1, 1]} : vector<64x31xf32> to vector<64x1xf32>
    %64 = vector.broadcast %63 : vector<64x1xf32> to vector<64x128xf32>
    %65 = arith.mulf %60, %64 : vector<64x128xf32>
    %c0_31 = arith.constant 0 : index
    %c0_32 = arith.constant 0 : index
    %c0_33 = arith.constant 0 : index
    %66 = vector.load %arg9[%c0_31, %c0_32, %c0_33] : memref<2x64x1xf32, #tpu.memory_space<vmem>>, vector<1x64x1xf32>
    %67 = vector.shape_cast %66 : vector<1x64x1xf32> to vector<64x1xf32>
    %68 = vector.broadcast %67 : vector<64x1xf32> to vector<64x128xf32>
    %69 = arith.addf %65, %68 : vector<64x128xf32>
    %c15_i32 = arith.constant 15 : i32
    %70 = tpu.dynamic_rotate %60 by %c15_i32 dim 1 : vector<64x128xf32>, i32 -> vector<64x128xf32>
    %71 = vector.extract_strided_slice %62 {offsets = [0, 0], sizes = [64, 1], strides = [1, 1]} : vector<64x31xf32> to vector<64x1xf32>
    %72 = vector.broadcast %71 : vector<64x1xf32> to vector<64x128xf32>
    %73 = arith.mulf %70, %72 : vector<64x128xf32>
    %74 = arith.addf %69, %73 : vector<64x128xf32>
    %c14_i32 = arith.constant 14 : i32
    %75 = tpu.dynamic_rotate %60 by %c14_i32 dim 1 : vector<64x128xf32>, i32 -> vector<64x128xf32>
    %76 = vector.extract_strided_slice %62 {offsets = [0, 1], sizes = [64, 1], strides = [1, 1]} : vector<64x31xf32> to vector<64x1xf32>
    %77 = vector.broadcast %76 : vector<64x1xf32> to vector<64x128xf32>
    %78 = arith.mulf %75, %77 : vector<64x128xf32>
    %79 = arith.addf %74, %78 : vector<64x128xf32>
    %c13_i32 = arith.constant 13 : i32
    %80 = tpu.dynamic_rotate %60 by %c13_i32 dim 1 : vector<64x128xf32>, i32 -> vector<64x128xf32>
    %81 = vector.extract_strided_slice %62 {offsets = [0, 2], sizes = [64, 1], strides = [1, 1]} : vector<64x31xf32> to vector<64x1xf32>
    %82 = vector.broadcast %81 : vector<64x1xf32> to vector<64x128xf32>
    %83 = arith.mulf %80, %82 : vector<64x128xf32>
    %84 = arith.addf %79, %83 : vector<64x128xf32>
    %c12_i32 = arith.constant 12 : i32
    %85 = tpu.dynamic_rotate %60 by %c12_i32 dim 1 : vector<64x128xf32>, i32 -> vector<64x128xf32>
    %86 = vector.extract_strided_slice %62 {offsets = [0, 3], sizes = [64, 1], strides = [1, 1]} : vector<64x31xf32> to vector<64x1xf32>
    %87 = vector.broadcast %86 : vector<64x1xf32> to vector<64x128xf32>
    %88 = arith.mulf %85, %87 : vector<64x128xf32>
    %89 = arith.addf %84, %88 : vector<64x128xf32>
    %c11_i32 = arith.constant 11 : i32
    %90 = tpu.dynamic_rotate %60 by %c11_i32 dim 1 : vector<64x128xf32>, i32 -> vector<64x128xf32>
    %91 = vector.extract_strided_slice %62 {offsets = [0, 4], sizes = [64, 1], strides = [1, 1]} : vector<64x31xf32> to vector<64x1xf32>
    %92 = vector.broadcast %91 : vector<64x1xf32> to vector<64x128xf32>
    %93 = arith.mulf %90, %92 : vector<64x128xf32>
    %94 = arith.addf %89, %93 : vector<64x128xf32>
    %c10_i32 = arith.constant 10 : i32
    %95 = tpu.dynamic_rotate %60 by %c10_i32 dim 1 : vector<64x128xf32>, i32 -> vector<64x128xf32>
    %96 = vector.extract_strided_slice %62 {offsets = [0, 5], sizes = [64, 1], strides = [1, 1]} : vector<64x31xf32> to vector<64x1xf32>
    %97 = vector.broadcast %96 : vector<64x1xf32> to vector<64x128xf32>
    %98 = arith.mulf %95, %97 : vector<64x128xf32>
    %99 = arith.addf %94, %98 : vector<64x128xf32>
    %c9_i32 = arith.constant 9 : i32
    %100 = tpu.dynamic_rotate %60 by %c9_i32 dim 1 : vector<64x128xf32>, i32 -> vector<64x128xf32>
    %101 = vector.extract_strided_slice %62 {offsets = [0, 6], sizes = [64, 1], strides = [1, 1]} : vector<64x31xf32> to vector<64x1xf32>
    %102 = vector.broadcast %101 : vector<64x1xf32> to vector<64x128xf32>
    %103 = arith.mulf %100, %102 : vector<64x128xf32>
    %104 = arith.addf %99, %103 : vector<64x128xf32>
    %c8_i32 = arith.constant 8 : i32
    %105 = tpu.dynamic_rotate %60 by %c8_i32 dim 1 : vector<64x128xf32>, i32 -> vector<64x128xf32>
    %106 = vector.extract_strided_slice %62 {offsets = [0, 7], sizes = [64, 1], strides = [1, 1]} : vector<64x31xf32> to vector<64x1xf32>
    %107 = vector.broadcast %106 : vector<64x1xf32> to vector<64x128xf32>
    %108 = arith.mulf %105, %107 : vector<64x128xf32>
    %109 = arith.addf %104, %108 : vector<64x128xf32>
    %c7_i32 = arith.constant 7 : i32
    %110 = tpu.dynamic_rotate %60 by %c7_i32 dim 1 : vector<64x128xf32>, i32 -> vector<64x128xf32>
    %111 = vector.extract_strided_slice %62 {offsets = [0, 8], sizes = [64, 1], strides = [1, 1]} : vector<64x31xf32> to vector<64x1xf32>
    %112 = vector.broadcast %111 : vector<64x1xf32> to vector<64x128xf32>
    %113 = arith.mulf %110, %112 : vector<64x128xf32>
    %114 = arith.addf %109, %113 : vector<64x128xf32>
    %c6_i32 = arith.constant 6 : i32
    %115 = tpu.dynamic_rotate %60 by %c6_i32 dim 1 : vector<64x128xf32>, i32 -> vector<64x128xf32>
    %116 = vector.extract_strided_slice %62 {offsets = [0, 9], sizes = [64, 1], strides = [1, 1]} : vector<64x31xf32> to vector<64x1xf32>
    %117 = vector.broadcast %116 : vector<64x1xf32> to vector<64x128xf32>
    %118 = arith.mulf %115, %117 : vector<64x128xf32>
    %119 = arith.addf %114, %118 : vector<64x128xf32>
    %c5_i32 = arith.constant 5 : i32
    %120 = tpu.dynamic_rotate %60 by %c5_i32 dim 1 : vector<64x128xf32>, i32 -> vector<64x128xf32>
    %121 = vector.extract_strided_slice %62 {offsets = [0, 10], sizes = [64, 1], strides = [1, 1]} : vector<64x31xf32> to vector<64x1xf32>
    %122 = vector.broadcast %121 : vector<64x1xf32> to vector<64x128xf32>
    %123 = arith.mulf %120, %122 : vector<64x128xf32>
    %124 = arith.addf %119, %123 : vector<64x128xf32>
    %c4_i32 = arith.constant 4 : i32
    %125 = tpu.dynamic_rotate %60 by %c4_i32 dim 1 : vector<64x128xf32>, i32 -> vector<64x128xf32>
    %126 = vector.extract_strided_slice %62 {offsets = [0, 11], sizes = [64, 1], strides = [1, 1]} : vector<64x31xf32> to vector<64x1xf32>
    %127 = vector.broadcast %126 : vector<64x1xf32> to vector<64x128xf32>
    %128 = arith.mulf %125, %127 : vector<64x128xf32>
    %129 = arith.addf %124, %128 : vector<64x128xf32>
    %c3_i32 = arith.constant 3 : i32
    %130 = tpu.dynamic_rotate %60 by %c3_i32 dim 1 : vector<64x128xf32>, i32 -> vector<64x128xf32>
    %131 = vector.extract_strided_slice %62 {offsets = [0, 12], sizes = [64, 1], strides = [1, 1]} : vector<64x31xf32> to vector<64x1xf32>
    %132 = vector.broadcast %131 : vector<64x1xf32> to vector<64x128xf32>
    %133 = arith.mulf %130, %132 : vector<64x128xf32>
    %134 = arith.addf %129, %133 : vector<64x128xf32>
    %c2_i32 = arith.constant 2 : i32
    %135 = tpu.dynamic_rotate %60 by %c2_i32 dim 1 : vector<64x128xf32>, i32 -> vector<64x128xf32>
    %136 = vector.extract_strided_slice %62 {offsets = [0, 13], sizes = [64, 1], strides = [1, 1]} : vector<64x31xf32> to vector<64x1xf32>
    %137 = vector.broadcast %136 : vector<64x1xf32> to vector<64x128xf32>
    %138 = arith.mulf %135, %137 : vector<64x128xf32>
    %139 = arith.addf %134, %138 : vector<64x128xf32>
    %c1_i32_34 = arith.constant 1 : i32
    %140 = tpu.dynamic_rotate %60 by %c1_i32_34 dim 1 : vector<64x128xf32>, i32 -> vector<64x128xf32>
    %141 = vector.extract_strided_slice %62 {offsets = [0, 14], sizes = [64, 1], strides = [1, 1]} : vector<64x31xf32> to vector<64x1xf32>
    %142 = vector.broadcast %141 : vector<64x1xf32> to vector<64x128xf32>
    %143 = arith.mulf %140, %142 : vector<64x128xf32>
    %144 = arith.addf %139, %143 : vector<64x128xf32>
    %c127_i32_35 = arith.constant 127 : i32
    %145 = tpu.dynamic_rotate %60 by %c127_i32_35 dim 1 : vector<64x128xf32>, i32 -> vector<64x128xf32>
    %146 = vector.extract_strided_slice %62 {offsets = [0, 16], sizes = [64, 1], strides = [1, 1]} : vector<64x31xf32> to vector<64x1xf32>
    %147 = vector.broadcast %146 : vector<64x1xf32> to vector<64x128xf32>
    %148 = arith.mulf %145, %147 : vector<64x128xf32>
    %149 = arith.addf %144, %148 : vector<64x128xf32>
    %c126_i32 = arith.constant 126 : i32
    %150 = tpu.dynamic_rotate %60 by %c126_i32 dim 1 : vector<64x128xf32>, i32 -> vector<64x128xf32>
    %151 = vector.extract_strided_slice %62 {offsets = [0, 17], sizes = [64, 1], strides = [1, 1]} : vector<64x31xf32> to vector<64x1xf32>
    %152 = vector.broadcast %151 : vector<64x1xf32> to vector<64x128xf32>
    %153 = arith.mulf %150, %152 : vector<64x128xf32>
    %154 = arith.addf %149, %153 : vector<64x128xf32>
    %c125_i32 = arith.constant 125 : i32
    %155 = tpu.dynamic_rotate %60 by %c125_i32 dim 1 : vector<64x128xf32>, i32 -> vector<64x128xf32>
    %156 = vector.extract_strided_slice %62 {offsets = [0, 18], sizes = [64, 1], strides = [1, 1]} : vector<64x31xf32> to vector<64x1xf32>
    %157 = vector.broadcast %156 : vector<64x1xf32> to vector<64x128xf32>
    %158 = arith.mulf %155, %157 : vector<64x128xf32>
    %159 = arith.addf %154, %158 : vector<64x128xf32>
    %c124_i32 = arith.constant 124 : i32
    %160 = tpu.dynamic_rotate %60 by %c124_i32 dim 1 : vector<64x128xf32>, i32 -> vector<64x128xf32>
    %161 = vector.extract_strided_slice %62 {offsets = [0, 19], sizes = [64, 1], strides = [1, 1]} : vector<64x31xf32> to vector<64x1xf32>
    %162 = vector.broadcast %161 : vector<64x1xf32> to vector<64x128xf32>
    %163 = arith.mulf %160, %162 : vector<64x128xf32>
    %164 = arith.addf %159, %163 : vector<64x128xf32>
    %c123_i32 = arith.constant 123 : i32
    %165 = tpu.dynamic_rotate %60 by %c123_i32 dim 1 : vector<64x128xf32>, i32 -> vector<64x128xf32>
    %166 = vector.extract_strided_slice %62 {offsets = [0, 20], sizes = [64, 1], strides = [1, 1]} : vector<64x31xf32> to vector<64x1xf32>
    %167 = vector.broadcast %166 : vector<64x1xf32> to vector<64x128xf32>
    %168 = arith.mulf %165, %167 : vector<64x128xf32>
    %169 = arith.addf %164, %168 : vector<64x128xf32>
    %c122_i32 = arith.constant 122 : i32
    %170 = tpu.dynamic_rotate %60 by %c122_i32 dim 1 : vector<64x128xf32>, i32 -> vector<64x128xf32>
    %171 = vector.extract_strided_slice %62 {offsets = [0, 21], sizes = [64, 1], strides = [1, 1]} : vector<64x31xf32> to vector<64x1xf32>
    %172 = vector.broadcast %171 : vector<64x1xf32> to vector<64x128xf32>
    %173 = arith.mulf %170, %172 : vector<64x128xf32>
    %174 = arith.addf %169, %173 : vector<64x128xf32>
    %c121_i32 = arith.constant 121 : i32
    %175 = tpu.dynamic_rotate %60 by %c121_i32 dim 1 : vector<64x128xf32>, i32 -> vector<64x128xf32>
    %176 = vector.extract_strided_slice %62 {offsets = [0, 22], sizes = [64, 1], strides = [1, 1]} : vector<64x31xf32> to vector<64x1xf32>
    %177 = vector.broadcast %176 : vector<64x1xf32> to vector<64x128xf32>
    %178 = arith.mulf %175, %177 : vector<64x128xf32>
    %179 = arith.addf %174, %178 : vector<64x128xf32>
    %c120_i32 = arith.constant 120 : i32
    %180 = tpu.dynamic_rotate %60 by %c120_i32 dim 1 : vector<64x128xf32>, i32 -> vector<64x128xf32>
    %181 = vector.extract_strided_slice %62 {offsets = [0, 23], sizes = [64, 1], strides = [1, 1]} : vector<64x31xf32> to vector<64x1xf32>
    %182 = vector.broadcast %181 : vector<64x1xf32> to vector<64x128xf32>
    %183 = arith.mulf %180, %182 : vector<64x128xf32>
    %184 = arith.addf %179, %183 : vector<64x128xf32>
    %c119_i32 = arith.constant 119 : i32
    %185 = tpu.dynamic_rotate %60 by %c119_i32 dim 1 : vector<64x128xf32>, i32 -> vector<64x128xf32>
    %186 = vector.extract_strided_slice %62 {offsets = [0, 24], sizes = [64, 1], strides = [1, 1]} : vector<64x31xf32> to vector<64x1xf32>
    %187 = vector.broadcast %186 : vector<64x1xf32> to vector<64x128xf32>
    %188 = arith.mulf %185, %187 : vector<64x128xf32>
    %189 = arith.addf %184, %188 : vector<64x128xf32>
    %c118_i32 = arith.constant 118 : i32
    %190 = tpu.dynamic_rotate %60 by %c118_i32 dim 1 : vector<64x128xf32>, i32 -> vector<64x128xf32>
    %191 = vector.extract_strided_slice %62 {offsets = [0, 25], sizes = [64, 1], strides = [1, 1]} : vector<64x31xf32> to vector<64x1xf32>
    %192 = vector.broadcast %191 : vector<64x1xf32> to vector<64x128xf32>
    %193 = arith.mulf %190, %192 : vector<64x128xf32>
    %194 = arith.addf %189, %193 : vector<64x128xf32>
    %c117_i32 = arith.constant 117 : i32
    %195 = tpu.dynamic_rotate %60 by %c117_i32 dim 1 : vector<64x128xf32>, i32 -> vector<64x128xf32>
    %196 = vector.extract_strided_slice %62 {offsets = [0, 26], sizes = [64, 1], strides = [1, 1]} : vector<64x31xf32> to vector<64x1xf32>
    %197 = vector.broadcast %196 : vector<64x1xf32> to vector<64x128xf32>
    %198 = arith.mulf %195, %197 : vector<64x128xf32>
    %199 = arith.addf %194, %198 : vector<64x128xf32>
    %c116_i32 = arith.constant 116 : i32
    %200 = tpu.dynamic_rotate %60 by %c116_i32 dim 1 : vector<64x128xf32>, i32 -> vector<64x128xf32>
    %201 = vector.extract_strided_slice %62 {offsets = [0, 27], sizes = [64, 1], strides = [1, 1]} : vector<64x31xf32> to vector<64x1xf32>
    %202 = vector.broadcast %201 : vector<64x1xf32> to vector<64x128xf32>
    %203 = arith.mulf %200, %202 : vector<64x128xf32>
    %204 = arith.addf %199, %203 : vector<64x128xf32>
    %c115_i32 = arith.constant 115 : i32
    %205 = tpu.dynamic_rotate %60 by %c115_i32 dim 1 : vector<64x128xf32>, i32 -> vector<64x128xf32>
    %206 = vector.extract_strided_slice %62 {offsets = [0, 28], sizes = [64, 1], strides = [1, 1]} : vector<64x31xf32> to vector<64x1xf32>
    %207 = vector.broadcast %206 : vector<64x1xf32> to vector<64x128xf32>
    %208 = arith.mulf %205, %207 : vector<64x128xf32>
    %209 = arith.addf %204, %208 : vector<64x128xf32>
    %c114_i32 = arith.constant 114 : i32
    %210 = tpu.dynamic_rotate %60 by %c114_i32 dim 1 : vector<64x128xf32>, i32 -> vector<64x128xf32>
    %211 = vector.extract_strided_slice %62 {offsets = [0, 29], sizes = [64, 1], strides = [1, 1]} : vector<64x31xf32> to vector<64x1xf32>
    %212 = vector.broadcast %211 : vector<64x1xf32> to vector<64x128xf32>
    %213 = arith.mulf %210, %212 : vector<64x128xf32>
    %214 = arith.addf %209, %213 : vector<64x128xf32>
    %c113_i32 = arith.constant 113 : i32
    %215 = tpu.dynamic_rotate %60 by %c113_i32 dim 1 : vector<64x128xf32>, i32 -> vector<64x128xf32>
    %216 = vector.extract_strided_slice %62 {offsets = [0, 30], sizes = [64, 1], strides = [1, 1]} : vector<64x31xf32> to vector<64x1xf32>
    %217 = vector.broadcast %216 : vector<64x1xf32> to vector<64x128xf32>
    %218 = arith.mulf %215, %217 : vector<64x128xf32>
    %219 = arith.addf %214, %218 : vector<64x128xf32>
    %cst_36 = arith.constant 5.000000e-01 : f32
    %220 = vector.broadcast %cst_36 : f32 to vector<64x128xf32>
    %221 = arith.mulf %220, %219 : vector<64x128xf32>
    %cst_37 = arith.constant 4.471500e-02 : f32
    %222 = vector.broadcast %cst_37 : f32 to vector<64x128xf32>
    %223 = arith.mulf %222, %219 : vector<64x128xf32>
    %224 = arith.mulf %223, %219 : vector<64x128xf32>
    %225 = arith.mulf %224, %219 : vector<64x128xf32>
    %226 = arith.addf %219, %225 : vector<64x128xf32>
    %cst_38 = arith.constant 0.797884583 : f32
    %227 = vector.broadcast %cst_38 : f32 to vector<64x128xf32>
    %228 = arith.mulf %227, %226 : vector<64x128xf32>
    %229 = math.tanh %228 : vector<64x128xf32>
    %cst_39 = arith.constant 1.000000e+00 : f32
    %230 = vector.broadcast %cst_39 : f32 to vector<64x128xf32>
    %231 = arith.addf %230, %229 : vector<64x128xf32>
    %232 = arith.mulf %221, %231 : vector<64x128xf32>
    %c0_40 = arith.constant 0 : index
    %c0_41 = arith.constant 0 : index
    %c0_42 = arith.constant 0 : index
    %233 = vector.load %arg10[%c0_40, %c0_41, %c0_42] : memref<2x32x64xbf16, #tpu.memory_space<vmem>>, vector<1x32x64xbf16>
    %234 = vector.shape_cast %233 : vector<1x32x64xbf16> to vector<32x64xbf16>
    %235 = arith.truncf %232 : vector<64x128xf32> to vector<64x128xbf16>
    %cst_43 = arith.constant dense<0.000000e+00> : vector<32x128xf32>
    %236 = tpu.matmul %234, %235, %cst_43 {dimension_numbers = #tpu.dot_dimension_numbers<[1], [0], [0], [1], [0, 0, 1, 1], [], []>} : vector<32x64xbf16>, vector<64x128xbf16>, vector<32x128xf32> -> vector<32x128xf32>
    %237 = arith.addf %13, %236 : vector<32x128xf32>
    %c0_44 = arith.constant 0 : index
    %c0_45 = arith.constant 0 : index
    %c0_46 = arith.constant 0 : index
    %238 = vector.load %arg11[%c0_44, %c0_45, %c0_46] : memref<2x32x1xf32, #tpu.memory_space<vmem>>, vector<1x32x1xf32>
    %239 = vector.shape_cast %238 : vector<1x32x1xf32> to vector<32x1xf32>
    %240 = vector.broadcast %239 : vector<32x1xf32> to vector<32x128xf32>
    %241 = arith.addf %237, %240 : vector<32x128xf32>
    %cst_47 = arith.constant dense<0.000000e+00> : vector<128xf32>
    %242 = vector.multi_reduction <add>, %241, %cst_47 [0] : vector<32x128xf32> to vector<128xf32>
    %243 = vector.shape_cast %242 : vector<128xf32> to vector<1x128xf32>
    %cst_48 = arith.constant 3.200000e+01 : f32
    %244 = vector.broadcast %cst_48 : f32 to vector<1x128xf32>
    %245 = arith.divf %243, %244 : vector<1x128xf32>
    %246 = vector.broadcast %245 : vector<1x128xf32> to vector<32x128xf32>
    %247 = arith.subf %241, %246 : vector<32x128xf32>
    %248 = arith.mulf %247, %247 : vector<32x128xf32>
    %cst_49 = arith.constant dense<0.000000e+00> : vector<128xf32>
    %249 = vector.multi_reduction <add>, %248, %cst_49 [0] : vector<32x128xf32> to vector<128xf32>
    %250 = vector.shape_cast %249 : vector<128xf32> to vector<1x128xf32>
    %cst_50 = arith.constant 3.200000e+01 : f32
    %251 = vector.broadcast %cst_50 : f32 to vector<1x128xf32>
    %252 = arith.divf %250, %251 : vector<1x128xf32>
    %cst_51 = arith.constant 9.99999974E-6 : f32
    %253 = vector.broadcast %cst_51 : f32 to vector<1x128xf32>
    %254 = arith.addf %252, %253 : vector<1x128xf32>
    %255 = math.rsqrt %254 : vector<1x128xf32>
    %256 = vector.broadcast %255 : vector<1x128xf32> to vector<32x128xf32>
    %257 = arith.mulf %247, %256 : vector<32x128xf32>
    %c1 = arith.constant 1 : index
    %c0_52 = arith.constant 0 : index
    %c0_53 = arith.constant 0 : index
    %258 = vector.load %arg4[%c1, %c0_52, %c0_53] : memref<2x32x1xf32, #tpu.memory_space<vmem>>, vector<1x32x1xf32>
    %259 = vector.shape_cast %258 : vector<1x32x1xf32> to vector<32x1xf32>
    %260 = vector.broadcast %259 : vector<32x1xf32> to vector<32x128xf32>
    %261 = arith.mulf %257, %260 : vector<32x128xf32>
    %c1_54 = arith.constant 1 : index
    %c0_55 = arith.constant 0 : index
    %c0_56 = arith.constant 0 : index
    %262 = vector.load %arg5[%c1_54, %c0_55, %c0_56] : memref<2x32x1xf32, #tpu.memory_space<vmem>>, vector<1x32x1xf32>
    %263 = vector.shape_cast %262 : vector<1x32x1xf32> to vector<32x1xf32>
    %264 = vector.broadcast %263 : vector<32x1xf32> to vector<32x128xf32>
    %265 = arith.addf %261, %264 : vector<32x128xf32>
    %cst_57 = arith.constant 0.000000e+00 : f32
    %266 = vector.broadcast %cst_57 : f32 to vector<32x128xf32>
    %267 = arith.select %2, %265, %266 : vector<32x128xi1>, vector<32x128xf32>
    %c1_i32_58 = arith.constant 1 : i32
    %268 = tpu.dynamic_rotate %267 by %c1_i32_58 dim 1 : vector<32x128xf32>, i32 -> vector<32x128xf32>
    %c127_i32_59 = arith.constant 127 : i32
    %269 = tpu.dynamic_rotate %267 by %c127_i32_59 dim 1 : vector<32x128xf32>, i32 -> vector<32x128xf32>
    %270 = tpu.concatenate %268, %267, %269 in 0 : vector<32x128xf32>, vector<32x128xf32>, vector<32x128xf32> -> vector<96x128xf32>
    %c1_60 = arith.constant 1 : index
    %c0_61 = arith.constant 0 : index
    %c0_62 = arith.constant 0 : index
    %271 = vector.load %arg6[%c1_60, %c0_61, %c0_62] : memref<2x128x96xbf16, #tpu.memory_space<vmem>>, vector<1x128x96xbf16>
    %272 = vector.shape_cast %271 : vector<1x128x96xbf16> to vector<128x96xbf16>
    %273 = arith.truncf %270 : vector<96x128xf32> to vector<96x128xbf16>
    %cst_63 = arith.constant dense<0.000000e+00> : vector<128x128xf32>
    %274 = tpu.matmul %272, %273, %cst_63 {dimension_numbers = #tpu.dot_dimension_numbers<[1], [0], [0], [1], [0, 0, 1, 1], [], []>} : vector<128x96xbf16>, vector<96x128xbf16>, vector<128x128xf32> -> vector<128x128xf32>
    %c1_64 = arith.constant 1 : index
    %c0_65 = arith.constant 0 : index
    %c0_66 = arith.constant 0 : index
    %275 = vector.load %arg7[%c1_64, %c0_65, %c0_66] : memref<2x128x1xf32, #tpu.memory_space<vmem>>, vector<1x128x1xf32>
    %276 = vector.shape_cast %275 : vector<1x128x1xf32> to vector<128x1xf32>
    %277 = vector.broadcast %276 : vector<128x1xf32> to vector<128x128xf32>
    %278 = arith.addf %274, %277 : vector<128x128xf32>
    %279 = vector.extract_strided_slice %278 {offsets = [0, 0], sizes = [64, 128], strides = [1, 1]} : vector<128x128xf32> to vector<64x128xf32>
    %280 = vector.extract_strided_slice %278 {offsets = [64, 0], sizes = [64, 128], strides = [1, 1]} : vector<128x128xf32> to vector<64x128xf32>
    %281 = arith.negf %280 : vector<64x128xf32>
    %282 = math.exp %281 : vector<64x128xf32>
    %cst_67 = arith.constant 1.000000e+00 : f32
    %283 = vector.broadcast %cst_67 : f32 to vector<64x128xf32>
    %284 = arith.addf %283, %282 : vector<64x128xf32>
    %285 = arith.divf %283, %284 : vector<64x128xf32>
    %286 = arith.mulf %279, %285 : vector<64x128xf32>
    %cst_68 = arith.constant 0.000000e+00 : f32
    %287 = vector.broadcast %cst_68 : f32 to vector<64x128xf32>
    %288 = arith.select %5, %286, %287 : vector<64x128xi1>, vector<64x128xf32>
    %c1_69 = arith.constant 1 : index
    %c0_70 = arith.constant 0 : index
    %c0_71 = arith.constant 0 : index
    %289 = vector.load %arg8[%c1_69, %c0_70, %c0_71] : memref<2x64x31xf32, #tpu.memory_space<vmem>>, vector<1x64x31xf32>
    %290 = vector.shape_cast %289 : vector<1x64x31xf32> to vector<64x31xf32>
    %291 = vector.extract_strided_slice %290 {offsets = [0, 15], sizes = [64, 1], strides = [1, 1]} : vector<64x31xf32> to vector<64x1xf32>
    %292 = vector.broadcast %291 : vector<64x1xf32> to vector<64x128xf32>
    %293 = arith.mulf %288, %292 : vector<64x128xf32>
    %c1_72 = arith.constant 1 : index
    %c0_73 = arith.constant 0 : index
    %c0_74 = arith.constant 0 : index
    %294 = vector.load %arg9[%c1_72, %c0_73, %c0_74] : memref<2x64x1xf32, #tpu.memory_space<vmem>>, vector<1x64x1xf32>
    %295 = vector.shape_cast %294 : vector<1x64x1xf32> to vector<64x1xf32>
    %296 = vector.broadcast %295 : vector<64x1xf32> to vector<64x128xf32>
    %297 = arith.addf %293, %296 : vector<64x128xf32>
    %c15_i32_75 = arith.constant 15 : i32
    %298 = tpu.dynamic_rotate %288 by %c15_i32_75 dim 1 : vector<64x128xf32>, i32 -> vector<64x128xf32>
    %299 = vector.extract_strided_slice %290 {offsets = [0, 0], sizes = [64, 1], strides = [1, 1]} : vector<64x31xf32> to vector<64x1xf32>
    %300 = vector.broadcast %299 : vector<64x1xf32> to vector<64x128xf32>
    %301 = arith.mulf %298, %300 : vector<64x128xf32>
    %302 = arith.addf %297, %301 : vector<64x128xf32>
    %c14_i32_76 = arith.constant 14 : i32
    %303 = tpu.dynamic_rotate %288 by %c14_i32_76 dim 1 : vector<64x128xf32>, i32 -> vector<64x128xf32>
    %304 = vector.extract_strided_slice %290 {offsets = [0, 1], sizes = [64, 1], strides = [1, 1]} : vector<64x31xf32> to vector<64x1xf32>
    %305 = vector.broadcast %304 : vector<64x1xf32> to vector<64x128xf32>
    %306 = arith.mulf %303, %305 : vector<64x128xf32>
    %307 = arith.addf %302, %306 : vector<64x128xf32>
    %c13_i32_77 = arith.constant 13 : i32
    %308 = tpu.dynamic_rotate %288 by %c13_i32_77 dim 1 : vector<64x128xf32>, i32 -> vector<64x128xf32>
    %309 = vector.extract_strided_slice %290 {offsets = [0, 2], sizes = [64, 1], strides = [1, 1]} : vector<64x31xf32> to vector<64x1xf32>
    %310 = vector.broadcast %309 : vector<64x1xf32> to vector<64x128xf32>
    %311 = arith.mulf %308, %310 : vector<64x128xf32>
    %312 = arith.addf %307, %311 : vector<64x128xf32>
    %c12_i32_78 = arith.constant 12 : i32
    %313 = tpu.dynamic_rotate %288 by %c12_i32_78 dim 1 : vector<64x128xf32>, i32 -> vector<64x128xf32>
    %314 = vector.extract_strided_slice %290 {offsets = [0, 3], sizes = [64, 1], strides = [1, 1]} : vector<64x31xf32> to vector<64x1xf32>
    %315 = vector.broadcast %314 : vector<64x1xf32> to vector<64x128xf32>
    %316 = arith.mulf %313, %315 : vector<64x128xf32>
    %317 = arith.addf %312, %316 : vector<64x128xf32>
    %c11_i32_79 = arith.constant 11 : i32
    %318 = tpu.dynamic_rotate %288 by %c11_i32_79 dim 1 : vector<64x128xf32>, i32 -> vector<64x128xf32>
    %319 = vector.extract_strided_slice %290 {offsets = [0, 4], sizes = [64, 1], strides = [1, 1]} : vector<64x31xf32> to vector<64x1xf32>
    %320 = vector.broadcast %319 : vector<64x1xf32> to vector<64x128xf32>
    %321 = arith.mulf %318, %320 : vector<64x128xf32>
    %322 = arith.addf %317, %321 : vector<64x128xf32>
    %c10_i32_80 = arith.constant 10 : i32
    %323 = tpu.dynamic_rotate %288 by %c10_i32_80 dim 1 : vector<64x128xf32>, i32 -> vector<64x128xf32>
    %324 = vector.extract_strided_slice %290 {offsets = [0, 5], sizes = [64, 1], strides = [1, 1]} : vector<64x31xf32> to vector<64x1xf32>
    %325 = vector.broadcast %324 : vector<64x1xf32> to vector<64x128xf32>
    %326 = arith.mulf %323, %325 : vector<64x128xf32>
    %327 = arith.addf %322, %326 : vector<64x128xf32>
    %c9_i32_81 = arith.constant 9 : i32
    %328 = tpu.dynamic_rotate %288 by %c9_i32_81 dim 1 : vector<64x128xf32>, i32 -> vector<64x128xf32>
    %329 = vector.extract_strided_slice %290 {offsets = [0, 6], sizes = [64, 1], strides = [1, 1]} : vector<64x31xf32> to vector<64x1xf32>
    %330 = vector.broadcast %329 : vector<64x1xf32> to vector<64x128xf32>
    %331 = arith.mulf %328, %330 : vector<64x128xf32>
    %332 = arith.addf %327, %331 : vector<64x128xf32>
    %c8_i32_82 = arith.constant 8 : i32
    %333 = tpu.dynamic_rotate %288 by %c8_i32_82 dim 1 : vector<64x128xf32>, i32 -> vector<64x128xf32>
    %334 = vector.extract_strided_slice %290 {offsets = [0, 7], sizes = [64, 1], strides = [1, 1]} : vector<64x31xf32> to vector<64x1xf32>
    %335 = vector.broadcast %334 : vector<64x1xf32> to vector<64x128xf32>
    %336 = arith.mulf %333, %335 : vector<64x128xf32>
    %337 = arith.addf %332, %336 : vector<64x128xf32>
    %c7_i32_83 = arith.constant 7 : i32
    %338 = tpu.dynamic_rotate %288 by %c7_i32_83 dim 1 : vector<64x128xf32>, i32 -> vector<64x128xf32>
    %339 = vector.extract_strided_slice %290 {offsets = [0, 8], sizes = [64, 1], strides = [1, 1]} : vector<64x31xf32> to vector<64x1xf32>
    %340 = vector.broadcast %339 : vector<64x1xf32> to vector<64x128xf32>
    %341 = arith.mulf %338, %340 : vector<64x128xf32>
    %342 = arith.addf %337, %341 : vector<64x128xf32>
    %c6_i32_84 = arith.constant 6 : i32
    %343 = tpu.dynamic_rotate %288 by %c6_i32_84 dim 1 : vector<64x128xf32>, i32 -> vector<64x128xf32>
    %344 = vector.extract_strided_slice %290 {offsets = [0, 9], sizes = [64, 1], strides = [1, 1]} : vector<64x31xf32> to vector<64x1xf32>
    %345 = vector.broadcast %344 : vector<64x1xf32> to vector<64x128xf32>
    %346 = arith.mulf %343, %345 : vector<64x128xf32>
    %347 = arith.addf %342, %346 : vector<64x128xf32>
    %c5_i32_85 = arith.constant 5 : i32
    %348 = tpu.dynamic_rotate %288 by %c5_i32_85 dim 1 : vector<64x128xf32>, i32 -> vector<64x128xf32>
    %349 = vector.extract_strided_slice %290 {offsets = [0, 10], sizes = [64, 1], strides = [1, 1]} : vector<64x31xf32> to vector<64x1xf32>
    %350 = vector.broadcast %349 : vector<64x1xf32> to vector<64x128xf32>
    %351 = arith.mulf %348, %350 : vector<64x128xf32>
    %352 = arith.addf %347, %351 : vector<64x128xf32>
    %c4_i32_86 = arith.constant 4 : i32
    %353 = tpu.dynamic_rotate %288 by %c4_i32_86 dim 1 : vector<64x128xf32>, i32 -> vector<64x128xf32>
    %354 = vector.extract_strided_slice %290 {offsets = [0, 11], sizes = [64, 1], strides = [1, 1]} : vector<64x31xf32> to vector<64x1xf32>
    %355 = vector.broadcast %354 : vector<64x1xf32> to vector<64x128xf32>
    %356 = arith.mulf %353, %355 : vector<64x128xf32>
    %357 = arith.addf %352, %356 : vector<64x128xf32>
    %c3_i32_87 = arith.constant 3 : i32
    %358 = tpu.dynamic_rotate %288 by %c3_i32_87 dim 1 : vector<64x128xf32>, i32 -> vector<64x128xf32>
    %359 = vector.extract_strided_slice %290 {offsets = [0, 12], sizes = [64, 1], strides = [1, 1]} : vector<64x31xf32> to vector<64x1xf32>
    %360 = vector.broadcast %359 : vector<64x1xf32> to vector<64x128xf32>
    %361 = arith.mulf %358, %360 : vector<64x128xf32>
    %362 = arith.addf %357, %361 : vector<64x128xf32>
    %c2_i32_88 = arith.constant 2 : i32
    %363 = tpu.dynamic_rotate %288 by %c2_i32_88 dim 1 : vector<64x128xf32>, i32 -> vector<64x128xf32>
    %364 = vector.extract_strided_slice %290 {offsets = [0, 13], sizes = [64, 1], strides = [1, 1]} : vector<64x31xf32> to vector<64x1xf32>
    %365 = vector.broadcast %364 : vector<64x1xf32> to vector<64x128xf32>
    %366 = arith.mulf %363, %365 : vector<64x128xf32>
    %367 = arith.addf %362, %366 : vector<64x128xf32>
    %c1_i32_89 = arith.constant 1 : i32
    %368 = tpu.dynamic_rotate %288 by %c1_i32_89 dim 1 : vector<64x128xf32>, i32 -> vector<64x128xf32>
    %369 = vector.extract_strided_slice %290 {offsets = [0, 14], sizes = [64, 1], strides = [1, 1]} : vector<64x31xf32> to vector<64x1xf32>
    %370 = vector.broadcast %369 : vector<64x1xf32> to vector<64x128xf32>
    %371 = arith.mulf %368, %370 : vector<64x128xf32>
    %372 = arith.addf %367, %371 : vector<64x128xf32>
    %c127_i32_90 = arith.constant 127 : i32
    %373 = tpu.dynamic_rotate %288 by %c127_i32_90 dim 1 : vector<64x128xf32>, i32 -> vector<64x128xf32>
    %374 = vector.extract_strided_slice %290 {offsets = [0, 16], sizes = [64, 1], strides = [1, 1]} : vector<64x31xf32> to vector<64x1xf32>
    %375 = vector.broadcast %374 : vector<64x1xf32> to vector<64x128xf32>
    %376 = arith.mulf %373, %375 : vector<64x128xf32>
    %377 = arith.addf %372, %376 : vector<64x128xf32>
    %c126_i32_91 = arith.constant 126 : i32
    %378 = tpu.dynamic_rotate %288 by %c126_i32_91 dim 1 : vector<64x128xf32>, i32 -> vector<64x128xf32>
    %379 = vector.extract_strided_slice %290 {offsets = [0, 17], sizes = [64, 1], strides = [1, 1]} : vector<64x31xf32> to vector<64x1xf32>
    %380 = vector.broadcast %379 : vector<64x1xf32> to vector<64x128xf32>
    %381 = arith.mulf %378, %380 : vector<64x128xf32>
    %382 = arith.addf %377, %381 : vector<64x128xf32>
    %c125_i32_92 = arith.constant 125 : i32
    %383 = tpu.dynamic_rotate %288 by %c125_i32_92 dim 1 : vector<64x128xf32>, i32 -> vector<64x128xf32>
    %384 = vector.extract_strided_slice %290 {offsets = [0, 18], sizes = [64, 1], strides = [1, 1]} : vector<64x31xf32> to vector<64x1xf32>
    %385 = vector.broadcast %384 : vector<64x1xf32> to vector<64x128xf32>
    %386 = arith.mulf %383, %385 : vector<64x128xf32>
    %387 = arith.addf %382, %386 : vector<64x128xf32>
    %c124_i32_93 = arith.constant 124 : i32
    %388 = tpu.dynamic_rotate %288 by %c124_i32_93 dim 1 : vector<64x128xf32>, i32 -> vector<64x128xf32>
    %389 = vector.extract_strided_slice %290 {offsets = [0, 19], sizes = [64, 1], strides = [1, 1]} : vector<64x31xf32> to vector<64x1xf32>
    %390 = vector.broadcast %389 : vector<64x1xf32> to vector<64x128xf32>
    %391 = arith.mulf %388, %390 : vector<64x128xf32>
    %392 = arith.addf %387, %391 : vector<64x128xf32>
    %c123_i32_94 = arith.constant 123 : i32
    %393 = tpu.dynamic_rotate %288 by %c123_i32_94 dim 1 : vector<64x128xf32>, i32 -> vector<64x128xf32>
    %394 = vector.extract_strided_slice %290 {offsets = [0, 20], sizes = [64, 1], strides = [1, 1]} : vector<64x31xf32> to vector<64x1xf32>
    %395 = vector.broadcast %394 : vector<64x1xf32> to vector<64x128xf32>
    %396 = arith.mulf %393, %395 : vector<64x128xf32>
    %397 = arith.addf %392, %396 : vector<64x128xf32>
    %c122_i32_95 = arith.constant 122 : i32
    %398 = tpu.dynamic_rotate %288 by %c122_i32_95 dim 1 : vector<64x128xf32>, i32 -> vector<64x128xf32>
    %399 = vector.extract_strided_slice %290 {offsets = [0, 21], sizes = [64, 1], strides = [1, 1]} : vector<64x31xf32> to vector<64x1xf32>
    %400 = vector.broadcast %399 : vector<64x1xf32> to vector<64x128xf32>
    %401 = arith.mulf %398, %400 : vector<64x128xf32>
    %402 = arith.addf %397, %401 : vector<64x128xf32>
    %c121_i32_96 = arith.constant 121 : i32
    %403 = tpu.dynamic_rotate %288 by %c121_i32_96 dim 1 : vector<64x128xf32>, i32 -> vector<64x128xf32>
    %404 = vector.extract_strided_slice %290 {offsets = [0, 22], sizes = [64, 1], strides = [1, 1]} : vector<64x31xf32> to vector<64x1xf32>
    %405 = vector.broadcast %404 : vector<64x1xf32> to vector<64x128xf32>
    %406 = arith.mulf %403, %405 : vector<64x128xf32>
    %407 = arith.addf %402, %406 : vector<64x128xf32>
    %c120_i32_97 = arith.constant 120 : i32
    %408 = tpu.dynamic_rotate %288 by %c120_i32_97 dim 1 : vector<64x128xf32>, i32 -> vector<64x128xf32>
    %409 = vector.extract_strided_slice %290 {offsets = [0, 23], sizes = [64, 1], strides = [1, 1]} : vector<64x31xf32> to vector<64x1xf32>
    %410 = vector.broadcast %409 : vector<64x1xf32> to vector<64x128xf32>
    %411 = arith.mulf %408, %410 : vector<64x128xf32>
    %412 = arith.addf %407, %411 : vector<64x128xf32>
    %c119_i32_98 = arith.constant 119 : i32
    %413 = tpu.dynamic_rotate %288 by %c119_i32_98 dim 1 : vector<64x128xf32>, i32 -> vector<64x128xf32>
    %414 = vector.extract_strided_slice %290 {offsets = [0, 24], sizes = [64, 1], strides = [1, 1]} : vector<64x31xf32> to vector<64x1xf32>
    %415 = vector.broadcast %414 : vector<64x1xf32> to vector<64x128xf32>
    %416 = arith.mulf %413, %415 : vector<64x128xf32>
    %417 = arith.addf %412, %416 : vector<64x128xf32>
    %c118_i32_99 = arith.constant 118 : i32
    %418 = tpu.dynamic_rotate %288 by %c118_i32_99 dim 1 : vector<64x128xf32>, i32 -> vector<64x128xf32>
    %419 = vector.extract_strided_slice %290 {offsets = [0, 25], sizes = [64, 1], strides = [1, 1]} : vector<64x31xf32> to vector<64x1xf32>
    %420 = vector.broadcast %419 : vector<64x1xf32> to vector<64x128xf32>
    %421 = arith.mulf %418, %420 : vector<64x128xf32>
    %422 = arith.addf %417, %421 : vector<64x128xf32>
    %c117_i32_100 = arith.constant 117 : i32
    %423 = tpu.dynamic_rotate %288 by %c117_i32_100 dim 1 : vector<64x128xf32>, i32 -> vector<64x128xf32>
    %424 = vector.extract_strided_slice %290 {offsets = [0, 26], sizes = [64, 1], strides = [1, 1]} : vector<64x31xf32> to vector<64x1xf32>
    %425 = vector.broadcast %424 : vector<64x1xf32> to vector<64x128xf32>
    %426 = arith.mulf %423, %425 : vector<64x128xf32>
    %427 = arith.addf %422, %426 : vector<64x128xf32>
    %c116_i32_101 = arith.constant 116 : i32
    %428 = tpu.dynamic_rotate %288 by %c116_i32_101 dim 1 : vector<64x128xf32>, i32 -> vector<64x128xf32>
    %429 = vector.extract_strided_slice %290 {offsets = [0, 27], sizes = [64, 1], strides = [1, 1]} : vector<64x31xf32> to vector<64x1xf32>
    %430 = vector.broadcast %429 : vector<64x1xf32> to vector<64x128xf32>
    %431 = arith.mulf %428, %430 : vector<64x128xf32>
    %432 = arith.addf %427, %431 : vector<64x128xf32>
    %c115_i32_102 = arith.constant 115 : i32
    %433 = tpu.dynamic_rotate %288 by %c115_i32_102 dim 1 : vector<64x128xf32>, i32 -> vector<64x128xf32>
    %434 = vector.extract_strided_slice %290 {offsets = [0, 28], sizes = [64, 1], strides = [1, 1]} : vector<64x31xf32> to vector<64x1xf32>
    %435 = vector.broadcast %434 : vector<64x1xf32> to vector<64x128xf32>
    %436 = arith.mulf %433, %435 : vector<64x128xf32>
    %437 = arith.addf %432, %436 : vector<64x128xf32>
    %c114_i32_103 = arith.constant 114 : i32
    %438 = tpu.dynamic_rotate %288 by %c114_i32_103 dim 1 : vector<64x128xf32>, i32 -> vector<64x128xf32>
    %439 = vector.extract_strided_slice %290 {offsets = [0, 29], sizes = [64, 1], strides = [1, 1]} : vector<64x31xf32> to vector<64x1xf32>
    %440 = vector.broadcast %439 : vector<64x1xf32> to vector<64x128xf32>
    %441 = arith.mulf %438, %440 : vector<64x128xf32>
    %442 = arith.addf %437, %441 : vector<64x128xf32>
    %c113_i32_104 = arith.constant 113 : i32
    %443 = tpu.dynamic_rotate %288 by %c113_i32_104 dim 1 : vector<64x128xf32>, i32 -> vector<64x128xf32>
    %444 = vector.extract_strided_slice %290 {offsets = [0, 30], sizes = [64, 1], strides = [1, 1]} : vector<64x31xf32> to vector<64x1xf32>
    %445 = vector.broadcast %444 : vector<64x1xf32> to vector<64x128xf32>
    %446 = arith.mulf %443, %445 : vector<64x128xf32>
    %447 = arith.addf %442, %446 : vector<64x128xf32>
    %cst_105 = arith.constant 5.000000e-01 : f32
    %448 = vector.broadcast %cst_105 : f32 to vector<64x128xf32>
    %449 = arith.mulf %448, %447 : vector<64x128xf32>
    %cst_106 = arith.constant 4.471500e-02 : f32
    %450 = vector.broadcast %cst_106 : f32 to vector<64x128xf32>
    %451 = arith.mulf %450, %447 : vector<64x128xf32>
    %452 = arith.mulf %451, %447 : vector<64x128xf32>
    %453 = arith.mulf %452, %447 : vector<64x128xf32>
    %454 = arith.addf %447, %453 : vector<64x128xf32>
    %cst_107 = arith.constant 0.797884583 : f32
    %455 = vector.broadcast %cst_107 : f32 to vector<64x128xf32>
    %456 = arith.mulf %455, %454 : vector<64x128xf32>
    %457 = math.tanh %456 : vector<64x128xf32>
    %cst_108 = arith.constant 1.000000e+00 : f32
    %458 = vector.broadcast %cst_108 : f32 to vector<64x128xf32>
    %459 = arith.addf %458, %457 : vector<64x128xf32>
    %460 = arith.mulf %449, %459 : vector<64x128xf32>
    %c1_109 = arith.constant 1 : index
    %c0_110 = arith.constant 0 : index
    %c0_111 = arith.constant 0 : index
    %461 = vector.load %arg10[%c1_109, %c0_110, %c0_111] : memref<2x32x64xbf16, #tpu.memory_space<vmem>>, vector<1x32x64xbf16>
    %462 = vector.shape_cast %461 : vector<1x32x64xbf16> to vector<32x64xbf16>
    %463 = arith.truncf %460 : vector<64x128xf32> to vector<64x128xbf16>
    %cst_112 = arith.constant dense<0.000000e+00> : vector<32x128xf32>
    %464 = tpu.matmul %462, %463, %cst_112 {dimension_numbers = #tpu.dot_dimension_numbers<[1], [0], [0], [1], [0, 0, 1, 1], [], []>} : vector<32x64xbf16>, vector<64x128xbf16>, vector<32x128xf32> -> vector<32x128xf32>
    %465 = arith.addf %241, %464 : vector<32x128xf32>
    %c1_113 = arith.constant 1 : index
    %c0_114 = arith.constant 0 : index
    %c0_115 = arith.constant 0 : index
    %466 = vector.load %arg11[%c1_113, %c0_114, %c0_115] : memref<2x32x1xf32, #tpu.memory_space<vmem>>, vector<1x32x1xf32>
    %467 = vector.shape_cast %466 : vector<1x32x1xf32> to vector<32x1xf32>
    %468 = vector.broadcast %467 : vector<32x1xf32> to vector<32x128xf32>
    %469 = arith.addf %465, %468 : vector<32x128xf32>
    %c0_116 = arith.constant 0 : index
    %c0_117 = arith.constant 0 : index
    %c0_118 = arith.constant 0 : index
    %470 = vector.load %arg12[%c0_116, %c0_117, %c0_118] : memref<1x32x128xf32, #tpu.memory_space<vmem>>, vector<1x32x128xf32>
    %471 = vector.shape_cast %470 : vector<1x32x128xf32> to vector<32x128xf32>
    %472 = vector.shape_cast %469 : vector<32x128xf32> to vector<1x32x128xf32>
    tpu.vector_store %arg12[%c0_116, %c0_117, %c0_118], %472 {strides = array<i32>} : memref<1x32x128xf32, #tpu.memory_space<vmem>>, vector<1x32x128xf32>,
    return
  }
  func.func @transform_0(%arg0: i32) -> (i32, i32, i32) {
    %c0_i32 = arith.constant 0 : i32
    %c0_i32_0 = arith.constant 0 : i32
    %c0_i32_1 = arith.constant 0 : i32
    return %arg0, %c0_i32, %c0_i32_0 : i32, i32, i32
  }
  func.func @transform_1(%arg0: i32) -> (i32, i32) {
    %c0_i32 = arith.constant 0 : i32
    %c0_i32_0 = arith.constant 0 : i32
    %c0_i32_1 = arith.constant 0 : i32
    return %c0_i32, %c0_i32_0 : i32, i32
  }
  func.func @transform_2(%arg0: i32) -> (i32, i32) {
    %c0_i32 = arith.constant 0 : i32
    %c0_i32_0 = arith.constant 0 : i32
    %c0_i32_1 = arith.constant 0 : i32
    return %c0_i32, %c0_i32_0 : i32, i32
  }
  func.func @transform_3(%arg0: i32) -> (i32, i32, i32) {
    %c0_i32 = arith.constant 0 : i32
    %c0_i32_0 = arith.constant 0 : i32
    %c0_i32_1 = arith.constant 0 : i32
    %c0_i32_2 = arith.constant 0 : i32
    return %c0_i32, %c0_i32_0, %c0_i32_1 : i32, i32, i32
  }
  func.func @transform_4(%arg0: i32) -> (i32, i32, i32) {
    %c0_i32 = arith.constant 0 : i32
    %c0_i32_0 = arith.constant 0 : i32
    %c0_i32_1 = arith.constant 0 : i32
    %c0_i32_2 = arith.constant 0 : i32
    return %c0_i32, %c0_i32_0, %c0_i32_1 : i32, i32, i32
  }
  func.func @transform_5(%arg0: i32) -> (i32, i32, i32) {
    %c0_i32 = arith.constant 0 : i32
    %c0_i32_0 = arith.constant 0 : i32
    %c0_i32_1 = arith.constant 0 : i32
    %c0_i32_2 = arith.constant 0 : i32
    return %c0_i32, %c0_i32_0, %c0_i32_1 : i32, i32, i32
  }
  func.func @transform_6(%arg0: i32) -> (i32, i32, i32) {
    %c0_i32 = arith.constant 0 : i32
    %c0_i32_0 = arith.constant 0 : i32
    %c0_i32_1 = arith.constant 0 : i32
    %c0_i32_2 = arith.constant 0 : i32
    return %c0_i32, %c0_i32_0, %c0_i32_1 : i32, i32, i32
  }
  func.func @transform_7(%arg0: i32) -> (i32, i32, i32) {
    %c0_i32 = arith.constant 0 : i32
    %c0_i32_0 = arith.constant 0 : i32
    %c0_i32_1 = arith.constant 0 : i32
    %c0_i32_2 = arith.constant 0 : i32
    return %c0_i32, %c0_i32_0, %c0_i32_1 : i32, i32, i32
  }
  func.func @transform_8(%arg0: i32) -> (i32, i32, i32) {
    %c0_i32 = arith.constant 0 : i32
    %c0_i32_0 = arith.constant 0 : i32
    %c0_i32_1 = arith.constant 0 : i32
    %c0_i32_2 = arith.constant 0 : i32
    return %c0_i32, %c0_i32_0, %c0_i32_1 : i32, i32, i32
  }
  func.func @transform_9(%arg0: i32) -> (i32, i32, i32) {
    %c0_i32 = arith.constant 0 : i32
    %c0_i32_0 = arith.constant 0 : i32
    %c0_i32_1 = arith.constant 0 : i32
    %c0_i32_2 = arith.constant 0 : i32
    return %c0_i32, %c0_i32_0, %c0_i32_1 : i32, i32, i32
  }
  func.func @transform_10(%arg0: i32) -> (i32, i32, i32) {
    %c0_i32 = arith.constant 0 : i32
    %c0_i32_0 = arith.constant 0 : i32
    %c0_i32_1 = arith.constant 0 : i32
    %c0_i32_2 = arith.constant 0 : i32
    return %c0_i32, %c0_i32_0, %c0_i32_1 : i32, i32, i32
  }
  func.func @transform_11(%arg0: i32) -> (i32, i32, i32) {
    %c0_i32 = arith.constant 0 : i32
    %c0_i32_0 = arith.constant 0 : i32
    %c0_i32_1 = arith.constant 0 : i32
    return %arg0, %c0_i32, %c0_i32_0 : i32, i32, i32
  }
}

</mosaic_0001>

<bundles_post_ra>
// kernel: encoder_forward.1
= control target key start
LH: loop header
LB: loop body
LE: loop exit
PB: predicated region body
PF: predicated region fallthrough
CT: control target
= control target key end

     0   :  { %s6695_s17 = smov 0   ;;  %s12648_s0 = inlined_call_operand.vmem [shape: f32[2,16,128], index: 0, kind: input, shape index: {}]   ;;  %s12649_s1 = inlined_call_operand.vmem [shape: bf16[32,16], index: 1, kind: input, shape index: {}]   ;;  %s12650_s2 = inlined_call_operand.vmem [shape: f32[32,1], index: 2, kind: input, shape index: {}]   ;;  %s12651_s3 = inlined_call_operand.vmem [shape: f32[2,32,1], index: 3, kind: input, shape index: {}]   ;;  %s12652_s4 = inlined_call_operand.vmem [shape: f32[2,32,1], index: 4, kind: input, shape index: {}]   ;;  %s12653_s5 = inlined_call_operand.vmem [shape: bf16[2,128,96], index: 5, kind: input, shape index: {}]   ;;  %s12654_s6 = inlined_call_operand.vmem [shape: f32[2,128,1], index: 6, kind: input, shape index: {}]   ;;  %s12655_s7 = inlined_call_operand.vmem [shape: f32[2,64,31], index: 7, kind: input, shape index: {}]   ;;  %s12656_s8 = inlined_call_operand.vmem [shape: f32[2,64,1], index: 8, kind: input, shape index: {}]   ;;  %s12657_s9 = inlined_call_operand.vmem [shape: bf16[2,32,64], index: 9, kind: input, shape index: {}]   ;;  %s12658_s10 = inlined_call_operand.vmem [shape: f32[2,32,1], index: 10, kind: input, shape index: {}]   ;;  %s12659_s11 = inlined_call_operand.vmem [shape: f32[2,32,128], index: 11, kind: output, shape index: {}]  }
   0x1 LB: > { %s5882_s18 = sadd.s32 4294967295, %s6572_s17   ;;  %p5886_p0 = scmp.ge.s32.totalorder %s6572_s17, 1  ;;  %s6572_s17 = sphi %s6695_s17, %s21_s17  }
   0x2   : > { %p337_p1 = scmp.lt.s32.totalorder %s6572_s17, 3 }
   0x4   : > { %p338_p2 = pnand %p5886_p0, %p337_p1 }
   0x6   : > { %341 = sbr.rel (%p338_p2) target bundleno = 3642 (0xe3a), region = 64 }
   0xd   : > { %v400_v0 = vld [vmem:[%s12650_s2 + $0x10] sm:$0xff]  ;;  %p377_p3 = scmp.lt.s32.totalorder %s5882_s18, 1  ;;  %vm432_vm0 = vcmask 130048   ;;  %v12672_v1 = vmov 0   ;;  %v6417_v2 = vld [vmem:[%s12649_s1] sm:$0xff]   ;;  %v401_v3 = vld [vmem:[%s12650_s2 + $0x18] sm:$0xff] }
   0xe   : > { %6230 = vset.pattern.permute.xlu1 %v12672_v1  ;;  %6229 = vset.pattern.permute.xlu0 %v12672_v1  ;;  %v398_v4 = vld [vmem:[%s12650_s2] sm:$0xff]  ;;  %v524_v8 = vld [vmem:[%s12651_s3 + $0x8] sm:$0xff]  ;;  %v526_v11 = vld [vmem:[%s12651_s3 + $0x18] sm:$0xff]  ;;  %v12674_v35 = vmov 15   ;;  %v12670_v38 = vmov 1   ;;  %v12668_v46 = vmov 2  }
   0xf   : > { %414 = vperm.xlu1 %6230, %v400_v0   ;;  %s14634_s18 = smov (!%p377_p3, %s5882_s18), 1  ;;  %6076 = vmatprep.mubr.msk.bf16.mxu1 %vm432_vm0, %v6417_v2  ;;  %v399_v9 = vld [vmem:[%s12650_s2 + $0x8] sm:$0xff]  ;;  %v523_v12 = vld [vmem:[%s12651_s3] sm:$0xff]  ;;  %v525_v14 = vld [vmem:[%s12651_s3 + $0x10] sm:$0xff]  ;;  %v12666_v50 = vmov 3   ;;  %v12664_v51 = vmov 4  }
  0x10   : > { %s6029_s25 = sshll.u32 %s14634_s18, 4  ;;  %404 = vperm.xlu0 %6229, %v398_v4   ;;  %v6418_v10 = vld [vmem:[%s12649_s1 + $0x8] sm:$0xff]   ;;  %v554_v15 = vld [vmem:[%s12652_s4 + $0x18] sm:$0xff]  ;;  %v551_v16 = vld [vmem:[%s12652_s4] sm:$0xff]  ;;  %v12662_v52 = vmov 5   ;;  %v12660_v58 = vmov 6  }
  0x11   : > { %s381_s28 = scalar_lea.vmem %s12648_s0, %s6029_s25  ;;  %v552_v13 = vld [vmem:[%s12652_s4 + $0x8] sm:$0xff]  ;;  %v553_v18 = vld [vmem:[%s12652_s4 + $0x10] sm:$0xff]  ;;  %v624_v19 = vld [vmem:[%s12654_s6 + $0x18] sm:$0xff]  ;;  %s12706_s24 = smov 1   ;;  %vm757_vm2 = vcmask 785408   ;;  %vm3065_vm4 = vcmask 523264  }
  0x12   : > { %v391_v5 = vld [vmem:[%s381_s28] sm:$0xff]  ;;  %v392_v6 = vld [vmem:[%s381_s28 + $0x8] sm:$0xff]  ;;  %v623_v22 = vld [vmem:[%s12654_s6 + $0x10] sm:$0xff]  ;;  %s12708_s25 = smov 127   ;;  %s12790_s27 = smov 13  }
  0x13   : > { %419 = vperm.xlu1 %6230, %v401_v3   ;;  %v397_v7 = vpack.c.bf16 %v392_v6, %v391_v5  ;;  %v622_v17 = vld [vmem:[%s12654_s6 + $0x8] sm:$0xff]  ;;  %v621_v20 = vld [vmem:[%s12654_s6] sm:$0xff]  ;;  %v628_v23 = vld [vmem:[%s12654_s6 + $0x38] sm:$0xff]  ;;  %v12678_v3 = vmov 7   ;;  %s12788_s28 = smov 15   ;;  %s12786_s29 = smov 11  }
  0x14   : > { %409 = vperm.xlu0 %6229, %v399_v9   ;;  %v626_v21 = vld [vmem:[%s12654_s6 + $0x28] sm:$0xff]  ;;  %v625_v24 = vld [vmem:[%s12654_s6 + $0x20] sm:$0xff]  ;;  %v627_v26 = vld [vmem:[%s12654_s6 + $0x30] sm:$0xff]  ;;  %s12722_s30 = smov 14   ;;  %s12716_s12 = smov 9  }
  0x15   : > { %6074 = vmatprep.subr.bf16.mxu1 %v397_v7  ;;  %v630_v25 = vld [vmem:[%s12654_s6 + $0x48] sm:$0xff]  ;;  %v632_v27 = vld [vmem:[%s12654_s6 + $0x58] sm:$0xff]  ;;  %v629_v28 = vld [vmem:[%s12654_s6 + $0x40] sm:$0xff]  ;;  %s12712_s13 = smov 12   ;;  %s12736_s14 = smov 7  }
  0x16   : > { %6075 = vmatpush3.bf16.msra.mxu1 %v397_v7  ;;  %v634_v29 = vld [vmem:[%s12654_s6 + $0x68] sm:$0xff]  ;;  %v631_v30 = vld [vmem:[%s12654_s6 + $0x50] sm:$0xff]  ;;  %v636_v31 = vld [vmem:[%s12654_s6 + $0x78] sm:$0xff]  ;;  %s12734_s15 = smov 10   ;;  %s12732_s16 = smov 5  }
  0x17   : > { %534 = vperm.xlu1 %6230, %v524_v8   ;;  %v633_v32 = vld [vmem:[%s12654_s6 + $0x60] sm:$0xff]  ;;  %v6803_v33 = vld [vmem:[%s12655_s7 + $0x8] sm:$0xff]  ;;  %v635_v34 = vld [vmem:[%s12654_s6 + $0x70] sm:$0xff]  ;;  %s12718_s19 = smov 8   ;;  %s12730_s20 = smov 3  }
  0x18   : > { %529 = vperm.xlu0 %6229, %v523_v12   ;;  %v6813_v36 = vld [vmem:[%s12655_s7 + $0x10] sm:$0xff]  ;;  %v6818_v37 = vld [vmem:[%s12655_s7] sm:$0xff]  ;;  %v6832_v40 = vld [vmem:[%s12655_s7 + $0x18] sm:$0xff]  ;;  %v12684_v12 = vmov 8   ;;  %s12710_s21 = smov 6   ;;  %s12704_s22 = smov 4  }
  0x19   : > { %6077 = vmatmul.mubr.msk.bf16.vlgmr.msra.gmra.mrb[0].mxu1 %vm432_vm0, %v6418_v10  ;;  %v6825_v39 = vld [vmem:[%s12655_s7 + $0x20] sm:$0xff]  ;;  %v6837_v41 = vld [vmem:[%s12655_s7 + $0x30] sm:$0xff]  ;;  %v6844_v42 = vld [vmem:[%s12655_s7 + $0x28] sm:$0xff]  ;;  %s12728_s23 = smov 126   ;;  %s12724_s26 = smov 2  }
  0x1a   : > { %v999_v43 = vld [vmem:[%s12656_s8] sm:$0xff]  ;;  %v6854_v44 = vld [vmem:[%s12655_s7 + $0x38] sm:$0xff]  ;;  %v1001_v45 = vld [vmem:[%s12656_s8 + $0x10] sm:$0xff] }
  0x1b   : > { %544 = vperm.xlu1 %6230, %v526_v11   ;;  %v1002_v47 = vld [vmem:[%s12656_s8 + $0x18] sm:$0xff]  ;;  %v1004_v48 = vld [vmem:[%s12656_s8 + $0x28] sm:$0xff] }
  0x1c   : > { %539 = vperm.xlu0 %6229, %v525_v14   ;;  %v1006_v49 = vld [vmem:[%s12656_s8 + $0x38] sm:$0xff] }
  0x1f   : > { %562 = vperm.xlu1 %6230, %v552_v13  }
  0x20   : > { %557 = vperm.xlu0 %6229, %v551_v16  }
  0x23   : > { %572 = vperm.xlu1 %6230, %v554_v15  }
  0x24   : > { %567 = vperm.xlu0 %6229, %v553_v18   ;;  %v12682_v18 = vmov 9  }
  0x27   : > { %644 = vperm.xlu1 %6230, %v622_v17  }
  0x28   : > { %639 = vperm.xlu0 %6229, %v621_v20  }
  0x2b   : > { %654 = vperm.xlu1 %6230, %v624_v19  }
  0x2c   : > { %649 = vperm.xlu0 %6229, %v623_v22  }
  0x2f   : > { %664 = vperm.xlu1 %6230, %v626_v21  }
  0x30   : > { %659 = vperm.xlu0 %6229, %v625_v24  }
  0x33   : > { %674 = vperm.xlu1 %6230, %v628_v23  }
  0x34   : > { %669 = vperm.xlu0 %6229, %v627_v26  }
  0x37   : > { %684 = vperm.xlu1 %6230, %v630_v25  }
  0x38   : > { %679 = vperm.xlu0 %6229, %v629_v28  }
  0x3b   : > { %694 = vperm.xlu1 %6230, %v632_v27   ;;  %v12680_v27 = vmov 10  }
  0x3c   : > { %689 = vperm.xlu0 %6229, %v631_v30  }
  0x3f   : > { %704 = vperm.xlu1 %6230, %v634_v29  }
  0x40   : > { %699 = vperm.xlu0 %6229, %v633_v32  }
  0x43   : > { %714 = vperm.xlu1 %6230, %v636_v31  }
  0x44   : > { %709 = vperm.xlu0 %6229, %v635_v34   ;;  %v12676_v34 = vmov 11  }
  0x47   : > { %6231 = vset.pattern.permute.xlu1 %v12674_v35 }
  0x48   : > { %958 = vperm.xlu1 %6231, %v6803_v33   ;;  %6233 = vset.pattern.permute.xlu0 %v12670_v38 }
  0x49   : > { %1136 = vperm.xlu0 %6233, %v6818_v37  }
  0x4c   : > { %963 = vperm.xlu1 %6231, %v6813_v36  }
  0x4d   : > { %1148 = vperm.xlu0 %6233, %v6832_v40  }
  0x50   : > { %973 = vperm.xlu1 %6231, %v6825_v39  }
  0x51   : > { %1156 = vperm.xlu0 %6233, %v6844_v42  }
  0x54   : > { %983 = vperm.xlu1 %6231, %v6837_v41  }
  0x55   : > { %1164 = vperm.xlu0 %6233, %v6854_v44  }
  0x58   : > { %6232 = vset.pattern.permute.xlu1 %v12672_v1 }
  0x59   : > { %1009 = vperm.xlu1 %6232, %v999_v43   ;;  %6236 = vset.pattern.permute.xlu0 %v12668_v46 }
  0x5a   : > { %1204 = vperm.xlu0 %6236, %v6803_v33  }
  0x5d   : > { %1019 = vperm.xlu1 %6232, %v1001_v45  }
  0x5e   : > { %1216 = vperm.xlu0 %6236, %v6825_v39  }
  0x61   : > { %1024 = vperm.xlu1 %6232, %v1002_v47  }
  0x62   : > { %1224 = vperm.xlu0 %6236, %v6837_v41  }
  0x65   : > { %1034 = vperm.xlu1 %6232, %v1004_v48  }
  0x66   : > { %6237 = vset.pattern.permute.xlu0 %v12666_v50 }
  0x67   : > { %1264 = vperm.xlu0 %6237, %v6818_v37  }
  0x69   : > { %1044 = vperm.xlu1 %6232, %v1006_v49  }
  0x6b   : > { %1276 = vperm.xlu0 %6237, %v6832_v40  }
  0x6d   : > { %1076 = vperm.xlu1 %6232, %v6803_v33  }
  0x6f   : > { %1284 = vperm.xlu0 %6237, %v6844_v42  }
  0x71   : > { %1084 = vperm.xlu1 %6232, %v6832_v40  }
  0x73   : > { %1292 = vperm.xlu0 %6237, %v6854_v44  }
  0x75   : > { %1092 = vperm.xlu1 %6232, %v6844_v42  }
  0x77   : > { %6240 = vset.pattern.permute.xlu0 %v12664_v51 }
  0x78   : > { %1332 = vperm.xlu0 %6240, %v6803_v33  }
  0x79   : > { %1100 = vperm.xlu1 %6232, %v6854_v44  }
  0x7c   : > { %1344 = vperm.xlu0 %6240, %v6825_v39  }
  0x7d   : > { %6234 = vset.pattern.permute.xlu1 %v12670_v38 }
  0x7e   : > { %1140 = vperm.xlu1 %6234, %v6803_v33  }
  0x80   : > { %1352 = vperm.xlu0 %6240, %v6837_v41  }
  0x82   : > { %1144 = vperm.xlu1 %6234, %v6813_v36  }
  0x84   : > { %6241 = vset.pattern.permute.xlu0 %v12662_v52 }
  0x85   : > { %1392 = vperm.xlu0 %6241, %v6818_v37  }
  0x86   : > { %1152 = vperm.xlu1 %6234, %v6825_v39  }
  0x89   : > { %1404 = vperm.xlu0 %6241, %v6832_v40  }
  0x8a   : > { %1160 = vperm.xlu1 %6234, %v6837_v41  }
  0x8d   : > { %1412 = vperm.xlu0 %6241, %v6844_v42  }
  0x8e   : > { %6235 = vset.pattern.permute.xlu1 %v12668_v46  ;;  %v6895_v53 = vpop.permute.xlu1 %414 }
  0x8f   : > { %1200 = vperm.xlu1 %6235, %v6818_v37   ;;  %v6901_v55 = vpop.permute.xlu0 %404 }
  0x91   : > { %1420 = vperm.xlu0 %6241, %v6854_v44  }
  0x92   : > { %v6899_v54 = vpop.permute.xlu1 %419 }
  0x93   : > { %1208 = vperm.xlu1 %6235, %v6813_v36   ;;  %v6908_v57 = vpop.permute.xlu0 %409 }
  0x95   : > { %6244 = vset.pattern.permute.xlu0 %v12660_v58 }
  0x96   : > { %v6905_v56 = vpop.permute.xlu1 %534  ;;  %1460 = vperm.xlu0 %6244, %v6803_v33  }
  0x97   : > { %1212 = vperm.xlu1 %6235, %v6832_v40   ;;  %v6915_v60 = vpop.permute.xlu0 %529 }
  0x9a   : > { %v6911_v59 = vpop.permute.xlu1 %544  ;;  %1472 = vperm.xlu0 %6244, %v6825_v39  }
  0x9b   : > { %1220 = vperm.xlu1 %6235, %v6844_v42   ;;  %v6921_v62 = vpop.permute.xlu0 %539 }
  0x9e   : > { %v6917_v61 = vpop.permute.xlu1 %562  ;;  %1480 = vperm.xlu0 %6244, %v6837_v41  }
  0x9f   : > { %1228 = vperm.xlu1 %6235, %v6854_v44   ;;  %v6927_v0 = vpop.permute.xlu0 %557 }
  0xa2   : > { %v6923_v63 = vpop.permute.xlu1 %572  ;;  %6245 = vset.pattern.permute.xlu0 %v12678_v3 }
  0xa3   : > { %6238 = vset.pattern.permute.xlu1 %v12666_v50  ;;  %v6933_v4 = vpop.permute.xlu0 %567  ;;  %1520 = vperm.xlu0 %6245, %v6818_v37  }
  0xa4   : > { %1268 = vperm.xlu1 %6238, %v6803_v33  }
  0xa6   : > { %v6930_v2 = vpop.permute.xlu1 %644 }
  0xa7   : > { %v6939_v6 = vpop.permute.xlu0 %639  ;;  %1532 = vperm.xlu0 %6245, %v6832_v40  }
  0xa8   : > { %1272 = vperm.xlu1 %6238, %v6813_v36  }
  0xaa   : > { %v6937_v5 = vpop.permute.xlu1 %654 }
  0xab   : > { %v6945_v8 = vpop.permute.xlu0 %649  ;;  %1540 = vperm.xlu0 %6245, %v6844_v42  }
  0xac   : > { %1280 = vperm.xlu1 %6238, %v6825_v39  }
  0xae   : > { %v6943_v7 = vpop.permute.xlu1 %664 }
  0xaf   : > { %v6951_v10 = vpop.permute.xlu0 %659  ;;  %1548 = vperm.xlu0 %6245, %v6854_v44  }
  0xb0   : > { %1288 = vperm.xlu1 %6238, %v6837_v41  }
  0xb2   : > { %v6949_v9 = vpop.permute.xlu1 %674 }
  0xb3   : > { %6248 = vset.pattern.permute.xlu0 %v12684_v12  ;;  %v6961_v13 = vpop.permute.xlu0 %669 }
  0xb4   : > { %6239 = vset.pattern.permute.xlu1 %v12664_v51  ;;  %1588 = vperm.xlu0 %6248, %v6803_v33  }
  0xb5   : > { %1328 = vperm.xlu1 %6239, %v6818_v37  }
  0xb6   : > { %v6956_v11 = vpop.permute.xlu1 %684 }
  0xb7   : > { %v6969_v16 = vpop.permute.xlu0 %679 }
  0xb8   : > { %1600 = vperm.xlu0 %6248, %v6825_v39  }
  0xb9   : > { %1336 = vperm.xlu1 %6239, %v6813_v36  }
  0xba   : > { %v6963_v14 = vpop.permute.xlu1 %694 }
  0xbb   : > { %v6977_v19 = vpop.permute.xlu0 %689 }
  0xbc   : > { %1608 = vperm.xlu0 %6248, %v6837_v41  }
  0xbd   : > { %1340 = vperm.xlu1 %6239, %v6832_v40  }
  0xbe   : > { %v6967_v15 = vpop.permute.xlu1 %704 }
  0xbf   : > { %v6987_v22 = vpop.permute.xlu0 %699 }
  0xc0   : > { %6249 = vset.pattern.permute.xlu0 %v12682_v18 }
  0xc1   : > { %1348 = vperm.xlu1 %6239, %v6844_v42   ;;  %1648 = vperm.xlu0 %6249, %v6818_v37  }
  0xc2   : > { %v6973_v17 = vpop.permute.xlu1 %714 }
  0xc3   : > { %v6993_v24 = vpop.permute.xlu0 %709 }
  0xc5   : > { %1356 = vperm.xlu1 %6239, %v6854_v44   ;;  %1660 = vperm.xlu0 %6249, %v6832_v40  }
  0xc7   : > { %v6980_v20 = vpop.permute.xlu1 %958 }
  0xc8   : > { %v6999_v26 = vpop.permute.xlu0 %1136 }
  0xc9   : > { %6242 = vset.pattern.permute.xlu1 %v12662_v52  ;;  %1668 = vperm.xlu0 %6249, %v6844_v42   ;;  %12799 = vst [vmem:[#allocation2_spill] sm:$0xff] %v6999_v26 }
  0xca   : > { %1396 = vperm.xlu1 %6242, %v6803_v33  }
  0xcb   : > { %v6985_v21 = vpop.permute.xlu1 %963 }
  0xcc   : > { %v7009_v29 = vpop.permute.xlu0 %1148 }
  0xcd   : > { %1676 = vperm.xlu0 %6249, %v6854_v44   ;;  %12801 = vst [vmem:[#allocation4_spill] sm:$0xff] %v7009_v29 }
  0xce   : > { %1400 = vperm.xlu1 %6242, %v6813_v36  }
  0xcf   : > { %v6991_v23 = vpop.permute.xlu1 %973 }
  0xd0   : > { %v7017_v32 = vpop.permute.xlu0 %1156 }
  0xd1   : > { %6252 = vset.pattern.permute.xlu0 %v12680_v27  ;;  %12803 = vst [vmem:[#allocation6_spill] sm:$0xff] %v7017_v32 }
  0xd2   : > { %1408 = vperm.xlu1 %6242, %v6825_v39   ;;  %1716 = vperm.xlu0 %6252, %v6803_v33  }
  0xd3   : > { %v6997_v25 = vpop.permute.xlu1 %983 }
  0xd4   : > { %v7025_v45 = vpop.permute.xlu0 %1164 }
  0xd5   : > { %12805 = vst [vmem:[#allocation8_spill] sm:$0xff] %v7025_v45 }
  0xd6   : > { %1416 = vperm.xlu1 %6242, %v6837_v41   ;;  %1728 = vperm.xlu0 %6252, %v6825_v39  }
  0xd8   : > { %v7004_v28 = vpop.permute.xlu1 %1009 }
  0xd9   : > { %12800 = vst [vmem:[#allocation3_spill] sm:$0xff] %v7004_v28  ;;  %v7030_v48 = vpop.permute.xlu0 %1204 }
  0xda   : > { %6243 = vset.pattern.permute.xlu1 %v12660_v58  ;;  %1736 = vperm.xlu0 %6252, %v6837_v41   ;;  %12807 = vst [vmem:[#allocation10_spill] sm:$0xff] %v7030_v48  ;;  %v12827_v48 = vmov 9  }
  0xdb   : > { %1456 = vperm.xlu1 %6243, %v6818_v37  }
  0xdc   : > { %v7011_v30 = vpop.permute.xlu1 %1019 }
  0xdd   : > { %v7044_v35 = vpop.permute.xlu0 %1216 }
  0xde   : > { %6253 = vset.pattern.permute.xlu0 %v12676_v34  ;;  %12812 = vst [vmem:[#allocation15_spill] sm:$0xff] %v7044_v35 }
  0xdf   : > { %1464 = vperm.xlu1 %6243, %v6813_v36   ;;  %1776 = vperm.xlu0 %6253, %v6818_v37  }
  0xe0   : > { %v7015_v31 = vpop.permute.xlu1 %1024 }
  0xe1   : > { %12802 = vst [vmem:[#allocation5_spill] sm:$0xff] %v7015_v31 }
  0xe3   : > { %1468 = vperm.xlu1 %6243, %v6832_v40  }
  0xe4   : > { %v7022_v43 = vpop.permute.xlu1 %1034 }
  0xe5   : > { %12804 = vst [vmem:[#allocation7_spill] sm:$0xff] %v7022_v43 }
  0xe7   : > { %1476 = vperm.xlu1 %6243, %v6844_v42  }
  0xe8   : > { %v7027_v47 = vpop.permute.xlu1 %1044 }
  0xe9   : > { %12806 = vst [vmem:[#allocation9_spill] sm:$0xff] %v7027_v47 }
  0xeb   : > { %1484 = vperm.xlu1 %6243, %v6854_v44  }
  0xec   : > { %v7032_v49 = vpop.permute.xlu1 %1076  ;;  %v6078_v58 = vpop.f32.mrb[0].mxu1 }
  0xed   : > { %12808 = vst [vmem:[#allocation11_spill] sm:$0xff] %v7032_v49  ;;  %v473_v52 = vpop.f32.mrb[1].mxu1  ;;  %v7047_v34 = vadd.f32 %v6078_v58, %v6895_v53 }
  0xee   : > { %v6079_v51 = vpop.f32.mrb[2].mxu1  ;;  %v7039_v38 = vadd.f32 %v473_v52, %v6901_v55  ;;  %v7059_v55 = vpop.permute.xlu0 %1224 }
  0xef   : > { %6246 = vset.pattern.permute.xlu1 %v12678_v3  ;;  %v476_v46 = vpop.f32.mrb[3].mxu1  ;;  %12813 = vst [vmem:[#allocation16_spill] sm:$0xff] %v7047_v34  ;;  %v7055_v18 = vadd.f32 %v6079_v51, %v6899_v54  ;;  %12816 = vst [vmem:[#allocation19_spill] sm:$0xff] %v7059_v55  ;;  %v12820_v54 = vmov 8  }
  0xf0   : > { %1524 = vperm.xlu1 %6246, %v6803_v33   ;;  %v7036_v50 = vpop.permute.xlu1 %1084  ;;  %12810 = vst [vmem:[#allocation13_spill] sm:$0xff] %v7039_v38  ;;  %v7042_v1 = vadd.f32 %v476_v46, %v6908_v57 }
  0xf1   : > { %12809 = vst [vmem:[#allocation12_spill] sm:$0xff] %v7036_v50  ;;  %12815 = vst [vmem:[#allocation18_spill] sm:$0xff] %v7055_v18 }
  0xf2   : > { %12811 = vst [vmem:[#allocation14_spill] sm:$0xff] %v7042_v1  ;;  %v488_v3 = vadd.f32 %v7042_v1, %v7039_v38  ;;  %v7067_v45 = vpop.permute.xlu0 %1264 }
  0xf3   : > { %12819 = vst [vmem:[#allocation22_spill] sm:$0xff] %v7067_v45 }
  0xf4   : > { %1528 = vperm.xlu1 %6246, %v6813_v36   ;;  %v7052_v27 = vpop.permute.xlu1 %1092  ;;  %v489_v52 = vadd.f32 %v488_v3, %v7047_v34 }
  0xf5   : > { %12814 = vst [vmem:[#allocation17_spill] sm:$0xff] %v7052_v27 }
  0xf6   : > { %v490_v46 = vadd.f32 %v489_v52, %v7055_v18  ;;  %v7073_v32 = vpop.permute.xlu0 %1276 }
  0xf7   : > { %12821 = vst [vmem:[#allocation23_spill] sm:$0xff] %v7073_v32 }
  0xf8   : > { %1536 = vperm.xlu1 %6246, %v6825_v39   ;;  %v7062_v53 = vpop.permute.xlu1 %1100  ;;  %v491_v57 = vrot.slane %v490_v46, 4 }
  0xf9   : > { %12817 = vst [vmem:[#allocation20_spill] sm:$0xff] %v7062_v53 }
  0xfa   : > { %v492_v58 = vadd.f32 %v491_v57, %v490_v46 }
  0xfc   : > { %1544 = vperm.xlu1 %6246, %v6837_v41   ;;  %v493_v12 = vrot.slane %v492_v58, 2 }
  0xfd   : > { %v7065_v28 = vpop.permute.xlu1 %1140 }
  0xfe   : > { %12818 = vst [vmem:[#allocation21_spill] sm:$0xff] %v7065_v28  ;;  %v494_v51 = vadd.f32 %v493_v12, %v492_v58 }
 0x100   : > { %6247 = vset.pattern.permute.xlu1 %v12820_v54  ;;  %v495_v3 = vrot.slane %v494_v51, 1 }
 0x101   : > { %1584 = vperm.xlu1 %6247, %v6818_v37   ;;  %v7071_v52 = vpop.permute.xlu1 %1144 }
 0x102   : > { %v496_v47 = vadd.f32 %v495_v3, %v494_v51  ;;  %v7085_v3 = vpop.permute.xlu0 %1284 }
 0x103   : > { %12824 = vst [vmem:[#allocation26_spill] sm:$0xff] %v7085_v3 }
 0x104   : > { %v498_v53 = vmul.f32 0.03125, %v496_v47 }
 0x105   : > { %1592 = vperm.xlu1 %6247, %v6813_v36   ;;  %v7076_v46 = vpop.permute.xlu1 %1152 }
 0x106   : > { %12822 = vst [vmem:[#allocation24_spill] sm:$0xff] %v7076_v46  ;;  %v499_v57 = vsub.f32 %v7039_v38, %v498_v53  ;;  %v500_v43 = vsub.f32 %v7042_v1, %v498_v53  ;;  %v501_v12 = vsub.f32 %v7047_v34, %v498_v53  ;;  %v502_v58 = vsub.f32 %v7055_v18, %v498_v53  ;;  %v7090_v34 = vpop.permute.xlu0 %1292 }
 0x107   : > { %12825 = vst [vmem:[#allocation27_spill] sm:$0xff] %v7090_v34 }
 0x108   : > { %v503_v54 = vmul.f32 %v499_v57, %v499_v57  ;;  %v504_v27 = vmul.f32 %v500_v43, %v500_v43  ;;  %v505_v47 = vmul.f32 %v501_v12, %v501_v12  ;;  %v506_v31 = vmul.f32 %v502_v58, %v502_v58 }
 0x109   : > { %1596 = vperm.xlu1 %6247, %v6832_v40   ;;  %v7083_v51 = vpop.permute.xlu1 %1160 }
 0x10a   : > { %12823 = vst [vmem:[#allocation25_spill] sm:$0xff] %v7083_v51  ;;  %v507_v35 = vadd.f32 %v504_v27, %v503_v54  ;;  %v7095_v51 = vpop.permute.xlu0 %1332 }
 0x10b   : > { %12826 = vst [vmem:[#allocation28_spill] sm:$0xff] %v7095_v51 }
 0x10c   : > { %v508_v46 = vadd.f32 %v507_v35, %v505_v47 }
 0x10d   : > { %1604 = vperm.xlu1 %6247, %v6844_v42  }
 0x10e   : > { %v7088_v38 = vpop.permute.xlu1 %1200  ;;  %v509_v1 = vadd.f32 %v508_v46, %v506_v31  ;;  %v7101_v31 = vpop.permute.xlu0 %1344 }
 0x10f   : > { %12829 = vst [vmem:[#allocation30_spill] sm:$0xff] %v7101_v31  ;;  %v12835_v31 = vmov 10  }
 0x110   : > { %v510_v53 = vrot.slane %v509_v1, 4 }
 0x111   : > { %1612 = vperm.xlu1 %6247, %v6854_v44  }
 0x112   : > { %v7093_v18 = vpop.permute.xlu1 %1208  ;;  %v511_v55 = vadd.f32 %v510_v53, %v509_v1 }
 0x114   : > { %v512_v3 = vrot.slane %v511_v55, 2 }
 0x115   : > { %6250 = vset.pattern.permute.xlu1 %v12827_v48  ;;  %v7109_v48 = vpop.permute.xlu0 %1352 }
 0x116   : > { %1652 = vperm.xlu1 %6250, %v6803_v33   ;;  %v7099_v35 = vpop.permute.xlu1 %1212  ;;  %v513_v27 = vadd.f32 %v512_v3, %v511_v55  ;;  %12832 = vst [vmem:[#allocation33_spill] sm:$0xff] %v7109_v48 }
 0x117   : > { %12828 = vst [vmem:[#allocation29_spill] sm:$0xff] %v7099_v35 }
 0x118   : > { %v514_v54 = vrot.slane %v513_v27, 1 }
 0x119   : > { %v7114_v3 = vpop.permute.xlu0 %1392 }
 0x11a   : > { %1656 = vperm.xlu1 %6250, %v6813_v36   ;;  %v7104_v46 = vpop.permute.xlu1 %1220  ;;  %v515_v47 = vadd.f32 %v514_v54, %v513_v27  ;;  %12834 = vst [vmem:[#allocation35_spill] sm:$0xff] %v7114_v3  ;;  %v388_v54 = vlaneseq }
 0x11b   : > { %12830 = vst [vmem:[#allocation31_spill] sm:$0xff] %v7104_v46 }
 0x11c   : > { %v516_v34 = vmul.f32 0.03125, %v515_v47 }
 0x11e   : > { %1664 = vperm.xlu1 %6250, %v6825_v39   ;;  %v7107_v1 = vpop.permute.xlu1 %1228  ;;  %v517_v53 = vadd.f32 1e-05, %v516_v34 }
 0x11f   : > { %12831 = vst [vmem:[#allocation32_spill] sm:$0xff] %v7107_v1  ;;  %v7123_v1 = vand.u32 127, %v388_v54 }
 0x120   : > { %6439 = vrsqrt.f32 %v517_v53  ;;  %v7125_v53 = vpop.permute.xlu0 %1404 }
 0x121   : > { %12837 = vst [vmem:[#allocation37_spill] sm:$0xff] %v7123_v1  ;;  %12838 = vst [vmem:[#allocation38_spill] sm:$0xff] %v7125_v53  ;;  %vm390_vm1 = vcmp.lt.s32.totalorder %v7123_v1, 16 }
 0x122   : > { %1672 = vperm.xlu1 %6250, %v6837_v41   ;;  %vm7323_vm3 = vmpackc.low %vm390_vm1, %vm390_vm1 }
 0x123   : > { %v7112_v55 = vpop.permute.xlu1 %1268 }
 0x124   : > { %12833 = vst [vmem:[#allocation34_spill] sm:$0xff] %v7112_v55 }
 0x126   : > { %6251 = vset.pattern.permute.xlu1 %v12835_v31 }
 0x127   : > { %1712 = vperm.xlu1 %6251, %v6818_v37   ;;  %v7118_v27 = vpop.permute.xlu1 %1272 }
 0x12a   : > { %v6440_v47 = vpop.eup %6439 }
 0x12b   : > { %1720 = vperm.xlu1 %6251, %v6813_v36   ;;  %v7121_v34 = vpop.permute.xlu1 %1280  ;;  %v520_v46 = vmul.f32 %v6440_v47, %v500_v43  ;;  %v519_v48 = vmul.f32 %v6440_v47, %v499_v57  ;;  %v521_v51 = vmul.f32 %v6440_v47, %v501_v12  ;;  %v522_v55 = vmul.f32 %v6440_v47, %v502_v58  ;;  %v7139_v12 = vpop.permute.xlu0 %1412 }
 0x12c   : > { %12836 = vst [vmem:[#allocation36_spill] sm:$0xff] %v7121_v34  ;;  %12840 = vst [vmem:[#allocation40_spill] sm:$0xff] %v7139_v12  ;;  %v12690_v34 = vmov 12  }
 0x12d   : > { %v548_v31 = vmul.f32 %v6905_v56, %v520_v46  ;;  %v547_v28 = vmul.f32 %v6915_v60, %v519_v48  ;;  %v549_v49 = vmul.f32 %v6921_v62, %v521_v51  ;;  %v550_v35 = vmul.f32 %v6911_v59, %v522_v55 }
 0x12f   : > { %1724 = vperm.xlu1 %6251, %v6832_v40   ;;  %v7132_v32 = vpop.permute.xlu1 %1288  ;;  %v575_v54 = vadd.f32 %v6927_v0, %v547_v28  ;;  %v576_v43 = vadd.f32 %v6917_v61, %v548_v31  ;;  %v577_v57 = vadd.f32 %v6933_v4, %v549_v49  ;;  %v578_v56 = vadd.f32 %v6923_v63, %v550_v35  ;;  %v7158_v28 = vpop.permute.xlu0 %1420 }
 0x130   : > { %12839 = vst [vmem:[#allocation39_spill] sm:$0xff] %v7132_v32  ;;  %12842 = vst [vmem:[#allocation42_spill] sm:$0xff] %v7158_v28  ;;  %v12845_v31 = vmov 11  }
 0x131   : > { %v579_v60 = vsel %vm390_vm1, %v575_v54, 0.0  ;;  %v580_v59 = vsel %vm390_vm1, %v576_v43, 0.0  ;;  %v7148_v0 = vpack.c.bf16 %v576_v43, %v575_v54  ;;  %v7150_v61 = vpack.c.bf16 %v578_v56, %v577_v57 }
 0x132   : > { %v6254_v62 = vpack.i.bf16 %v580_v59, %v579_v60  ;;  %v581_v63 = vsel %vm390_vm1, %v577_v57, 0.0  ;;  %v582_v4 = vsel %vm390_vm1, %v578_v56, 0.0  ;;  %v6419_v60 = vld [vmem:[%s12653_s5] sm:$0xff]  }
 0x133   : > { %1732 = vperm.xlu1 %6251, %v6844_v42   ;;  %v6259_v58 = vpack.i.bf16 %v582_v4, %v581_v63  ;;  %v7164_v51 = vpop.permute.xlu0 %1460  ;;  %6092 = vmatprep.mubr.msk.bf16.mxu1 %vm757_vm2, %v6419_v60 }
 0x134   : > { %v7146_v48 = vpop.permute.xlu1 %1328  ;;  %6255 = vrot.lane.b32.xlu0 %v6254_v62, %s12706_s24  ;;  %12843 = vst [vmem:[#allocation43_spill] sm:$0xff] %v7164_v51 }
 0x135   : > { %12841 = vst [vmem:[#allocation41_spill] sm:$0xff] %v7146_v48 }
 0x137   : > { %1740 = vperm.xlu1 %6251, %v6854_v44   ;;  %v7174_v55 = vpop.permute.xlu0 %1472 }
 0x138   : > { %v7160_v49 = vpop.permute.xlu1 %1336  ;;  %6265 = vrot.lane.b32.xlu0 %v6254_v62, %s12708_s25  ;;  %12847 = vst [vmem:[#allocation46_spill] sm:$0xff] %v7174_v55 }
 0x13b   : > { %6260 = vrot.lane.b32.xlu1 %v6259_v58, %s12706_s24  ;;  %v7180_v54 = vpop.permute.xlu0 %1480 }
 0x13c   : > { %v7166_v35 = vpop.permute.xlu1 %1340  ;;  %6274 = vset.pattern.permute.xlu1 %v12845_v31  ;;  %1788 = vperm.xlu0 %6253, %v6832_v40   ;;  %12849 = vst [vmem:[#allocation48_spill] sm:$0xff] %v7180_v54 }
 0x13d   : > { %12844 = vst [vmem:[#allocation44_spill] sm:$0xff] %v7166_v35 }
 0x13f   : > { %6270 = vrot.lane.b32.xlu1 %v6259_v58, %s12708_s25  ;;  %v7188_v56 = vpop.permute.xlu0 %1520 }
 0x140   : > { %v7171_v46 = vpop.permute.xlu1 %1348  ;;  %1796 = vperm.xlu0 %6253, %v6844_v42   ;;  %12851 = vst [vmem:[#allocation50_spill] sm:$0xff] %v7188_v56 }
 0x141   : > { %12846 = vst [vmem:[#allocation45_spill] sm:$0xff] %v7171_v46 }
 0x143   : > { %1780 = vperm.xlu1 %6274, %v6803_v33   ;;  %v7197_v62 = vpop.permute.xlu0 %1532 }
 0x144   : > { %v7177_v47 = vpop.permute.xlu1 %1356  ;;  %1804 = vperm.xlu0 %6253, %v6854_v44   ;;  %12853 = vst [vmem:[#allocation52_spill] sm:$0xff] %v7197_v62 }
 0x145   : > { %12848 = vst [vmem:[#allocation47_spill] sm:$0xff] %v7177_v47 }
 0x147   : > { %1784 = vperm.xlu1 %6274, %v6813_v36   ;;  %v7201_v4 = vpop.permute.xlu0 %1540 }
 0x148   : > { %12855 = vst [vmem:[#allocation54_spill] sm:$0xff] %v7201_v4  ;;  %6276 = vset.pattern.permute.xlu0 %v12690_v34 }
 0x149   : > { %v7183_v43 = vpop.permute.xlu1 %1396  ;;  %1844 = vperm.xlu0 %6276, %v6803_v33  }
 0x14a   : > { %12850 = vst [vmem:[#allocation49_spill] sm:$0xff] %v7183_v43  ;;  %v12883_v43 = vmov 16  }
 0x14b   : > { %1792 = vperm.xlu1 %6274, %v6825_v39   ;;  %v7207_v47 = vpop.permute.xlu0 %1548 }
 0x14c   : > { %12857 = vst [vmem:[#allocation56_spill] sm:$0xff] %v7207_v47 }
 0x14d   : > { %v7186_v57 = vpop.permute.xlu1 %1400  ;;  %1856 = vperm.xlu0 %6276, %v6825_v39  }
 0x14f   : > { %1800 = vperm.xlu1 %6274, %v6837_v41   ;;  %v7211_v28 = vpop.permute.xlu0 %1588 }
 0x150   : > { %12859 = vst [vmem:[#allocation58_spill] sm:$0xff] %v7211_v28  ;;  %v12694_v28 = vmov 14  }
 0x151   : > { %v7194_v59 = vpop.permute.xlu1 %1408  ;;  %1864 = vperm.xlu0 %6276, %v6837_v41  }
 0x152   : > { %12852 = vst [vmem:[#allocation51_spill] sm:$0xff] %v7194_v59 }
 0x153   : > { %v7217_v60 = vpop.permute.xlu0 %1600  ;;  %6275 = vset.pattern.permute.xlu1 %v12690_v34 }
 0x154   : > { %12862 = vst [vmem:[#allocation61_spill] sm:$0xff] %v7217_v60  ;;  %1840 = vperm.xlu1 %6275, %v6818_v37   ;;  %v12692_v60 = vmov 13  }
 0x155   : > { %v7199_v63 = vpop.permute.xlu1 %1416  ;;  %6277 = vset.pattern.permute.xlu0 %v12692_v60 }
 0x156   : > { %12854 = vst [vmem:[#allocation53_spill] sm:$0xff] %v7199_v63  ;;  %1904 = vperm.xlu0 %6277, %v6818_v37  }
 0x157   : > { %v7225_v47 = vpop.permute.xlu0 %1608 }
 0x158   : > { %12864 = vst [vmem:[#allocation63_spill] sm:$0xff] %v7225_v47  ;;  %1848 = vperm.xlu1 %6275, %v6813_v36  }
 0x15a   : > { %v7203_v58 = vpop.permute.xlu1 %1456  ;;  %1916 = vperm.xlu0 %6277, %v6832_v40  }
 0x15b   : > { %12856 = vst [vmem:[#allocation55_spill] sm:$0xff] %v7203_v58  ;;  %v7235_v34 = vpop.permute.xlu0 %1648 }
 0x15c   : > { %1852 = vperm.xlu1 %6275, %v6832_v40   ;;  %12866 = vst [vmem:[#allocation65_spill] sm:$0xff] %v7235_v34 }
 0x15e   : > { %v7205_v31 = vpop.permute.xlu1 %1464  ;;  %1924 = vperm.xlu0 %6277, %v6844_v42  }
 0x15f   : > { %v7242_v63 = vpop.permute.xlu0 %1660 }
 0x160   : > { %1860 = vperm.xlu1 %6275, %v6844_v42   ;;  %12868 = vst [vmem:[#allocation67_spill] sm:$0xff] %v7242_v63 }
 0x162   : > { %v7209_v12 = vpop.permute.xlu1 %1468  ;;  %1932 = vperm.xlu0 %6277, %v6854_v44  }
 0x163   : > { %12858 = vst [vmem:[#allocation57_spill] sm:$0xff] %v7209_v12 }
 0x164   : > { %1868 = vperm.xlu1 %6275, %v6854_v44  }
 0x166   : > { %v7213_v46 = vpop.permute.xlu1 %1476  ;;  %6280 = vset.pattern.permute.xlu0 %v12694_v28 }
 0x167   : > { %12860 = vst [vmem:[#allocation59_spill] sm:$0xff] %v7213_v46  ;;  %1972 = vperm.xlu0 %6280, %v6803_v33  }
 0x168   : > { %6278 = vset.pattern.permute.xlu1 %v12692_v60 }
 0x169   : > { %1908 = vperm.xlu1 %6278, %v6803_v33  }
 0x16a   : > { %v7215_v59 = vpop.permute.xlu1 %1484 }
 0x16b   : > { %12861 = vst [vmem:[#allocation60_spill] sm:$0xff] %v7215_v59  ;;  %1984 = vperm.xlu0 %6280, %v6825_v39  }
 0x16d   : > { %1912 = vperm.xlu1 %6278, %v6813_v36  }
 0x16f   : > { %v7223_v4 = vpop.permute.xlu1 %1524  ;;  %1992 = vperm.xlu0 %6280, %v6837_v41  }
 0x170   : > { %12863 = vst [vmem:[#allocation62_spill] sm:$0xff] %v7223_v4 }
 0x171   : > { %1920 = vperm.xlu1 %6278, %v6825_v39  }
 0x173   : > { %v7229_v46 = vpop.permute.xlu1 %1528 }
 0x175   : > { %1928 = vperm.xlu1 %6278, %v6837_v41  }
 0x177   : > { %v7233_v59 = vpop.permute.xlu1 %1536 }
 0x178   : > { %12865 = vst [vmem:[#allocation64_spill] sm:$0xff] %v7233_v59  ;;  %v7251_v59 = vpop.permute.xlu0 %1668 }
 0x179   : > { %12870 = vst [vmem:[#allocation69_spill] sm:$0xff] %v7251_v59  ;;  %6279 = vset.pattern.permute.xlu1 %v12694_v28 }
 0x17a   : > { %1968 = vperm.xlu1 %6279, %v6818_v37  }
 0x17b   : > { %v7240_v55 = vpop.permute.xlu1 %1544 }
 0x17c   : > { %12867 = vst [vmem:[#allocation66_spill] sm:$0xff] %v7240_v55  ;;  %v7259_v54 = vpop.permute.xlu0 %1676 }
 0x17d   : > { %12872 = vst [vmem:[#allocation71_spill] sm:$0xff] %v7259_v54 }
 0x17e   : > { %1976 = vperm.xlu1 %6279, %v6813_v36  }
 0x180   : > { %v7246_v47 = vpop.permute.xlu1 %1584  ;;  %v7267_v59 = vpop.permute.xlu0 %1716 }
 0x181   : > { %12869 = vst [vmem:[#allocation68_spill] sm:$0xff] %v7246_v47  ;;  %12874 = vst [vmem:[#allocation73_spill] sm:$0xff] %v7267_v59 }
 0x182   : > { %1980 = vperm.xlu1 %6279, %v6832_v40  }
 0x184   : > { %v7253_v32 = vpop.permute.xlu1 %1592  ;;  %v7277_v4 = vpop.permute.xlu0 %1728 }
 0x185   : > { %12877 = vst [vmem:[#allocation76_spill] sm:$0xff] %v7277_v4 }
 0x186   : > { %1988 = vperm.xlu1 %6279, %v6844_v42  }
 0x188   : > { %v7257_v55 = vpop.permute.xlu1 %1596 }
 0x189   : > { %12871 = vst [vmem:[#allocation70_spill] sm:$0xff] %v7257_v55 }
 0x18a   : > { %1996 = vperm.xlu1 %6279, %v6854_v44  }
 0x18c   : > { %v7264_v60 = vpop.permute.xlu1 %1604 }
 0x18d   : > { %12873 = vst [vmem:[#allocation72_spill] sm:$0xff] %v7264_v60  ;;  %v12696_v60 = vmov 16  }
 0x18e   : > { %6281 = vset.pattern.permute.xlu0 %v12696_v60  ;;  %6282 = vset.pattern.permute.xlu1 %v12883_v43  ;;  %v12887_v43 = vmov 17  }
 0x18f   : > { %2032 = vperm.xlu0 %6281, %v6818_v37   ;;  %2036 = vperm.xlu1 %6282, %v6803_v33  }
 0x190   : > { %v7270_v51 = vpop.permute.xlu1 %1612 }
 0x191   : > { %12875 = vst [vmem:[#allocation74_spill] sm:$0xff] %v7270_v51  ;;  %v7284_v51 = vpop.permute.xlu0 %1736 }
 0x192   : > { %12878 = vst [vmem:[#allocation77_spill] sm:$0xff] %v7284_v51 }
 0x193   : > { %2044 = vperm.xlu0 %6281, %v6832_v40   ;;  %2040 = vperm.xlu1 %6282, %v6813_v36  }
 0x195   : > { %v7275_v54 = vpop.permute.xlu1 %1652 }
 0x196   : > { %12876 = vst [vmem:[#allocation75_spill] sm:$0xff] %v7275_v54  ;;  %v7294_v54 = vpop.permute.xlu0 %1776 }
 0x197   : > { %2052 = vperm.xlu0 %6281, %v6844_v42   ;;  %12881 = vst [vmem:[#allocation80_spill] sm:$0xff] %v7294_v54  ;;  %2048 = vperm.xlu1 %6282, %v6825_v39  }
 0x199   : > { %v7282_v59 = vpop.permute.xlu1 %1656 }
 0x19b   : > { %2060 = vperm.xlu0 %6281, %v6854_v44   ;;  %2056 = vperm.xlu1 %6282, %v6837_v41  }
 0x19d   : > { %v7288_v28 = vpop.permute.xlu1 %1664 }
 0x19e   : > { %12879 = vst [vmem:[#allocation78_spill] sm:$0xff] %v7288_v28  ;;  %v12698_v28 = vmov 17  }
 0x19f   : > { %6284 = vset.pattern.permute.xlu0 %v12698_v28  ;;  %6283 = vset.pattern.permute.xlu1 %v12887_v43 }
 0x1a0   : > { %2100 = vperm.xlu0 %6284, %v6803_v33   ;;  %2096 = vperm.xlu1 %6283, %v6818_v37  }
 0x1a1   : > { %v7292_v4 = vpop.permute.xlu1 %1672 }
 0x1a2   : > { %12880 = vst [vmem:[#allocation79_spill] sm:$0xff] %v7292_v4 }
 0x1a4   : > { %2112 = vperm.xlu0 %6284, %v6825_v39   ;;  %2104 = vperm.xlu1 %6283, %v6813_v36  }
 0x1a6   : > { %v7298_v60 = vpop.permute.xlu1 %1712  ;;  %v6256_v51 = vpop.permute.xlu0 %6255 }
 0x1a7   : > { %12882 = vst [vmem:[#allocation81_spill] sm:$0xff] %v7298_v60  ;;  %v6258_v55 = vunpack.i.h.bf16 %v6256_v51  ;;  %v6257_v12 = vunpack.i.l.bf16 %v6256_v51 }
 0x1a8   : > { %2120 = vperm.xlu0 %6284, %v6837_v41   ;;  %2108 = vperm.xlu1 %6283, %v6832_v40  }
 0x1a9   : > { %v615_v35 = vpack.c.bf16 %v6258_v55, %v6257_v12 }
 0x1aa   : > { %v7304_v4 = vpop.permute.xlu1 %1720 }
 0x1ab   : > { %6080 = vmatprep.subr.bf16.mxu1 %v615_v35 }
 0x1ac   : > { %6081 = vmatpush3.bf16.msra.mxu1 %v615_v35  ;;  %2116 = vperm.xlu1 %6283, %v6844_v42  }
 0x1ae   : > { %v7308_v63 = vpop.permute.xlu1 %1724 }
 0x1af   : > { %12884 = vst [vmem:[#allocation82_spill] sm:$0xff] %v7308_v63  ;;  %v12888_v63 = vmov 0 }
 0x1b0   : > { %v12889_v63 = vsel %vm7323_vm3, 4294967295, %v12888_v63  ;;  %2124 = vperm.xlu1 %6283, %v6854_v44  }
 0x1b1   : > { %12890 = vst [vmem:[#allocation85_spill] sm:$0xff] %v12889_v63 }
 0x1b2   : > { %v7312_v51 = vpop.permute.xlu1 %1732 }
 0x1b3   : > { %12885 = vst [vmem:[#allocation83_spill] sm:$0xff] %v7312_v51  ;;  %v6266_v51 = vpop.permute.xlu0 %6265 }
 0x1b6   : > { %v7315_v28 = vpop.permute.xlu1 %1740 }
 0x1b7   : > { %12886 = vst [vmem:[#allocation84_spill] sm:$0xff] %v7315_v28 }
 0x1ba   : > { %v6261_v12 = vpop.permute.xlu1 %6260 }
 0x1bb   : > { %v6263_v35 = vunpack.i.h.bf16 %v6261_v12  ;;  %v6262_v55 = vunpack.i.l.bf16 %v6261_v12  ;;  %v6268_v12 = vunpack.i.h.bf16 %v6266_v51  ;;  %v7416_v3 = vpop.permute.xlu0 %1788 }
 0x1bc   : > { %12897 = vst [vmem:[#allocation92_spill] sm:$0xff] %v7416_v3 }
 0x1bd   : > { %v616_v62 = vpack.c.bf16 %v6263_v35, %v6262_v55  ;;  %v6267_v35 = vunpack.i.l.bf16 %v6266_v51 }
 0x1be   : > { %v6271_v55 = vpop.permute.xlu1 %6270 }
 0x1bf   : > { %6082 = vmatprep.subr.bf16.mxu1 %v616_v62  ;;  %v6272_v43 = vunpack.i.l.bf16 %v6271_v55  ;;  %v619_v28 = vpack.c.bf16 %v6268_v12, %v6267_v35  ;;  %v6425_v12 = vld [vmem:[%s12653_s5 + $0x30] sm:$0xff]   ;;  %v6426_v35 = vld [vmem:[%s12653_s5 + $0x38] sm:$0xff]  }
 0x1c0   : > { %6083 = vmatpush3.bf16.msra.mxu1 %v616_v62  ;;  %v6273_v62 = vunpack.i.h.bf16 %v6271_v55  ;;  %v6421_v55 = vld [vmem:[%s12653_s5 + $0x10] sm:$0xff]  }
 0x1c1   : > { %6084 = vmatprep.subr.msk.bf16.mxu1 %vm7323_vm3, %v7148_v0 }
 0x1c2   : > { %v620_v51 = vpack.c.bf16 %v6273_v62, %v6272_v43  ;;  %v6424_v43 = vld [vmem:[%s12653_s5 + $0x28] sm:$0xff]   ;;  %v12700_v62 = vmov 18  }
 0x1c3   : > { %6286 = vset.pattern.permute.xlu1 %v12700_v62  ;;  %6285 = vset.pattern.permute.xlu0 %v12700_v62 }
 0x1c4   : > { %6085 = vmatpush3.bf16.msk.msra.mxu1 %vm7323_vm3, %v7148_v0  ;;  %v6420_v0 = vld [vmem:[%s12653_s5 + $0x8] sm:$0xff]   ;;  %2164 = vperm.xlu1 %6286, %v6803_v33  }
 0x1c5   : > { %6086 = vmatprep.subr.msk.bf16.mxu1 %vm7323_vm3, %v7150_v61  ;;  %2160 = vperm.xlu0 %6285, %v6818_v37  }
 0x1c8   : > { %6087 = vmatpush3.bf16.msk.msra.mxu1 %vm7323_vm3, %v7150_v61  ;;  %v6422_v61 = vld [vmem:[%s12653_s5 + $0x18] sm:$0xff]   ;;  %2168 = vperm.xlu1 %6286, %v6813_v36  }
 0x1c9   : > { %6088 = vmatprep.subr.bf16.mxu1 %v619_v28  ;;  %2172 = vperm.xlu0 %6285, %v6832_v40  }
 0x1cc   : > { %6089 = vmatpush3.bf16.msra.mxu1 %v619_v28  ;;  %v6423_v28 = vld [vmem:[%s12653_s5 + $0x20] sm:$0xff]   ;;  %2176 = vperm.xlu1 %6286, %v6825_v39  }
 0x1cd   : > { %6090 = vmatprep.subr.bf16.mxu1 %v620_v51  ;;  %2180 = vperm.xlu0 %6285, %v6844_v42  }
 0x1d0   : > { %6091 = vmatpush3.bf16.msra.mxu1 %v620_v51  ;;  %2184 = vperm.xlu1 %6286, %v6837_v41   ;;  %v7380_v51 = vpop.permute.xlu1 %1780 }
 0x1d1   : > { %2188 = vperm.xlu0 %6285, %v6854_v44   ;;  %12891 = vst [vmem:[#allocation86_spill] sm:$0xff] %v7380_v51 }
 0x1d3   : > { %6093 = vmatmul.mubr.msk.bf16.vlgmr.msra.gmra.mrb[4].mxu1 %vm757_vm2, %v6420_v0 }
 0x1d4   : > { %6096 = vmatprep.mubr.msk.bf16.mxu1 %vm757_vm2, %v6421_v55  ;;  %v7382_v0 = vpop.permute.xlu1 %1784 }
 0x1d8   : > { %v7384_v55 = vpop.permute.xlu1 %1792 }
 0x1d9   : > { %12892 = vst [vmem:[#allocation87_spill] sm:$0xff] %v7384_v55 }
 0x1db   : > { %6097 = vmatmul.mubr.msk.bf16.gmra.mrb[8].mxu1 %vm757_vm2, %v6422_v61 }
 0x1dc   : > { %6100 = vmatprep.mubr.msk.bf16.mxu1 %vm757_vm2, %v6423_v28  ;;  %v7386_v33 = vpop.permute.xlu1 %1800 }
 0x1dd   : > { %12893 = vst [vmem:[#allocation88_spill] sm:$0xff] %v7386_v33 }
 0x1e0   : > { %v7390_v36 = vpop.permute.xlu1 %1840 }
 0x1e1   : > { %12894 = vst [vmem:[#allocation89_spill] sm:$0xff] %v7390_v36 }
 0x1e3   : > { %6101 = vmatmul.mubr.msk.bf16.gmra.mrb[12].mxu1 %vm757_vm2, %v6424_v43 }
 0x1e4   : > { %6104 = vmatprep.mubr.msk.bf16.mxu1 %vm757_vm2, %v6425_v12  ;;  %v7398_v41 = vpop.permute.xlu1 %1848 }
 0x1e8   : > { %v7408_v12 = vpop.permute.xlu1 %1852 }
 0x1e9   : > { %12895 = vst [vmem:[#allocation90_spill] sm:$0xff] %v7408_v12 }
 0x1eb   : > { %6105 = vmatmul.mubr.msk.bf16.gmra.mrb[16].mxu1 %vm757_vm2, %v6426_v35 }
 0x1ec   : > { %v7412_v51 = vpop.permute.xlu1 %1860 }
 0x1ed   : > { %12896 = vst [vmem:[#allocation91_spill] sm:$0xff] %v7412_v51 }
 0x2a6   : > { %v7388_v37 = vpop.f32.mrb[4].mxu1 }
 0x2a7   : > { %v7392_v40 = vpop.f32.mrb[5].mxu1 }
 0x2a8   : > { %v7394_v39 = vpop.f32.mrb[6].mxu1 }
 0x2a9   : > { %v7396_v42 = vpop.f32.mrb[7].mxu1 }
 0x2ae   : > { %v7400_v44 = vpop.f32.mrb[8].mxu1 }
 0x2af   : > { %v7402_v61 = vpop.f32.mrb[9].mxu1 }
 0x2b0   : > { %v7404_v28 = vpop.f32.mrb[10].mxu1 }
 0x2b1   : > { %v7406_v43 = vpop.f32.mrb[11].mxu1 }
 0x2b6   : > { %v6102_v35 = vpop.f32.mrb[12].mxu1 }
 0x2b7   : > { %v857_v62 = vadd.f32 %v6102_v35, %v6977_v19  ;;  %v848_v63 = vpop.f32.mrb[13].mxu1 }
 0x2b8   : > { %v849_v55 = vadd.f32 %v848_v63, %v6969_v16  ;;  %v6103_v33 = vpop.f32.mrb[14].mxu1  ;;  %v7418_v16 = vpop.permute.xlu1 %1868 }
 0x2b9   : > { %v5919_v53 = vmul.f32 -1.442695, %v857_v62  ;;  %v860_v29 = vadd.f32 %v6103_v33, %v6963_v14  ;;  %v851_v54 = vpop.f32.mrb[15].mxu1  ;;  %12898 = vst [vmem:[#allocation93_spill] sm:$0xff] %v7418_v16 }
 0x2ba   : > { %v5917_v50 = vmul.f32 -1.442695, %v849_v55  ;;  %v852_v34 = vadd.f32 %v851_v54, %v6956_v11 }
 0x2bb   : > { %6441 = vpow2.f32 %v5919_v53  ;;  %v5920_v56 = vmul.f32 -1.442695, %v860_v29  ;;  %v7423_v29 = vpop.permute.xlu0 %1796 }
 0x2bc   : > { %6443 = vpow2.f32 %v5917_v50  ;;  %v5918_v12 = vmul.f32 -1.442695, %v852_v34  ;;  %12899 = vst [vmem:[#allocation94_spill] sm:$0xff] %v7423_v29 }
 0x2bd   : > { %6445 = vpow2.f32 %v5920_v56 }
 0x2be   : > { %6447 = vpow2.f32 %v5918_v12  ;;  %v6106_v19 = vpop.f32.mrb[16].mxu1  ;;  %v7426_v12 = vpop.permute.xlu1 %1908 }
 0x2bf   : > { %v873_v63 = vadd.f32 %v6106_v19, %v6993_v24  ;;  %v864_v62 = vpop.f32.mrb[17].mxu1  ;;  %12900 = vst [vmem:[#allocation95_spill] sm:$0xff] %v7426_v12 }
 0x2c0   : > { %v865_v14 = vadd.f32 %v864_v62, %v6987_v22  ;;  %v6107_v33 = vpop.f32.mrb[18].mxu1  ;;  %v7428_v62 = vpop.permute.xlu0 %1804 }
 0x2c1   : > { %v5923_v55 = vmul.f32 -1.442695, %v873_v63  ;;  %v876_v11 = vadd.f32 %v6107_v33, %v6973_v17  ;;  %v867_v53 = vpop.f32.mrb[19].mxu1  ;;  %12901 = vst [vmem:[#allocation96_spill] sm:$0xff] %v7428_v62 }
 0x2c2   : > { %v5921_v54 = vmul.f32 -1.442695, %v865_v14  ;;  %v868_v50 = vadd.f32 %v867_v53, %v6967_v15  ;;  %v7430_v33 = vpop.permute.xlu1 %1912 }
 0x2c3   : > { %6449 = vpow2.f32 %v5923_v55  ;;  %v5924_v34 = vmul.f32 -1.442695, %v876_v11 }
 0x2c4   : > { %6451 = vpow2.f32 %v5921_v54  ;;  %v5922_v56 = vmul.f32 -1.442695, %v868_v50  ;;  %v7432_v55 = vpop.permute.xlu0 %1844 }
 0x2c5   : > { %v6442_v24 = vpop.eup %6441  ;;  %6453 = vpow2.f32 %v5924_v34  ;;  %12902 = vst [vmem:[#allocation97_spill] sm:$0xff] %v7432_v55 }
 0x2c6   : > { %v6444_v35 = vpop.eup %6443  ;;  %v905_v22 = vadd.f32 1.0, %v6442_v24  ;;  %6455 = vpow2.f32 %v5922_v56 }
 0x2c7   : > { %v6446_v19 = vpop.eup %6445  ;;  %v903_v63 = vadd.f32 1.0, %v6444_v35  ;;  %v7434_v35 = vpop.permute.xlu1 %1920 }
 0x2c8   : > { %v6448_v17 = vpop.eup %6447  ;;  %6457 = vrcp.f32 %v905_v22  ;;  %v906_v14 = vadd.f32 1.0, %v6446_v19  ;;  %12903 = vst [vmem:[#allocation98_spill] sm:$0xff] %v7434_v35  ;;  %v825_v22 = vadd.f32 %v7388_v37, %v6945_v8 }
 0x2c9   : > { %6459 = vrcp.f32 %v903_v63  ;;  %v904_v15 = vadd.f32 1.0, %v6448_v17  ;;  %v817_v17 = vadd.f32 %v7392_v40, %v6939_v6 }
 0x2ca   : > { %6461 = vrcp.f32 %v906_v14  ;;  %v7440_v14 = vpop.permute.xlu0 %1856 }
 0x2cb   : > { %6463 = vrcp.f32 %v904_v15  ;;  %12904 = vst [vmem:[#allocation99_spill] sm:$0xff] %v7440_v14 }
 0x2cd   : > { %v6450_v11 = vpop.eup %6449 }
 0x2ce   : > { %v6452_v53 = vpop.eup %6451  ;;  %v909_v54 = vadd.f32 1.0, %v6450_v11  ;;  %v828_v11 = vadd.f32 %v7394_v39, %v6937_v5  ;;  %v7458_v5 = vpop.permute.xlu1 %1928  ;;  %v841_v39 = vadd.f32 %v7400_v44, %v6961_v13  ;;  %v836_v13 = vadd.f32 %v7406_v43, %v6943_v7 }
 0x2cf   : > { %v6454_v50 = vpop.eup %6453  ;;  %v907_v34 = vadd.f32 1.0, %v6452_v53  ;;  %12905 = vst [vmem:[#allocation100_spill] sm:$0xff] %v7458_v5 }
 0x2d0   : > { %v6456_v56 = vpop.eup %6455  ;;  %6465 = vrcp.f32 %v909_v54  ;;  %v910_v24 = vadd.f32 1.0, %v6454_v50  ;;  %v820_v50 = vadd.f32 %v7396_v42, %v6930_v2  ;;  %v7460_v2 = vpop.permute.xlu0 %1864 }
 0x2d1   : > { %6467 = vrcp.f32 %v907_v34  ;;  %v908_v19 = vadd.f32 1.0, %v6456_v56  ;;  %12906 = vst [vmem:[#allocation101_spill] sm:$0xff] %v7460_v2  ;;  %v833_v56 = vadd.f32 %v7402_v61, %v6951_v10 }
 0x2d2   : > { %v6458_v63 = vpop.eup %6457  ;;  %6469 = vrcp.f32 %v910_v24  ;;  %v7478_v10 = vpop.permute.xlu1 %1968 }
 0x2d3   : > { %v6460_v15 = vpop.eup %6459  ;;  %v929_v53 = vmul.f32 %v6458_v63, %v825_v22  ;;  %6471 = vrcp.f32 %v908_v19  ;;  %v844_v22 = vadd.f32 %v7404_v28, %v6949_v9  ;;  %12907 = vst [vmem:[#allocation102_spill] sm:$0xff] %v7478_v10 }
 0x2d4   : > { %v6462_v54 = vpop.eup %6461  ;;  %v927_v8 = vmul.f32 %v6460_v15, %v817_v17  ;;  %v7488_v9 = vpop.permute.xlu0 %1904 }
 0x2d5   : > { %v6464_v37 = vpop.eup %6463  ;;  %v7448_v34 = vsel %vm390_vm1, %v929_v53, 0.0  ;;  %v7450_v6 = vmul.f32 %v6462_v54, %v828_v11  ;;  %12908 = vst [vmem:[#allocation103_spill] sm:$0xff] %v7488_v9 }
 0x2d6   : > { %v7452_v40 = vmul.f32 %v6464_v37, %v820_v50  ;;  %1187 = vrot.lane.b32.xlu1 %v7448_v34, %s12790_s27  ;;  %1059 = vrot.lane.b32.xlu0 %v7448_v34, %s12788_s28  ;;  %v7494_v7 = vpop.permute.xlu1 %1976 }
 0x2d8   : > { %v7496_v28 = vpop.permute.xlu0 %1916  ;;  %v7658_v14 = vsel %vm390_vm1, %v7452_v40, 0.0 }
 0x2d9   : > { %12909 = vst [vmem:[#allocation104_spill] sm:$0xff] %v7496_v28 }
 0x2da   : > { %v6466_v42 = vpop.eup %6465  ;;  %1315 = vrot.lane.b32.xlu1 %v7448_v34, %s12786_s29  ;;  %1123 = vrot.lane.b32.xlu0 %v7448_v34, %s12722_s30  ;;  %v7502_v43 = vpop.permute.xlu1 %1980 }
 0x2db   : > { %v6468_v24 = vpop.eup %6467  ;;  %v7472_v19 = vmul.f32 %v6466_v42, %v841_v39  ;;  %12910 = vst [vmem:[#allocation105_spill] sm:$0xff] %v7502_v43  ;;  %v7528_v39 = vsel %vm390_vm1, %v927_v8, 0.0 }
 0x2dc   : > { %v6470_v63 = vpop.eup %6469  ;;  %v7476_v44 = vmul.f32 %v6468_v24, %v833_v56  ;;  %v7508_v11 = vpop.permute.xlu0 %1924  ;;  %12916 = vst [vmem:[#allocation111_spill] sm:$0xff] %v7528_v39 }
 0x2dd   : > { %v6472_v61 = vpop.eup %6471  ;;  %v7480_v17 = vmul.f32 %v6470_v63, %v844_v22  ;;  %12911 = vst [vmem:[#allocation106_spill] sm:$0xff] %v7508_v11  ;;  %v7585_v11 = vsel %vm390_vm1, %v7450_v6, 0.0  ;;  %v7739_v43 = vsel %vm390_vm1, %v7472_v19, 0.0 }
 0x2de   : > { %v7482_v15 = vmul.f32 %v6472_v61, %v836_v13  ;;  %1443 = vrot.lane.b32.xlu1 %v7448_v34, %s12716_s12  ;;  %1251 = vrot.lane.b32.xlu0 %v7448_v34, %s12712_s13  ;;  %v7514_v53 = vpop.permute.xlu1 %1988 }
 0x2df   : > { %12912 = vst [vmem:[#allocation107_spill] sm:$0xff] %v7514_v53 }
 0x2e0   : > { %v7516_v54 = vpop.permute.xlu0 %1932 }
 0x2e1   : > { %12913 = vst [vmem:[#allocation108_spill] sm:$0xff] %v7516_v54 }
 0x2e2   : > { %1571 = vrot.lane.b32.xlu1 %v7448_v34, %s12736_s14  ;;  %1379 = vrot.lane.b32.xlu0 %v7448_v34, %s12734_s15  ;;  %v7524_v37 = vpop.permute.xlu1 %1996 }
 0x2e3   : > { %12915 = vst [vmem:[#allocation110_spill] sm:$0xff] %v7524_v37 }
 0x2e4   : > { %v7522_v50 = vpop.permute.xlu0 %1972 }
 0x2e5   : > { %12914 = vst [vmem:[#allocation109_spill] sm:$0xff] %v7522_v50 }
 0x2e6   : > { %1699 = vrot.lane.b32.xlu1 %v7448_v34, %s12732_s16  ;;  %1507 = vrot.lane.b32.xlu0 %v7448_v34, %s12718_s19  ;;  %v7540_v56 = vpop.permute.xlu1 %2036 }
 0x2e7   : > { %12918 = vst [vmem:[#allocation113_spill] sm:$0xff] %v7540_v56 }
 0x2e8   : > { %v7538_v42 = vpop.permute.xlu0 %1984 }
 0x2e9   : > { %12917 = vst [vmem:[#allocation112_spill] sm:$0xff] %v7538_v42 }
 0x2ea   : > { %1827 = vrot.lane.b32.xlu1 %v7448_v34, %s12730_s20  ;;  %1635 = vrot.lane.b32.xlu0 %v7448_v34, %s12710_s21  ;;  %v7548_v24 = vpop.permute.xlu1 %2040 }
 0x2ec   : > { %v7546_v8 = vpop.permute.xlu0 %1992 }
 0x2ed   : > { %12919 = vst [vmem:[#allocation114_spill] sm:$0xff] %v7546_v8 }
 0x2ee   : > { %1955 = vrot.lane.b32.xlu1 %v7448_v34, %s12706_s24  ;;  %1763 = vrot.lane.b32.xlu0 %v7448_v34, %s12704_s22  ;;  %s12726_s22 = smov 125   ;;  %v7560_v63 = vpop.permute.xlu1 %2048 }
 0x2ef   : > { %12921 = vst [vmem:[#allocation116_spill] sm:$0xff] %v7560_v63 }
 0x2f0   : > { %v7558_v22 = vpop.permute.xlu0 %2032 }
 0x2f1   : > { %12920 = vst [vmem:[#allocation115_spill] sm:$0xff] %v7558_v22 }
 0x2f2   : > { %2083 = vrot.lane.b32.xlu1 %v7448_v34, %s12728_s23  ;;  %1891 = vrot.lane.b32.xlu0 %v7448_v34, %s12724_s26  ;;  %v7568_v61 = vpop.permute.xlu1 %2056 }
 0x2f3   : > { %12923 = vst [vmem:[#allocation118_spill] sm:$0xff] %v7568_v61 }
 0x2f4   : > { %v7566_v13 = vpop.permute.xlu0 %2044 }
 0x2f5   : > { %12922 = vst [vmem:[#allocation117_spill] sm:$0xff] %v7566_v13 }
 0x2f6   : > { %2019 = vrot.lane.b32.xlu0 %v7448_v34, %s12708_s25  ;;  %1183 = vrot.lane.b32.xlu1 %v7528_v39, %s12790_s27  ;;  %v7580_v51 = vpop.permute.xlu1 %2096 }
 0x2f7   : > { %12925 = vst [vmem:[#allocation120_spill] sm:$0xff] %v7580_v51 }
 0x2f8   : > { %v7578_v53 = vpop.permute.xlu0 %2052 }
 0x2f9   : > { %12924 = vst [vmem:[#allocation119_spill] sm:$0xff] %v7578_v53 }
 0x2fa   : > { %2147 = vrot.lane.b32.xlu0 %v7448_v34, %s12726_s22  ;;  %1311 = vrot.lane.b32.xlu1 %v7528_v39, %s12786_s29  ;;  %v7593_v37 = vpop.permute.xlu1 %2104 }
 0x2fc   : > { %v7591_v29 = vpop.permute.xlu0 %2060 }
 0x2fd   : > { %12927 = vst [vmem:[#allocation121_spill] sm:$0xff] %v7591_v29 }
 0x2fe   : > { %1439 = vrot.lane.b32.xlu1 %v7528_v39, %s12716_s12  ;;  %1055 = vrot.lane.b32.xlu0 %v7528_v39, %s12788_s28  ;;  %v7603_v6 = vpop.permute.xlu1 %2108 }
 0x2ff   : > { %12928 = vst [vmem:[#allocation122_spill] sm:$0xff] %v7603_v6 }
 0x300   : > { %v7605_v53 = vpop.permute.xlu0 %2100 }
 0x301   : > { %12929 = vst [vmem:[#allocation123_spill] sm:$0xff] %v7605_v53 }
 0x302   : > { %1567 = vrot.lane.b32.xlu1 %v7528_v39, %s12736_s14  ;;  %1119 = vrot.lane.b32.xlu0 %v7528_v39, %s12722_s30  ;;  %v7611_v16 = vpop.permute.xlu1 %2116 }
 0x303   : > { %12930 = vst [vmem:[#allocation124_spill] sm:$0xff] %v7611_v16 }
 0x304   : > { %v7613_v29 = vpop.permute.xlu0 %2112 }
 0x305   : > { %12931 = vst [vmem:[#allocation125_spill] sm:$0xff] %v7613_v29 }
 0x306   : > { %1695 = vrot.lane.b32.xlu1 %v7528_v39, %s12732_s16  ;;  %1247 = vrot.lane.b32.xlu0 %v7528_v39, %s12712_s13  ;;  %v7623_v54 = vpop.permute.xlu1 %2124 }
 0x307   : > { %12932 = vst [vmem:[#allocation126_spill] sm:$0xff] %v7623_v54 }
 0x308   : > { %v7625_v62 = vpop.permute.xlu0 %2120 }
 0x309   : > { %12933 = vst [vmem:[#allocation127_spill] sm:$0xff] %v7625_v62 }
 0x30a   : > { %1823 = vrot.lane.b32.xlu1 %v7528_v39, %s12730_s20  ;;  %1375 = vrot.lane.b32.xlu0 %v7528_v39, %s12734_s15  ;;  %v7631_v16 = vpop.permute.xlu1 %2164 }
 0x30b   : > { %12934 = vst [vmem:[#allocation128_spill] sm:$0xff] %v7631_v16 }
 0x30c   : > { %v7633_v63 = vpop.permute.xlu0 %2160 }
 0x30d   : > { %12935 = vst [vmem:[#allocation129_spill] sm:$0xff] %v7633_v63 }
 0x30e   : > { %1951 = vrot.lane.b32.xlu1 %v7528_v39, %s12706_s24  ;;  %1503 = vrot.lane.b32.xlu0 %v7528_v39, %s12718_s19  ;;  %s12926_s24 = smov 4   ;;  %v7643_v54 = vpop.permute.xlu1 %2168 }
 0x310   : > { %v7645_v35 = vpop.permute.xlu0 %2172 }
 0x311   : > { %12936 = vst [vmem:[#allocation130_spill] sm:$0xff] %v7645_v35 }
 0x312   : > { %2079 = vrot.lane.b32.xlu1 %v7528_v39, %s12728_s23  ;;  %1631 = vrot.lane.b32.xlu0 %v7528_v39, %s12710_s21  ;;  %v7651_v29 = vpop.permute.xlu1 %2176 }
 0x313   : > { %12937 = vst [vmem:[#allocation131_spill] sm:$0xff] %v7651_v29 }
 0x314   : > { %v7653_v42 = vpop.permute.xlu0 %2180 }
 0x315   : > { %12938 = vst [vmem:[#allocation132_spill] sm:$0xff] %v7653_v42 }
 0x316   : > { %1061 = vrot.lane.b32.xlu1 %v7585_v11, %s12788_s28  ;;  %1759 = vrot.lane.b32.xlu0 %v7528_v39, %s12926_s24  ;;  %v7668_v29 = vpop.permute.xlu1 %2184 }
 0x317   : > { %12940 = vst [vmem:[#allocation133_spill] sm:$0xff] %v7668_v29 }
 0x318   : > { %v7670_v42 = vpop.permute.xlu0 %2188 }
 0x319   : > { %12941 = vst [vmem:[#allocation134_spill] sm:$0xff] %v7670_v42 }
 0x31a   : > { %1125 = vrot.lane.b32.xlu1 %v7585_v11, %s12722_s30  ;;  %1887 = vrot.lane.b32.xlu0 %v7528_v39, %s12724_s26 }
 0x31e   : > { %1253 = vrot.lane.b32.xlu1 %v7585_v11, %s12712_s13  ;;  %2015 = vrot.lane.b32.xlu0 %v7528_v39, %s12708_s25 }
 0x322   : > { %1381 = vrot.lane.b32.xlu1 %v7585_v11, %s12734_s15  ;;  %2143 = vrot.lane.b32.xlu0 %v7528_v39, %s12726_s22 }
 0x326   : > { %1509 = vrot.lane.b32.xlu1 %v7585_v11, %s12718_s19  ;;  %1189 = vrot.lane.b32.xlu0 %v7585_v11, %s12790_s27 }
 0x32a   : > { %1637 = vrot.lane.b32.xlu1 %v7585_v11, %s12710_s21  ;;  %1317 = vrot.lane.b32.xlu0 %v7585_v11, %s12786_s29 }
 0x32e   : > { %1765 = vrot.lane.b32.xlu1 %v7585_v11, %s12926_s24  ;;  %1445 = vrot.lane.b32.xlu0 %v7585_v11, %s12716_s12 }
 0x332   : > { %1893 = vrot.lane.b32.xlu1 %v7585_v11, %s12724_s26  ;;  %1573 = vrot.lane.b32.xlu0 %v7585_v11, %s12736_s14 }
 0x336   : > { %2021 = vrot.lane.b32.xlu1 %v7585_v11, %s12708_s25  ;;  %1701 = vrot.lane.b32.xlu0 %v7585_v11, %s12732_s16  ;;  %s12939_s25 = smov 1  }
 0x33a   : > { %2149 = vrot.lane.b32.xlu1 %v7585_v11, %s12726_s22  ;;  %1829 = vrot.lane.b32.xlu0 %v7585_v11, %s12730_s20 }
 0x33e   : > { %1057 = vrot.lane.b32.xlu1 %v7658_v14, %s12788_s28  ;;  %1957 = vrot.lane.b32.xlu0 %v7585_v11, %s12939_s25 }
 0x342   : > { %1121 = vrot.lane.b32.xlu1 %v7658_v14, %s12722_s30  ;;  %2085 = vrot.lane.b32.xlu0 %v7585_v11, %s12728_s23 }
 0x346   : > { %1249 = vrot.lane.b32.xlu1 %v7658_v14, %s12712_s13  ;;  %1185 = vrot.lane.b32.xlu0 %v7658_v14, %s12790_s27 }
 0x348   : > { %v7676_v40 = vpop.permute.xlu1 %1187  ;;  %v7678_v61 = vpop.permute.xlu0 %1059 }
 0x349   : > { %12942 = vst [vmem:[#allocation135_spill] sm:$0xff] %v7678_v61 }
 0x34a   : > { %1377 = vrot.lane.b32.xlu1 %v7658_v14, %s12734_s15  ;;  %1313 = vrot.lane.b32.xlu0 %v7658_v14, %s12786_s29 }
 0x34c   : > { %v7684_v5 = vpop.permute.xlu1 %1315  ;;  %v7686_v29 = vpop.permute.xlu0 %1123 }
 0x34e   : > { %1505 = vrot.lane.b32.xlu1 %v7658_v14, %s12718_s19  ;;  %1441 = vrot.lane.b32.xlu0 %v7658_v14, %s12716_s12 }
 0x350   : > { %v7692_v42 = vpop.permute.xlu1 %1443  ;;  %v7694_v62 = vpop.permute.xlu0 %1251 }
 0x352   : > { %1633 = vrot.lane.b32.xlu1 %v7658_v14, %s12710_s21  ;;  %1569 = vrot.lane.b32.xlu0 %v7658_v14, %s12736_s14  ;;  %s12943_s21 = smov 127  }
 0x354   : > { %v7700_v61 = vpop.permute.xlu1 %1571  ;;  %v7702_v8 = vpop.permute.xlu0 %1379 }
 0x356   : > { %1761 = vrot.lane.b32.xlu1 %v7658_v14, %s12926_s24  ;;  %1697 = vrot.lane.b32.xlu0 %v7658_v14, %s12732_s16 }
 0x358   : > { %v7708_v2 = vpop.permute.xlu1 %1699  ;;  %v7710_v53 = vpop.permute.xlu0 %1507 }
 0x35a   : > { %1889 = vrot.lane.b32.xlu1 %v7658_v14, %s12724_s26  ;;  %1825 = vrot.lane.b32.xlu0 %v7658_v14, %s12730_s20 }
 0x35c   : > { %v7716_v16 = vpop.permute.xlu1 %1827  ;;  %v7718_v50 = vpop.permute.xlu0 %1635 }
 0x35e   : > { %2017 = vrot.lane.b32.xlu1 %v7658_v14, %s12943_s21  ;;  %1953 = vrot.lane.b32.xlu0 %v7658_v14, %s12939_s25 }
 0x360   : > { %v7724_v56 = vpop.permute.xlu1 %1955  ;;  %v7726_v55 = vpop.permute.xlu0 %1763 }
 0x362   : > { %2145 = vrot.lane.b32.xlu1 %v7658_v14, %s12726_s22  ;;  %2081 = vrot.lane.b32.xlu0 %v7658_v14, %s12728_s23 }
 0x364   : > { %v7732_v12 = vpop.permute.xlu1 %2083  ;;  %v7734_v6 = vpop.permute.xlu0 %1891 }
 0x366   : > { %1195 = vrot.lane.b32.xlu1 %v7739_v43, %s12790_s27  ;;  %1067 = vrot.lane.b32.xlu0 %v7739_v43, %s12788_s28 }
 0x368   : > { %v7745_v35 = vpop.permute.xlu0 %2019  ;;  %v7747_v13 = vpop.permute.xlu1 %1183 }
 0x36a   : > { %1323 = vrot.lane.b32.xlu1 %v7739_v43, %s12786_s29  ;;  %1131 = vrot.lane.b32.xlu0 %v7739_v43, %s12722_s30 }
 0x36c   : > { %v7753_v28 = vpop.permute.xlu0 %2147  ;;  %v7755_v19 = vpop.permute.xlu1 %1311 }
 0x36e   : > { %1451 = vrot.lane.b32.xlu1 %v7739_v43, %s12716_s12  ;;  %1259 = vrot.lane.b32.xlu0 %v7739_v43, %s12712_s13  ;;  %s12950_s13 = smov 6  }
 0x370   : > { %v7761_v3 = vpop.permute.xlu1 %1439  ;;  %v7763_v63 = vpop.permute.xlu0 %1055 }
 0x371   : > { %12944 = vst [vmem:[#allocation136_spill] sm:$0xff] %v7761_v3  ;;  %12945 = vst [vmem:[#allocation137_spill] sm:$0xff] %v7763_v63 }
 0x372   : > { %1579 = vrot.lane.b32.xlu1 %v7739_v43, %s12736_s14  ;;  %1387 = vrot.lane.b32.xlu0 %v7739_v43, %s12734_s15 }
 0x374   : > { %v7769_v22 = vpop.permute.xlu1 %1567  ;;  %v7771_v9 = vpop.permute.xlu0 %1119 }
 0x375   : > { %12946 = vst [vmem:[#allocation138_spill] sm:$0xff] %v7769_v22  ;;  %12947 = vst [vmem:[#allocation139_spill] sm:$0xff] %v7771_v9 }
 0x376   : > { %1707 = vrot.lane.b32.xlu1 %v7739_v43, %s12732_s16  ;;  %1515 = vrot.lane.b32.xlu0 %v7739_v43, %s12718_s19 }
 0x378   : > { %v7777_v51 = vpop.permute.xlu1 %1695  ;;  %v7779_v10 = vpop.permute.xlu0 %1247 }
 0x379   : > { %12948 = vst [vmem:[#allocation140_spill] sm:$0xff] %v7777_v51  ;;  %12949 = vst [vmem:[#allocation141_spill] sm:$0xff] %v7779_v10  ;;  %v12714_v10 = vmov 19  }
 0x37a   : > { %1835 = vrot.lane.b32.xlu1 %v7739_v43, %s12730_s20  ;;  %1643 = vrot.lane.b32.xlu0 %v7739_v43, %s12950_s13 }
 0x37b   : > { %6288 = vset.pattern.permute.xlu0 %v12714_v10  ;;  %6287 = vset.pattern.permute.xlu1 %v12714_v10 }
 0x37c   : > { %v7785_v63 = vpop.permute.xlu1 %1823  ;;  %v7787_v36 = vpop.permute.xlu0 %1375 }
 0x37d   : > { %12951 = vst [vmem:[#allocation142_spill] sm:$0xff] %v7785_v63  ;;  %12952 = vst [vmem:[#allocation143_spill] sm:$0xff] %v7787_v36 }
 0x37e   : > { %1963 = vrot.lane.b32.xlu1 %v7739_v43, %s12939_s25  ;;  %1771 = vrot.lane.b32.xlu0 %v7739_v43, %s12926_s24 }
 0x380   : > { %v7793_v45 = vpop.permute.xlu1 %1951  ;;  %v7795_v60 = vpop.permute.xlu0 %1503 }
 0x381   : > { %12953 = vst [vmem:[#allocation144_spill] sm:$0xff] %v7793_v45  ;;  %12954 = vst [vmem:[#allocation145_spill] sm:$0xff] %v7795_v60  ;;  %v7810_v45 = vsel %vm390_vm1, %v7476_v44, 0.0 }
 0x382   : > { %2091 = vrot.lane.b32.xlu1 %v7739_v43, %s12728_s23  ;;  %1899 = vrot.lane.b32.xlu0 %v7739_v43, %s12724_s26 }
 0x384   : > { %v7803_v36 = vpop.permute.xlu1 %2079  ;;  %v7805_v63 = vpop.permute.xlu0 %1631 }
 0x385   : > { %12955 = vst [vmem:[#allocation146_spill] sm:$0xff] %v7803_v36  ;;  %12956 = vst [vmem:[#allocation147_spill] sm:$0xff] %v7805_v63 }
 0x386   : > { %1191 = vrot.lane.b32.xlu1 %v7810_v45, %s12790_s27  ;;  %2027 = vrot.lane.b32.xlu0 %v7739_v43, %s12943_s21 }
 0x388   : > { %v7816_v60 = vpop.permute.xlu1 %1061  ;;  %v7818_v51 = vpop.permute.xlu0 %1759 }
 0x389   : > { %12957 = vst [vmem:[#allocation148_spill] sm:$0xff] %v7816_v60  ;;  %12958 = vst [vmem:[#allocation149_spill] sm:$0xff] %v7818_v51 }
 0x38a   : > { %1319 = vrot.lane.b32.xlu1 %v7810_v45, %s12786_s29  ;;  %2155 = vrot.lane.b32.xlu0 %v7739_v43, %s12726_s22 }
 0x38c   : > { %v7824_v10 = vpop.permute.xlu1 %1125  ;;  %v7826_v44 = vpop.permute.xlu0 %1887 }
 0x38d   : > { %12959 = vst [vmem:[#allocation150_spill] sm:$0xff] %v7824_v10  ;;  %12960 = vst [vmem:[#allocation151_spill] sm:$0xff] %v7826_v44 }
 0x38e   : > { %1447 = vrot.lane.b32.xlu1 %v7810_v45, %s12716_s12  ;;  %1063 = vrot.lane.b32.xlu0 %v7810_v45, %s12788_s28  ;;  %s12965_s12 = smov 12  }
 0x390   : > { %v7832_v63 = vpop.permute.xlu1 %1253  ;;  %v7834_v60 = vpop.permute.xlu0 %2015 }
 0x391   : > { %12961 = vst [vmem:[#allocation152_spill] sm:$0xff] %v7832_v63  ;;  %12962 = vst [vmem:[#allocation153_spill] sm:$0xff] %v7834_v60 }
 0x392   : > { %1575 = vrot.lane.b32.xlu1 %v7810_v45, %s12736_s14  ;;  %1127 = vrot.lane.b32.xlu0 %v7810_v45, %s12722_s30 }
 0x394   : > { %v7840_v51 = vpop.permute.xlu1 %1381  ;;  %v7842_v10 = vpop.permute.xlu0 %2143 }
 0x395   : > { %12963 = vst [vmem:[#allocation154_spill] sm:$0xff] %v7840_v51  ;;  %12964 = vst [vmem:[#allocation155_spill] sm:$0xff] %v7842_v10 }
 0x396   : > { %1703 = vrot.lane.b32.xlu1 %v7810_v45, %s12732_s16  ;;  %1255 = vrot.lane.b32.xlu0 %v7810_v45, %s12965_s12 }
 0x398   : > { %v7848_v44 = vpop.permute.xlu1 %1509  ;;  %v7850_v63 = vpop.permute.xlu0 %1189 }
 0x399   : > { %12966 = vst [vmem:[#allocation156_spill] sm:$0xff] %v7848_v44  ;;  %12967 = vst [vmem:[#allocation157_spill] sm:$0xff] %v7850_v63 }
 0x39a   : > { %1831 = vrot.lane.b32.xlu1 %v7810_v45, %s12730_s20  ;;  %1383 = vrot.lane.b32.xlu0 %v7810_v45, %s12734_s15 }
 0x39c   : > { %v7856_v60 = vpop.permute.xlu1 %1637  ;;  %v7858_v51 = vpop.permute.xlu0 %1317 }
 0x39d   : > { %12968 = vst [vmem:[#allocation158_spill] sm:$0xff] %v7856_v60  ;;  %12969 = vst [vmem:[#allocation159_spill] sm:$0xff] %v7858_v51  ;;  %v7879_v51 = vsel %vm390_vm1, %v7480_v17, 0.0 }
 0x39e   : > { %1959 = vrot.lane.b32.xlu1 %v7810_v45, %s12939_s25  ;;  %1511 = vrot.lane.b32.xlu0 %v7810_v45, %s12718_s19 }
 0x3a0   : > { %v7864_v10 = vpop.permute.xlu1 %1765  ;;  %v7866_v44 = vpop.permute.xlu0 %1445 }
 0x3a1   : > { %12970 = vst [vmem:[#allocation160_spill] sm:$0xff] %v7864_v10  ;;  %12971 = vst [vmem:[#allocation161_spill] sm:$0xff] %v7866_v44 }
 0x3a2   : > { %2087 = vrot.lane.b32.xlu1 %v7810_v45, %s12728_s23  ;;  %1639 = vrot.lane.b32.xlu0 %v7810_v45, %s12950_s13 }
 0x3a4   : > { %v7872_v63 = vpop.permute.xlu1 %1893  ;;  %v7874_v60 = vpop.permute.xlu0 %1573 }
 0x3a5   : > { %12972 = vst [vmem:[#allocation162_spill] sm:$0xff] %v7872_v63  ;;  %12973 = vst [vmem:[#allocation163_spill] sm:$0xff] %v7874_v60 }
 0x3a6   : > { %1069 = vrot.lane.b32.xlu1 %v7879_v51, %s12788_s28  ;;  %1767 = vrot.lane.b32.xlu0 %v7810_v45, %s12926_s24 }
 0x3a8   : > { %v7885_v44 = vpop.permute.xlu1 %2021  ;;  %v7887_v10 = vpop.permute.xlu0 %1701 }
 0x3a9   : > { %12974 = vst [vmem:[#allocation164_spill] sm:$0xff] %v7885_v44  ;;  %12975 = vst [vmem:[#allocation165_spill] sm:$0xff] %v7887_v10 }
 0x3aa   : > { %1133 = vrot.lane.b32.xlu1 %v7879_v51, %s12722_s30  ;;  %1895 = vrot.lane.b32.xlu0 %v7810_v45, %s12724_s26 }
 0x3ac   : > { %v7893_v60 = vpop.permute.xlu1 %2149  ;;  %v7895_v17 = vpop.permute.xlu0 %1829 }
 0x3ad   : > { %12976 = vst [vmem:[#allocation166_spill] sm:$0xff] %v7893_v60  ;;  %12977 = vst [vmem:[#allocation167_spill] sm:$0xff] %v7895_v17 }
 0x3ae   : > { %1261 = vrot.lane.b32.xlu1 %v7879_v51, %s12965_s12  ;;  %2023 = vrot.lane.b32.xlu0 %v7810_v45, %s12943_s21 }
 0x3b0   : > { %v7901_v63 = vpop.permute.xlu1 %1057  ;;  %v7903_v44 = vpop.permute.xlu0 %1957 }
 0x3b1   : > { %12978 = vst [vmem:[#allocation168_spill] sm:$0xff] %v7901_v63  ;;  %12979 = vst [vmem:[#allocation169_spill] sm:$0xff] %v7903_v44 }
 0x3b2   : > { %1389 = vrot.lane.b32.xlu1 %v7879_v51, %s12734_s15  ;;  %2151 = vrot.lane.b32.xlu0 %v7810_v45, %s12726_s22 }
 0x3b4   : > { %v7909_v10 = vpop.permute.xlu1 %1121  ;;  %v7911_v60 = vpop.permute.xlu0 %2085 }
 0x3b5   : > { %12980 = vst [vmem:[#allocation170_spill] sm:$0xff] %v7909_v10  ;;  %12981 = vst [vmem:[#allocation171_spill] sm:$0xff] %v7911_v60 }
 0x3b6   : > { %1517 = vrot.lane.b32.xlu1 %v7879_v51, %s12718_s19  ;;  %1197 = vrot.lane.b32.xlu0 %v7879_v51, %s12790_s27  ;;  %s12986_s19 = smov 9  }
 0x3b8   : > { %v7917_v17 = vpop.permute.xlu1 %1249  ;;  %v7919_v63 = vpop.permute.xlu0 %1185 }
 0x3b9   : > { %12982 = vst [vmem:[#allocation172_spill] sm:$0xff] %v7917_v17  ;;  %12983 = vst [vmem:[#allocation173_spill] sm:$0xff] %v7919_v63 }
 0x3ba   : > { %1645 = vrot.lane.b32.xlu1 %v7879_v51, %s12950_s13  ;;  %1325 = vrot.lane.b32.xlu0 %v7879_v51, %s12786_s29 }
 0x3bc   : > { %v7925_v44 = vpop.permute.xlu1 %1377  ;;  %v7927_v10 = vpop.permute.xlu0 %1313 }
 0x3bd   : > { %12984 = vst [vmem:[#allocation174_spill] sm:$0xff] %v7925_v44  ;;  %12985 = vst [vmem:[#allocation175_spill] sm:$0xff] %v7927_v10 }
 0x3be   : > { %1773 = vrot.lane.b32.xlu1 %v7879_v51, %s12926_s24  ;;  %1453 = vrot.lane.b32.xlu0 %v7879_v51, %s12986_s19 }
 0x3c0   : > { %v7933_v60 = vpop.permute.xlu1 %1505  ;;  %v7935_v17 = vpop.permute.xlu0 %1441 }
 0x3c1   : > { %12987 = vst [vmem:[#allocation176_spill] sm:$0xff] %v7933_v60  ;;  %12988 = vst [vmem:[#allocation177_spill] sm:$0xff] %v7935_v17 }
 0x3c2   : > { %1901 = vrot.lane.b32.xlu1 %v7879_v51, %s12724_s26  ;;  %1581 = vrot.lane.b32.xlu0 %v7879_v51, %s12736_s14 }
 0x3c4   : > { %v7941_v63 = vpop.permute.xlu1 %1633  ;;  %v7943_v44 = vpop.permute.xlu0 %1569 }
 0x3c5   : > { %12989 = vst [vmem:[#allocation178_spill] sm:$0xff] %v7941_v63  ;;  %12990 = vst [vmem:[#allocation179_spill] sm:$0xff] %v7943_v44  ;;  %v7964_v44 = vsel %vm390_vm1, %v7482_v15, 0.0 }
 0x3c6   : > { %2029 = vrot.lane.b32.xlu1 %v7879_v51, %s12943_s21  ;;  %1709 = vrot.lane.b32.xlu0 %v7879_v51, %s12732_s16 }
 0x3c8   : > { %v7949_v10 = vpop.permute.xlu1 %1761  ;;  %v7951_v60 = vpop.permute.xlu0 %1697 }
 0x3c9   : > { %12991 = vst [vmem:[#allocation180_spill] sm:$0xff] %v7949_v10  ;;  %12992 = vst [vmem:[#allocation181_spill] sm:$0xff] %v7951_v60 }
 0x3ca   : > { %2157 = vrot.lane.b32.xlu1 %v7879_v51, %s12726_s22  ;;  %1837 = vrot.lane.b32.xlu0 %v7879_v51, %s12730_s20 }
 0x3cc   : > { %v7957_v17 = vpop.permute.xlu1 %1889  ;;  %v7959_v63 = vpop.permute.xlu0 %1825 }
 0x3cd   : > { %12993 = vst [vmem:[#allocation182_spill] sm:$0xff] %v7957_v17  ;;  %12994 = vst [vmem:[#allocation183_spill] sm:$0xff] %v7959_v63 }
 0x3ce   : > { %1065 = vrot.lane.b32.xlu1 %v7964_v44, %s12788_s28  ;;  %1965 = vrot.lane.b32.xlu0 %v7879_v51, %s12939_s25  ;;  %s13948_s28 = smov 15  }
 0x3d0   : > { %v7970_v60 = vpop.permute.xlu1 %2017  ;;  %v7972_v10 = vpop.permute.xlu0 %1953 }
 0x3d1   : > { %12995 = vst [vmem:[#allocation184_spill] sm:$0xff] %v7970_v60  ;;  %12996 = vst [vmem:[#allocation185_spill] sm:$0xff] %v7972_v10 }
 0x3d2   : > { %1129 = vrot.lane.b32.xlu1 %v7964_v44, %s12722_s30  ;;  %2093 = vrot.lane.b32.xlu0 %v7879_v51, %s12728_s23  ;;  %s13003_s30 = smov 8  }
 0x3d4   : > { %v7978_v63 = vpop.permute.xlu1 %2145  ;;  %v7980_v15 = vpop.permute.xlu0 %2081 }
 0x3d5   : > { %12997 = vst [vmem:[#allocation186_spill] sm:$0xff] %v7978_v63  ;;  %12998 = vst [vmem:[#allocation187_spill] sm:$0xff] %v7980_v15 }
 0x3d6   : > { %1257 = vrot.lane.b32.xlu1 %v7964_v44, %s12965_s12  ;;  %1193 = vrot.lane.b32.xlu0 %v7964_v44, %s12790_s27  ;;  %s13947_s27 = smov 13  }
 0x3d8   : > { %v7986_v1 = vpop.permute.xlu1 %1195  ;;  %v7988_v60 = vpop.permute.xlu0 %1067 }
 0x3d9   : > { %12999 = vst [vmem:[#allocation188_spill] sm:$0xff] %v7986_v1  ;;  %13000 = vst [vmem:[#allocation189_spill] sm:$0xff] %v7988_v60 }
 0x3da   : > { %1385 = vrot.lane.b32.xlu1 %v7964_v44, %s12734_s15  ;;  %1321 = vrot.lane.b32.xlu0 %v7964_v44, %s12786_s29  ;;  %s12777_s15 = smov 122   ;;  %s13959_s29 = smov 5  }
 0x3dc   : > { %v7994_v10 = vpop.permute.xlu1 %1323  ;;  %v7996_v63 = vpop.permute.xlu0 %1131 }
 0x3dd   : > { %13001 = vst [vmem:[#allocation190_spill] sm:$0xff] %v7994_v10  ;;  %13002 = vst [vmem:[#allocation191_spill] sm:$0xff] %v7996_v63 }
 0x3de   : > { %1513 = vrot.lane.b32.xlu1 %v7964_v44, %s13003_s30  ;;  %1449 = vrot.lane.b32.xlu0 %v7964_v44, %s12986_s19 }
 0x3e0   : > { %v8002_v15 = vpop.permute.xlu1 %1451  ;;  %v8004_v1 = vpop.permute.xlu0 %1259 }
 0x3e1   : > { %13004 = vst [vmem:[#allocation192_spill] sm:$0xff] %v8002_v15  ;;  %13005 = vst [vmem:[#allocation193_spill] sm:$0xff] %v8004_v1 }
 0x3e2   : > { %1641 = vrot.lane.b32.xlu1 %v7964_v44, %s12950_s13  ;;  %1577 = vrot.lane.b32.xlu0 %v7964_v44, %s12736_s14  ;;  %s12754_s14 = smov 118  }
 0x3e4   : > { %v8010_v60 = vpop.permute.xlu1 %1579  ;;  %v8012_v10 = vpop.permute.xlu0 %1387 }
 0x3e5   : > { %13006 = vst [vmem:[#allocation194_spill] sm:$0xff] %v8010_v60  ;;  %13007 = vst [vmem:[#allocation195_spill] sm:$0xff] %v8012_v10 }
 0x3e6   : > { %1769 = vrot.lane.b32.xlu1 %v7964_v44, %s12926_s24  ;;  %1705 = vrot.lane.b32.xlu0 %v7964_v44, %s12732_s16  ;;  %s12766_s16 = smov 120  }
 0x3e8   : > { %v8018_v63 = vpop.permute.xlu1 %1707  ;;  %v8020_v15 = vpop.permute.xlu0 %1515 }
 0x3e9   : > { %13008 = vst [vmem:[#allocation196_spill] sm:$0xff] %v8018_v63  ;;  %13009 = vst [vmem:[#allocation197_spill] sm:$0xff] %v8020_v15 }
 0x3ea   : > { %1897 = vrot.lane.b32.xlu1 %v7964_v44, %s12724_s26  ;;  %1833 = vrot.lane.b32.xlu0 %v7964_v44, %s12730_s20  ;;  %s12784_s26 = smov 124   ;;  %s12750_s20 = smov 119  }
 0x3ec   : > { %v8026_v1 = vpop.permute.xlu1 %1835  ;;  %v8028_v60 = vpop.permute.xlu0 %1643 }
 0x3ed   : > { %13010 = vst [vmem:[#allocation198_spill] sm:$0xff] %v8026_v1  ;;  %13011 = vst [vmem:[#allocation199_spill] sm:$0xff] %v8028_v60 }
 0x3ee   : > { %2025 = vrot.lane.b32.xlu1 %v7964_v44, %s12943_s21  ;;  %1961 = vrot.lane.b32.xlu0 %v7964_v44, %s12939_s25 }
 0x3f0   : > { %v8034_v10 = vpop.permute.xlu1 %1963  ;;  %v8036_v63 = vpop.permute.xlu0 %1771 }
 0x3f1   : > { %13012 = vst [vmem:[#allocation200_spill] sm:$0xff] %v8034_v10  ;;  %13013 = vst [vmem:[#allocation201_spill] sm:$0xff] %v8036_v63 }
 0x3f2   : > { %2153 = vrot.lane.b32.xlu1 %v7964_v44, %s12726_s22  ;;  %2089 = vrot.lane.b32.xlu0 %v7964_v44, %s12728_s23  ;;  %s12782_s22 = smov 123   ;;  %s12775_s23 = smov 121  }
 0x3f4   : > { %v8042_v15 = vpop.permute.xlu1 %2091  ;;  %v8044_v1 = vpop.permute.xlu0 %1899 }
 0x3f5   : > { %13014 = vst [vmem:[#allocation202_spill] sm:$0xff] %v8042_v15  ;;  %13015 = vst [vmem:[#allocation203_spill] sm:$0xff] %v8044_v1 }
 0x3f6   : > { %2207 = vrot.lane.b32.xlu1 %v7528_v39, %s12784_s26  ;;  %2209 = vrot.lane.b32.xlu0 %v7658_v14, %s12784_s26 }
 0x3f8   : > { %v8050_v10 = vpop.permute.xlu1 %1191  ;;  %v8052_v63 = vpop.permute.xlu0 %2027 }
 0x3f9   : > { %13016 = vst [vmem:[#allocation204_spill] sm:$0xff] %v8050_v10  ;;  %13017 = vst [vmem:[#allocation205_spill] sm:$0xff] %v8052_v63  ;;  %v8075_v63 = vld [vmem:[%s12655_s7 + $0x8] sm:$0xff] }
 0x3fa   : > { %2211 = vrot.lane.b32.xlu1 %v7448_v34, %s12784_s26  ;;  %2213 = vrot.lane.b32.xlu0 %v7585_v11, %s12784_s26 }
 0x3fc   : > { %v8058_v15 = vpop.permute.xlu1 %1319  ;;  %v8060_v1 = vpop.permute.xlu0 %2155 }
 0x3fd   : > { %13018 = vst [vmem:[#allocation206_spill] sm:$0xff] %v8058_v15  ;;  %13019 = vst [vmem:[#allocation207_spill] sm:$0xff] %v8060_v1 }
 0x3fe   : > { %2215 = vrot.lane.b32.xlu1 %v7810_v45, %s12784_s26  ;;  %2221 = vrot.lane.b32.xlu0 %v7879_v51, %s12784_s26 }
 0x400   : > { %v8066_v60 = vpop.permute.xlu1 %1447  ;;  %v8068_v10 = vpop.permute.xlu0 %1063 }
 0x401   : > { %13020 = vst [vmem:[#allocation208_spill] sm:$0xff] %v8066_v60  ;;  %13021 = vst [vmem:[#allocation209_spill] sm:$0xff] %v8068_v10  ;;  %v8085_v60 = vld [vmem:[%s12655_s7] sm:$0xff] }
 0x402   : > { %2219 = vrot.lane.b32.xlu1 %v7739_v43, %s12784_s26  ;;  %2228 = vperm.xlu0 %6288, %v8075_v63   ;;  %v8091_v10 = vld [vmem:[%s12655_s7 + $0x20] sm:$0xff] }
 0x404   : > { %v8078_v1 = vpop.permute.xlu1 %1575  ;;  %v8080_v15 = vpop.permute.xlu0 %1127 }
 0x405   : > { %13022 = vst [vmem:[#allocation210_spill] sm:$0xff] %v8078_v1  ;;  %13023 = vst [vmem:[#allocation211_spill] sm:$0xff] %v8080_v15  ;;  %v8101_v15 = vld [vmem:[%s12655_s7 + $0x10] sm:$0xff] }
 0x406   : > { %2224 = vperm.xlu1 %6287, %v8085_v60   ;;  %2240 = vperm.xlu0 %6288, %v8091_v10   ;;  %v8107_v1 = vld [vmem:[%s12655_s7 + $0x30] sm:$0xff] }
 0x408   : > { %v8094_v17 = vpop.permute.xlu1 %1703  ;;  %v8096_v36 = vpop.permute.xlu0 %1255 }
 0x409   : > { %13024 = vst [vmem:[#allocation212_spill] sm:$0xff] %v8094_v17  ;;  %13025 = vst [vmem:[#allocation213_spill] sm:$0xff] %v8096_v36  ;;  %v8117_v36 = vld [vmem:[%s12655_s7 + $0x18] sm:$0xff]  ;;  %v12738_v17 = vmov 20  }
 0x40a   : > { %2232 = vperm.xlu1 %6287, %v8101_v15   ;;  %2248 = vperm.xlu0 %6288, %v8107_v1  }
 0x40c   : > { %v8110_v26 = vpop.permute.xlu1 %1831  ;;  %v8112_v9 = vpop.permute.xlu0 %1383 }
 0x40d   : > { %13026 = vst [vmem:[#allocation214_spill] sm:$0xff] %v8110_v26  ;;  %13027 = vst [vmem:[#allocation215_spill] sm:$0xff] %v8112_v9  ;;  %v8130_v9 = vld [vmem:[%s12655_s7 + $0x28] sm:$0xff] }
 0x40e   : > { %2236 = vperm.xlu1 %6287, %v8117_v36   ;;  %2271 = vrot.lane.b32.xlu0 %v7528_v39, %s12782_s22 }
 0x40f   : > { %6289 = vset.pattern.permute.xlu0 %v12738_v17  ;;  %v8142_v17 = vld [vmem:[%s12655_s7 + $0x38] sm:$0xff] }
 0x410   : > { %v8123_v47 = vpop.permute.xlu1 %1959  ;;  %v8125_v22 = vpop.permute.xlu0 %1511 }
 0x411   : > { %13028 = vst [vmem:[#allocation216_spill] sm:$0xff] %v8123_v47  ;;  %13029 = vst [vmem:[#allocation217_spill] sm:$0xff] %v8125_v22 }
 0x412   : > { %2244 = vperm.xlu1 %6287, %v8130_v9   ;;  %2275 = vrot.lane.b32.xlu0 %v7448_v34, %s12782_s22 }
 0x414   : > { %v8135_v26 = vpop.permute.xlu1 %2087  ;;  %v8137_v58 = vpop.permute.xlu0 %1639 }
 0x415   : > { %13030 = vst [vmem:[#allocation218_spill] sm:$0xff] %v8135_v26  ;;  %13031 = vst [vmem:[#allocation219_spill] sm:$0xff] %v8137_v58  ;;  %v13034_v58 = vmov 20  }
 0x416   : > { %2252 = vperm.xlu1 %6287, %v8142_v17   ;;  %2279 = vrot.lane.b32.xlu0 %v7810_v45, %s12782_s22 }
 0x418   : > { %v8147_v22 = vpop.permute.xlu1 %1069  ;;  %v8149_v47 = vpop.permute.xlu0 %1767 }
 0x419   : > { %13032 = vst [vmem:[#allocation220_spill] sm:$0xff] %v8147_v22  ;;  %13033 = vst [vmem:[#allocation221_spill] sm:$0xff] %v8149_v47 }
 0x41a   : > { %2273 = vrot.lane.b32.xlu1 %v7658_v14, %s12782_s22  ;;  %2217 = vrot.lane.b32.xlu0 %v7964_v44, %s12784_s26  ;;  %s13951_s26 = smov 11  }
 0x41b   : > { %6290 = vset.pattern.permute.xlu1 %v13034_v58 }
 0x41c   : > { %v8156_v26 = vpop.permute.xlu1 %1133  ;;  %v8158_v3 = vpop.permute.xlu0 %1895 }
 0x41d   : > { %13035 = vst [vmem:[#allocation222_spill] sm:$0xff] %v8156_v26  ;;  %13036 = vst [vmem:[#allocation223_spill] sm:$0xff] %v8158_v3 }
 0x41e   : > { %2277 = vrot.lane.b32.xlu1 %v7585_v11, %s12782_s22  ;;  %2283 = vrot.lane.b32.xlu0 %v7739_v43, %s12782_s22 }
 0x420   : > { %v8164_v22 = vpop.permute.xlu1 %1261  ;;  %v8166_v47 = vpop.permute.xlu0 %2023 }
 0x421   : > { %13037 = vst [vmem:[#allocation224_spill] sm:$0xff] %v8164_v22  ;;  %13038 = vst [vmem:[#allocation225_spill] sm:$0xff] %v8166_v47 }
 0x422   : > { %2281 = vrot.lane.b32.xlu1 %v7964_v44, %s12782_s22  ;;  %2288 = vperm.xlu0 %6289, %v8085_v60  }
 0x424   : > { %v8171_v58 = vpop.permute.xlu1 %1389  ;;  %v8173_v26 = vpop.permute.xlu0 %2151 }
 0x425   : > { %13039 = vst [vmem:[#allocation226_spill] sm:$0xff] %v8171_v58  ;;  %13040 = vst [vmem:[#allocation227_spill] sm:$0xff] %v8173_v26 }
 0x426   : > { %2285 = vrot.lane.b32.xlu1 %v7879_v51, %s12782_s22  ;;  %2300 = vperm.xlu0 %6289, %v8117_v36   ;;  %s13956_s22 = smov 7  }
 0x428   : > { %v8178_v3 = vpop.permute.xlu1 %1517  ;;  %v8180_v48 = vpop.permute.xlu0 %1197 }
 0x429   : > { %13041 = vst [vmem:[#allocation228_spill] sm:$0xff] %v8178_v3  ;;  %13042 = vst [vmem:[#allocation229_spill] sm:$0xff] %v8180_v48  ;;  %v12740_v3 = vmov 21  }
 0x42a   : > { %2292 = vperm.xlu1 %6290, %v8075_v63   ;;  %2308 = vperm.xlu0 %6289, %v8130_v9  }
 0x42c   : > { %v8184_v47 = vpop.permute.xlu1 %1645  ;;  %v8186_v22 = vpop.permute.xlu0 %1325 }
 0x42d   : > { %13043 = vst [vmem:[#allocation230_spill] sm:$0xff] %v8184_v47  ;;  %13044 = vst [vmem:[#allocation231_spill] sm:$0xff] %v8186_v22 }
 0x42e   : > { %2296 = vperm.xlu1 %6290, %v8101_v15   ;;  %2316 = vperm.xlu0 %6289, %v8142_v17  }
 0x430   : > { %v8190_v26 = vpop.permute.xlu1 %1773  ;;  %v8192_v58 = vpop.permute.xlu0 %1453 }
 0x431   : > { %13045 = vst [vmem:[#allocation232_spill] sm:$0xff] %v8190_v26  ;;  %13046 = vst [vmem:[#allocation233_spill] sm:$0xff] %v8192_v58 }
 0x432   : > { %2304 = vperm.xlu1 %6290, %v8091_v10   ;;  %2337 = vrot.lane.b32.xlu0 %v7658_v14, %s12777_s15 }
 0x433   : > { %6292 = vset.pattern.permute.xlu0 %v12740_v3 }
 0x434   : > { %v8198_v47 = vpop.permute.xlu1 %1901  ;;  %v8200_v22 = vpop.permute.xlu0 %1581 }
 0x435   : > { %13047 = vst [vmem:[#allocation234_spill] sm:$0xff] %v8198_v47  ;;  %13048 = vst [vmem:[#allocation235_spill] sm:$0xff] %v8200_v22 }
 0x436   : > { %2312 = vperm.xlu1 %6290, %v8107_v1   ;;  %2341 = vrot.lane.b32.xlu0 %v7585_v11, %s12777_s15 }
 0x438   : > { %v8205_v26 = vpop.permute.xlu1 %2029  ;;  %v8207_v58 = vpop.permute.xlu0 %1709 }
 0x439   : > { %13049 = vst [vmem:[#allocation236_spill] sm:$0xff] %v8205_v26  ;;  %13050 = vst [vmem:[#allocation237_spill] sm:$0xff] %v8207_v58 }
 0x43a   : > { %2335 = vrot.lane.b32.xlu1 %v7528_v39, %s12777_s15  ;;  %2345 = vrot.lane.b32.xlu0 %v7964_v44, %s12777_s15 }
 0x43b   : > { %6291 = vset.pattern.permute.xlu1 %v12740_v3 }
 0x43c   : > { %v8214_v47 = vpop.permute.xlu1 %2157  ;;  %v8216_v22 = vpop.permute.xlu0 %1837 }
 0x43d   : > { %13051 = vst [vmem:[#allocation238_spill] sm:$0xff] %v8214_v47  ;;  %13052 = vst [vmem:[#allocation239_spill] sm:$0xff] %v8216_v22 }
 0x43e   : > { %2339 = vrot.lane.b32.xlu1 %v7448_v34, %s12777_s15  ;;  %2349 = vrot.lane.b32.xlu0 %v7879_v51, %s12777_s15 }
 0x440   : > { %v8222_v26 = vpop.permute.xlu1 %1065  ;;  %v8224_v58 = vpop.permute.xlu0 %1965 }
 0x441   : > { %13053 = vst [vmem:[#allocation240_spill] sm:$0xff] %v8222_v26  ;;  %13054 = vst [vmem:[#allocation241_spill] sm:$0xff] %v8224_v58 }
 0x442   : > { %2343 = vrot.lane.b32.xlu1 %v7810_v45, %s12777_s15  ;;  %2356 = vperm.xlu0 %6292, %v8075_v63  }
 0x444   : > { %v8229_v3 = vpop.permute.xlu1 %1129  ;;  %v8231_v47 = vpop.permute.xlu0 %2093 }
 0x445   : > { %13055 = vst [vmem:[#allocation242_spill] sm:$0xff] %v8229_v3  ;;  %13056 = vst [vmem:[#allocation243_spill] sm:$0xff] %v8231_v47  ;;  %v12742_v47 = vmov 22  }
 0x446   : > { %2347 = vrot.lane.b32.xlu1 %v7739_v43, %s12777_s15  ;;  %2368 = vperm.xlu0 %6292, %v8091_v10  }
 0x448   : > { %v8236_v22 = vpop.permute.xlu1 %1257  ;;  %v8238_v48 = vpop.permute.xlu0 %1193 }
 0x449   : > { %13057 = vst [vmem:[#allocation244_spill] sm:$0xff] %v8236_v22  ;;  %13058 = vst [vmem:[#allocation245_spill] sm:$0xff] %v8238_v48 }
 0x44a   : > { %2352 = vperm.xlu1 %6291, %v8085_v60   ;;  %2376 = vperm.xlu0 %6292, %v8107_v1  }
 0x44c   : > { %v8242_v58 = vpop.permute.xlu1 %1385  ;;  %v8244_v26 = vpop.permute.xlu0 %1321 }
 0x44d   : > { %13059 = vst [vmem:[#allocation246_spill] sm:$0xff] %v8242_v58  ;;  %13060 = vst [vmem:[#allocation247_spill] sm:$0xff] %v8244_v26 }
 0x44e   : > { %2360 = vperm.xlu1 %6291, %v8101_v15   ;;  %2399 = vrot.lane.b32.xlu0 %v7528_v39, %s12775_s23 }
 0x44f   : > { %6293 = vset.pattern.permute.xlu0 %v12742_v47 }
 0x450   : > { %v8250_v22 = vpop.permute.xlu1 %1513  ;;  %v8252_v48 = vpop.permute.xlu0 %1449 }
 0x451   : > { %13061 = vst [vmem:[#allocation248_spill] sm:$0xff] %v8250_v22  ;;  %13062 = vst [vmem:[#allocation249_spill] sm:$0xff] %v8252_v48 }
 0x452   : > { %2364 = vperm.xlu1 %6291, %v8117_v36   ;;  %2403 = vrot.lane.b32.xlu0 %v7448_v34, %s12775_s23 }
 0x454   : > { %v8257_v58 = vpop.permute.xlu1 %1641  ;;  %v8259_v26 = vpop.permute.xlu0 %1577 }
 0x455   : > { %13063 = vst [vmem:[#allocation250_spill] sm:$0xff] %v8257_v58  ;;  %13064 = vst [vmem:[#allocation251_spill] sm:$0xff] %v8259_v26  ;;  %v13069_v26 = vmov 22  }
 0x456   : > { %2372 = vperm.xlu1 %6291, %v8130_v9   ;;  %2407 = vrot.lane.b32.xlu0 %v7810_v45, %s12775_s23 }
 0x458   : > { %v8264_v3 = vpop.permute.xlu1 %1769  ;;  %v8266_v47 = vpop.permute.xlu0 %1705 }
 0x459   : > { %13065 = vst [vmem:[#allocation252_spill] sm:$0xff] %v8264_v3  ;;  %13066 = vst [vmem:[#allocation253_spill] sm:$0xff] %v8266_v47 }
 0x45a   : > { %2380 = vperm.xlu1 %6291, %v8142_v17   ;;  %2411 = vrot.lane.b32.xlu0 %v7739_v43, %s12775_s23 }
 0x45c   : > { %v8271_v22 = vpop.permute.xlu1 %1897  ;;  %v8276_v58 = vpop.permute.xlu0 %1833 }
 0x45d   : > { %13067 = vst [vmem:[#allocation254_spill] sm:$0xff] %v8271_v22  ;;  %13068 = vst [vmem:[#allocation255_spill] sm:$0xff] %v8276_v58 }
 0x45e   : > { %2401 = vrot.lane.b32.xlu1 %v7658_v14, %s12775_s23  ;;  %2416 = vperm.xlu0 %6293, %v8085_v60  }
 0x45f   : > { %6294 = vset.pattern.permute.xlu1 %v13069_v26 }
 0x460   : > { %v8282_v47 = vpop.permute.xlu1 %2025  ;;  %v8284_v3 = vpop.permute.xlu0 %1961 }
 0x461   : > { %13070 = vst [vmem:[#allocation256_spill] sm:$0xff] %v8282_v47  ;;  %13071 = vst [vmem:[#allocation257_spill] sm:$0xff] %v8284_v3  ;;  %v12744_v47 = vmov 23  }
 0x462   : > { %2405 = vrot.lane.b32.xlu1 %v7585_v11, %s12775_s23  ;;  %2428 = vperm.xlu0 %6293, %v8117_v36  }
 0x464   : > { %v8289_v22 = vpop.permute.xlu1 %2153  ;;  %v8294_v26 = vpop.permute.xlu0 %2089 }
 0x465   : > { %13072 = vst [vmem:[#allocation258_spill] sm:$0xff] %v8289_v22  ;;  %13073 = vst [vmem:[#allocation259_spill] sm:$0xff] %v8294_v26 }
 0x466   : > { %2409 = vrot.lane.b32.xlu1 %v7964_v44, %s12775_s23  ;;  %2436 = vperm.xlu0 %6293, %v8130_v9  }
 0x468   : > { %v8299_v3 = vpop.permute.xlu1 %2207  ;;  %v8302_v58 = vpop.permute.xlu0 %2209 }
 0x469   : > { %13074 = vst [vmem:[#allocation260_spill] sm:$0xff] %v8299_v3  ;;  %13075 = vst [vmem:[#allocation261_spill] sm:$0xff] %v8302_v58 }
 0x46a   : > { %2413 = vrot.lane.b32.xlu1 %v7879_v51, %s12775_s23  ;;  %2444 = vperm.xlu0 %6293, %v8142_v17   ;;  %s14163_s23 = smov 121  }
 0x46c   : > { %v8307_v22 = vpop.permute.xlu1 %2211  ;;  %v8312_v26 = vpop.permute.xlu0 %2213 }
 0x46d   : > { %13076 = vst [vmem:[#allocation262_spill] sm:$0xff] %v8307_v22  ;;  %13077 = vst [vmem:[#allocation263_spill] sm:$0xff] %v8312_v26  ;;  %v13080_v22 = vmov 23  }
 0x46e   : > { %2420 = vperm.xlu1 %6294, %v8075_v63   ;;  %2465 = vrot.lane.b32.xlu0 %v7658_v14, %s12766_s16 }
 0x46f   : > { %6296 = vset.pattern.permute.xlu0 %v12744_v47 }
 0x470   : > { %v8317_v47 = vpop.permute.xlu1 %2215  ;;  %v8319_v3 = vpop.permute.xlu0 %2221 }
 0x471   : > { %13078 = vst [vmem:[#allocation264_spill] sm:$0xff] %v8317_v47  ;;  %13079 = vst [vmem:[#allocation265_spill] sm:$0xff] %v8319_v3 }
 0x472   : > { %2424 = vperm.xlu1 %6294, %v8101_v15   ;;  %2469 = vrot.lane.b32.xlu0 %v7585_v11, %s12766_s16 }
 0x474   : > { %v8325_v58 = vpop.permute.xlu1 %2219 }
 0x475   : > { %13081 = vst [vmem:[#allocation266_spill] sm:$0xff] %v8325_v58  ;;  %v12746_v58 = vmov 24  }
 0x476   : > { %2432 = vperm.xlu1 %6294, %v8091_v10   ;;  %2473 = vrot.lane.b32.xlu0 %v7964_v44, %s12766_s16 }
 0x47a   : > { %2440 = vperm.xlu1 %6294, %v8107_v1   ;;  %2477 = vrot.lane.b32.xlu0 %v7879_v51, %s12766_s16 }
 0x47e   : > { %2463 = vrot.lane.b32.xlu1 %v7528_v39, %s12766_s16  ;;  %2484 = vperm.xlu0 %6296, %v8075_v63  }
 0x47f   : > { %6295 = vset.pattern.permute.xlu1 %v13080_v22 }
 0x481   : > { %v8327_v48 = vpop.permute.xlu0 %2228 }
 0x482   : > { %13082 = vst [vmem:[#allocation267_spill] sm:$0xff] %v8327_v48  ;;  %2467 = vrot.lane.b32.xlu1 %v7448_v34, %s12766_s16  ;;  %2496 = vperm.xlu0 %6296, %v8091_v10  }
 0x485   : > { %v8332_v26 = vpop.permute.xlu1 %2224  ;;  %v8334_v47 = vpop.permute.xlu0 %2240 }
 0x486   : > { %13083 = vst [vmem:[#allocation268_spill] sm:$0xff] %v8332_v26  ;;  %13084 = vst [vmem:[#allocation269_spill] sm:$0xff] %v8334_v47  ;;  %2471 = vrot.lane.b32.xlu1 %v7810_v45, %s12766_s16  ;;  %2504 = vperm.xlu0 %6296, %v8107_v1  }
 0x489   : > { %v8339_v3 = vpop.permute.xlu1 %2232  ;;  %v8341_v22 = vpop.permute.xlu0 %2248 }
 0x48a   : > { %13085 = vst [vmem:[#allocation270_spill] sm:$0xff] %v8339_v3  ;;  %13086 = vst [vmem:[#allocation271_spill] sm:$0xff] %v8341_v22  ;;  %2475 = vrot.lane.b32.xlu1 %v7739_v43, %s12766_s16  ;;  %2527 = vrot.lane.b32.xlu0 %v7528_v39, %s12750_s20  ;;  %s12780_s16 = smov 113  }
 0x48b   : > { %6297 = vset.pattern.permute.xlu0 %v12746_v58 }
 0x48d   : > { %v8348_v47 = vpop.permute.xlu1 %2236  ;;  %v8350_v26 = vpop.permute.xlu0 %2271 }
 0x48e   : > { %13087 = vst [vmem:[#allocation272_spill] sm:$0xff] %v8348_v47  ;;  %13088 = vst [vmem:[#allocation273_spill] sm:$0xff] %v8350_v26  ;;  %2480 = vperm.xlu1 %6295, %v8085_v60   ;;  %2531 = vrot.lane.b32.xlu0 %v7448_v34, %s12750_s20 }
 0x491   : > { %v8355_v22 = vpop.permute.xlu1 %2244  ;;  %v8357_v3 = vpop.permute.xlu0 %2275 }
 0x492   : > { %13089 = vst [vmem:[#allocation274_spill] sm:$0xff] %v8355_v22  ;;  %13090 = vst [vmem:[#allocation275_spill] sm:$0xff] %v8357_v3  ;;  %2488 = vperm.xlu1 %6295, %v8101_v15   ;;  %2535 = vrot.lane.b32.xlu0 %v7810_v45, %s12750_s20 }
 0x495   : > { %v8362_v48 = vpop.permute.xlu1 %2252  ;;  %v8364_v58 = vpop.permute.xlu0 %2279 }
 0x496   : > { %13091 = vst [vmem:[#allocation276_spill] sm:$0xff] %v8362_v48  ;;  %13092 = vst [vmem:[#allocation277_spill] sm:$0xff] %v8364_v58  ;;  %2492 = vperm.xlu1 %6295, %v8117_v36   ;;  %2539 = vrot.lane.b32.xlu0 %v7739_v43, %s12750_s20 }
 0x499   : > { %v8369_v26 = vpop.permute.xlu1 %2273  ;;  %v8371_v47 = vpop.permute.xlu0 %2217 }
 0x49a   : > { %13093 = vst [vmem:[#allocation278_spill] sm:$0xff] %v8369_v26  ;;  %13094 = vst [vmem:[#allocation279_spill] sm:$0xff] %v8371_v47  ;;  %2500 = vperm.xlu1 %6295, %v8130_v9   ;;  %2544 = vperm.xlu0 %6297, %v8085_v60   ;;  %v13099_v26 = vmov 24  }
 0x49d   : > { %v8375_v3 = vpop.permute.xlu1 %2277  ;;  %v8377_v22 = vpop.permute.xlu0 %2283 }
 0x49e   : > { %13095 = vst [vmem:[#allocation280_spill] sm:$0xff] %v8375_v3  ;;  %13096 = vst [vmem:[#allocation281_spill] sm:$0xff] %v8377_v22  ;;  %2508 = vperm.xlu1 %6295, %v8142_v17   ;;  %2556 = vperm.xlu0 %6297, %v8117_v36  }
 0x4a1   : > { %v8381_v58 = vpop.permute.xlu1 %2281  ;;  %v8383_v48 = vpop.permute.xlu0 %2288 }
 0x4a2   : > { %13097 = vst [vmem:[#allocation282_spill] sm:$0xff] %v8381_v58  ;;  %13098 = vst [vmem:[#allocation283_spill] sm:$0xff] %v8383_v48  ;;  %2529 = vrot.lane.b32.xlu1 %v7658_v14, %s12750_s20  ;;  %2564 = vperm.xlu0 %6297, %v8130_v9  }
 0x4a3   : > { %6298 = vset.pattern.permute.xlu1 %v13099_v26  ;;  %v12748_v26 = vmov 25  }
 0x4a5   : > { %v8389_v47 = vpop.permute.xlu1 %2285  ;;  %v8391_v3 = vpop.permute.xlu0 %2300 }
 0x4a6   : > { %13100 = vst [vmem:[#allocation284_spill] sm:$0xff] %v8389_v47  ;;  %13101 = vst [vmem:[#allocation285_spill] sm:$0xff] %v8391_v3  ;;  %2533 = vrot.lane.b32.xlu1 %v7585_v11, %s12750_s20  ;;  %2572 = vperm.xlu0 %6297, %v8142_v17  }
 0x4a9   : > { %v8396_v22 = vpop.permute.xlu1 %2292  ;;  %v8398_v58 = vpop.permute.xlu0 %2308 }
 0x4aa   : > { %13102 = vst [vmem:[#allocation286_spill] sm:$0xff] %v8396_v22  ;;  %13103 = vst [vmem:[#allocation287_spill] sm:$0xff] %v8398_v58  ;;  %2537 = vrot.lane.b32.xlu1 %v7964_v44, %s12750_s20  ;;  %2593 = vrot.lane.b32.xlu0 %v7658_v14, %s12754_s14 }
 0x4ab   : > { %6300 = vset.pattern.permute.xlu0 %v12748_v26 }
 0x4ad   : > { %v8405_v47 = vpop.permute.xlu1 %2296  ;;  %v8407_v3 = vpop.permute.xlu0 %2316 }
 0x4ae   : > { %13104 = vst [vmem:[#allocation288_spill] sm:$0xff] %v8405_v47  ;;  %13105 = vst [vmem:[#allocation289_spill] sm:$0xff] %v8407_v3  ;;  %2541 = vrot.lane.b32.xlu1 %v7879_v51, %s12750_s20  ;;  %2597 = vrot.lane.b32.xlu0 %v7585_v11, %s12754_s14  ;;  %s12758_s20 = smov 117  }
 0x4b1   : > { %v8413_v58 = vpop.permute.xlu1 %2304  ;;  %v8415_v22 = vpop.permute.xlu0 %2337 }
 0x4b2   : > { %13106 = vst [vmem:[#allocation290_spill] sm:$0xff] %v8413_v58  ;;  %13107 = vst [vmem:[#allocation291_spill] sm:$0xff] %v8415_v22  ;;  %2548 = vperm.xlu1 %6298, %v8075_v63   ;;  %2601 = vrot.lane.b32.xlu0 %v7964_v44, %s12754_s14 }
 0x4b5   : > { %v8420_v26 = vpop.permute.xlu1 %2312  ;;  %v8422_v47 = vpop.permute.xlu0 %2341 }
 0x4b6   : > { %13108 = vst [vmem:[#allocation292_spill] sm:$0xff] %v8420_v26  ;;  %13109 = vst [vmem:[#allocation293_spill] sm:$0xff] %v8422_v47  ;;  %2552 = vperm.xlu1 %6298, %v8101_v15   ;;  %2605 = vrot.lane.b32.xlu0 %v7879_v51, %s12754_s14 }
 0x4b9   : > { %v8427_v3 = vpop.permute.xlu1 %2335  ;;  %v8429_v48 = vpop.permute.xlu0 %2345 }
 0x4ba   : > { %13110 = vst [vmem:[#allocation294_spill] sm:$0xff] %v8427_v3  ;;  %13111 = vst [vmem:[#allocation295_spill] sm:$0xff] %v8429_v48  ;;  %2560 = vperm.xlu1 %6298, %v8091_v10   ;;  %2612 = vperm.xlu0 %6300, %v8075_v63   ;;  %v13116_v48 = vmov 25  }
 0x4bd   : > { %v8433_v22 = vpop.permute.xlu1 %2339  ;;  %v8435_v58 = vpop.permute.xlu0 %2349 }
 0x4be   : > { %13112 = vst [vmem:[#allocation296_spill] sm:$0xff] %v8433_v22  ;;  %13113 = vst [vmem:[#allocation297_spill] sm:$0xff] %v8435_v58  ;;  %2568 = vperm.xlu1 %6298, %v8107_v1   ;;  %2624 = vperm.xlu0 %6300, %v8091_v10   ;;  %v12752_v58 = vmov 26  }
 0x4c1   : > { %v8439_v47 = vpop.permute.xlu1 %2343  ;;  %v8441_v26 = vpop.permute.xlu0 %2356 }
 0x4c2   : > { %13114 = vst [vmem:[#allocation298_spill] sm:$0xff] %v8439_v47  ;;  %13115 = vst [vmem:[#allocation299_spill] sm:$0xff] %v8441_v26  ;;  %2591 = vrot.lane.b32.xlu1 %v7528_v39, %s12754_s14  ;;  %2632 = vperm.xlu0 %6300, %v8107_v1  }
 0x4c3   : > { %6299 = vset.pattern.permute.xlu1 %v13116_v48 }
 0x4c5   : > { %v8447_v3 = vpop.permute.xlu1 %2347  ;;  %v8449_v22 = vpop.permute.xlu0 %2368 }
 0x4c6   : > { %13117 = vst [vmem:[#allocation300_spill] sm:$0xff] %v8447_v3  ;;  %13118 = vst [vmem:[#allocation301_spill] sm:$0xff] %v8449_v22  ;;  %2595 = vrot.lane.b32.xlu1 %v7448_v34, %s12754_s14  ;;  %2655 = vrot.lane.b32.xlu0 %v7528_v39, %s12758_s20 }
 0x4c7   : > { %6301 = vset.pattern.permute.xlu0 %v12752_v58 }
 0x4c9   : > { %v8456_v47 = vpop.permute.xlu1 %2352  ;;  %v8458_v26 = vpop.permute.xlu0 %2376 }
 0x4ca   : > { %13119 = vst [vmem:[#allocation302_spill] sm:$0xff] %v8456_v47  ;;  %13120 = vst [vmem:[#allocation303_spill] sm:$0xff] %v8458_v26  ;;  %2599 = vrot.lane.b32.xlu1 %v7810_v45, %s12754_s14  ;;  %2659 = vrot.lane.b32.xlu0 %v7448_v34, %s12758_s20 }
 0x4cd   : > { %v8464_v48 = vpop.permute.xlu1 %2360  ;;  %v8466_v3 = vpop.permute.xlu0 %2399 }
 0x4ce   : > { %13121 = vst [vmem:[#allocation304_spill] sm:$0xff] %v8464_v48  ;;  %13122 = vst [vmem:[#allocation305_spill] sm:$0xff] %v8466_v3  ;;  %2603 = vrot.lane.b32.xlu1 %v7739_v43, %s12754_s14  ;;  %2663 = vrot.lane.b32.xlu0 %v7810_v45, %s12758_s20  ;;  %s12762_s14 = smov 116  }
 0x4d1   : > { %v8472_v58 = vpop.permute.xlu1 %2364  ;;  %v8474_v47 = vpop.permute.xlu0 %2403 }
 0x4d2   : > { %13123 = vst [vmem:[#allocation306_spill] sm:$0xff] %v8472_v58  ;;  %13124 = vst [vmem:[#allocation307_spill] sm:$0xff] %v8474_v47  ;;  %2608 = vperm.xlu1 %6299, %v8085_v60   ;;  %2667 = vrot.lane.b32.xlu0 %v7739_v43, %s12758_s20 }
 0x4d5   : > { %v8479_v26 = vpop.permute.xlu1 %2372  ;;  %v8481_v48 = vpop.permute.xlu0 %2407 }
 0x4d6   : > { %13125 = vst [vmem:[#allocation308_spill] sm:$0xff] %v8479_v26  ;;  %13126 = vst [vmem:[#allocation309_spill] sm:$0xff] %v8481_v48  ;;  %2616 = vperm.xlu1 %6299, %v8101_v15   ;;  %2672 = vperm.xlu0 %6301, %v8085_v60  }
 0x4d9   : > { %v8485_v3 = vpop.permute.xlu1 %2380  ;;  %v8487_v22 = vpop.permute.xlu0 %2411 }
 0x4da   : > { %13127 = vst [vmem:[#allocation310_spill] sm:$0xff] %v8485_v3  ;;  %13128 = vst [vmem:[#allocation311_spill] sm:$0xff] %v8487_v22  ;;  %2620 = vperm.xlu1 %6299, %v8117_v36   ;;  %2684 = vperm.xlu0 %6301, %v8117_v36  }
 0x4dd   : > { %v8491_v47 = vpop.permute.xlu1 %2401  ;;  %v8493_v58 = vpop.permute.xlu0 %2416 }
 0x4de   : > { %13129 = vst [vmem:[#allocation312_spill] sm:$0xff] %v8491_v47  ;;  %13130 = vst [vmem:[#allocation313_spill] sm:$0xff] %v8493_v58  ;;  %2628 = vperm.xlu1 %6299, %v8130_v9   ;;  %2692 = vperm.xlu0 %6301, %v8130_v9   ;;  %v13135_v47 = vmov 26  }
 0x4e1   : > { %v8497_v48 = vpop.permute.xlu1 %2405  ;;  %v8499_v26 = vpop.permute.xlu0 %2428 }
 0x4e2   : > { %13131 = vst [vmem:[#allocation314_spill] sm:$0xff] %v8497_v48  ;;  %13132 = vst [vmem:[#allocation315_spill] sm:$0xff] %v8499_v26  ;;  %2636 = vperm.xlu1 %6299, %v8142_v17   ;;  %2700 = vperm.xlu0 %6301, %v8142_v17   ;;  %v12756_v48 = vmov 27  }
 0x4e5   : > { %v8503_v22 = vpop.permute.xlu1 %2409  ;;  %v8505_v3 = vpop.permute.xlu0 %2436 }
 0x4e6   : > { %13133 = vst [vmem:[#allocation316_spill] sm:$0xff] %v8503_v22  ;;  %13134 = vst [vmem:[#allocation317_spill] sm:$0xff] %v8505_v3  ;;  %2657 = vrot.lane.b32.xlu1 %v7658_v14, %s12758_s20  ;;  %2721 = vrot.lane.b32.xlu0 %v7658_v14, %s12762_s14 }
 0x4e7   : > { %6302 = vset.pattern.permute.xlu1 %v13135_v47  ;;  %6304 = vset.pattern.permute.xlu0 %v12756_v48 }
 0x4e9   : > { %v8513_v26 = vpop.permute.xlu1 %2413  ;;  %v8515_v58 = vpop.permute.xlu0 %2444 }
 0x4ea   : > { %13136 = vst [vmem:[#allocation318_spill] sm:$0xff] %v8513_v26  ;;  %13137 = vst [vmem:[#allocation319_spill] sm:$0xff] %v8515_v58  ;;  %2661 = vrot.lane.b32.xlu1 %v7585_v11, %s12758_s20  ;;  %2725 = vrot.lane.b32.xlu0 %v7585_v11, %s12762_s14 }
 0x4ed   : > { %v8521_v3 = vpop.permute.xlu1 %2420  ;;  %v8523_v22 = vpop.permute.xlu0 %2465 }
 0x4ee   : > { %13138 = vst [vmem:[#allocation320_spill] sm:$0xff] %v8521_v3  ;;  %13139 = vst [vmem:[#allocation321_spill] sm:$0xff] %v8523_v22  ;;  %2665 = vrot.lane.b32.xlu1 %v7964_v44, %s12758_s20  ;;  %2729 = vrot.lane.b32.xlu0 %v7964_v44, %s12762_s14 }
 0x4f1   : > { %v8529_v48 = vpop.permute.xlu1 %2424  ;;  %v8531_v47 = vpop.permute.xlu0 %2469 }
 0x4f2   : > { %13140 = vst [vmem:[#allocation322_spill] sm:$0xff] %v8529_v48  ;;  %13141 = vst [vmem:[#allocation323_spill] sm:$0xff] %v8531_v47  ;;  %2669 = vrot.lane.b32.xlu1 %v7879_v51, %s12758_s20  ;;  %2733 = vrot.lane.b32.xlu0 %v7879_v51, %s12762_s14  ;;  %s12773_s20 = smov 115  }
 0x4f5   : > { %v8537_v58 = vpop.permute.xlu1 %2432  ;;  %v8539_v3 = vpop.permute.xlu0 %2473 }
 0x4f6   : > { %13142 = vst [vmem:[#allocation324_spill] sm:$0xff] %v8537_v58  ;;  %13143 = vst [vmem:[#allocation325_spill] sm:$0xff] %v8539_v3  ;;  %2676 = vperm.xlu1 %6302, %v8075_v63   ;;  %2740 = vperm.xlu0 %6304, %v8075_v63  }
 0x4f9   : > { %v8543_v22 = vpop.permute.xlu1 %2440  ;;  %v8545_v26 = vpop.permute.xlu0 %2477 }
 0x4fa   : > { %13144 = vst [vmem:[#allocation326_spill] sm:$0xff] %v8543_v22  ;;  %13145 = vst [vmem:[#allocation327_spill] sm:$0xff] %v8545_v26  ;;  %2680 = vperm.xlu1 %6302, %v8101_v15   ;;  %2752 = vperm.xlu0 %6304, %v8091_v10   ;;  %v12760_v26 = vmov 28  }
 0x4fd   : > { %v8549_v47 = vpop.permute.xlu1 %2463  ;;  %v8551_v48 = vpop.permute.xlu0 %2484 }
 0x4fe   : > { %13146 = vst [vmem:[#allocation328_spill] sm:$0xff] %v8549_v47  ;;  %13147 = vst [vmem:[#allocation329_spill] sm:$0xff] %v8551_v48  ;;  %2688 = vperm.xlu1 %6302, %v8091_v10   ;;  %2760 = vperm.xlu0 %6304, %v8107_v1  }
 0x501   : > { %v8555_v3 = vpop.permute.xlu1 %2467  ;;  %v8557_v58 = vpop.permute.xlu0 %2496 }
 0x502   : > { %13148 = vst [vmem:[#allocation330_spill] sm:$0xff] %v8555_v3  ;;  %13149 = vst [vmem:[#allocation331_spill] sm:$0xff] %v8557_v58  ;;  %2696 = vperm.xlu1 %6302, %v8107_v1   ;;  %2783 = vrot.lane.b32.xlu0 %v7528_v39, %s12773_s20  ;;  %v13152_v3 = vmov 27  }
 0x503   : > { %6305 = vset.pattern.permute.xlu0 %v12760_v26 }
 0x505   : > { %v8563_v47 = vpop.permute.xlu1 %2471  ;;  %v8565_v48 = vpop.permute.xlu0 %2504 }
 0x506   : > { %13150 = vst [vmem:[#allocation332_spill] sm:$0xff] %v8563_v47  ;;  %13151 = vst [vmem:[#allocation333_spill] sm:$0xff] %v8565_v48  ;;  %2719 = vrot.lane.b32.xlu1 %v7528_v39, %s12762_s14  ;;  %2787 = vrot.lane.b32.xlu0 %v7448_v34, %s12773_s20 }
 0x507   : > { %6303 = vset.pattern.permute.xlu1 %v13152_v3 }
 0x509   : > { %v8572_v58 = vpop.permute.xlu1 %2475  ;;  %v8574_v22 = vpop.permute.xlu0 %2527 }
 0x50a   : > { %13153 = vst [vmem:[#allocation334_spill] sm:$0xff] %v8572_v58  ;;  %13154 = vst [vmem:[#allocation335_spill] sm:$0xff] %v8574_v22  ;;  %2723 = vrot.lane.b32.xlu1 %v7448_v34, %s12762_s14  ;;  %2791 = vrot.lane.b32.xlu0 %v7810_v45, %s12773_s20 }
 0x50d   : > { %v8580_v26 = vpop.permute.xlu1 %2480  ;;  %v8582_v48 = vpop.permute.xlu0 %2531 }
 0x50e   : > { %13155 = vst [vmem:[#allocation336_spill] sm:$0xff] %v8580_v26  ;;  %13156 = vst [vmem:[#allocation337_spill] sm:$0xff] %v8582_v48  ;;  %2727 = vrot.lane.b32.xlu1 %v7810_v45, %s12762_s14  ;;  %2795 = vrot.lane.b32.xlu0 %v7739_v43, %s12773_s20 }
 0x511   : > { %v8588_v3 = vpop.permute.xlu1 %2488  ;;  %v8590_v58 = vpop.permute.xlu0 %2535 }
 0x512   : > { %13157 = vst [vmem:[#allocation338_spill] sm:$0xff] %v8588_v3  ;;  %13158 = vst [vmem:[#allocation339_spill] sm:$0xff] %v8590_v58  ;;  %2731 = vrot.lane.b32.xlu1 %v7739_v43, %s12762_s14  ;;  %2800 = vperm.xlu0 %6305, %v8085_v60   ;;  %s12771_s14 = smov 114  }
 0x515   : > { %v8595_v22 = vpop.permute.xlu1 %2492  ;;  %v8597_v26 = vpop.permute.xlu0 %2539 }
 0x516   : > { %13159 = vst [vmem:[#allocation340_spill] sm:$0xff] %v8595_v22  ;;  %13160 = vst [vmem:[#allocation341_spill] sm:$0xff] %v8597_v26  ;;  %2736 = vperm.xlu1 %6303, %v8085_v60   ;;  %2812 = vperm.xlu0 %6305, %v8117_v36  }
 0x519   : > { %v8601_v48 = vpop.permute.xlu1 %2500  ;;  %v8603_v47 = vpop.permute.xlu0 %2544 }
 0x51a   : > { %13161 = vst [vmem:[#allocation342_spill] sm:$0xff] %v8601_v48  ;;  %13162 = vst [vmem:[#allocation343_spill] sm:$0xff] %v8603_v47  ;;  %2744 = vperm.xlu1 %6303, %v8101_v15   ;;  %2820 = vperm.xlu0 %6305, %v8130_v9   ;;  %v12764_v47 = vmov 29  }
 0x51d   : > { %v8607_v58 = vpop.permute.xlu1 %2508  ;;  %v8609_v3 = vpop.permute.xlu0 %2556 }
 0x51e   : > { %13163 = vst [vmem:[#allocation344_spill] sm:$0xff] %v8607_v58  ;;  %13164 = vst [vmem:[#allocation345_spill] sm:$0xff] %v8609_v3  ;;  %2748 = vperm.xlu1 %6303, %v8117_v36   ;;  %2828 = vperm.xlu0 %6305, %v8142_v17  }
 0x521   : > { %v8613_v26 = vpop.permute.xlu1 %2529  ;;  %v8615_v22 = vpop.permute.xlu0 %2564 }
 0x522   : > { %13165 = vst [vmem:[#allocation346_spill] sm:$0xff] %v8613_v26  ;;  %13166 = vst [vmem:[#allocation347_spill] sm:$0xff] %v8615_v22  ;;  %2756 = vperm.xlu1 %6303, %v8130_v9   ;;  %2849 = vrot.lane.b32.xlu0 %v7658_v14, %s12771_s14 }
 0x523   : > { %6308 = vset.pattern.permute.xlu0 %v12764_v47  ;;  %v13171_v47 = vmov 28  }
 0x525   : > { %v8621_v58 = vpop.permute.xlu1 %2533  ;;  %v8623_v3 = vpop.permute.xlu0 %2572 }
 0x526   : > { %13167 = vst [vmem:[#allocation348_spill] sm:$0xff] %v8621_v58  ;;  %13168 = vst [vmem:[#allocation349_spill] sm:$0xff] %v8623_v3  ;;  %2764 = vperm.xlu1 %6303, %v8142_v17   ;;  %2853 = vrot.lane.b32.xlu0 %v7585_v11, %s12771_s14 }
 0x529   : > { %v8628_v26 = vpop.permute.xlu1 %2537  ;;  %v8630_v22 = vpop.permute.xlu0 %2593 }
 0x52a   : > { %13169 = vst [vmem:[#allocation350_spill] sm:$0xff] %v8628_v26  ;;  %13170 = vst [vmem:[#allocation351_spill] sm:$0xff] %v8630_v22  ;;  %2785 = vrot.lane.b32.xlu1 %v7658_v14, %s12773_s20  ;;  %2857 = vrot.lane.b32.xlu0 %v7964_v44, %s12771_s14 }
 0x52b   : > { %6306 = vset.pattern.permute.xlu1 %v13171_v47 }
 0x52d   : > { %v8637_v58 = vpop.permute.xlu1 %2541  ;;  %v8639_v3 = vpop.permute.xlu0 %2597 }
 0x52e   : > { %13172 = vst [vmem:[#allocation352_spill] sm:$0xff] %v8637_v58  ;;  %13173 = vst [vmem:[#allocation353_spill] sm:$0xff] %v8639_v3  ;;  %2789 = vrot.lane.b32.xlu1 %v7585_v11, %s12773_s20  ;;  %2861 = vrot.lane.b32.xlu0 %v7879_v51, %s12771_s14 }
 0x531   : > { %v8645_v26 = vpop.permute.xlu1 %2548  ;;  %v8647_v22 = vpop.permute.xlu0 %2601 }
 0x532   : > { %13174 = vst [vmem:[#allocation354_spill] sm:$0xff] %v8645_v26  ;;  %13175 = vst [vmem:[#allocation355_spill] sm:$0xff] %v8647_v22  ;;  %2793 = vrot.lane.b32.xlu1 %v7964_v44, %s12773_s20  ;;  %2868 = vperm.xlu0 %6308, %v8075_v63  }
 0x535   : > { %v8652_v47 = vpop.permute.xlu1 %2552  ;;  %v8654_v58 = vpop.permute.xlu0 %2605 }
 0x536   : > { %13176 = vst [vmem:[#allocation356_spill] sm:$0xff] %v8652_v47  ;;  %13177 = vst [vmem:[#allocation357_spill] sm:$0xff] %v8654_v58  ;;  %2797 = vrot.lane.b32.xlu1 %v7879_v51, %s12773_s20  ;;  %2880 = vperm.xlu0 %6308, %v8091_v10   ;;  %v12768_v58 = vmov 30   ;;  %s14181_s20 = smov 120  }
 0x539   : > { %v8659_v3 = vpop.permute.xlu1 %2560  ;;  %v8661_v48 = vpop.permute.xlu0 %2612 }
 0x53a   : > { %13178 = vst [vmem:[#allocation358_spill] sm:$0xff] %v8659_v3  ;;  %13179 = vst [vmem:[#allocation359_spill] sm:$0xff] %v8661_v48  ;;  %2804 = vperm.xlu1 %6306, %v8075_v63   ;;  %2888 = vperm.xlu0 %6308, %v8107_v1  }
 0x53d   : > { %v8665_v22 = vpop.permute.xlu1 %2568  ;;  %v8667_v26 = vpop.permute.xlu0 %2624 }
 0x53e   : > { %13180 = vst [vmem:[#allocation360_spill] sm:$0xff] %v8665_v22  ;;  %13181 = vst [vmem:[#allocation361_spill] sm:$0xff] %v8667_v26  ;;  %2808 = vperm.xlu1 %6306, %v8101_v15   ;;  %2911 = vrot.lane.b32.xlu0 %v7528_v39, %s12780_s16 }
 0x53f   : > { %6309 = vset.pattern.permute.xlu0 %v12768_v58 }
 0x541   : > { %v8673_v3 = vpop.permute.xlu1 %2591  ;;  %v8675_v48 = vpop.permute.xlu0 %2632 }
 0x542   : > { %13182 = vst [vmem:[#allocation362_spill] sm:$0xff] %v8673_v3  ;;  %13183 = vst [vmem:[#allocation363_spill] sm:$0xff] %v8675_v48  ;;  %2816 = vperm.xlu1 %6306, %v8091_v10   ;;  %2915 = vrot.lane.b32.xlu0 %v7448_v34, %s12780_s16  ;;  %v13188_v3 = vmov 29  }
 0x545   : > { %v8680_v22 = vpop.permute.xlu1 %2595  ;;  %v8682_v26 = vpop.permute.xlu0 %2655 }
 0x546   : > { %13184 = vst [vmem:[#allocation364_spill] sm:$0xff] %v8680_v22  ;;  %13185 = vst [vmem:[#allocation365_spill] sm:$0xff] %v8682_v26  ;;  %2824 = vperm.xlu1 %6306, %v8107_v1   ;;  %2919 = vrot.lane.b32.xlu0 %v7810_v45, %s12780_s16 }
 0x549   : > { %v8687_v47 = vpop.permute.xlu1 %2599  ;;  %v8689_v58 = vpop.permute.xlu0 %2659 }
 0x54a   : > { %13186 = vst [vmem:[#allocation366_spill] sm:$0xff] %v8687_v47  ;;  %13187 = vst [vmem:[#allocation367_spill] sm:$0xff] %v8689_v58  ;;  %2847 = vrot.lane.b32.xlu1 %v7528_v39, %s12771_s14  ;;  %2923 = vrot.lane.b32.xlu0 %v7739_v43, %s12780_s16 }
 0x54b   : > { %6307 = vset.pattern.permute.xlu1 %v13188_v3 }
 0x54d   : > { %v8696_v22 = vpop.permute.xlu1 %2603  ;;  %v8698_v26 = vpop.permute.xlu0 %2663 }
 0x54e   : > { %13189 = vst [vmem:[#allocation368_spill] sm:$0xff] %v8696_v22  ;;  %13190 = vst [vmem:[#allocation369_spill] sm:$0xff] %v8698_v26  ;;  %2851 = vrot.lane.b32.xlu1 %v7448_v34, %s12771_s14  ;;  %2928 = vperm.xlu0 %6309, %v8085_v60  }
 0x551   : > { %v8703_v48 = vpop.permute.xlu1 %2608  ;;  %v8705_v58 = vpop.permute.xlu0 %2667 }
 0x552   : > { %13191 = vst [vmem:[#allocation370_spill] sm:$0xff] %v8703_v48  ;;  %13192 = vst [vmem:[#allocation371_spill] sm:$0xff] %v8705_v58  ;;  %2855 = vrot.lane.b32.xlu1 %v7810_v45, %s12771_s14  ;;  %2940 = vperm.xlu0 %6309, %v8117_v36  }
 0x555   : > { %v8710_v47 = vpop.permute.xlu1 %2616  ;;  %v8712_v3 = vpop.permute.xlu0 %2672 }
 0x556   : > { %13193 = vst [vmem:[#allocation372_spill] sm:$0xff] %v8710_v47  ;;  %13194 = vst [vmem:[#allocation373_spill] sm:$0xff] %v8712_v3  ;;  %2859 = vrot.lane.b32.xlu1 %v7739_v43, %s12771_s14  ;;  %2948 = vperm.xlu0 %6309, %v8130_v9   ;;  %v13199_v3 = vmov 15   ;;  %s13952_s14 = smov 14  }
 0x559   : > { %v8717_v26 = vpop.permute.xlu1 %2620  ;;  %v8719_v22 = vpop.permute.xlu0 %2684 }
 0x55a   : > { %13195 = vst [vmem:[#allocation374_spill] sm:$0xff] %v8717_v26  ;;  %13196 = vst [vmem:[#allocation375_spill] sm:$0xff] %v8719_v22  ;;  %2864 = vperm.xlu1 %6307, %v8085_v60   ;;  %2956 = vperm.xlu0 %6309, %v8142_v17  }
 0x55d   : > { %v8723_v58 = vpop.permute.xlu1 %2628  ;;  %v8725_v48 = vpop.permute.xlu0 %2692 }
 0x55e   : > { %13197 = vst [vmem:[#allocation376_spill] sm:$0xff] %v8723_v58  ;;  %13198 = vst [vmem:[#allocation377_spill] sm:$0xff] %v8725_v48  ;;  %2872 = vperm.xlu1 %6307, %v8101_v15   ;;  %6311 = vset.pattern.permute.xlu0 %v13199_v3  ;;  %v13379_v58 = vld [vmem:[#allocation86_spill] sm:$0xff] }
 0x55f   : > { %953 = vperm.xlu0 %6311, %v8085_v60  }
 0x561   : > { %v8730_v47 = vpop.permute.xlu1 %2636  ;;  %v8732_v39 = vpop.permute.xlu0 %2700 }
 0x562   : > { %13200 = vst [vmem:[#allocation378_spill] sm:$0xff] %v8730_v47  ;;  %13201 = vst [vmem:[#allocation379_spill] sm:$0xff] %v8732_v39  ;;  %2876 = vperm.xlu1 %6307, %v8117_v36   ;;  %v13373_v47 = vld [vmem:[#allocation43_spill] sm:$0xff] }
 0x563   : > { %968 = vperm.xlu0 %6311, %v8117_v36   ;;  %v5999_v36 = vld [vmem:[%s12655_s7 + $0x40] sm:$0xff] }
 0x565   : > { %v8736_v22 = vpop.permute.xlu1 %2657  ;;  %v8738_v26 = vpop.permute.xlu0 %2721 }
 0x566   : > { %13202 = vst [vmem:[#allocation380_spill] sm:$0xff] %v8736_v22  ;;  %13203 = vst [vmem:[#allocation381_spill] sm:$0xff] %v8738_v26  ;;  %2884 = vperm.xlu1 %6307, %v8130_v9  }
 0x567   : > { %978 = vperm.xlu0 %6311, %v8130_v9   ;;  %v13208_v9 = vmov 30  }
 0x569   : > { %v8742_v48 = vpop.permute.xlu1 %2661  ;;  %v8744_v3 = vpop.permute.xlu0 %2725 }
 0x56a   : > { %13204 = vst [vmem:[#allocation382_spill] sm:$0xff] %v8742_v48  ;;  %13205 = vst [vmem:[#allocation383_spill] sm:$0xff] %v8744_v3  ;;  %2892 = vperm.xlu1 %6307, %v8142_v17   ;;  %v6002_v3 = vld [vmem:[%s12655_s7 + $0x58] sm:$0xff] }
 0x56b   : > { %988 = vperm.xlu0 %6311, %v8142_v17  }
 0x56d   : > { %v8751_v39 = vpop.permute.xlu1 %2665  ;;  %v8753_v22 = vpop.permute.xlu0 %2729 }
 0x56e   : > { %13206 = vst [vmem:[#allocation384_spill] sm:$0xff] %v8751_v39  ;;  %13207 = vst [vmem:[#allocation385_spill] sm:$0xff] %v8753_v22  ;;  %2913 = vrot.lane.b32.xlu1 %v7658_v14, %s12780_s16  ;;  %v6004_v22 = vld [vmem:[%s12655_s7 + $0x68] sm:$0xff] }
 0x56f   : > { %3621 = vperm.xlu0 %6311, %v5999_v36   ;;  %6310 = vset.pattern.permute.xlu1 %v13208_v9  ;;  %v6006_v9 = vld [vmem:[%s12655_s7 + $0x78] sm:$0xff] }
 0x571   : > { %v8761_v26 = vpop.permute.xlu1 %2669  ;;  %v8763_v17 = vpop.permute.xlu0 %2733 }
 0x572   : > { %13209 = vst [vmem:[#allocation386_spill] sm:$0xff] %v8761_v26  ;;  %13210 = vst [vmem:[#allocation387_spill] sm:$0xff] %v8763_v17  ;;  %2917 = vrot.lane.b32.xlu1 %v7585_v11, %s12780_s16 }
 0x573   : > { %3636 = vperm.xlu0 %6311, %v6002_v3  }
 0x575   : > { %v8770_v39 = vpop.permute.xlu1 %2676  ;;  %v8772_v36 = vpop.permute.xlu0 %2740 }
 0x576   : > { %13211 = vst [vmem:[#allocation388_spill] sm:$0xff] %v8770_v39  ;;  %13212 = vst [vmem:[#allocation389_spill] sm:$0xff] %v8772_v36  ;;  %2921 = vrot.lane.b32.xlu1 %v7964_v44, %s12780_s16  ;;  %v13217_v36 = vmov 0  }
 0x577   : > { %3646 = vperm.xlu0 %6311, %v6004_v22   ;;  %v1000_v22 = vld [vmem:[%s12656_s8 + $0x8] sm:$0xff] }
 0x579   : > { %v8779_v17 = vpop.permute.xlu1 %2680  ;;  %v8781_v26 = vpop.permute.xlu0 %2752 }
 0x57a   : > { %13213 = vst [vmem:[#allocation390_spill] sm:$0xff] %v8779_v17  ;;  %13214 = vst [vmem:[#allocation391_spill] sm:$0xff] %v8781_v26  ;;  %2925 = vrot.lane.b32.xlu1 %v7879_v51, %s12780_s16  ;;  %s13957_s16 = smov 10  }
 0x57b   : > { %3656 = vperm.xlu0 %6311, %v6006_v9   ;;  %v1003_v9 = vld [vmem:[%s12656_s8 + $0x20] sm:$0xff] }
 0x57d   : > { %v8785_v3 = vpop.permute.xlu1 %2688  ;;  %v8787_v39 = vpop.permute.xlu0 %2760 }
 0x57e   : > { %13215 = vst [vmem:[#allocation392_spill] sm:$0xff] %v8785_v3  ;;  %13216 = vst [vmem:[#allocation393_spill] sm:$0xff] %v8787_v39  ;;  %2932 = vperm.xlu1 %6310, %v8075_v63   ;;  %v1005_v63 = vld [vmem:[%s12656_s8 + $0x30] sm:$0xff] }
 0x57f   : > { %6314 = vset.pattern.permute.xlu0 %v13217_v36 }
 0x580   : > { %1014 = vperm.xlu0 %6314, %v1000_v22  }
 0x581   : > { %v8794_v17 = vpop.permute.xlu1 %2696  ;;  %v8796_v26 = vpop.permute.xlu0 %2783 }
 0x582   : > { %13218 = vst [vmem:[#allocation394_spill] sm:$0xff] %v8794_v17  ;;  %13219 = vst [vmem:[#allocation395_spill] sm:$0xff] %v8796_v26  ;;  %2936 = vperm.xlu1 %6310, %v8101_v15  }
 0x584   : > { %1029 = vperm.xlu0 %6314, %v1003_v9  }
 0x585   : > { %v8802_v39 = vpop.permute.xlu1 %2719  ;;  %v8804_v3 = vpop.permute.xlu0 %2787 }
 0x586   : > { %13220 = vst [vmem:[#allocation396_spill] sm:$0xff] %v8802_v39  ;;  %13221 = vst [vmem:[#allocation397_spill] sm:$0xff] %v8804_v3  ;;  %2944 = vperm.xlu1 %6310, %v8091_v10  }
 0x588   : > { %1039 = vperm.xlu0 %6314, %v1005_v63  }
 0x589   : > { %v8810_v22 = vpop.permute.xlu1 %2723  ;;  %v8812_v17 = vpop.permute.xlu0 %2791 }
 0x58a   : > { %13222 = vst [vmem:[#allocation398_spill] sm:$0xff] %v8810_v22  ;;  %13223 = vst [vmem:[#allocation399_spill] sm:$0xff] %v8812_v17  ;;  %2952 = vperm.xlu1 %6310, %v8107_v1  }
 0x58c   : > { %1072 = vperm.xlu0 %6314, %v8085_v60   ;;  %v3126_v60 = vld [vmem:[%s12658_s10 + $0x8] sm:$0xff] }
 0x58d   : > { %v8816_v9 = vpop.permute.xlu0 %2795  ;;  %v8818_v26 = vpop.permute.xlu1 %2727 }
 0x58e   : > { %13224 = vst [vmem:[#allocation400_spill] sm:$0xff] %v8816_v9  ;;  %13225 = vst [vmem:[#allocation401_spill] sm:$0xff] %v8818_v26  ;;  %6312 = vset.pattern.permute.xlu1 %v13217_v36  ;;  %v5929_v36 = vld [vmem:[%s12651_s3 + $0x20] sm:$0xff] }
 0x590   : > { %1080 = vperm.xlu0 %6314, %v8101_v15  }
 0x591   : > { %v8822_v3 = vpop.permute.xlu0 %2800  ;;  %v8824_v39 = vpop.permute.xlu1 %2731 }
 0x592   : > { %13226 = vst [vmem:[#allocation402_spill] sm:$0xff] %v8822_v3  ;;  %13227 = vst [vmem:[#allocation403_spill] sm:$0xff] %v8824_v39 }
 0x594   : > { %1088 = vperm.xlu0 %6314, %v8091_v10  }
 0x595   : > { %v8827_v63 = vpop.permute.xlu0 %2812  ;;  %v8835_v9 = vpop.permute.xlu1 %2736 }
 0x596   : > { %13228 = vst [vmem:[#allocation404_spill] sm:$0xff] %v8827_v63  ;;  %13230 = vst [vmem:[#allocation406_spill] sm:$0xff] %v8835_v9  ;;  %v8921_v63 = vmul.f32 %v6980_v20, %v7658_v14  ;;  %v8942_v20 = vmul.f32 %v6997_v25, %v7739_v43  ;;  %v8962_v25 = vmul.f32 %v7186_v57, %v7702_v8  ;;  %v13279_v14 = vld [vmem:[#allocation68_spill] sm:$0xff] }
 0x597   : > { %v8986_v57 = vmul.f32 %v7382_v0, %v7726_v55  ;;  %v9006_v0 = vmul.f32 %v7643_v54, %v7753_v28  ;;  %v13284_v43 = vld [vmem:[#allocation140_spill] sm:$0xff] }
 0x598   : > { %1096 = vperm.xlu0 %6314, %v8107_v1   ;;  %v5931_v1 = vld [vmem:[%s12651_s3 + $0x30] sm:$0xff]  ;;  %13256 = vst [vmem:[#allocation432_spill] sm:$0xff] %v8942_v20  ;;  %13261 = vst [vmem:[#allocation437_spill] sm:$0xff] %v8962_v25  ;;  %v13394_v25 = vld [vmem:[#allocation109_spill] sm:$0xff] }
 0x599   : > { %v8830_v17 = vpop.permute.xlu0 %2820  ;;  %v8842_v10 = vpop.permute.xlu1 %2744  ;;  %13267 = vst [vmem:[#allocation443_spill] sm:$0xff] %v8986_v57  ;;  %13271 = vst [vmem:[#allocation447_spill] sm:$0xff] %v9006_v0  ;;  %v13332_v0 = vld [vmem:[#allocation29_spill] sm:$0xff]  ;;  %v13361_v57 = vld [vmem:[#allocation122_spill] sm:$0xff] }
 0x59a   : > { %13229 = vst [vmem:[#allocation405_spill] sm:$0xff] %v8830_v17  ;;  %13232 = vst [vmem:[#allocation408_spill] sm:$0xff] %v8842_v10  ;;  %v13524_v20 = vld [vmem:[#allocation247_spill] sm:$0xff] }
 0x59c   : > { %3136 = vperm.xlu0 %6314, %v3126_v60   ;;  %v5933_v60 = vld [vmem:[%s12652_s4 + $0x20] sm:$0xff] }
 0x59d   : > { %v8837_v15 = vpop.permute.xlu0 %2828  ;;  %v8854_v22 = vpop.permute.xlu1 %2748 }
 0x59e   : > { %13231 = vst [vmem:[#allocation407_spill] sm:$0xff] %v8837_v15  ;;  %13235 = vst [vmem:[#allocation411_spill] sm:$0xff] %v8854_v22 }
 0x5a0   : > { %3194 = vperm.xlu0 %6314, %v5929_v36   ;;  %v5935_v36 = vld [vmem:[%s12652_s4 + $0x30] sm:$0xff] }
 0x5a1   : > { %v8844_v39 = vpop.permute.xlu0 %2849  ;;  %v8861_v10 = vpop.permute.xlu1 %2756 }
 0x5a2   : > { %13233 = vst [vmem:[#allocation409_spill] sm:$0xff] %v8844_v39  ;;  %13237 = vst [vmem:[#allocation413_spill] sm:$0xff] %v8861_v10 }
 0x5a4   : > { %3204 = vperm.xlu0 %6314, %v5931_v1   ;;  %v5953_v1 = vld [vmem:[%s12654_s6 + $0x80] sm:$0xff] }
 0x5a5   : > { %v8849_v26 = vpop.permute.xlu0 %2853 }
 0x5a6   : > { %13234 = vst [vmem:[#allocation410_spill] sm:$0xff] %v8849_v26 }
 0x5a8   : > { %3223 = vperm.xlu0 %6314, %v5933_v60   ;;  %v5955_v60 = vld [vmem:[%s12654_s6 + $0x90] sm:$0xff] }
 0x5a9   : > { %v8856_v3 = vpop.permute.xlu0 %2857 }
 0x5aa   : > { %13236 = vst [vmem:[#allocation412_spill] sm:$0xff] %v8856_v3  ;;  %v8873_v3 = vpop.permute.xlu1 %2764 }
 0x5ab   : > { %13240 = vst [vmem:[#allocation416_spill] sm:$0xff] %v8873_v3  ;;  %v13342_v3 = vld [vmem:[#allocation104_spill] sm:$0xff] }
 0x5ac   : > { %3233 = vperm.xlu0 %6314, %v5935_v36   ;;  %v5957_v36 = vld [vmem:[%s12654_s6 + $0xa0] sm:$0xff] }
 0x5ad   : > { %v8863_v9 = vpop.permute.xlu0 %2861 }
 0x5ae   : > { %13238 = vst [vmem:[#allocation414_spill] sm:$0xff] %v8863_v9  ;;  %v8880_v9 = vpop.permute.xlu1 %2785 }
 0x5af   : > { %13242 = vst [vmem:[#allocation418_spill] sm:$0xff] %v8880_v9 }
 0x5b0   : > { %3307 = vperm.xlu0 %6314, %v5953_v1   ;;  %v5959_v1 = vld [vmem:[%s12654_s6 + $0xb0] sm:$0xff] }
 0x5b1   : > { %v8868_v15 = vpop.permute.xlu0 %2868 }
 0x5b2   : > { %13239 = vst [vmem:[#allocation415_spill] sm:$0xff] %v8868_v15 }
 0x5b4   : > { %3317 = vperm.xlu0 %6314, %v5955_v60   ;;  %v5961_v60 = vld [vmem:[%s12654_s6 + $0xc0] sm:$0xff] }
 0x5b5   : > { %v8875_v26 = vpop.permute.xlu0 %2880 }
 0x5b6   : > { %13241 = vst [vmem:[#allocation417_spill] sm:$0xff] %v8875_v26  ;;  %v8892_v26 = vpop.permute.xlu1 %2789 }
 0x5b7   : > { %13245 = vst [vmem:[#allocation421_spill] sm:$0xff] %v8892_v26  ;;  %v13336_v26 = vld [vmem:[#allocation44_spill] sm:$0xff] }
 0x5b8   : > { %3327 = vperm.xlu0 %6314, %v5957_v36   ;;  %v5963_v36 = vld [vmem:[%s12654_s6 + $0xd0] sm:$0xff] }
 0x5b9   : > { %v8882_v39 = vpop.permute.xlu0 %2888 }
 0x5ba   : > { %13243 = vst [vmem:[#allocation419_spill] sm:$0xff] %v8882_v39  ;;  %v8899_v39 = vpop.permute.xlu1 %2793 }
 0x5bb   : > { %13247 = vst [vmem:[#allocation423_spill] sm:$0xff] %v8899_v39  ;;  %v993_v39 = vmul.f32 %v6985_v21, %v7448_v34  ;;  %v8938_v34 = vmul.f32 %v6991_v23, %v7810_v45  ;;  %v8958_v23 = vmul.f32 %v7253_v32, %v7700_v61  ;;  %v8966_v45 = vmul.f32 %v7304_v4, %v7708_v2  ;;  %v13282_v2 = vld [vmem:[#allocation2_spill] sm:$0xff] }
 0x5bc   : > { %3337 = vperm.xlu0 %6314, %v5959_v1   ;;  %v5965_v1 = vld [vmem:[%s12654_s6 + $0xe0] sm:$0xff]  ;;  %v8978_v32 = vmul.f32 %v7282_v59, %v7718_v50  ;;  %v8994_v4 = vmul.f32 %v7430_v33, %v7734_v6  ;;  %v8998_v59 = vmul.f32 %v7548_v24, %v7745_v35  ;;  %v13276_v33 = vld [vmem:[#allocation55_spill] sm:$0xff]  ;;  %v13287_v50 = vld [vmem:[#allocation141_spill] sm:$0xff] }
 0x5bd   : > { %v8887_v15 = vpop.permute.xlu0 %2911  ;;  %13260 = vst [vmem:[#allocation436_spill] sm:$0xff] %v8958_v23  ;;  %13262 = vst [vmem:[#allocation438_spill] sm:$0xff] %v8966_v45  ;;  %v13278_v35 = vld [vmem:[#allocation138_spill] sm:$0xff]  ;;  %v13293_v24 = vld [vmem:[#allocation143_spill] sm:$0xff] }
 0x5be   : > { %13244 = vst [vmem:[#allocation420_spill] sm:$0xff] %v8887_v15  ;;  %13265 = vst [vmem:[#allocation441_spill] sm:$0xff] %v8978_v32  ;;  %v13296_v6 = vld [vmem:[#allocation144_spill] sm:$0xff]  ;;  %v13375_v23 = vld [vmem:[#allocation75_spill] sm:$0xff] }
 0x5bf   : > { %13269 = vst [vmem:[#allocation445_spill] sm:$0xff] %v8994_v4  ;;  %13270 = vst [vmem:[#allocation446_spill] sm:$0xff] %v8998_v59  ;;  %v13338_v59 = vld [vmem:[#allocation92_spill] sm:$0xff] }
 0x5c0   : > { %3347 = vperm.xlu0 %6314, %v5961_v60   ;;  %v5967_v60 = vld [vmem:[%s12654_s6 + $0xf0] sm:$0xff] }
 0x5c1   : > { %v8894_v17 = vpop.permute.xlu0 %2915 }
 0x5c2   : > { %13246 = vst [vmem:[#allocation422_spill] sm:$0xff] %v8894_v17  ;;  %v8911_v17 = vpop.permute.xlu1 %2797 }
 0x5c3   : > { %13250 = vst [vmem:[#allocation426_spill] sm:$0xff] %v8911_v17 }
 0x5c4   : > { %3357 = vperm.xlu0 %6314, %v5963_v36  }
 0x5c5   : > { %v8901_v9 = vpop.permute.xlu0 %2919 }
 0x5c6   : > { %13248 = vst [vmem:[#allocation424_spill] sm:$0xff] %v8901_v9  ;;  %v8917_v9 = vpop.permute.xlu1 %2804 }
 0x5c7   : > { %13252 = vst [vmem:[#allocation428_spill] sm:$0xff] %v8917_v9 }
 0x5c8   : > { %3367 = vperm.xlu0 %6314, %v5965_v1   ;;  %v8924_v1 = vadd.f32 %v7011_v30, %v993_v39  ;;  %v8946_v30 = vmul.f32 %v7071_v52, %v7686_v29  ;;  %v8970_v52 = vmul.f32 %v7229_v46, %v7710_v53  ;;  %v8990_v46 = vmul.f32 %v7593_v37, %v7732_v12  ;;  %v13273_v29 = vld [vmem:[#allocation41_spill] sm:$0xff]  ;;  %v13288_v37 = vld [vmem:[#allocation22_spill] sm:$0xff] }
 0x5c9   : > { %v8906_v15 = vpop.permute.xlu0 %2923  ;;  %v9012_v12 = vmul.f32 %v13273_v29, %v7755_v19  ;;  %v13285_v53 = vld [vmem:[#allocation81_spill] sm:$0xff]  ;;  %v9034_v39 = vmul.f32 %v13288_v37, %v13287_v50  ;;  %v13308_v50 = vld [vmem:[#allocation148_spill] sm:$0xff] }
 0x5ca   : > { %13249 = vst [vmem:[#allocation425_spill] sm:$0xff] %v8906_v15  ;;  %v8928_v15 = vmul.f32 %v7093_v18, %v7676_v40  ;;  %13257 = vst [vmem:[#allocation433_spill] sm:$0xff] %v8946_v30  ;;  %v8950_v18 = vmul.f32 %v7205_v31, %v7692_v42  ;;  %v8982_v31 = vmul.f32 %v7494_v7, %v7724_v56  ;;  %v9026_v28 = vpop.permute.xlu1 %2808  ;;  %v13290_v42 = vld [vmem:[#allocation142_spill] sm:$0xff]  ;;  %v13291_v56 = vld [vmem:[#allocation89_spill] sm:$0xff] }
 0x5cb   : > { %13263 = vst [vmem:[#allocation439_spill] sm:$0xff] %v8970_v52  ;;  %13268 = vst [vmem:[#allocation444_spill] sm:$0xff] %v8990_v46  ;;  %v9030_v54 = vmul.f32 %v13285_v53, %v13284_v43  ;;  %v9038_v8 = vmul.f32 %v13291_v56, %v13290_v42  ;;  %v13297_v40 = vld [vmem:[#allocation102_spill] sm:$0xff]  ;;  %v13299_v29 = vld [vmem:[#allocation145_spill] sm:$0xff] }
 0x5cc   : > { %3377 = vperm.xlu0 %6314, %v5967_v60   ;;  %13253 = vst [vmem:[#allocation429_spill] sm:$0xff] %v8928_v15  ;;  %v8932_v60 = vmul.f32 %v7160_v49, %v7684_v5  ;;  %13258 = vst [vmem:[#allocation434_spill] sm:$0xff] %v8950_v18  ;;  %v8954_v49 = vmul.f32 %v7118_v27, %v7694_v62  ;;  %v8974_v27 = vmul.f32 %v7398_v41, %v7716_v16  ;;  %v13275_v62 = vld [vmem:[#allocation136_spill] sm:$0xff]  ;;  %v13306_v43 = vld [vmem:[#allocation65_spill] sm:$0xff] }
 0x5cd   : > { %v8915_v36 = vpop.permute.xlu0 %2928  ;;  %13266 = vst [vmem:[#allocation442_spill] sm:$0xff] %v8982_v31  ;;  %v9002_v41 = vmul.f32 %v7088_v38, %v7747_v13  ;;  %13274 = vst [vmem:[#allocation41_spill] sm:$0xff] %v9012_v12  ;;  %v9016_v55 = vmul.f32 %v13276_v33, %v13275_v62  ;;  %v9020_v5 = vmul.f32 %v13279_v14, %v13278_v35  ;;  %v13281_v38 = vld [vmem:[#allocation139_spill] sm:$0xff]  ;;  %v13300_v62 = vld [vmem:[#allocation50_spill] sm:$0xff] }
 0x5ce   : > { %13251 = vst [vmem:[#allocation427_spill] sm:$0xff] %v8915_v36  ;;  %13254 = vst [vmem:[#allocation430_spill] sm:$0xff] %v8932_v60  ;;  %v9024_v7 = vmul.f32 %v13282_v2, %v13281_v38  ;;  %v13294_v13 = vld [vmem:[#allocation35_spill] sm:$0xff]  ;;  %v9046_v19 = vmul.f32 %v13297_v40, %v13296_v6  ;;  %v9050_v33 = vmul.f32 %v13300_v62, %v13299_v29  ;;  %v13302_v35 = vld [vmem:[#allocation146_spill] sm:$0xff] }
 0x5cf   : > { %13259 = vst [vmem:[#allocation435_spill] sm:$0xff] %v8954_v49  ;;  %13264 = vst [vmem:[#allocation440_spill] sm:$0xff] %v8974_v27  ;;  %v9042_v61 = vmul.f32 %v13294_v13, %v13293_v24  ;;  %v13303_v14 = vld [vmem:[#allocation120_spill] sm:$0xff]  ;;  %v13305_v2 = vld [vmem:[#allocation147_spill] sm:$0xff] }
 0x5d0   : > { %13277 = vst [vmem:[#allocation136_spill] sm:$0xff] %v9016_v55  ;;  %13280 = vst [vmem:[#allocation55_spill] sm:$0xff] %v9020_v5  ;;  %v9054_v38 = vmul.f32 %v13303_v14, %v13302_v35  ;;  %v9058_v53 = vmul.f32 %v13306_v43, %v13305_v2  ;;  %v13309_v37 = vld [vmem:[#allocation12_spill] sm:$0xff]  ;;  %v13310_v56 = vld [vmem:[#allocation149_spill] sm:$0xff] }
 0x5d1   : > { %v8934_v21 = vpop.permute.xlu0 %2940  ;;  %13283 = vst [vmem:[#allocation138_spill] sm:$0xff] %v9026_v28  ;;  %13286 = vst [vmem:[#allocation68_spill] sm:$0xff] %v9030_v54  ;;  %v9062_v42 = vmul.f32 %v13309_v37, %v13308_v50  ;;  %v13311_v24 = vld [vmem:[#allocation80_spill] sm:$0xff]  ;;  %v13313_v6 = vld [vmem:[#allocation150_spill] sm:$0xff] }
 0x5d2   : > { %13255 = vst [vmem:[#allocation431_spill] sm:$0xff] %v8934_v21  ;;  %13289 = vst [vmem:[#allocation139_spill] sm:$0xff] %v9034_v39  ;;  %v9066_v13 = vmul.f32 %v13311_v24, %v13310_v56  ;;  %v13314_v40 = vld [vmem:[#allocation4_spill] sm:$0xff]  ;;  %v13315_v62 = vld [vmem:[#allocation151_spill] sm:$0xff] }
 0x5d3   : > { %13292 = vst [vmem:[#allocation2_spill] sm:$0xff] %v9038_v8  ;;  %13295 = vst [vmem:[#allocation140_spill] sm:$0xff] %v9042_v61  ;;  %v9070_v29 = vmul.f32 %v13314_v40, %v13313_v6  ;;  %v13316_v36 = vld [vmem:[#allocation103_spill] sm:$0xff]  ;;  %v13319_v2 = vld [vmem:[#allocation152_spill] sm:$0xff] }
 0x5d4   : > { %13298 = vst [vmem:[#allocation81_spill] sm:$0xff] %v9046_v19  ;;  %13301 = vst [vmem:[#allocation141_spill] sm:$0xff] %v9050_v33  ;;  %v9074_v35 = vmul.f32 %v13316_v36, %v13315_v62  ;;  %v13320_v43 = vld [vmem:[#allocation23_spill] sm:$0xff]  ;;  %v13321_v50 = vld [vmem:[#allocation153_spill] sm:$0xff] }
 0x5d5   : > { %v9008_v16 = vpop.permute.xlu0 %2948  ;;  %13304 = vst [vmem:[#allocation22_spill] sm:$0xff] %v9054_v38  ;;  %13307 = vst [vmem:[#allocation142_spill] sm:$0xff] %v9058_v53  ;;  %v9080_v28 = vmul.f32 %v13320_v43, %v13319_v2  ;;  %v13322_v37 = vld [vmem:[#allocation115_spill] sm:$0xff]  ;;  %v13324_v56 = vld [vmem:[#allocation154_spill] sm:$0xff] }
 0x5d6   : > { %13272 = vst [vmem:[#allocation448_spill] sm:$0xff] %v9008_v16  ;;  %13312 = vst [vmem:[#allocation89_spill] sm:$0xff] %v9066_v13  ;;  %v9084_v16 = vmul.f32 %v13322_v37, %v13321_v50  ;;  %v13325_v24 = vld [vmem:[#allocation38_spill] sm:$0xff]  ;;  %v13326_v6 = vld [vmem:[#allocation155_spill] sm:$0xff] }
 0x5d7   : > { %13317 = vst [vmem:[#allocation143_spill] sm:$0xff] %v9074_v35  ;;  %v9088_v21 = vmul.f32 %v13325_v24, %v13324_v56  ;;  %v13327_v40 = vld [vmem:[#allocation129_spill] sm:$0xff]  ;;  %v13329_v36 = vld [vmem:[#allocation156_spill] sm:$0xff]  ;;  %v13333_v43 = vld [vmem:[#allocation158_spill] sm:$0xff] }
 0x5d8   : > { %13323 = vst [vmem:[#allocation144_spill] sm:$0xff] %v9084_v16  ;;  %v9092_v17 = vmul.f32 %v13327_v40, %v13326_v6  ;;  %v13330_v62 = vld [vmem:[#allocation52_spill] sm:$0xff]  ;;  %v13334_v46 = vld [vmem:[#allocation67_spill] sm:$0xff]  ;;  %v13339_v40 = vld [vmem:[#allocation161_spill] sm:$0xff] }
 0x5d9   : > { %v9076_v14 = vpop.permute.xlu0 %2956  ;;  %v9096_v9 = vmul.f32 %v13330_v62, %v13329_v36  ;;  %v9104_v50 = vmul.f32 %v13334_v46, %v13333_v43  ;;  %v13335_v37 = vld [vmem:[#allocation159_spill] sm:$0xff]  ;;  %v13337_v24 = vld [vmem:[#allocation160_spill] sm:$0xff]  ;;  %v13341_v62 = vld [vmem:[#allocation162_spill] sm:$0xff]  ;;  %v9126_v43 = vpop.permute.xlu1 %2816 }
 0x5da   : > { %13318 = vst [vmem:[#allocation35_spill] sm:$0xff] %v9076_v14  ;;  %13328 = vst [vmem:[#allocation102_spill] sm:$0xff] %v9092_v17  ;;  %v13331_v14 = vld [vmem:[#allocation157_spill] sm:$0xff]  ;;  %v9108_v56 = vmul.f32 %v13336_v26, %v13335_v37  ;;  %v9112_v6 = vmul.f32 %v13338_v59, %v13337_v24  ;;  %v13344_v31 = vld [vmem:[#allocation70_spill] sm:$0xff] }
 0x5db   : > { %v9100_v2 = vmul.f32 %v13332_v0, %v13331_v14  ;;  %v13340_v17 = vld [vmem:[#allocation57_spill] sm:$0xff]  ;;  %v9120_v0 = vmul.f32 %v13342_v3, %v13341_v62  ;;  %v13343_v14 = vld [vmem:[#allocation163_spill] sm:$0xff]  ;;  %13345 = vst [vmem:[#allocation145_spill] sm:$0xff] %v9126_v43  ;;  %v13346_v26 = vld [vmem:[#allocation164_spill] sm:$0xff] }
 0x5dc   : > { %v9116_v36 = vmul.f32 %v13340_v17, %v13339_v40  ;;  %v9124_v46 = vmul.f32 %v13344_v31, %v13343_v14  ;;  %v13347_v37 = vld [vmem:[#allocation117_spill] sm:$0xff]  ;;  %v13349_v24 = vld [vmem:[#allocation82_spill] sm:$0xff]  ;;  %v13352_v3 = vld [vmem:[#allocation167_spill] sm:$0xff] }
 0x5dd   : > { %v9130_v38 = vmul.f32 %v13347_v37, %v13346_v26  ;;  %v13348_v59 = vld [vmem:[#allocation165_spill] sm:$0xff]  ;;  %v13350_v17 = vld [vmem:[#allocation166_spill] sm:$0xff]  ;;  %v13354_v31 = vld [vmem:[#allocation168_spill] sm:$0xff] }
 0x5de   : > { %v9134_v10 = vmul.f32 %v13349_v24, %v13348_v59  ;;  %v13351_v40 = vld [vmem:[#allocation130_spill] sm:$0xff]  ;;  %v13355_v14 = vld [vmem:[#allocation11_spill] sm:$0xff]  ;;  %v13356_v43 = vld [vmem:[#allocation169_spill] sm:$0xff] }
 0x5df   : > { %v9138_v22 = vmul.f32 %v13351_v40, %v13350_v17  ;;  %v13353_v62 = vld [vmem:[#allocation90_spill] sm:$0xff]  ;;  %v9146_v16 = vmul.f32 %v13355_v14, %v13354_v31  ;;  %v13357_v27 = vld [vmem:[#allocation105_spill] sm:$0xff]  ;;  %v13360_v24 = vld [vmem:[#allocation171_spill] sm:$0xff]  ;;  %v9160_v40 = vpop.permute.xlu0 %953 }
 0x5e0   : > { %v9142_v4 = vmul.f32 %v13353_v62, %v13352_v3  ;;  %v9150_v26 = vmul.f32 %v13357_v27, %v13356_v43  ;;  %v13358_v37 = vld [vmem:[#allocation170_spill] sm:$0xff]  ;;  %v13359_v19 = vld [vmem:[#allocation21_spill] sm:$0xff]  ;;  %v9158_v17 = vmul.f32 %v13361_v57, %v13360_v24  ;;  %v13362_v3 = vld [vmem:[#allocation172_spill] sm:$0xff] }
 0x5e1   : > { %v9154_v59 = vmul.f32 %v13359_v19, %v13358_v37  ;;  %v13363_v62 = vld [vmem:[#allocation34_spill] sm:$0xff]  ;;  %v13364_v31 = vld [vmem:[#allocation173_spill] sm:$0xff]  ;;  %v13368_v19 = vld [vmem:[#allocation175_spill] sm:$0xff] }
 0x5e2   : > { %v9164_v35 = vmul.f32 %v13363_v62, %v13362_v3  ;;  %v13365_v14 = vld [vmem:[#allocation10_spill] sm:$0xff]  ;;  %v13367_v43 = vld [vmem:[#allocation49_spill] sm:$0xff]  ;;  %v13369_v37 = vld [vmem:[#allocation28_spill] sm:$0xff] }
 0x5e3   : > { %v9168_v45 = vmul.f32 %v13365_v14, %v13364_v31  ;;  %v13366_v27 = vld [vmem:[#allocation174_spill] sm:$0xff]  ;;  %v9176_v48 = vmul.f32 %v13369_v37, %v13368_v19  ;;  %v13370_v57 = vld [vmem:[#allocation176_spill] sm:$0xff]  ;;  %v13372_v13 = vld [vmem:[#allocation177_spill] sm:$0xff] }
 0x5e4   : > { %v9172_v8 = vmul.f32 %v13367_v43, %v13366_v27  ;;  %v13371_v24 = vld [vmem:[#allocation62_spill] sm:$0xff]  ;;  %v9184_v3 = vmul.f32 %v13373_v47, %v13372_v13  ;;  %v13376_v14 = vld [vmem:[#allocation179_spill] sm:$0xff]  ;;  %v13378_v43 = vld [vmem:[#allocation180_spill] sm:$0xff] }
 0x5e5   : > { %v9180_v32 = vmul.f32 %v13371_v24, %v13370_v57  ;;  %v13374_v62 = vld [vmem:[#allocation178_spill] sm:$0xff]  ;;  %v9196_v19 = vmul.f32 %v13379_v58, %v13378_v43  ;;  %v13381_v37 = vld [vmem:[#allocation181_spill] sm:$0xff]  ;;  %v13385_v53 = vld [vmem:[#allocation95_spill] sm:$0xff] }
 0x5e6   : > { %v9188_v31 = vmul.f32 %v13375_v23, %v13374_v62  ;;  %v13377_v54 = vld [vmem:[#allocation58_spill] sm:$0xff]  ;;  %v13382_v52 = vld [vmem:[#allocation73_spill] sm:$0xff]  ;;  %v13387_v13 = vld [vmem:[#allocation183_spill] sm:$0xff] }
 0x5e7   : > { %v9192_v27 = vmul.f32 %v13377_v54, %v13376_v14  ;;  %13380 = vst [vmem:[#allocation50_spill] sm:$0xff] %v9196_v19  ;;  %v9200_v57 = vmul.f32 %v13382_v52, %v13381_v37  ;;  %v13384_v24 = vld [vmem:[#allocation182_spill] sm:$0xff]  ;;  %v13388_v18 = vld [vmem:[#allocation97_spill] sm:$0xff]  ;;  %v13390_v62 = vld [vmem:[#allocation184_spill] sm:$0xff] }
 0x5e8   : > { %v9204_v47 = vmul.f32 %v13385_v53, %v13384_v24  ;;  %v9208_v23 = vmul.f32 %v13388_v18, %v13387_v13  ;;  %v13391_v5 = vld [vmem:[#allocation113_spill] sm:$0xff]  ;;  %v13396_v43 = vld [vmem:[#allocation186_spill] sm:$0xff]  ;;  %v13397_v33 = vld [vmem:[#allocation128_spill] sm:$0xff]  ;;  %v9226_v24 = vpop.permute.xlu1 %2824  ;;  %v969_v18 = vpop.permute.xlu0 %968 }
 0x5e9   : > { %13383 = vst [vmem:[#allocation146_spill] sm:$0xff] %v9200_v57  ;;  %v9212_v54 = vmul.f32 %v13391_v5, %v13390_v62  ;;  %v13393_v14 = vld [vmem:[#allocation185_spill] sm:$0xff]  ;;  %v9220_v52 = vmul.f32 %v13397_v33, %v13396_v43  ;;  %v13399_v37 = vld [vmem:[#allocation187_spill] sm:$0xff]  ;;  %13402 = vst [vmem:[#allocation80_spill] sm:$0xff] %v9226_v24  ;;  %v994_v33 = vmul.f32 %v969_v18, %v7585_v11 }
 0x5ea   : > { %13386 = vst [vmem:[#allocation120_spill] sm:$0xff] %v9204_v47  ;;  %13389 = vst [vmem:[#allocation147_spill] sm:$0xff] %v9208_v23  ;;  %v9216_v58 = vmul.f32 %v13394_v25, %v13393_v14  ;;  %v13400_v60 = vld [vmem:[#allocation123_spill] sm:$0xff]  ;;  %v13403_v13 = vld [vmem:[#allocation188_spill] sm:$0xff] }
 0x5eb   : > { %13392 = vst [vmem:[#allocation65_spill] sm:$0xff] %v9212_v54  ;;  %13398 = vst [vmem:[#allocation12_spill] sm:$0xff] %v9220_v52  ;;  %v9224_v53 = vmul.f32 %v13400_v60, %v13399_v37  ;;  %v13404_v47 = vld [vmem:[#allocation19_spill] sm:$0xff]  ;;  %v13406_v5 = vld [vmem:[#allocation190_spill] sm:$0xff] }
 0x5ec   : > { %13395 = vst [vmem:[#allocation148_spill] sm:$0xff] %v9216_v58  ;;  %v9230_v55 = vmul.f32 %v13404_v47, %v13403_v13  ;;  %v13407_v62 = vld [vmem:[#allocation33_spill] sm:$0xff]  ;;  %v13409_v25 = vld [vmem:[#allocation191_spill] sm:$0xff]  ;;  %v13412_v43 = vld [vmem:[#allocation192_spill] sm:$0xff] }
 0x5ed   : > { %13401 = vst [vmem:[#allocation149_spill] sm:$0xff] %v9224_v53  ;;  %v9234_v54 = vmul.f32 %v13407_v62, %v13406_v5  ;;  %v13410_v14 = vld [vmem:[#allocation25_spill] sm:$0xff]  ;;  %v13413_v60 = vld [vmem:[#allocation48_spill] sm:$0xff]  ;;  %v13416_v52 = vld [vmem:[#allocation39_spill] sm:$0xff] }
 0x5ee   : > { %13405 = vst [vmem:[#allocation150_spill] sm:$0xff] %v9230_v55  ;;  %v9238_v58 = vmul.f32 %v13410_v14, %v13409_v25  ;;  %v9243_v37 = vmul.f32 %v13413_v60, %v13412_v43  ;;  %v13415_v24 = vld [vmem:[#allocation193_spill] sm:$0xff]  ;;  %v13418_v47 = vld [vmem:[#allocation194_spill] sm:$0xff]  ;;  %v13419_v13 = vld [vmem:[#allocation63_spill] sm:$0xff] }
 0x5ef   : > { %13408 = vst [vmem:[#allocation4_spill] sm:$0xff] %v9234_v54  ;;  %v9247_v53 = vmul.f32 %v13416_v52, %v13415_v24  ;;  %v9251_v55 = vmul.f32 %v13419_v13, %v13418_v47  ;;  %v13421_v5 = vld [vmem:[#allocation195_spill] sm:$0xff]  ;;  %v13422_v62 = vld [vmem:[#allocation53_spill] sm:$0xff]  ;;  %v13424_v25 = vld [vmem:[#allocation196_spill] sm:$0xff] }
 0x5f0   : > { %13411 = vst [vmem:[#allocation151_spill] sm:$0xff] %v9238_v58  ;;  %13414 = vst [vmem:[#allocation103_spill] sm:$0xff] %v9243_v37  ;;  %v9255_v54 = vmul.f32 %v13422_v62, %v13421_v5  ;;  %v13425_v14 = vld [vmem:[#allocation77_spill] sm:$0xff]  ;;  %v13428_v18 = vld [vmem:[#allocation66_spill] sm:$0xff] }
 0x5f1   : > { %13417 = vst [vmem:[#allocation152_spill] sm:$0xff] %v9247_v53  ;;  %13420 = vst [vmem:[#allocation23_spill] sm:$0xff] %v9251_v55  ;;  %v9259_v58 = vmul.f32 %v13425_v14, %v13424_v25  ;;  %v13427_v11 = vld [vmem:[#allocation197_spill] sm:$0xff]  ;;  %v13430_v60 = vld [vmem:[#allocation198_spill] sm:$0xff] }
 0x5f2   : > { %13423 = vst [vmem:[#allocation153_spill] sm:$0xff] %v9255_v54  ;;  %v9263_v43 = vmul.f32 %v13428_v18, %v13427_v11  ;;  %v13431_v37 = vld [vmem:[#allocation101_spill] sm:$0xff]  ;;  %v13434_v47 = vld [vmem:[#allocation199_spill] sm:$0xff]  ;;  %v13437_v5 = vld [vmem:[#allocation200_spill] sm:$0xff] }
 0x5f3   : > { %13426 = vst [vmem:[#allocation115_spill] sm:$0xff] %v9259_v58  ;;  %v9267_v52 = vmul.f32 %v13431_v37, %v13430_v60  ;;  %v13433_v24 = vld [vmem:[#allocation5_spill] sm:$0xff]  ;;  %v13435_v13 = vld [vmem:[#allocation79_spill] sm:$0xff]  ;;  %v13438_v62 = vld [vmem:[#allocation114_spill] sm:$0xff]  ;;  %v979_v37 = vpop.permute.xlu0 %978 }
 0x5f4   : > { %13429 = vst [vmem:[#allocation154_spill] sm:$0xff] %v9263_v43  ;;  %v1050_v53 = vadd.f32 %v13433_v24, %v994_v33  ;;  %v9272_v55 = vmul.f32 %v13435_v13, %v13434_v47  ;;  %v9276_v54 = vmul.f32 %v13438_v62, %v13437_v5  ;;  %v13440_v25 = vld [vmem:[#allocation201_spill] sm:$0xff]  ;;  %v13441_v14 = vld [vmem:[#allocation88_spill] sm:$0xff]  ;;  %v13443_v11 = vld [vmem:[#allocation202_spill] sm:$0xff]  ;;  %v996_v62 = vmul.f32 %v979_v37, %v7964_v44 }
 0x5f5   : > { %13432 = vst [vmem:[#allocation38_spill] sm:$0xff] %v9267_v52  ;;  %v9280_v58 = vmul.f32 %v13441_v14, %v13440_v25  ;;  %v13444_v18 = vld [vmem:[#allocation127_spill] sm:$0xff]  ;;  %v13447_v52 = vld [vmem:[#allocation100_spill] sm:$0xff]  ;;  %v13453_v25 = vld [vmem:[#allocation118_spill] sm:$0xff] }
 0x5f6   : > { %13436 = vst [vmem:[#allocation155_spill] sm:$0xff] %v9272_v55  ;;  %13439 = vst [vmem:[#allocation129_spill] sm:$0xff] %v9276_v54  ;;  %v9284_v43 = vmul.f32 %v13444_v18, %v13443_v11  ;;  %v13446_v60 = vld [vmem:[#allocation203_spill] sm:$0xff]  ;;  %v13449_v24 = vld [vmem:[#allocation204_spill] sm:$0xff]  ;;  %v1114_v5 = vadd.f32 %v9062_v42, %v1050_v53 }
 0x5f7   : > { %13442 = vst [vmem:[#allocation156_spill] sm:$0xff] %v9280_v58  ;;  %v9288_v33 = vmul.f32 %v13447_v52, %v13446_v60  ;;  %v13450_v47 = vld [vmem:[#allocation15_spill] sm:$0xff]  ;;  %v13452_v54 = vld [vmem:[#allocation205_spill] sm:$0xff]  ;;  %v13455_v58 = vld [vmem:[#allocation206_spill] sm:$0xff] }
 0x5f8   : > { %13445 = vst [vmem:[#allocation52_spill] sm:$0xff] %v9284_v43  ;;  %v9292_v13 = vmul.f32 %v13450_v47, %v13449_v24  ;;  %v9298_v14 = vmul.f32 %v13453_v25, %v13452_v54  ;;  %v13456_v11 = vld [vmem:[#allocation30_spill] sm:$0xff]  ;;  %v13458_v43 = vld [vmem:[#allocation207_spill] sm:$0xff]  ;;  %v13459_v55 = vld [vmem:[#allocation133_spill] sm:$0xff]  ;;  %v9312_v47 = vpop.permute.xlu1 %2847 }
 0x5f9   : > { %13448 = vst [vmem:[#allocation157_spill] sm:$0xff] %v9288_v33  ;;  %v9302_v18 = vmul.f32 %v13456_v11, %v13455_v58  ;;  %v9306_v52 = vmul.f32 %v13459_v55, %v13458_v43  ;;  %v13461_v60 = vld [vmem:[#allocation208_spill] sm:$0xff]  ;;  %v13462_v33 = vld [vmem:[#allocation46_spill] sm:$0xff]  ;;  %13464 = vst [vmem:[#allocation160_spill] sm:$0xff] %v9312_v47  ;;  %v1178_v58 = vadd.f32 %v9070_v29, %v1114_v5 }
 0x5fa   : > { %13451 = vst [vmem:[#allocation29_spill] sm:$0xff] %v9292_v13  ;;  %13454 = vst [vmem:[#allocation158_spill] sm:$0xff] %v9298_v14  ;;  %v9310_v24 = vmul.f32 %v13462_v33, %v13461_v60  ;;  %v13465_v42 = vld [vmem:[#allocation210_spill] sm:$0xff]  ;;  %v13466_v44 = vld [vmem:[#allocation61_spill] sm:$0xff] }
 0x5fb   : > { %13457 = vst [vmem:[#allocation67_spill] sm:$0xff] %v9302_v18  ;;  %13460 = vst [vmem:[#allocation159_spill] sm:$0xff] %v9306_v52  ;;  %v9316_v53 = vmul.f32 %v13466_v44, %v13465_v42  ;;  %v13468_v54 = vld [vmem:[#allocation240_spill] sm:$0xff]  ;;  %v13469_v37 = vld [vmem:[#allocation17_spill] sm:$0xff] }
 0x5fc   : > { %13463 = vst [vmem:[#allocation44_spill] sm:$0xff] %v9310_v24  ;;  %v1108_v25 = vmul.f32 %v13469_v37, %v13468_v54  ;;  %v13470_v11 = vld [vmem:[#allocation7_spill] sm:$0xff]  ;;  %v13472_v55 = vld [vmem:[#allocation24_spill] sm:$0xff]  ;;  %v13477_v47 = vld [vmem:[#allocation213_spill] sm:$0xff]  ;;  %v989_v54 = vpop.permute.xlu0 %988  ;;  %v1242_v37 = vadd.f32 %v9100_v2, %v1178_v58 }
 0x5fd   : > { %13467 = vst [vmem:[#allocation92_spill] sm:$0xff] %v9316_v53  ;;  %v1052_v14 = vadd.f32 %v13470_v11, %v996_v62  ;;  %v13471_v18 = vld [vmem:[#allocation211_spill] sm:$0xff]  ;;  %v13474_v52 = vld [vmem:[#allocation212_spill] sm:$0xff]  ;;  %v13480_v42 = vld [vmem:[#allocation214_spill] sm:$0xff]  ;;  %v998_v11 = vmul.f32 %v989_v54, %v7879_v51 }
 0x5fe   : > { %v9324_v43 = vmul.f32 %v13472_v55, %v13471_v18  ;;  %v13475_v33 = vld [vmem:[#allocation76_spill] sm:$0xff]  ;;  %v13481_v44 = vld [vmem:[#allocation99_spill] sm:$0xff]  ;;  %v13483_v29 = vld [vmem:[#allocation242_spill] sm:$0xff]  ;;  %v1306_v51 = vadd.f32 %v9080_v28, %v1242_v37 }
 0x5ff   : > { %v9328_v60 = vmul.f32 %v13475_v33, %v13474_v52  ;;  %v13478_v24 = vld [vmem:[#allocation36_spill] sm:$0xff]  ;;  %v9336_v53 = vmul.f32 %v13481_v44, %v13480_v42  ;;  %v13484_v5 = vld [vmem:[#allocation6_spill] sm:$0xff]  ;;  %v1116_v18 = vadd.f32 %v1108_v25, %v1052_v14  ;;  %v13485_v55 = vld [vmem:[#allocation215_spill] sm:$0xff] }
 0x600   : > { %13473 = vst [vmem:[#allocation161_spill] sm:$0xff] %v9324_v43  ;;  %v9332_v13 = vmul.f32 %v13478_v24, %v13477_v47  ;;  %v1172_v62 = vmul.f32 %v13484_v5, %v13483_v29  ;;  %v13486_v52 = vld [vmem:[#allocation51_spill] sm:$0xff]  ;;  %v13489_v24 = vld [vmem:[#allocation112_spill] sm:$0xff]  ;;  %v13496_v5 = vld [vmem:[#allocation245_spill] sm:$0xff]  ;;  %v9376_v28 = vpop.permute.xlu0 %3621 }
 0x601   : > { %13476 = vst [vmem:[#allocation57_spill] sm:$0xff] %v9328_v60  ;;  %13482 = vst [vmem:[#allocation104_spill] sm:$0xff] %v9336_v53  ;;  %v9344_v33 = vmul.f32 %v13486_v52, %v13485_v55  ;;  %v13488_v60 = vld [vmem:[#allocation216_spill] sm:$0xff]  ;;  %v13497_v2 = vld [vmem:[#allocation31_spill] sm:$0xff] }
 0x602   : > { %13479 = vst [vmem:[#allocation162_spill] sm:$0xff] %v9332_v13  ;;  %v9348_v47 = vmul.f32 %v13489_v24, %v13488_v60  ;;  %v13491_v13 = vld [vmem:[#allocation217_spill] sm:$0xff]  ;;  %v13492_v42 = vld [vmem:[#allocation64_spill] sm:$0xff]  ;;  %v1236_v14 = vmul.f32 %v13497_v2, %v13496_v5  ;;  %v1180_v25 = vadd.f32 %v1172_v62, %v1116_v18  ;;  %v13499_v55 = vld [vmem:[#allocation218_spill] sm:$0xff]  ;;  %v9374_v2 = vpop.permute.xlu1 %2851 }
 0x603   : > { %13487 = vst [vmem:[#allocation163_spill] sm:$0xff] %v9344_v33  ;;  %v9352_v44 = vmul.f32 %v13492_v42, %v13491_v13  ;;  %v13494_v53 = vld [vmem:[#allocation220_spill] sm:$0xff]  ;;  %v13498_v58 = vld [vmem:[#allocation9_spill] sm:$0xff]  ;;  %v13502_v60 = vld [vmem:[#allocation219_spill] sm:$0xff] }
 0x604   : > { %13490 = vst [vmem:[#allocation70_spill] sm:$0xff] %v9348_v47  ;;  %v13495_v23 = vld [vmem:[#allocation20_spill] sm:$0xff]  ;;  %v1054_v54 = vadd.f32 %v13498_v58, %v998_v11  ;;  %v13500_v52 = vld [vmem:[#allocation125_spill] sm:$0xff]  ;;  %v13503_v24 = vld [vmem:[#allocation78_spill] sm:$0xff]  ;;  %v1370_v11 = vadd.f32 %v9108_v56, %v1306_v51  ;;  %v1244_v58 = vadd.f32 %v1236_v14, %v1180_v25 }
 0x605   : > { %13493 = vst [vmem:[#allocation164_spill] sm:$0xff] %v9352_v44  ;;  %v1110_v29 = vmul.f32 %v13495_v23, %v13494_v53  ;;  %v9362_v33 = vmul.f32 %v13500_v52, %v13499_v55  ;;  %v9366_v47 = vmul.f32 %v13503_v24, %v13502_v60  ;;  %v13505_v13 = vld [vmem:[#allocation221_spill] sm:$0xff]  ;;  %v13506_v42 = vld [vmem:[#allocation87_spill] sm:$0xff]  ;;  %v13508_v23 = vld [vmem:[#allocation222_spill] sm:$0xff] }
 0x606   : > { %v9370_v44 = vmul.f32 %v13506_v42, %v13505_v13  ;;  %v13509_v53 = vld [vmem:[#allocation8_spill] sm:$0xff]  ;;  %13510 = vst [vmem:[#allocation166_spill] sm:$0xff] %v9374_v2  ;;  %13511 = vst [vmem:[#allocation130_spill] sm:$0xff] %v9376_v28  ;;  %v13513_v37 = vld [vmem:[#allocation26_spill] sm:$0xff]  ;;  %v1434_v56 = vadd.f32 %v9088_v21, %v1370_v11 }
 0x607   : > { %13501 = vst [vmem:[#allocation117_spill] sm:$0xff] %v9362_v33  ;;  %13504 = vst [vmem:[#allocation165_spill] sm:$0xff] %v9366_v47  ;;  %v1174_v5 = vmul.f32 %v13509_v53, %v13508_v23  ;;  %v13512_v62 = vld [vmem:[#allocation244_spill] sm:$0xff]  ;;  %v1118_v55 = vadd.f32 %v1110_v29, %v1054_v54  ;;  %v13514_v52 = vld [vmem:[#allocation223_spill] sm:$0xff] }
 0x608   : > { %13507 = vst [vmem:[#allocation82_spill] sm:$0xff] %v9370_v44  ;;  %v1300_v18 = vmul.f32 %v13513_v37, %v13512_v62  ;;  %v13515_v60 = vld [vmem:[#allocation98_spill] sm:$0xff]  ;;  %v13517_v13 = vld [vmem:[#allocation224_spill] sm:$0xff]  ;;  %v13518_v42 = vld [vmem:[#allocation27_spill] sm:$0xff] }
 0x609   : > { %v9383_v24 = vmul.f32 %v13515_v60, %v13514_v52  ;;  %v1302_v33 = vmul.f32 %v13518_v42, %v13517_v13  ;;  %v13519_v44 = vld [vmem:[#allocation225_spill] sm:$0xff]  ;;  %v13520_v23 = vld [vmem:[#allocation116_spill] sm:$0xff]  ;;  %v1182_v14 = vadd.f32 %v1174_v5, %v1118_v55  ;;  %v13526_v51 = vld [vmem:[#allocation226_spill] sm:$0xff] }
 0x60a   : > { %v9389_v53 = vmul.f32 %v13520_v23, %v13519_v44  ;;  %v13522_v2 = vld [vmem:[#allocation229_spill] sm:$0xff]  ;;  %v13523_v28 = vld [vmem:[#allocation32_spill] sm:$0xff]  ;;  %v1308_v29 = vadd.f32 %v1300_v18, %v1244_v58  ;;  %v13527_v25 = vld [vmem:[#allocation42_spill] sm:$0xff] }
 0x60b   : > { %13516 = vst [vmem:[#allocation167_spill] sm:$0xff] %v9383_v24  ;;  %v1238_v47 = vmul.f32 %v13523_v28, %v13522_v2  ;;  %v13525_v62 = vld [vmem:[#allocation45_spill] sm:$0xff]  ;;  %v1430_v54 = vmul.f32 %v13527_v25, %v13526_v51  ;;  %v13528_v52 = vld [vmem:[#allocation227_spill] sm:$0xff]  ;;  %v13531_v42 = vld [vmem:[#allocation228_spill] sm:$0xff]  ;;  %v9406_v28 = vpop.permute.xlu0 %3636 }
 0x60c   : > { %13521 = vst [vmem:[#allocation90_spill] sm:$0xff] %v9389_v53  ;;  %v1364_v37 = vmul.f32 %v13525_v62, %v13524_v20  ;;  %v13529_v60 = vld [vmem:[#allocation131_spill] sm:$0xff]  ;;  %v13532_v44 = vld [vmem:[#allocation56_spill] sm:$0xff]  ;;  %v13533_v53 = vld [vmem:[#allocation246_spill] sm:$0xff]  ;;  %v1498_v20 = vadd.f32 %v9116_v36, %v1434_v56 }
 0x60d   : > { %v9400_v13 = vmul.f32 %v13529_v60, %v13528_v52  ;;  %v1558_v23 = vmul.f32 %v13532_v44, %v13531_v42  ;;  %v13534_v24 = vld [vmem:[#allocation40_spill] sm:$0xff]  ;;  %13535 = vst [vmem:[#allocation11_spill] sm:$0xff] %v9406_v28  ;;  %v1246_v18 = vadd.f32 %v1238_v47, %v1182_v14  ;;  %v6427_v5 = vld [vmem:[%s12657_s9] sm:$0xff]   ;;  %v13537_v58 = vld [vmem:[#allocation71_spill] sm:$0xff]  ;;  %v9424_v47 = vpop.permute.xlu1 %2855 }
 0x60e   : > { %v1428_v2 = vmul.f32 %v13534_v24, %v13533_v53  ;;  %v1372_v21 = vadd.f32 %v1364_v37, %v1308_v29  ;;  %v13536_v11 = vld [vmem:[#allocation230_spill] sm:$0xff]  ;;  %v13538_v62 = vld [vmem:[#allocation231_spill] sm:$0xff]  ;;  %v13540_v52 = vld [vmem:[#allocation232_spill] sm:$0xff]  ;;  %13544 = vst [vmem:[#allocation169_spill] sm:$0xff] %v9424_v47  ;;  %v1562_v42 = vadd.f32 %v9096_v9, %v1498_v20  ;;  %6116 = vmatprep.mubr.msk.bf16.mxu0 %vm3065_vm4, %v6427_v5 }
 0x60f   : > { %13530 = vst [vmem:[#allocation168_spill] sm:$0xff] %v9400_v13  ;;  %v9414_v55 = vmul.f32 %v13537_v58, %v13536_v11  ;;  %v13539_v51 = vld [vmem:[#allocation47_spill] sm:$0xff]  ;;  %v13541_v24 = vld [vmem:[#allocation96_spill] sm:$0xff]  ;;  %v13542_v60 = vld [vmem:[#allocation233_spill] sm:$0xff]  ;;  %v1310_v11 = vadd.f32 %v1302_v33, %v1246_v18  ;;  %v9444_v9 = vpop.permute.xlu0 %3646 }
 0x610   : > { %v1366_v25 = vmul.f32 %v13539_v51, %v13538_v62  ;;  %v9420_v53 = vmul.f32 %v13541_v24, %v13540_v52  ;;  %v13543_v36 = vld [vmem:[#allocation60_spill] sm:$0xff]  ;;  %v13545_v56 = vld [vmem:[#allocation249_spill] sm:$0xff]  ;;  %v13546_v29 = vld [vmem:[#allocation59_spill] sm:$0xff]  ;;  %v1436_v44 = vadd.f32 %v1428_v2, %v1372_v21  ;;  %13555 = vst [vmem:[#allocation105_spill] sm:$0xff] %v9444_v9  ;;  %v1626_v18 = vadd.f32 %v9124_v46, %v1562_v42 }
 0x611   : > { %v1494_v37 = vmul.f32 %v13543_v36, %v13542_v60  ;;  %v1492_v14 = vmul.f32 %v13546_v29, %v13545_v56  ;;  %v13547_v58 = vld [vmem:[#allocation234_spill] sm:$0xff]  ;;  %v13548_v62 = vld [vmem:[#allocation108_spill] sm:$0xff]  ;;  %v13549_v52 = vld [vmem:[#allocation235_spill] sm:$0xff]  ;;  %v9482_v57 = vpop.permute.xlu1 %2859 }
 0x612   : > { %v9432_v51 = vmul.f32 %v13548_v62, %v13547_v58  ;;  %v13550_v24 = vld [vmem:[#allocation74_spill] sm:$0xff]  ;;  %v13551_v13 = vld [vmem:[#allocation236_spill] sm:$0xff]  ;;  %v13552_v60 = vld [vmem:[#allocation121_spill] sm:$0xff]  ;;  %v1374_v29 = vadd.f32 %v1366_v25, %v1310_v11  ;;  %13576 = vst [vmem:[#allocation170_spill] sm:$0xff] %v9482_v57 }
 0x613   : > { %v1622_v28 = vmul.f32 %v13550_v24, %v13549_v52  ;;  %v9438_v36 = vmul.f32 %v13552_v60, %v13551_v13  ;;  %v13553_v47 = vld [vmem:[#allocation237_spill] sm:$0xff]  ;;  %v13554_v43 = vld [vmem:[#allocation84_spill] sm:$0xff]  ;;  %v3125_v33 = vld [vmem:[%s12658_s10] sm:$0xff]  ;;  %v1500_v5 = vadd.f32 %v1492_v14, %v1436_v44  ;;  %v1690_v44 = vadd.f32 %v9104_v50, %v1626_v18  ;;  %v9484_v30 = vpop.permute.xlu0 %3656 }
 0x614   : > { %v9442_v56 = vmul.f32 %v13554_v43, %v13553_v47  ;;  %v13556_v2 = vld [vmem:[#allocation248_spill] sm:$0xff]  ;;  %v13557_v20 = vld [vmem:[#allocation54_spill] sm:$0xff]  ;;  %3131 = vperm.xlu1 %6312, %v3125_v33   ;;  %v13560_v43 = vld [vmem:[#allocation239_spill] sm:$0xff]  ;;  %v1438_v33 = vadd.f32 %v1430_v54, %v1374_v29  ;;  %13577 = vst [vmem:[#allocation21_spill] sm:$0xff] %v9484_v30 }
 0x615   : > { %v1556_v21 = vmul.f32 %v13557_v20, %v13556_v2  ;;  %v13558_v13 = vld [vmem:[#allocation238_spill] sm:$0xff]  ;;  %v13561_v47 = vld [vmem:[#allocation93_spill] sm:$0xff]  ;;  %v13564_v49 = vld [vmem:[#allocation243_spill] sm:$0xff]  ;;  %v1754_v54 = vadd.f32 %v9134_v10, %v1690_v44 }
 0x616   : > { %v13559_v58 = vld [vmem:[#allocation134_spill] sm:$0xff]  ;;  %v9458_v52 = vmul.f32 %v13561_v47, %v13560_v43  ;;  %v13562_v24 = vld [vmem:[#allocation241_spill] sm:$0xff]  ;;  %v3127_v46 = vld [vmem:[%s12658_s10 + $0x10] sm:$0xff] }
 0x617   : > { %v9454_v62 = vmul.f32 %v13559_v58, %v13558_v13  ;;  %v13563_v60 = vld [vmem:[#allocation110_spill] sm:$0xff]  ;;  %v13566_v25 = vld [vmem:[#allocation251_spill] sm:$0xff]  ;;  %v13567_v14 = vld [vmem:[#allocation72_spill] sm:$0xff]  ;;  %v1564_v11 = vadd.f32 %v1556_v21, %v1500_v5  ;;  %v1502_v5 = vadd.f32 %v1494_v37, %v1438_v33  ;;  %v1818_v44 = vadd.f32 %v9112_v6, %v1754_v54 }
 0x618   : > { %v9462_v9 = vmul.f32 %v13563_v60, %v13562_v24  ;;  %v13565_v61 = vld [vmem:[#allocation126_spill] sm:$0xff]  ;;  %v1620_v42 = vmul.f32 %v13567_v14, %v13566_v25  ;;  %v13569_v13 = vld [vmem:[#allocation69_spill] sm:$0xff]  ;;  %v13570_v43 = vld [vmem:[#allocation252_spill] sm:$0xff]  ;;  %3141 = vperm.xlu1 %6312, %v3127_v46  }
 0x619   : > { %v9466_v2 = vmul.f32 %v13565_v61, %v13564_v49  ;;  %v13568_v20 = vld [vmem:[#allocation250_spill] sm:$0xff]  ;;  %v13572_v60 = vld [vmem:[#allocation253_spill] sm:$0xff]  ;;  %v13573_v49 = vld [vmem:[#allocation83_spill] sm:$0xff]  ;;  %v1566_v33 = vadd.f32 %v1558_v23, %v1502_v5  ;;  %v1882_v23 = vadd.f32 %v9142_v4, %v1818_v44  ;;  %v1015_v5 = vpop.permute.xlu0 %1014 }
 0x61a   : > { %v1684_v58 = vmul.f32 %v13569_v13, %v13568_v20  ;;  %v13571_v47 = vld [vmem:[#allocation94_spill] sm:$0xff]  ;;  %v1748_v61 = vmul.f32 %v13573_v49, %v13572_v60  ;;  %v13578_v25 = vld [vmem:[#allocation255_spill] sm:$0xff]  ;;  %v1628_v18 = vadd.f32 %v1620_v42, %v1564_v11  ;;  %v13580_v29 = vld [vmem:[#allocation256_spill] sm:$0xff]  ;;  %v1048_v4 = vadd.f32 %v1015_v5, %v8921_v63 }
 0x61b   : > { %v1812_v24 = vmul.f32 %v13571_v47, %v13570_v43  ;;  %v13574_v19 = vld [vmem:[#allocation254_spill] sm:$0xff]  ;;  %v13579_v50 = vld [vmem:[#allocation91_spill] sm:$0xff]  ;;  %v13582_v13 = vld [vmem:[#allocation257_spill] sm:$0xff] }
 0x61c   : > { %v13575_v15 = vld [vmem:[#allocation106_spill] sm:$0xff]  ;;  %v1876_v21 = vmul.f32 %v13579_v50, %v13578_v25  ;;  %v13581_v14 = vld [vmem:[#allocation119_spill] sm:$0xff]  ;;  %v13587_v30 = vld [vmem:[#allocation124_spill] sm:$0xff]  ;;  %v1692_v11 = vadd.f32 %v1684_v58, %v1628_v18  ;;  %v1630_v18 = vadd.f32 %v1622_v28, %v1566_v33 }
 0x61d   : > { %v1940_v12 = vmul.f32 %v13575_v15, %v13574_v19  ;;  %v9491_v20 = vmul.f32 %v13581_v14, %v13580_v29  ;;  %v13583_v43 = vld [vmem:[#allocation107_spill] sm:$0xff]  ;;  %v13584_v15 = vld [vmem:[#allocation258_spill] sm:$0xff]  ;;  %v13585_v19 = vld [vmem:[#allocation132_spill] sm:$0xff] }
 0x61e   : > { %v2004_v47 = vmul.f32 %v13583_v43, %v13582_v13  ;;  %v9497_v60 = vmul.f32 %v13585_v19, %v13584_v15  ;;  %v13586_v49 = vld [vmem:[#allocation259_spill] sm:$0xff]  ;;  %v3128_v10 = vld [vmem:[%s12658_s10 + $0x18] sm:$0xff]  ;;  %v13590_v25 = vld [vmem:[#allocation260_spill] sm:$0xff]  ;;  %v1756_v54 = vadd.f32 %v1748_v61, %v1692_v11  ;;  %v1946_v11 = vadd.f32 %v9120_v0, %v1882_v23 }
 0x61f   : > { %v9501_v57 = vmul.f32 %v13587_v30, %v13586_v49  ;;  %v13588_v37 = vld [vmem:[#allocation261_spill] sm:$0xff]  ;;  %v13589_v46 = vld [vmem:[#allocation267_spill] sm:$0xff]  ;;  %v13591_v50 = vld [vmem:[#allocation268_spill] sm:$0xff]  ;;  %3146 = vperm.xlu1 %6312, %v3128_v10  }
 0x620   : > { %v9508_v42 = vmul.f32 %v13589_v46, %v13588_v37  ;;  %v9513_v29 = vmul.f32 %v13591_v50, %v13590_v25  ;;  %v13592_v14 = vld [vmem:[#allocation264_spill] sm:$0xff]  ;;  %v13593_v13 = vld [vmem:[#allocation269_spill] sm:$0xff]  ;;  %v13595_v43 = vld [vmem:[#allocation262_spill] sm:$0xff]  ;;  %v1820_v33 = vadd.f32 %v1812_v24, %v1756_v54  ;;  %v2010_v23 = vadd.f32 %v9150_v26, %v1946_v11  ;;  %v9575_v54 = vpop.permute.xlu0 %1029 }
 0x621   : > { %v9517_v30 = vmul.f32 %v13593_v13, %v13592_v14  ;;  %v13596_v15 = vld [vmem:[#allocation270_spill] sm:$0xff]  ;;  %v13598_v39 = vld [vmem:[#allocation271_spill] sm:$0xff]  ;;  %v13601_v6 = vld [vmem:[#allocation272_spill] sm:$0xff] }
 0x622   : > { %v9521_v19 = vmul.f32 %v13596_v15, %v13595_v43  ;;  %v13597_v49 = vld [vmem:[#allocation266_spill] sm:$0xff]  ;;  %v13600_v46 = vld [vmem:[#allocation263_spill] sm:$0xff]  ;;  %v13602_v25 = vld [vmem:[#allocation265_spill] sm:$0xff]  ;;  %v1884_v24 = vadd.f32 %v1876_v21, %v1820_v33 }
 0x623   : > { %13594 = vst [vmem:[#allocation171_spill] sm:$0xff] %v9517_v30  ;;  %v9525_v37 = vmul.f32 %v13598_v39, %v13597_v49  ;;  %v9529_v58 = vmul.f32 %v13601_v6, %v13600_v46  ;;  %v13603_v50 = vld [vmem:[#allocation276_spill] sm:$0xff]  ;;  %v13604_v13 = vld [vmem:[#allocation279_spill] sm:$0xff]  ;;  %v13605_v43 = vld [vmem:[#allocation274_spill] sm:$0xff]  ;;  %v9544_v46 = vpop.permute.xlu1 %2864  ;;  %v1694_v6 = vadd.f32 %v9414_v55, %v1630_v18 }
 0x624   : > { %v9534_v14 = vmul.f32 %v13603_v50, %v13602_v25  ;;  %v9538_v15 = vmul.f32 %v13605_v43, %v13604_v13  ;;  %v13606_v39 = vld [vmem:[#allocation273_spill] sm:$0xff]  ;;  %v13607_v49 = vld [vmem:[#allocation283_spill] sm:$0xff]  ;;  %13608 = vst [vmem:[#allocation172_spill] sm:$0xff] %v9544_v46  ;;  %v13609_v61 = vld [vmem:[#allocation280_spill] sm:$0xff]  ;;  %v1948_v33 = vadd.f32 %v1940_v12, %v1884_v24 }
 0x625   : > { %13599 = vst [vmem:[#allocation122_spill] sm:$0xff] %v9525_v37  ;;  %v9542_v37 = vmul.f32 %v13607_v49, %v13606_v39  ;;  %v5930_v28 = vld [vmem:[%s12651_s3 + $0x28] sm:$0xff]  ;;  %v13610_v10 = vld [vmem:[#allocation285_spill] sm:$0xff]  ;;  %v13611_v25 = vld [vmem:[#allocation278_spill] sm:$0xff]  ;;  %v1758_v55 = vadd.f32 %v9442_v56, %v1694_v6 }
 0x626   : > { %v9552_v44 = vmul.f32 %v13610_v10, %v13609_v61  ;;  %v13612_v50 = vld [vmem:[#allocation286_spill] sm:$0xff]  ;;  %v13614_v39 = vld [vmem:[#allocation287_spill] sm:$0xff]  ;;  %v13616_v49 = vld [vmem:[#allocation288_spill] sm:$0xff]  ;;  %v1112_v61 = vadd.f32 %v9146_v16, %v1048_v4  ;;  %3199 = vperm.xlu1 %6312, %v5930_v28  }
 0x627   : > { %v9558_v13 = vmul.f32 %v13612_v50, %v13611_v25  ;;  %v13613_v43 = vld [vmem:[#allocation282_spill] sm:$0xff]  ;;  %v13615_v5 = vld [vmem:[#allocation275_spill] sm:$0xff]  ;;  %v13617_v10 = vld [vmem:[#allocation284_spill] sm:$0xff]  ;;  %v1822_v6 = vadd.f32 %v9420_v53, %v1758_v55 }
 0x628   : > { %v9562_v63 = vmul.f32 %v13614_v39, %v13613_v43  ;;  %v9566_v46 = vmul.f32 %v13616_v49, %v13615_v5  ;;  %v13618_v30 = vld [vmem:[#allocation289_spill] sm:$0xff]  ;;  %v13620_v25 = vld [vmem:[#allocation290_spill] sm:$0xff]  ;;  %v13623_v39 = vld [vmem:[#allocation292_spill] sm:$0xff]  ;;  %v1176_v21 = vadd.f32 %v9154_v59, %v1112_v61  ;;  %v2074_v49 = vadd.f32 %v9130_v38, %v2010_v23 }
 0x629   : > { %v9571_v0 = vmul.f32 %v13618_v30, %v13617_v10  ;;  %v13619_v18 = vld [vmem:[#allocation277_spill] sm:$0xff]  ;;  %v13625_v16 = vld [vmem:[#allocation291_spill] sm:$0xff]  ;;  %v13627_v56 = vld [vmem:[#allocation298_spill] sm:$0xff]  ;;  %v1886_v38 = vadd.f32 %v9458_v52, %v1822_v6 }
 0x62a   : > { %v9579_v50 = vmul.f32 %v13620_v25, %v13619_v18  ;;  %v13622_v43 = vld [vmem:[#allocation281_spill] sm:$0xff]  ;;  %v13626_v4 = vld [vmem:[#allocation299_spill] sm:$0xff]  ;;  %v13630_v10 = vld [vmem:[#allocation294_spill] sm:$0xff]  ;;  %v1240_v12 = vadd.f32 %v9168_v45, %v1176_v21  ;;  %v2138_v23 = vadd.f32 %v9158_v17, %v2074_v49 }
 0x62b   : > { %v9583_v5 = vmul.f32 %v13623_v39, %v13622_v43  ;;  %v9587_v30 = vmul.f32 %v13626_v4, %v13625_v16  ;;  %v5932_v26 = vld [vmem:[%s12651_s3 + $0x38] sm:$0xff]  ;;  %v13631_v18 = vld [vmem:[#allocation302_spill] sm:$0xff]  ;;  %v13632_v43 = vld [vmem:[#allocation300_spill] sm:$0xff] }
 0x62c   : > { %13621 = vst [vmem:[#allocation34_spill] sm:$0xff] %v9579_v50  ;;  %v13628_v28 = vld [vmem:[#allocation301_spill] sm:$0xff]  ;;  %v9601_v25 = vmul.f32 %v13631_v18, %v13630_v10  ;;  %v13633_v39 = vld [vmem:[#allocation303_spill] sm:$0xff]  ;;  %v13635_v61 = vld [vmem:[#allocation296_spill] sm:$0xff]  ;;  %3209 = vperm.xlu1 %6312, %v5932_v26  }
 0x62d   : > { %13624 = vst [vmem:[#allocation173_spill] sm:$0xff] %v9583_v5  ;;  %v9595_v11 = vmul.f32 %v13628_v28, %v13627_v56  ;;  %v9605_v59 = vmul.f32 %v13633_v39, %v13632_v43  ;;  %v13636_v16 = vld [vmem:[#allocation304_spill] sm:$0xff]  ;;  %v9611_v5 = vpop.permute.xlu1 %2872  ;;  %v13638_v24 = vld [vmem:[#allocation293_spill] sm:$0xff]  ;;  %v13639_v53 = vld [vmem:[#allocation306_spill] sm:$0xff]  ;;  %v2012_v56 = vadd.f32 %v2004_v47, %v1948_v33  ;;  %v9620_v28 = vpop.permute.xlu0 %1039 }
 0x62e   : > { %v9609_v4 = vmul.f32 %v13636_v16, %v13635_v61  ;;  %13637 = vst [vmem:[#allocation49_spill] sm:$0xff] %v9611_v5  ;;  %v9616_v55 = vmul.f32 %v13639_v53, %v13638_v24  ;;  %v13640_v10 = vld [vmem:[#allocation295_spill] sm:$0xff]  ;;  %v13641_v18 = vld [vmem:[#allocation308_spill] sm:$0xff]  ;;  %v13642_v39 = vld [vmem:[#allocation297_spill] sm:$0xff]  ;;  %v1304_v24 = vadd.f32 %v9164_v35, %v1240_v12  ;;  %v1950_v53 = vadd.f32 %v9432_v51, %v1886_v38 }
 0x62f   : > { %13629 = vst [vmem:[#allocation10_spill] sm:$0xff] %v9595_v11  ;;  %13634 = vst [vmem:[#allocation174_spill] sm:$0xff] %v9605_v59  ;;  %v9624_v43 = vmul.f32 %v13641_v18, %v13640_v10  ;;  %v13643_v61 = vld [vmem:[#allocation310_spill] sm:$0xff]  ;;  %v13644_v45 = vld [vmem:[#allocation111_spill] sm:$0xff]  ;;  %v2076_v10 = vadd.f32 %v9491_v20, %v2012_v56  ;;  %v2202_v56 = vadd.f32 %v9138_v22, %v2138_v23 }
 0x630   : > { %v9628_v16 = vmul.f32 %v13643_v61, %v13642_v39  ;;  %v991_v21 = vmul.f32 %v9160_v40, %v13644_v45  ;;  %v5934_v17 = vld [vmem:[%s12652_s4 + $0x28] sm:$0xff]  ;;  %v13645_v52 = vld [vmem:[#allocation305_spill] sm:$0xff]  ;;  %v13647_v33 = vld [vmem:[#allocation314_spill] sm:$0xff] }
 0x631   : > { %v13646_v47 = vld [vmem:[#allocation313_spill] sm:$0xff]  ;;  %v13648_v6 = vld [vmem:[#allocation315_spill] sm:$0xff]  ;;  %v13649_v18 = vld [vmem:[#allocation316_spill] sm:$0xff]  ;;  %3228 = vperm.xlu1 %6312, %v5934_v17  }
 0x632   : > { %v9638_v26 = vmul.f32 %v13646_v47, %v13645_v52  ;;  %v9642_v49 = vmul.f32 %v13648_v6, %v13647_v33  ;;  %v13650_v40 = vld [vmem:[#allocation317_spill] sm:$0xff]  ;;  %v13651_v35 = vld [vmem:[#allocation318_spill] sm:$0xff]  ;;  %v13652_v12 = vld [vmem:[#allocation319_spill] sm:$0xff]  ;;  %v1368_v47 = vadd.f32 %v9176_v48, %v1304_v24  ;;  %v9674_v24 = vpop.permute.xlu1 %2876 }
 0x633   : > { %v9648_v39 = vmul.f32 %v13650_v40, %v13649_v18  ;;  %v9652_v61 = vmul.f32 %v13652_v12, %v13651_v35  ;;  %v13653_v45 = vld [vmem:[#allocation312_spill] sm:$0xff]  ;;  %v13655_v33 = vld [vmem:[#allocation307_spill] sm:$0xff]  ;;  %v13656_v6 = vld [vmem:[#allocation322_spill] sm:$0xff]  ;;  %v2014_v18 = vadd.f32 %v9462_v9, %v1950_v53  ;;  %v1073_v40 = vpop.permute.xlu0 %1072 }
 0x634   : > { %v13654_v5 = vld [vmem:[#allocation320_spill] sm:$0xff]  ;;  %v9661_v59 = vmul.f32 %v13656_v6, %v13655_v33  ;;  %v13657_v51 = vld [vmem:[#allocation309_spill] sm:$0xff]  ;;  %v13660_v35 = vld [vmem:[#allocation311_spill] sm:$0xff]  ;;  %v1432_v33 = vadd.f32 %v9172_v8, %v1368_v47 }
 0x635   : > { %v9656_v52 = vmul.f32 %v13654_v5, %v13653_v45  ;;  %v13658_v20 = vld [vmem:[#allocation324_spill] sm:$0xff]  ;;  %v13661_v12 = vld [vmem:[#allocation326_spill] sm:$0xff]  ;;  %v13663_v45 = vld [vmem:[#allocation3_spill] sm:$0xff] }
 0x636   : > { %v9665_v38 = vmul.f32 %v13658_v20, %v13657_v51  ;;  %v9671_v5 = vmul.f32 %v13661_v12, %v13660_v35  ;;  %v1047_v48 = vadd.f32 %v13663_v45, %v991_v21  ;;  %v13664_v6 = vld [vmem:[#allocation137_spill] sm:$0xff]  ;;  %v13667_v17 = vld [vmem:[#allocation332_spill] sm:$0xff]  ;;  %v13668_v51 = vld [vmem:[#allocation331_spill] sm:$0xff]  ;;  %v2140_v21 = vadd.f32 %v9501_v57, %v2076_v10 }
 0x637   : > { %v1103_v11 = vmul.f32 %v1073_v40, %v13664_v6  ;;  %v5936_v22 = vld [vmem:[%s12652_s4 + $0x38] sm:$0xff]  ;;  %v9687_v20 = vmul.f32 %v13668_v51, %v13667_v17  ;;  %v2078_v35 = vadd.f32 %v9438_v36, %v2014_v18  ;;  %v13670_v12 = vld [vmem:[#allocation334_spill] sm:$0xff]  ;;  %v13673_v40 = vld [vmem:[#allocation328_spill] sm:$0xff]  ;;  %v2266_v36 = vadd.f32 %v9529_v58, %v2202_v56  ;;  %v1081_v18 = vpop.permute.xlu0 %1080 }
 0x638   : > { %13659 = vst [vmem:[#allocation175_spill] sm:$0xff] %v9665_v38  ;;  %13662 = vst [vmem:[#allocation28_spill] sm:$0xff] %v9671_v5  ;;  %v13665_v23 = vld [vmem:[#allocation321_spill] sm:$0xff]  ;;  %v13674_v45 = vld [vmem:[#allocation336_spill] sm:$0xff]  ;;  %v1496_v5 = vadd.f32 %v9184_v3, %v1432_v33  ;;  %3238 = vperm.xlu1 %6312, %v5936_v22  }
 0x639   : > { %v13666_v9 = vld [vmem:[#allocation329_spill] sm:$0xff]  ;;  %13669 = vst [vmem:[#allocation176_spill] sm:$0xff] %v9687_v20  ;;  %v9697_v6 = vmul.f32 %v13674_v45, %v13673_v40  ;;  %v13676_v38 = vld [vmem:[#allocation338_spill] sm:$0xff]  ;;  %v13677_v17 = vld [vmem:[#allocation323_spill] sm:$0xff]  ;;  %v2142_v10 = vadd.f32 %v9466_v2, %v2078_v35 }
 0x63a   : > { %v9683_v53 = vmul.f32 %v13666_v9, %v13665_v23  ;;  %v13671_v8 = vld [vmem:[#allocation333_spill] sm:$0xff]  ;;  %v1111_v23 = vadd.f32 %v1103_v11, %v1047_v48  ;;  %v13675_v9 = vld [vmem:[#allocation330_spill] sm:$0xff]  ;;  %v13678_v51 = vld [vmem:[#allocation340_spill] sm:$0xff]  ;;  %v1560_v3 = vadd.f32 %v9180_v32, %v1496_v5  ;;  %v2204_v32 = vadd.f32 %v9497_v60, %v2140_v21 }
 0x63b   : > { %v9693_v47 = vmul.f32 %v13671_v8, %v13670_v12  ;;  %v9702_v50 = vmul.f32 %v13676_v38, %v13675_v9  ;;  %v9706_v57 = vmul.f32 %v13678_v51, %v13677_v17  ;;  %v13679_v12 = vld [vmem:[#allocation325_spill] sm:$0xff]  ;;  %v13680_v8 = vld [vmem:[#allocation342_spill] sm:$0xff]  ;;  %v13681_v38 = vld [vmem:[#allocation135_spill] sm:$0xff]  ;;  %v2206_v60 = vadd.f32 %v9454_v62, %v2142_v10 }
 0x63c   : > { %v9712_v40 = vmul.f32 %v13680_v8, %v13679_v12  ;;  %v1175_v11 = vadd.f32 %v9024_v7, %v1111_v23  ;;  %v1105_v48 = vmul.f32 %v1081_v18, %v13681_v38  ;;  %v5954_v33 = vld [vmem:[%s12654_s6 + $0x88] sm:$0xff]  ;;  %v13685_v22 = vld [vmem:[#allocation344_spill] sm:$0xff]  ;;  %v13687_v17 = vld [vmem:[#allocation345_spill] sm:$0xff]  ;;  %v9737_v18 = vpop.permute.xlu1 %2884  ;;  %v1624_v12 = vadd.f32 %v9192_v27, %v1560_v3 }
 0x63d   : > { %13672 = vst [vmem:[#allocation62_spill] sm:$0xff] %v9693_v47  ;;  %v13682_v45 = vld [vmem:[#allocation335_spill] sm:$0xff]  ;;  %v13686_v9 = vld [vmem:[#allocation348_spill] sm:$0xff]  ;;  %v13688_v7 = vld [vmem:[#allocation350_spill] sm:$0xff]  ;;  %v1051_v21 = vadd.f32 %v9575_v54, %v8938_v34  ;;  %3312 = vperm.xlu1 %6312, %v5954_v33  }
 0x63e   : > { %v13683_v58 = vld [vmem:[#allocation343_spill] sm:$0xff]  ;;  %v9730_v51 = vmul.f32 %v13687_v17, %v13686_v9  ;;  %v1239_v8 = vadd.f32 %v9002_v41, %v1175_v11  ;;  %v1113_v38 = vadd.f32 %v1105_v48, %v8924_v1  ;;  %v1089_v9 = vpop.permute.xlu0 %1088  ;;  %v1688_v17 = vadd.f32 %v9188_v31, %v1624_v12  ;;  %v13693_v41 = vld [vmem:[#allocation433_spill] sm:$0xff]  ;;  %v13698_v34 = vld [vmem:[#allocation356_spill] sm:$0xff] }
 0x63f   : > { %v9722_v56 = vmul.f32 %v13683_v58, %v13682_v45  ;;  %v13684_v2 = vld [vmem:[#allocation327_spill] sm:$0xff]  ;;  %v13690_v45 = vld [vmem:[#allocation352_spill] sm:$0xff]  ;;  %v13691_v58 = vld [vmem:[#allocation349_spill] sm:$0xff]  ;;  %v2268_v12 = vadd.f32 %v9538_v15, %v2204_v32 }
 0x640   : > { %v9726_v35 = vmul.f32 %v13685_v22, %v13684_v2  ;;  %v13689_v5 = vld [vmem:[#allocation347_spill] sm:$0xff]  ;;  %v9744_v2 = vmul.f32 %v13691_v58, %v13690_v45  ;;  %v2330_v22 = vadd.f32 %v9552_v44, %v2266_v36  ;;  %v1177_v11 = vadd.f32 %v13693_v41, %v1113_v38  ;;  %v13694_v1 = vld [vmem:[#allocation209_spill] sm:$0xff]  ;;  %v13695_v44 = vld [vmem:[#allocation346_spill] sm:$0xff]  ;;  %v9783_v32 = vpop.permute.xlu1 %2892 }
 0x641   : > { %v9735_v23 = vmul.f32 %v13689_v5, %v13688_v7  ;;  %v13692_v27 = vld [vmem:[#allocation139_spill] sm:$0xff]  ;;  %v1107_v48 = vmul.f32 %v1089_v9, %v13694_v1  ;;  %v5956_v7 = vld [vmem:[%s12654_s6 + $0x98] sm:$0xff]  ;;  %v13696_v36 = vld [vmem:[#allocation354_spill] sm:$0xff] }
 0x642   : > { %v1303_v3 = vadd.f32 %v13692_v27, %v1239_v8  ;;  %v9759_v62 = vmul.f32 %v13696_v36, %v13695_v44  ;;  %v13697_v10 = vld [vmem:[#allocation337_spill] sm:$0xff]  ;;  %v13699_v33 = vld [vmem:[#allocation339_spill] sm:$0xff]  ;;  %v13700_v31 = vld [vmem:[#allocation358_spill] sm:$0xff]  ;;  %v1097_v15 = vpop.permute.xlu0 %1096  ;;  %3322 = vperm.xlu1 %6312, %v5956_v7  }
 0x643   : > { %v9763_v54 = vmul.f32 %v13698_v34, %v13697_v10  ;;  %v9767_v5 = vmul.f32 %v13700_v31, %v13699_v33  ;;  %v13702_v8 = vld [vmem:[#allocation146_spill] sm:$0xff]  ;;  %v13703_v45 = vld [vmem:[#allocation41_spill] sm:$0xff]  ;;  %v1115_v41 = vadd.f32 %v1107_v48, %v1051_v21  ;;  %v13705_v1 = vld [vmem:[#allocation351_spill] sm:$0xff]  ;;  %v2394_v33 = vadd.f32 %v9616_v55, %v2330_v22 }
 0x644   : > { %v1752_v38 = vadd.f32 %v13702_v8, %v1688_v17  ;;  %v1367_v58 = vadd.f32 %v13703_v45, %v1303_v3  ;;  %v13704_v9 = vld [vmem:[#allocation429_spill] sm:$0xff]  ;;  %v13706_v44 = vld [vmem:[#allocation359_spill] sm:$0xff]  ;;  %v13708_v10 = vld [vmem:[#allocation360_spill] sm:$0xff]  ;;  %v2270_v31 = vadd.f32 %v9534_v14, %v2206_v60  ;;  %v2332_v14 = vadd.f32 %v9562_v63, %v2268_v12 }
 0x645   : > { %13701 = vst [vmem:[#allocation177_spill] sm:$0xff] %v9767_v5  ;;  %v1241_v27 = vadd.f32 %v13704_v9, %v1177_v11  ;;  %v9775_v36 = vmul.f32 %v13706_v44, %v13705_v1  ;;  %v13707_v47 = vld [vmem:[#allocation341_spill] sm:$0xff]  ;;  %v13710_v17 = vld [vmem:[#allocation50_spill] sm:$0xff]  ;;  %v13711_v11 = vld [vmem:[#allocation140_spill] sm:$0xff] }
 0x646   : > { %v9779_v34 = vmul.f32 %v13708_v10, %v13707_v47  ;;  %v1816_v3 = vadd.f32 %v13710_v17, %v1752_v38  ;;  %v1431_v21 = vadd.f32 %v13711_v11, %v1367_v58  ;;  %v13712_v48 = vld [vmem:[#allocation435_spill] sm:$0xff]  ;;  %v13713_v45 = vld [vmem:[#allocation161_spill] sm:$0xff]  ;;  %v13714_v1 = vld [vmem:[#allocation366_spill] sm:$0xff]  ;;  %v2334_v63 = vadd.f32 %v9571_v0, %v2270_v31 }
 0x647   : > { %v1305_v8 = vadd.f32 %v13712_v48, %v1241_v27  ;;  %v1179_v9 = vadd.f32 %v13713_v45, %v1115_v41  ;;  %v5958_v47 = vld [vmem:[%s12654_s6 + $0xa8] sm:$0xff]  ;;  %v13715_v55 = vld [vmem:[#allocation361_spill] sm:$0xff]  ;;  %v13716_v60 = vld [vmem:[#allocation432_spill] sm:$0xff]  ;;  %v2396_v31 = vadd.f32 %v9624_v43, %v2332_v14 }
 0x648   : > { %13709 = vst [vmem:[#allocation43_spill] sm:$0xff] %v9779_v34  ;;  %v9794_v22 = vmul.f32 %v13715_v55, %v13714_v1  ;;  %v1053_v7 = vadd.f32 %v9620_v28, %v13716_v60  ;;  %v13717_v38 = vld [vmem:[#allocation189_spill] sm:$0xff]  ;;  %v13718_v58 = vld [vmem:[#allocation147_spill] sm:$0xff]  ;;  %v13719_v27 = vld [vmem:[#allocation136_spill] sm:$0xff]  ;;  %v2458_v1 = vadd.f32 %v9642_v49, %v2394_v33  ;;  %3332 = vperm.xlu1 %6312, %v5958_v47  }
 0x649   : > { %v1109_v44 = vmul.f32 %v1097_v15, %v13717_v38  ;;  %v1880_v10 = vadd.f32 %v13718_v58, %v1816_v3  ;;  %v1495_v17 = vadd.f32 %v13719_v27, %v1431_v21  ;;  %v13720_v41 = vld [vmem:[#allocation430_spill] sm:$0xff]  ;;  %v13721_v48 = vld [vmem:[#allocation29_spill] sm:$0xff]  ;;  %v13722_v34 = vld [vmem:[#allocation368_spill] sm:$0xff]  ;;  %v2398_v43 = vadd.f32 %v9628_v16, %v2334_v63 }
 0x64a   : > { %v1369_v11 = vadd.f32 %v13720_v41, %v1305_v8  ;;  %v1243_v45 = vadd.f32 %v13721_v48, %v1179_v9  ;;  %v13723_v5 = vld [vmem:[#allocation363_spill] sm:$0xff]  ;;  %v13725_v28 = vld [vmem:[#allocation120_spill] sm:$0xff]  ;;  %v13726_v55 = vld [vmem:[#allocation141_spill] sm:$0xff] }
 0x64b   : > { %v9806_v20 = vmul.f32 %v13723_v5, %v13722_v34  ;;  %v1117_v12 = vadd.f32 %v1109_v44, %v1053_v7  ;;  %v1944_v15 = vadd.f32 %v13725_v28, %v1880_v10  ;;  %v1559_v3 = vadd.f32 %v13726_v55, %v1495_v17  ;;  %v13727_v60 = vld [vmem:[#allocation437_spill] sm:$0xff]  ;;  %v13728_v38 = vld [vmem:[#allocation162_spill] sm:$0xff]  ;;  %v13731_v49 = vld [vmem:[#allocation364_spill] sm:$0xff]  ;;  %v9827_v44 = vpop.permute.xlu1 %2913 }
 0x64c   : > { %v1433_v21 = vadd.f32 %v13727_v60, %v1369_v11  ;;  %v1307_v8 = vadd.f32 %v13728_v38, %v1243_v45  ;;  %v5960_v9 = vld [vmem:[%s12654_s6 + $0xb8] sm:$0xff]  ;;  %v13729_v5 = vld [vmem:[#allocation362_spill] sm:$0xff]  ;;  %v13732_v0 = vld [vmem:[#allocation372_spill] sm:$0xff] }
 0x64d   : > { %13724 = vst [vmem:[#allocation178_spill] sm:$0xff] %v9806_v20  ;;  %v13730_v34 = vld [vmem:[#allocation370_spill] sm:$0xff]  ;;  %v9823_v33 = vmul.f32 %v13732_v0, %v13731_v49  ;;  %v13733_v47 = vld [vmem:[#allocation151_spill] sm:$0xff]  ;;  %v13734_v10 = vld [vmem:[#allocation148_spill] sm:$0xff]  ;;  %3342 = vperm.xlu1 %6312, %v5960_v9   ;;  %v2460_v9 = vadd.f32 %v9648_v39, %v2396_v31 }
 0x64e   : > { %v9819_v58 = vmul.f32 %v13730_v34, %v13729_v5  ;;  %v1181_v7 = vadd.f32 %v13733_v47, %v1117_v12  ;;  %v2008_v27 = vadd.f32 %v13734_v10, %v1944_v15  ;;  %v13735_v17 = vld [vmem:[#allocation55_spill] sm:$0xff]  ;;  %v13736_v11 = vld [vmem:[#allocation434_spill] sm:$0xff]  ;;  %v13738_v55 = vld [vmem:[#allocation365_spill] sm:$0xff]  ;;  %v2522_v5 = vadd.f32 %v9706_v57, %v2458_v1 }
 0x64f   : > { %v1623_v41 = vadd.f32 %v13735_v17, %v1559_v3  ;;  %v1497_v48 = vadd.f32 %v13736_v11, %v1433_v21  ;;  %v13737_v45 = vld [vmem:[#allocation67_spill] sm:$0xff]  ;;  %v13739_v60 = vld [vmem:[#allocation373_spill] sm:$0xff]  ;;  %v13740_v14 = vld [vmem:[#allocation150_spill] sm:$0xff]  ;;  %v9862_v39 = vpop.permute.xlu1 %2917 }
 0x650   : > { %v1371_v28 = vadd.f32 %v13737_v45, %v1307_v8  ;;  %v9835_v38 = vmul.f32 %v13739_v60, %v13738_v55  ;;  %v1245_v12 = vadd.f32 %v13740_v14, %v1181_v7  ;;  %v13741_v34 = vld [vmem:[#allocation65_spill] sm:$0xff]  ;;  %v13742_v15 = vld [vmem:[#allocation142_spill] sm:$0xff]  ;;  %v13743_v3 = vld [vmem:[#allocation439_spill] sm:$0xff] }
 0x651   : > { %v2072_v49 = vadd.f32 %v13741_v34, %v2008_v27  ;;  %v1687_v0 = vadd.f32 %v13742_v15, %v1623_v41  ;;  %v1561_v47 = vadd.f32 %v13743_v3, %v1497_v48  ;;  %v13744_v21 = vld [vmem:[#allocation163_spill] sm:$0xff]  ;;  %v13745_v17 = vld [vmem:[#allocation353_spill] sm:$0xff]  ;;  %v13746_v11 = vld [vmem:[#allocation374_spill] sm:$0xff] }
 0x652   : > { %v1435_v10 = vadd.f32 %v13744_v21, %v1371_v28  ;;  %v5962_v8 = vld [vmem:[%s12654_s6 + $0xc8] sm:$0xff]  ;;  %v2642_v57 = vmul.f32 %v13746_v11, %v13745_v17  ;;  %v13748_v16 = vld [vmem:[#allocation376_spill] sm:$0xff]  ;;  %v13750_v45 = vld [vmem:[#allocation149_spill] sm:$0xff]  ;;  %v2586_v17 = vadd.f32 %v9730_v51, %v2522_v5  ;;  %v2462_v11 = vadd.f32 %v9652_v61, %v2398_v43 }
 0x653   : > { %v13747_v1 = vld [vmem:[#allocation355_spill] sm:$0xff]  ;;  %v13749_v7 = vld [vmem:[#allocation152_spill] sm:$0xff]  ;;  %v2136_v41 = vadd.f32 %v13750_v45, %v2072_v49  ;;  %v13754_v15 = vld [vmem:[#allocation357_spill] sm:$0xff]  ;;  %3352 = vperm.xlu1 %6312, %v5962_v8  }
 0x654   : > { %v2644_v63 = vmul.f32 %v13748_v16, %v13747_v1  ;;  %v1309_v27 = vadd.f32 %v13749_v7, %v1245_v12  ;;  %v13751_v55 = vld [vmem:[#allocation68_spill] sm:$0xff]  ;;  %v13755_v3 = vld [vmem:[#allocation378_spill] sm:$0xff]  ;;  %v13758_v49 = vld [vmem:[#allocation89_spill] sm:$0xff]  ;;  %v2650_v20 = vadd.f32 %v2642_v57, %v2586_v17 }
 0x655   : > { %v1751_v48 = vadd.f32 %v13751_v55, %v1687_v0  ;;  %v13752_v60 = vld [vmem:[#allocation436_spill] sm:$0xff]  ;;  %v2646_v21 = vmul.f32 %v13755_v3, %v13754_v15  ;;  %v13759_v7 = vld [vmem:[#allocation441_spill] sm:$0xff]  ;;  %v13761_v51 = vld [vmem:[#allocation382_spill] sm:$0xff] }
 0x656   : > { %v1625_v28 = vadd.f32 %v13752_v60, %v1561_v47  ;;  %v13753_v14 = vld [vmem:[#allocation44_spill] sm:$0xff]  ;;  %v5964_v55 = vld [vmem:[%s12654_s6 + $0xd8] sm:$0xff]  ;;  %v13762_v5 = vld [vmem:[#allocation375_spill] sm:$0xff]  ;;  %v2524_v60 = vadd.f32 %v9712_v40, %v2460_v9 }
 0x657   : > { %v1499_v34 = vadd.f32 %v13753_v14, %v1435_v10  ;;  %v13756_v1 = vld [vmem:[#allocation4_spill] sm:$0xff]  ;;  %v1815_v0 = vadd.f32 %v13758_v49, %v1751_v48  ;;  %v2706_v61 = vmul.f32 %v13762_v5, %v13761_v51  ;;  %v13765_v14 = vld [vmem:[#allocation153_spill] sm:$0xff]  ;;  %v13766_v15 = vld [vmem:[#allocation2_spill] sm:$0xff]  ;;  %v2526_v51 = vadd.f32 %v9726_v35, %v2462_v11  ;;  %3362 = vperm.xlu1 %6312, %v5964_v55  }
 0x658   : > { %v1373_v16 = vadd.f32 %v13756_v1, %v1309_v27  ;;  %v13757_v31 = vld [vmem:[#allocation12_spill] sm:$0xff]  ;;  %v1689_v47 = vadd.f32 %v13759_v7, %v1625_v28  ;;  %v13764_v27 = vld [vmem:[#allocation377_spill] sm:$0xff]  ;;  %v13767_v3 = vld [vmem:[#allocation438_spill] sm:$0xff]  ;;  %v2588_v55 = vadd.f32 %v9735_v23, %v2524_v60 }
 0x659   : > { %v2200_v12 = vadd.f32 %v13757_v31, %v2136_v41  ;;  %v13760_v45 = vld [vmem:[#allocation164_spill] sm:$0xff]  ;;  %v1879_v28 = vadd.f32 %v13766_v15, %v1815_v0  ;;  %v13769_v49 = vld [vmem:[#allocation386_spill] sm:$0xff]  ;;  %v13770_v7 = vld [vmem:[#allocation379_spill] sm:$0xff] }
 0x65a   : > { %v1563_v10 = vadd.f32 %v13760_v45, %v1499_v34  ;;  %v13763_v43 = vld [vmem:[#allocation384_spill] sm:$0xff]  ;;  %v1437_v41 = vadd.f32 %v13765_v14, %v1373_v16  ;;  %v1753_v34 = vadd.f32 %v13767_v3, %v1689_v47  ;;  %v2710_v45 = vmul.f32 %v13770_v7, %v13769_v49  ;;  %v13771_v5 = vld [vmem:[#allocation103_spill] sm:$0xff]  ;;  %v13777_v17 = vld [vmem:[#allocation381_spill] sm:$0xff] }
 0x65b   : > { %v2708_v8 = vmul.f32 %v13764_v27, %v13763_v43  ;;  %v2264_v48 = vadd.f32 %v9508_v42, %v2200_v12  ;;  %v13768_v1 = vld [vmem:[#allocation92_spill] sm:$0xff]  ;;  %v13772_v40 = vld [vmem:[#allocation143_spill] sm:$0xff]  ;;  %v13774_v42 = vld [vmem:[#allocation165_spill] sm:$0xff] }
 0x65c   : > { %v1627_v31 = vadd.f32 %v13768_v1, %v1563_v10  ;;  %v1501_v43 = vadd.f32 %v13771_v5, %v1437_v41  ;;  %v1943_v9 = vadd.f32 %v13772_v40, %v1879_v28  ;;  %v13773_v16 = vld [vmem:[#allocation443_spill] sm:$0xff]  ;;  %v13775_v10 = vld [vmem:[#allocation380_spill] sm:$0xff]  ;;  %v13778_v35 = vld [vmem:[#allocation389_spill] sm:$0xff]  ;;  %v9898_v28 = vpop.permute.xlu1 %2921 }
 0x65d   : > { %v1817_v27 = vadd.f32 %v13773_v16, %v1753_v34  ;;  %v2328_v0 = vadd.f32 %v9558_v13, %v2264_v48  ;;  %v5966_v47 = vld [vmem:[%s12654_s6 + $0xe8] sm:$0xff]  ;;  %v13776_v14 = vld [vmem:[#allocation388_spill] sm:$0xff]  ;;  %v2768_v11 = vmul.f32 %v13778_v35, %v13777_v17  ;;  %v13779_v41 = vld [vmem:[#allocation154_spill] sm:$0xff]  ;;  %v2714_v16 = vadd.f32 %v2706_v61, %v2650_v20 }
 0x65e   : > { %v1691_v12 = vadd.f32 %v13774_v42, %v1627_v31  ;;  %v2704_v57 = vmul.f32 %v13776_v14, %v13775_v10  ;;  %v1565_v15 = vadd.f32 %v13779_v41, %v1501_v43  ;;  %v13780_v3 = vld [vmem:[#allocation81_spill] sm:$0xff]  ;;  %v13781_v1 = vld [vmem:[#allocation440_spill] sm:$0xff]  ;;  %v13783_v7 = vld [vmem:[#allocation367_spill] sm:$0xff]  ;;  %v2590_v42 = vadd.f32 %v9744_v2, %v2526_v51  ;;  %3372 = vperm.xlu1 %6312, %v5966_v47  }
 0x65f   : > { %v2007_v34 = vadd.f32 %v13780_v3, %v1943_v9  ;;  %v1881_v13 = vadd.f32 %v13781_v1, %v1817_v27  ;;  %v13782_v48 = vld [vmem:[#allocation57_spill] sm:$0xff]  ;;  %v2392_v49 = vadd.f32 %v9587_v30, %v2328_v0  ;;  %v13784_v5 = vld [vmem:[#allocation390_spill] sm:$0xff]  ;;  %v13785_v23 = vld [vmem:[#allocation23_spill] sm:$0xff]  ;;  %v2652_v41 = vadd.f32 %v2644_v63, %v2588_v55 }
 0x660   : > { %v1755_v31 = vadd.f32 %v13782_v48, %v1691_v12  ;;  %v9906_v40 = vmul.f32 %v13784_v5, %v13783_v7  ;;  %v1629_v60 = vadd.f32 %v13785_v23, %v1565_v15  ;;  %v13786_v43 = vld [vmem:[#allocation144_spill] sm:$0xff]  ;;  %v13787_v14 = vld [vmem:[#allocation445_spill] sm:$0xff]  ;;  %v13788_v17 = vld [vmem:[#allocation82_spill] sm:$0xff] }
 0x661   : > { %v2071_v10 = vadd.f32 %v13786_v43, %v2007_v34  ;;  %v1945_v9 = vadd.f32 %v13787_v14, %v1881_v13  ;;  %v2456_v12 = vadd.f32 %v9656_v52, %v2392_v49  ;;  %v5968_v30 = vld [vmem:[%s12654_s6 + $0xf8] sm:$0xff]  ;;  %v13789_v0 = vld [vmem:[#allocation383_spill] sm:$0xff]  ;;  %v13794_v3 = vld [vmem:[#allocation22_spill] sm:$0xff]  ;;  %v2654_v43 = vadd.f32 %v2646_v21, %v2590_v42 }
 0x662   : > { %v1819_v27 = vadd.f32 %v13788_v17, %v1755_v31  ;;  %v13790_v35 = vld [vmem:[#allocation411_spill] sm:$0xff]  ;;  %v13791_v61 = vld [vmem:[#allocation385_spill] sm:$0xff]  ;;  %v13795_v1 = vld [vmem:[#allocation442_spill] sm:$0xff]  ;;  %3382 = vperm.xlu1 %6312, %v5968_v30   ;;  %v2716_v21 = vadd.f32 %v2708_v8, %v2652_v41 }
 0x663   : > { %v2770_v20 = vmul.f32 %v13790_v35, %v13789_v0  ;;  %v13792_v2 = vld [vmem:[#allocation413_spill] sm:$0xff]  ;;  %v13793_v47 = vld [vmem:[#allocation155_spill] sm:$0xff]  ;;  %v2135_v34 = vadd.f32 %v13794_v3, %v2071_v10  ;;  %v2009_v13 = vadd.f32 %v13795_v1, %v1945_v9  ;;  %v13796_v48 = vld [vmem:[#allocation104_spill] sm:$0xff]  ;;  %v2520_v52 = vadd.f32 %v9683_v53, %v2456_v12  ;;  %v9929_v0 = vpop.permute.xlu1 %2925 }
 0x664   : > { %v2772_v51 = vmul.f32 %v13792_v2, %v13791_v61  ;;  %v1693_v15 = vadd.f32 %v13793_v47, %v1629_v60  ;;  %v1883_v31 = vadd.f32 %v13796_v48, %v1819_v27  ;;  %v13797_v49 = vld [vmem:[#allocation387_spill] sm:$0xff]  ;;  %v13798_v7 = vld [vmem:[#allocation416_spill] sm:$0xff]  ;;  %v13800_v63 = vld [vmem:[#allocation102_spill] sm:$0xff] }
 0x665   : > { %v2774_v5 = vmul.f32 %v13798_v7, %v13797_v49  ;;  %v2778_v23 = vadd.f32 %v2770_v20, %v2714_v16  ;;  %v13799_v14 = vld [vmem:[#allocation115_spill] sm:$0xff]  ;;  %v2199_v55 = vadd.f32 %v13800_v63, %v2135_v34  ;;  %v13801_v60 = vld [vmem:[#allocation446_spill] sm:$0xff]  ;;  %v2584_v27 = vadd.f32 %v9759_v62, %v2520_v52  ;;  %v13803_v61 = vld [vmem:[#allocation421_spill] sm:$0xff] }
 0x666   : > { %v1757_v17 = vadd.f32 %v13799_v14, %v1693_v15  ;;  %v2073_v10 = vadd.f32 %v13801_v60, %v2009_v13  ;;  %v13802_v35 = vld [vmem:[#allocation167_spill] sm:$0xff]  ;;  %v13804_v53 = vld [vmem:[#allocation404_spill] sm:$0xff]  ;;  %v13806_v47 = vld [vmem:[#allocation405_spill] sm:$0xff]  ;;  %v2718_v49 = vadd.f32 %v2710_v45, %v2654_v43  ;;  %v13813_v63 = vmov 15  }
 0x667   : > { %v1947_v9 = vadd.f32 %v13802_v35, %v1883_v31  ;;  %v2834_v12 = vmul.f32 %v13804_v53, %v13803_v61  ;;  %v13805_v2 = vld [vmem:[#allocation423_spill] sm:$0xff]  ;;  %v13807_v42 = vld [vmem:[#allocation156_spill] sm:$0xff]  ;;  %v2263_v30 = vadd.f32 %v9513_v29, %v2199_v55  ;;  %v13809_v34 = vld [vmem:[#allocation70_spill] sm:$0xff]  ;;  %v2648_v13 = vadd.f32 %v9775_v36, %v2584_v27  ;;  %6313 = vset.pattern.permute.xlu1 %v13813_v63  ;;  %v2933_v43 = vpop.permute.xlu1 %2932 }
 0x668   : > { %v2836_v16 = vmul.f32 %v13806_v47, %v13805_v2  ;;  %v1821_v20 = vadd.f32 %v13807_v42, %v1757_v17  ;;  %v13808_v15 = vld [vmem:[#allocation444_spill] sm:$0xff]  ;;  %v13810_v48 = vld [vmem:[#allocation409_spill] sm:$0xff]  ;;  %v13811_v31 = vld [vmem:[#allocation415_spill] sm:$0xff]  ;;  %v2780_v61 = vadd.f32 %v2772_v51, %v2716_v21 }
 0x669   : > { %v2137_v3 = vadd.f32 %v13808_v15, %v2073_v10  ;;  %v2011_v1 = vadd.f32 %v13809_v34, %v1947_v9  ;;  %v2896_v62 = vmul.f32 %v13811_v31, %v13810_v48  ;;  %v2842_v52 = vadd.f32 %v2834_v12, %v2778_v23  ;;  %v13812_v7 = vld [vmem:[#allocation38_spill] sm:$0xff]  ;;  %v13814_v8 = vld [vmem:[#allocation447_spill] sm:$0xff]  ;;  %v13817_v35 = vld [vmem:[#allocation428_spill] sm:$0xff] }
 0x66a   : > { %v1885_v14 = vadd.f32 %v13812_v7, %v1821_v20  ;;  %v13815_v17 = vld [vmem:[#allocation90_spill] sm:$0xff]  ;;  %v2327_v29 = vadd.f32 %v9542_v37, %v2263_v30  ;;  %v2712_v55 = vadd.f32 %v2704_v57, %v2648_v13  ;;  %v13819_v23 = vld [vmem:[#allocation157_spill] sm:$0xff]  ;;  %v13822_v37 = vld [vmem:[#allocation407_spill] sm:$0xff]  ;;  %v2782_v15 = vadd.f32 %v2774_v5, %v2718_v49 }
 0x66b   : > { %v2201_v41 = vadd.f32 %v13814_v8, %v2137_v3  ;;  %v2075_v60 = vadd.f32 %v13815_v17, %v2011_v1  ;;  %v13816_v10 = vld [vmem:[#allocation418_spill] sm:$0xff]  ;;  %v13820_v12 = vld [vmem:[#allocation117_spill] sm:$0xff]  ;;  %v13824_v1 = vld [vmem:[#allocation168_spill] sm:$0xff]  ;;  %v2844_v31 = vadd.f32 %v2836_v16, %v2780_v61 }
 0x66c   : > { %v2832_v9 = vmul.f32 %v13817_v35, %v13816_v10  ;;  %v13818_v36 = vld [vmem:[#allocation410_spill] sm:$0xff]  ;;  %v1949_v45 = vadd.f32 %v13819_v23, %v1885_v14  ;;  %v2391_v47 = vadd.f32 %v9601_v25, %v2327_v29  ;;  %v2776_v42 = vadd.f32 %v2768_v11, %v2712_v55  ;;  %v13823_v3 = vld [vmem:[#allocation129_spill] sm:$0xff]  ;;  %v13827_v14 = vld [vmem:[#allocation171_spill] sm:$0xff] }
 0x66d   : > { %v2898_v27 = vmul.f32 %v9674_v24, %v13818_v36  ;;  %v2265_v53 = vadd.f32 %v9521_v19, %v2201_v41  ;;  %v2139_v2 = vadd.f32 %v13820_v12, %v2075_v60  ;;  %v13821_v20 = vld [vmem:[#allocation426_spill] sm:$0xff]  ;;  %v13825_v19 = vld [vmem:[#allocation431_spill] sm:$0xff]  ;;  %v2960_v25 = vmul.f32 %v2933_v43, %v9827_v44  ;;  %v13828_v8 = vld [vmem:[#allocation412_spill] sm:$0xff] }
 0x66e   : > { %v2838_v57 = vmul.f32 %v13822_v37, %v13821_v20  ;;  %v2013_v34 = vadd.f32 %v13823_v3, %v1949_v45  ;;  %v2455_v51 = vadd.f32 %v9638_v26, %v2391_v47  ;;  %v2840_v21 = vadd.f32 %v2832_v9, %v2776_v42  ;;  %v13826_v11 = vld [vmem:[#allocation158_spill] sm:$0xff]  ;;  %v13829_v17 = vld [vmem:[#allocation52_spill] sm:$0xff]  ;;  %v13835_v36 = vld [vmem:[#allocation159_spill] sm:$0xff] }
 0x66f   : > { %v2906_v30 = vadd.f32 %v2898_v27, %v2842_v52  ;;  %v2203_v24 = vadd.f32 %v13824_v1, %v2139_v2  ;;  %v2329_v13 = vadd.f32 %v9566_v46, %v2265_v53  ;;  %v2962_v48 = vmul.f32 %v13825_v19, %v9862_v39  ;;  %v13830_v29 = vld [vmem:[#allocation34_spill] sm:$0xff]  ;;  %v13837_v53 = vld [vmem:[#allocation448_spill] sm:$0xff]  ;;  %v13846_v19 = vld [vmem:[#allocation35_spill] sm:$0xff] }
 0x670   : > { %v2077_v7 = vadd.f32 %v13826_v11, %v2013_v34  ;;  %v2519_v5 = vadd.f32 %v9697_v6, %v2455_v51  ;;  %v2904_v49 = vadd.f32 %v2896_v62, %v2840_v21  ;;  %v2900_v26 = vmul.f32 %v9737_v18, %v13828_v8  ;;  %v13831_v6 = vld [vmem:[#allocation369_spill] sm:$0xff]  ;;  %v13832_v62 = vld [vmem:[#allocation392_spill] sm:$0xff]  ;;  %v13834_v35 = vld [vmem:[#allocation406_spill] sm:$0xff]  ;;  %v2937_v8 = vpop.permute.xlu1 %2936 }
 0x671   : > { %v2267_v52 = vadd.f32 %v13827_v14, %v2203_v24  ;;  %v2393_v63 = vadd.f32 %v9609_v4, %v2329_v13  ;;  %v9974_v41 = vadd.f32 %v2962_v48, %v2906_v30  ;;  %v2846_v46 = vadd.f32 %v2838_v57, %v2782_v15  ;;  %v13833_v4 = vld [vmem:[#allocation396_spill] sm:$0xff]  ;;  %v13836_v61 = vld [vmem:[#allocation414_spill] sm:$0xff]  ;;  %v13840_v30 = vld [vmem:[#allocation395_spill] sm:$0xff] }
 0x672   : > { %v2141_v39 = vadd.f32 %v13829_v17, %v2077_v7  ;;  %v2583_v16 = vadd.f32 %v9722_v56, %v2519_v5  ;;  %v9978_v44 = vadd.f32 %v2960_v25, %v2904_v49  ;;  %v2707_v10 = vmul.f32 %v13832_v62, %v13831_v6  ;;  %v13838_v2 = vld [vmem:[#allocation122_spill] sm:$0xff]  ;;  %v13842_v34 = vld [vmem:[#allocation175_spill] sm:$0xff]  ;;  %v13843_v24 = vld [vmem:[#allocation173_spill] sm:$0xff] }
 0x673   : > { %v2457_v60 = vadd.f32 %v9661_v59, %v2393_v63  ;;  %v2331_v55 = vadd.f32 %v13830_v29, %v2267_v52  ;;  %v2767_v9 = vmul.f32 %v13834_v35, %v13833_v4  ;;  %v2908_v18 = vadd.f32 %v2900_v26, %v2844_v31  ;;  %v13839_v42 = vld [vmem:[#allocation10_spill] sm:$0xff]  ;;  %v13845_v21 = vld [vmem:[#allocation408_spill] sm:$0xff]  ;;  %v13851_v17 = vld [vmem:[#allocation371_spill] sm:$0xff] }
 0x674   : > { %v2205_v27 = vadd.f32 %v13835_v36, %v2141_v39  ;;  %v2902_v23 = vmul.f32 %v9783_v32, %v13836_v61  ;;  %v2647_v56 = vadd.f32 %v9819_v58, %v2583_v16  ;;  %v2984_v45 = vmul.f32 0.044715, %v9978_v44  ;;  %v13841_v15 = vld [vmem:[#allocation402_spill] sm:$0xff]  ;;  %v13847_v25 = vld [vmem:[#allocation160_spill] sm:$0xff]  ;;  %v13855_v62 = vld [vmem:[#allocation397_spill] sm:$0xff] }
 0x675   : > { %v2521_v59 = vadd.f32 %v9702_v50, %v2457_v60  ;;  %v2986_v43 = vmul.f32 0.044715, %v9974_v41  ;;  %v2964_v12 = vmul.f32 %v13837_v53, %v9898_v28  ;;  %v2395_v20 = vadd.f32 %v13839_v42, %v2331_v55  ;;  %v13844_v51 = vld [vmem:[#allocation398_spill] sm:$0xff]  ;;  %v13849_v14 = vld [vmem:[#allocation176_spill] sm:$0xff]  ;;  %v13853_v60 = vld [vmem:[#allocation177_spill] sm:$0xff] }
 0x676   : > { %v2269_v47 = vadd.f32 %v13838_v2, %v2205_v27  ;;  %v2910_v37 = vadd.f32 %v2902_v23, %v2846_v46  ;;  %v2711_v57 = vadd.f32 %v9835_v38, %v2647_v56  ;;  %v2992_v32 = vmul.f32 %v2984_v45, %v9978_v44  ;;  %v13850_v5 = vld [vmem:[#allocation174_spill] sm:$0xff]  ;;  %v13854_v55 = vld [vmem:[#allocation28_spill] sm:$0xff]  ;;  %v13860_v56 = vld [vmem:[#allocation49_spill] sm:$0xff] }
 0x677   : > { %v2585_v58 = vadd.f32 %v9763_v54, %v2521_v59  ;;  %v2831_v3 = vmul.f32 %v13841_v15, %v13840_v30  ;;  %v10002_v50 = vadd.f32 %v2964_v12, %v2908_v18  ;;  %v2459_v1 = vadd.f32 %v13842_v34, %v2395_v20  ;;  %v13848_v54 = vld [vmem:[#allocation172_spill] sm:$0xff]  ;;  %v13852_v39 = vld [vmem:[#allocation394_spill] sm:$0xff]  ;;  %v13858_v18 = vld [vmem:[#allocation427_spill] sm:$0xff] }
 0x678   : > { %v2333_v28 = vadd.f32 %v13843_v24, %v2269_v47  ;;  %v2769_v13 = vmul.f32 %v13845_v21, %v13844_v51  ;;  %v2966_v48 = vmul.f32 %v13846_v19, %v9929_v0  ;;  %v2775_v38 = vadd.f32 %v2767_v9, %v2711_v57  ;;  %v13856_v4 = vld [vmem:[#allocation138_spill] sm:$0xff]  ;;  %v13857_v9 = vld [vmem:[#allocation420_spill] sm:$0xff]  ;;  %v13862_v20 = vld [vmem:[#allocation401_spill] sm:$0xff] }
 0x679   : > { %v2649_v31 = vadd.f32 %v9823_v33, %v2585_v58  ;;  %v2895_v11 = vmul.f32 %v13848_v54, %v13847_v25  ;;  %v2994_v7 = vmul.f32 %v2986_v43, %v9974_v41  ;;  %v2523_v52 = vadd.f32 %v13849_v14, %v2459_v1  ;;  %v13859_v23 = vld [vmem:[#allocation166_spill] sm:$0xff]  ;;  %v13864_v30 = vld [vmem:[#allocation43_spill] sm:$0xff]  ;;  %v13866_v34 = vld [vmem:[#allocation393_spill] sm:$0xff] }
 0x67a   : > { %v2397_v49 = vadd.f32 %v13850_v5, %v2333_v28  ;;  %v10016_v63 = vadd.f32 %v2966_v48, %v2910_v37  ;;  %v2839_v26 = vadd.f32 %v2831_v3, %v2775_v38  ;;  %v3000_v46 = vmul.f32 %v2992_v32, %v9978_v44  ;;  %v13861_v43 = vld [vmem:[#allocation62_spill] sm:$0xff]  ;;  %v13863_v37 = vld [vmem:[#allocation391_spill] sm:$0xff]  ;;  %v2945_v28 = vpop.permute.xlu1 %2944  ;;  %v13869_v19 = vld [vmem:[#allocation145_spill] sm:$0xff] }
 0x67b   : > { %v2713_v0 = vadd.f32 %v9906_v40, %v2649_v31  ;;  %v2709_v33 = vmul.f32 %v13852_v39, %v13851_v17  ;;  %v2988_v16 = vmul.f32 0.044715, %v10002_v50  ;;  %v2587_v29 = vadd.f32 %v13853_v60, %v2523_v52  ;;  %v13865_v3 = vld [vmem:[#allocation403_spill] sm:$0xff]  ;;  %v13867_v1 = vld [vmem:[#allocation422_spill] sm:$0xff]  ;;  %v13871_v52 = vld [vmem:[#allocation169_spill] sm:$0xff] }
 0x67c   : > { %v2461_v6 = vadd.f32 %v13854_v55, %v2397_v49  ;;  %v2833_v35 = vmul.f32 %v13856_v4, %v13855_v62  ;;  %v2959_v36 = vmul.f32 %v13858_v18, %v13857_v9  ;;  %v2903_v27 = vadd.f32 %v2895_v11, %v2839_v26  ;;  %v13872_v5 = vld [vmem:[#allocation417_spill] sm:$0xff]  ;;  %v13874_v17 = vld [vmem:[#allocation80_spill] sm:$0xff] }
 0x67d   : > { %v2777_v61 = vadd.f32 %v2769_v13, %v2713_v0  ;;  %v2897_v40 = vmul.f32 %v13860_v56, %v13859_v23  ;;  %v3002_v45 = vmul.f32 %v2994_v7, %v9974_v41  ;;  %v2651_v59 = vadd.f32 %v9794_v22, %v2587_v29  ;;  %v13868_v13 = vld [vmem:[#allocation399_spill] sm:$0xff]  ;;  %v13873_v0 = vld [vmem:[#allocation400_spill] sm:$0xff] }
 0x67e   : > { %v2525_v53 = vadd.f32 %v13861_v43, %v2461_v6  ;;  %v2990_v12 = vmul.f32 0.044715, %v10016_v63  ;;  %v10035_v2 = vadd.f32 %v2959_v36, %v2903_v27  ;;  %v3008_v47 = vadd.f32 %v3000_v46, %v9978_v44  ;;  %v13875_v29 = vld [vmem:[#allocation424_spill] sm:$0xff]  ;;  %v13876_v27 = vld [vmem:[#allocation170_spill] sm:$0xff]  ;;  %v13878_v43 = vld [vmem:[#allocation425_spill] sm:$0xff] }
 0x67f   : > { %v2841_v42 = vadd.f32 %v2833_v35, %v2777_v61  ;;  %v2771_v57 = vmul.f32 %v13863_v37, %v13862_v20  ;;  %v2715_v32 = vadd.f32 %v2707_v10, %v2651_v59  ;;  %v2996_v58 = vmul.f32 %v2988_v16, %v10002_v50  ;;  %v13870_v10 = vld [vmem:[#allocation178_spill] sm:$0xff]  ;;  %v2953_v35 = vpop.permute.xlu1 %2952 }
 0x680   : > { %v2589_v15 = vadd.f32 %v13864_v30, %v2525_v53  ;;  %v2773_v22 = vmul.f32 %v13866_v34, %v13865_v3  ;;  %v2961_v24 = vmul.f32 %v2937_v8, %v13867_v1  ;;  %v2983_v51 = vmul.f32 0.044715, %v10035_v2 }
 0x681   : > { %v2905_v21 = vadd.f32 %v2897_v40, %v2841_v42  ;;  %v2835_v48 = vmul.f32 %v13869_v19, %v13868_v13  ;;  %v3010_v38 = vadd.f32 %v3002_v45, %v9974_v41  ;;  %v2779_v31 = vadd.f32 %v2771_v57, %v2715_v32 }
 0x682   : > { %v2653_v25 = vadd.f32 %v13870_v10, %v2589_v15  ;;  %v2991_v54 = vmul.f32 %v2983_v51, %v10035_v2  ;;  %v3016_v11 = vmul.f32 0.7978846, %v3008_v47  ;;  %v2998_v14 = vmul.f32 %v2990_v12, %v10016_v63 }
 0x683   : > { %v2969_v7 = vadd.f32 %v2961_v24, %v2905_v21  ;;  %v2899_v49 = vmul.f32 %v13872_v5, %v13871_v52  ;;  %v2843_v8 = vadd.f32 %v2835_v48, %v2779_v31  ;;  %v3004_v26 = vmul.f32 %v2996_v58, %v10002_v50 }
 0x684   : > { %v2717_v46 = vadd.f32 %v2709_v33, %v2653_v25  ;;  %v2837_v39 = vmul.f32 %v13874_v17, %v13873_v0  ;;  %v2999_v16 = vmul.f32 %v2991_v54, %v10035_v2  ;;  %v2963_v55 = vmul.f32 %v2945_v28, %v13875_v29  ;;  %v13877_v33 = vld [vmem:[#allocation419_spill] sm:$0xff] }
 0x685   : > { %v2985_v60 = vmul.f32 0.044715, %v2969_v7  ;;  %v3018_v6 = vmul.f32 0.7978846, %v3010_v38  ;;  %v2907_v62 = vadd.f32 %v2899_v49, %v2843_v8  ;;  %6473 = vtanh.f32 %v3016_v11 }
 0x686   : > { %v2781_v4 = vadd.f32 %v2773_v22, %v2717_v46  ;;  %v3007_v9 = vadd.f32 %v2999_v16, %v10035_v2  ;;  %v3006_v36 = vmul.f32 %v2998_v14, %v10016_v63  ;;  %v2901_v61 = vmul.f32 %v13877_v33, %v13876_v27  ;;  %v10078_v33 = vld [vmem:[%s12655_s7 + $0x48] sm:$0xff] }
 0x687   : > { %v2993_v18 = vmul.f32 %v2985_v60, %v2969_v7  ;;  %v2971_v23 = vadd.f32 %v2963_v55, %v2907_v62  ;;  %v3012_v56 = vadd.f32 %v3004_v26, %v10002_v50  ;;  %v2965_v53 = vmul.f32 %v2953_v35, %v13878_v43  ;;  %3626 = vperm.xlu1 %6313, %v10078_v33  }
 0x688   : > { %v2845_v40 = vadd.f32 %v2837_v39, %v2781_v4  ;;  %v3015_v45 = vmul.f32 0.7978846, %v3007_v9  ;;  %6475 = vtanh.f32 %v3018_v6  ;;  %v3014_v20 = vadd.f32 %v3006_v36, %v10016_v63 }
 0x689   : > { %v3001_v59 = vmul.f32 %v2993_v18, %v2969_v7  ;;  %v2987_v12 = vmul.f32 0.044715, %v2971_v23  ;;  %v3020_v57 = vmul.f32 0.7978846, %v3012_v56  ;;  %v2975_v48 = vmul.f32 0.5, %v10035_v2 }
 0x68a   : > { %v2909_v47 = vadd.f32 %v2901_v61, %v2845_v40  ;;  %6477 = vtanh.f32 %v3015_v45  ;;  %v3022_v3 = vmul.f32 0.7978846, %v3014_v20  ;;  %v2976_v38 = vmul.f32 0.5, %v9978_v44  ;;  %v10090_v61 = vld [vmem:[%s12655_s7 + $0x60] sm:$0xff] }
 0x68b   : > { %v3009_v42 = vadd.f32 %v3001_v59, %v2969_v7  ;;  %v2995_v37 = vmul.f32 %v2987_v12, %v2971_v23  ;;  %v2977_v49 = vmul.f32 0.5, %v2969_v7  ;;  %v2978_v8 = vmul.f32 0.5, %v9974_v41  ;;  %v6007_v40 = vld [vmem:[%s12656_s8 + $0x40] sm:$0xff] }
 0x68c   : > { %v2973_v32 = vadd.f32 %v2965_v53, %v2909_v47  ;;  %v2979_v16 = vmul.f32 0.5, %v2971_v23  ;;  %v2980_v60 = vmul.f32 0.5, %v10002_v50  ;;  %v2982_v35 = vmul.f32 0.5, %v10016_v63  ;;  %v6428_v50 = vld [vmem:[%s12657_s9 + $0x8] sm:$0xff]   ;;  %v10084_v63 = vld [vmem:[%s12655_s7 + $0x50] sm:$0xff]  ;;  %v13880_v53 = vld [vmem:[#allocation13_spill] sm:$0xff] }
 0x68d   : > { %v3017_v58 = vmul.f32 0.7978846, %v3009_v42  ;;  %v3003_v30 = vmul.f32 %v2995_v37, %v2971_v23  ;;  %3631 = vperm.xlu1 %6313, %v10084_v63   ;;  %v13879_v56 = vmov 0   ;;  %v13881_v37 = vld [vmem:[#allocation16_spill] sm:$0xff] }
 0x68e   : > { %v2989_v15 = vmul.f32 0.044715, %v2973_v32  ;;  %v2981_v4 = vmul.f32 0.5, %v2973_v32 }
 0x68f   : > { %6479 = vtanh.f32 %v3017_v58  ;;  %v3011_v34 = vadd.f32 %v3003_v30, %v2971_v23  ;;  %v6474_v1 = vpop.eup %6473  ;;  %v10096_v23 = vld [vmem:[%s12655_s7 + $0x70] sm:$0xff]  ;;  %v3137_v30 = vpop.permute.xlu0 %3136 }
 0x690   : > { %6481 = vtanh.f32 %v3020_v57  ;;  %v2997_v22 = vmul.f32 %v2989_v15, %v2973_v32  ;;  %v3032_v21 = vadd.f32 1.0, %v6474_v1 }
 0x691   : > { %v3019_v24 = vmul.f32 0.7978846, %v3011_v34  ;;  %6483 = vtanh.f32 %v3022_v3  ;;  %3641 = vperm.xlu1 %6313, %v10090_v61   ;;  %v13884_v3 = vld [vmem:[#allocation18_spill] sm:$0xff] }
 0x692   : > { %v3005_v28 = vmul.f32 %v2997_v22, %v2973_v32  ;;  %v6476_v51 = vpop.eup %6475  ;;  %v3040_v54 = vmul.f32 %v3032_v21, %v2976_v38 }
 0x693   : > { %6485 = vtanh.f32 %v3019_v24  ;;  %v3034_v11 = vadd.f32 1.0, %v6476_v51  ;;  %v3132_v45 = vpop.permute.xlu1 %3131 }
 0x694   : > { %v3013_v13 = vadd.f32 %v3005_v28, %v2973_v32  ;;  %v6478_v19 = vpop.eup %6477  ;;  %v13882_v32 = vld [vmem:[#allocation14_spill] sm:$0xff] }
 0x695   : > { %v3031_v31 = vadd.f32 1.0, %v6478_v19  ;;  %v3042_v0 = vmul.f32 %v3034_v11, %v2978_v8  ;;  %3651 = vperm.xlu1 %6313, %v10096_v23  }
 0x696   : > { %v3021_v10 = vmul.f32 0.7978846, %v3013_v13 }
 0x697   : > { %v3039_v25 = vmul.f32 %v3031_v31, %v2975_v48  ;;  %v3142_v42 = vpop.permute.xlu1 %3141 }
 0x698   : > { %6487 = vtanh.f32 %v3021_v10 }
 0x699   : > { %v6480_v14 = vpop.eup %6479  ;;  %v3051_v5 = vpack.c.bf16 %v3040_v54, %v3039_v25  ;;  %6315 = vset.pattern.permute.xlu1 %v13879_v56 }
 0x69a   : > { %v6482_v52 = vpop.eup %6481  ;;  %v3033_v26 = vadd.f32 1.0, %v6480_v14  ;;  %3678 = vperm.xlu1 %6315, %v6007_v40  }
 0x69b   : > { %6108 = vmatprep.subr.bf16.mxu0 %v3051_v5  ;;  %v6484_v17 = vpop.eup %6483  ;;  %v3036_v2 = vadd.f32 1.0, %v6482_v52 }
 0x69c   : > { %v3041_v46 = vmul.f32 %v3033_v26, %v2977_v49  ;;  %6109 = vmatpush3.bf16.msra.mxu0 %v3051_v5  ;;  %v3038_v7 = vadd.f32 1.0, %v6484_v17 }
 0x69d   : > { %v6486_v44 = vpop.eup %6485  ;;  %v3044_v6 = vmul.f32 %v3036_v2, %v2980_v60 }
 0x69e   : > { %v3052_v39 = vpack.c.bf16 %v3042_v0, %v3041_v46  ;;  %v3035_v29 = vadd.f32 1.0, %v6486_v44  ;;  %v3046_v36 = vmul.f32 %v3038_v7, %v2982_v35  ;;  %v3147_v28 = vpop.permute.xlu1 %3146 }
 0x6a0   : > { %6110 = vmatprep.subr.bf16.mxu0 %v3052_v39  ;;  %v3043_v55 = vmul.f32 %v3035_v29, %v2979_v16 }
 0x6a1   : > { %6111 = vmatpush3.bf16.msra.mxu0 %v3052_v39 }
 0x6a2   : > { %v6488_v62 = vpop.eup %6487  ;;  %v3053_v41 = vpack.c.bf16 %v3044_v6, %v3043_v55  ;;  %v3195_v6 = vpop.permute.xlu0 %3194 }
 0x6a3   : > { %v3037_v9 = vadd.f32 1.0, %v6488_v62 }
 0x6a4   : > { %6112 = vmatprep.subr.bf16.mxu0 %v3053_v41 }
 0x6a5   : > { %v3045_v18 = vmul.f32 %v3037_v9, %v2981_v4  ;;  %6113 = vmatpush3.bf16.msra.mxu0 %v3053_v41  ;;  %v3200_v7 = vpop.permute.xlu1 %3199 }
 0x6a6   : > { %v3205_v4 = vpop.permute.xlu0 %3204 }
 0x6a7   : > { %v3054_v27 = vpack.c.bf16 %v3046_v36, %v3045_v18 }
 0x6a9   : > { %6114 = vmatprep.subr.bf16.mxu0 %v3054_v27 }
 0x6aa   : > { %6115 = vmatpush3.bf16.msra.mxu0 %v3054_v27  ;;  %v3224_v9 = vpop.permute.xlu0 %3223 }
 0x6ab   : > { %v3210_v35 = vpop.permute.xlu1 %3209 }
 0x6ad   : > { %6117 = vmatmul.mubr.msk.bf16.vlgmr.msra.gmra.mrb[0].mxu0 %vm3065_vm4, %v6428_v50 }
 0x6b0   : > { %v3229_v18 = vpop.permute.xlu1 %3228 }
 0x780   : > { %v6118_v59 = vpop.f32.mrb[0].mxu0 }
 0x781   : > { %v3106_v43 = vpop.f32.mrb[1].mxu0  ;;  %v3123_v57 = vadd.f32 %v6118_v59, %v13881_v37 }
 0x782   : > { %v3121_v12 = vadd.f32 %v3106_v43, %v13880_v53  ;;  %v6119_v47 = vpop.f32.mrb[2].mxu0 }
 0x783   : > { %v3109_v20 = vpop.f32.mrb[3].mxu0  ;;  %v3124_v34 = vadd.f32 %v6119_v47, %v13884_v3  ;;  %v10111_v1 = vadd.f32 %v3142_v42, %v3123_v57  ;;  %v3234_v47 = vpop.permute.xlu0 %3233 }
 0x784   : > { %v3122_v58 = vadd.f32 %v3109_v20, %v13882_v32  ;;  %v10106_v15 = vadd.f32 %v3132_v45, %v3121_v12  ;;  %v3239_v42 = vpop.permute.xlu1 %3238 }
 0x785   : > { %13886 = vst [vmem:[#allocation58_spill] sm:$0xff] %v10111_v1  ;;  %v10115_v51 = vadd.f32 %v3147_v28, %v3124_v34 }
 0x786   : > { %13883 = vst [vmem:[#allocation75_spill] sm:$0xff] %v10106_v15  ;;  %v10109_v22 = vadd.f32 %v3137_v30, %v3122_v58 }
 0x787   : > { %13887 = vst [vmem:[#allocation180_spill] sm:$0xff] %v10115_v51 }
 0x788   : > { %13885 = vst [vmem:[#allocation179_spill] sm:$0xff] %v10109_v22  ;;  %v3153_v24 = vadd.f32 %v10109_v22, %v10106_v15 }
 0x78a   : > { %v3154_v21 = vadd.f32 %v3153_v24, %v10111_v1 }
 0x78c   : > { %v3155_v13 = vadd.f32 %v3154_v21, %v10115_v51 }
 0x78e   : > { %v3156_v19 = vrot.slane %v3155_v13, 4 }
 0x790   : > { %v3157_v48 = vadd.f32 %v3156_v19, %v3155_v13 }
 0x792   : > { %v3158_v38 = vrot.slane %v3157_v48, 2 }
 0x794   : > { %v3159_v31 = vadd.f32 %v3158_v38, %v3157_v48  ;;  %v6008_v48 = vld [vmem:[%s12656_s8 + $0x48] sm:$0xff]  ;;  %v6009_v38 = vld [vmem:[%s12656_s8 + $0x50] sm:$0xff] }
 0x796   : > { %v3160_v10 = vrot.slane %v3159_v31, 1 }
 0x798   : > { %v3161_v25 = vadd.f32 %v3160_v10, %v3159_v31  ;;  %v6011_v31 = vld [vmem:[%s12656_s8 + $0x60] sm:$0xff]  ;;  %v6010_v10 = vld [vmem:[%s12656_s8 + $0x58] sm:$0xff] }
 0x79a   : > { %v3162_v54 = vmul.f32 0.03125, %v3161_v25  ;;  %v6429_v25 = vld [vmem:[%s12653_s5 + $0x40] sm:$0xff]  }
 0x79b   : > { %6132 = vmatprep.mubr.msk.bf16.mxu0 %vm757_vm2, %v6429_v25  ;;  %v6430_v25 = vld [vmem:[%s12653_s5 + $0x48] sm:$0xff]  }
 0x79c   : > { %v3163_v11 = vsub.f32 %v10106_v15, %v3162_v54  ;;  %v3164_v14 = vsub.f32 %v10109_v22, %v3162_v54  ;;  %v3165_v52 = vsub.f32 %v10111_v1, %v3162_v54  ;;  %v3166_v5 = vsub.f32 %v10115_v51, %v3162_v54  ;;  %v6013_v54 = vld [vmem:[%s12656_s8 + $0x70] sm:$0xff] }
 0x79e   : > { %v3167_v49 = vmul.f32 %v3163_v11, %v3163_v11  ;;  %v3168_v8 = vmul.f32 %v3164_v14, %v3164_v14  ;;  %v3169_v26 = vmul.f32 %v3165_v52, %v3165_v52  ;;  %v3170_v0 = vmul.f32 %v3166_v5, %v3166_v5 }
 0x7a0   : > { %v3171_v46 = vadd.f32 %v3168_v8, %v3167_v49  ;;  %v10183_v49 = vld [vmem:[%s12655_s7 + $0x68] sm:$0xff]  ;;  %v10189_v8 = vld [vmem:[%s12655_s7 + $0x78] sm:$0xff] }
 0x7a2   : > { %v3172_v17 = vadd.f32 %v3171_v46, %v3169_v26  ;;  %v13889_v26 = vmov 1   ;;  %v10194_v46 = vpop.permute.xlu1 %3312 }
 0x7a4   : > { %v3173_v2 = vadd.f32 %v3172_v17, %v3170_v0 }
 0x7a6   : > { %v3174_v44 = vrot.slane %v3173_v2, 4  ;;  %v10201_v0 = vpop.permute.xlu1 %3322 }
 0x7a8   : > { %v3175_v39 = vadd.f32 %v3174_v44, %v3173_v2  ;;  %v13890_v2 = vmov 2  }
 0x7aa   : > { %v3176_v16 = vrot.slane %v3175_v39, 2  ;;  %v10205_v17 = vpop.permute.xlu1 %3332 }
 0x7ac   : > { %v3177_v60 = vadd.f32 %v3176_v16, %v3175_v39  ;;  %v13891_v16 = vmov 3  }
 0x7ae   : > { %v3178_v29 = vrot.slane %v3177_v60, 1  ;;  %v10211_v44 = vpop.permute.xlu1 %3342 }
 0x7b0   : > { %v3179_v55 = vadd.f32 %v3178_v29, %v3177_v60  ;;  %v10222_v60 = vpop.permute.xlu0 %3307 }
 0x7b2   : > { %v3180_v62 = vmul.f32 0.03125, %v3179_v55  ;;  %v10217_v39 = vpop.permute.xlu1 %3352 }
 0x7b4   : > { %v3181_v41 = vadd.f32 1e-05, %v3180_v62  ;;  %v10228_v55 = vpop.permute.xlu0 %3317 }
 0x7b6   : > { %6489 = vrsqrt.f32 %v3181_v41  ;;  %v10224_v29 = vpop.permute.xlu1 %3362  ;;  %v13892_v41 = vmov 4  }
 0x7c0   : > { %v6490_v36 = vpop.eup %6489 }
 0x7c1   : > { %v3184_v27 = vmul.f32 %v6490_v36, %v3164_v14  ;;  %v3183_v50 = vmul.f32 %v6490_v36, %v3163_v11  ;;  %v3185_v40 = vmul.f32 %v6490_v36, %v3165_v52  ;;  %v3186_v45 = vmul.f32 %v6490_v36, %v3166_v5  ;;  %v6012_v11 = vld [vmem:[%s12656_s8 + $0x68] sm:$0xff]  ;;  %v6014_v14 = vld [vmem:[%s12656_s8 + $0x78] sm:$0xff]  ;;  %v10167_v52 = vld [vmem:[%s12655_s7 + $0x40] sm:$0xff] }
 0x7c2   : > { %v10176_v5 = vld [vmem:[%s12655_s7 + $0x58] sm:$0xff]  ;;  %v13895_v36 = vmov 5  }
 0x7c3   : > { %v3213_v59 = vmul.f32 %v3200_v7, %v3184_v27  ;;  %v3212_v43 = vmul.f32 %v3195_v6, %v3183_v50  ;;  %v3214_v53 = vmul.f32 %v3205_v4, %v3185_v40  ;;  %v3215_v12 = vmul.f32 %v3210_v35, %v3186_v45  ;;  %v10232_v6 = vpop.permute.xlu1 %3372  ;;  %v10237_v7 = vpop.permute.xlu0 %3327 }
 0x7c5   : > { %v3241_v20 = vadd.f32 %v3224_v9, %v3212_v43  ;;  %v3242_v37 = vadd.f32 %v3229_v18, %v3213_v59  ;;  %v3243_v57 = vadd.f32 %v3234_v47, %v3214_v53  ;;  %v3244_v32 = vadd.f32 %v3239_v42, %v3215_v12 }
 0x7c6   : > { %v13897_v53 = vmov 6  }
 0x7c7   : > { %v3245_v30 = vsel %vm390_vm1, %v3241_v20, 0.0  ;;  %v3246_v3 = vsel %vm390_vm1, %v3242_v37, 0.0  ;;  %v3247_v34 = vsel %vm390_vm1, %v3243_v57, 0.0  ;;  %v3248_v24 = vsel %vm390_vm1, %v3244_v32, 0.0  ;;  %v10239_v62 = vpop.permute.xlu1 %3382  ;;  %v10244_v4 = vpop.permute.xlu0 %3337 }
 0x7c8   : > { %v6316_v28 = vpack.i.bf16 %v3246_v3, %v3245_v30  ;;  %v6321_v21 = vpack.i.bf16 %v3248_v24, %v3247_v34  ;;  %v10131_v13 = vpack.c.bf16 %v3242_v37, %v3241_v20  ;;  %v10133_v19 = vpack.c.bf16 %v3244_v32, %v3243_v57 }
 0x7c9   : > { %v13899_v24 = vmov 7  }
 0x7ca   : > { %6317 = vrot.lane.b32.xlu0 %v6316_v28, %s12939_s25  ;;  %6322 = vrot.lane.b32.xlu1 %v6321_v21, %s12939_s25 }
 0x7cb   : > { %v10246_v35 = vpop.permute.xlu1 %3626  ;;  %v10251_v9 = vpop.permute.xlu0 %3347 }
 0x7cc   : > { %13893 = vst [vmem:[#allocation86_spill] sm:$0xff] %v10246_v35 }
 0x7ce   : > { %6327 = vrot.lane.b32.xlu0 %v6316_v28, %s12943_s21  ;;  %6332 = vrot.lane.b32.xlu1 %v6321_v21, %s12943_s21 }
 0x7cf   : > { %v10253_v18 = vpop.permute.xlu1 %3631  ;;  %v10260_v27 = vpop.permute.xlu0 %3357 }
 0x7d0   : > { %13894 = vst [vmem:[#allocation181_spill] sm:$0xff] %v10253_v18 }
 0x7d2   : > { %3683 = vperm.xlu0 %6314, %v6008_v48   ;;  %3688 = vperm.xlu1 %6315, %v6009_v38  }
 0x7d3   : > { %v10262_v50 = vpop.permute.xlu1 %3641  ;;  %v10266_v40 = vpop.permute.xlu0 %3367 }
 0x7d6   : > { %3698 = vperm.xlu0 %6314, %v6011_v31   ;;  %3693 = vperm.xlu1 %6315, %v6010_v10  }
 0x7d7   : > { %v10268_v45 = vpop.permute.xlu1 %3651  ;;  %v10276_v43 = vpop.permute.xlu0 %3377 }
 0x7d8   : > { %13896 = vst [vmem:[#allocation73_spill] sm:$0xff] %v10268_v45 }
 0x7da   : > { %3708 = vperm.xlu0 %6314, %v6013_v54   ;;  %3703 = vperm.xlu1 %6315, %v6012_v11   ;;  %v13900_v54 = vmov 8   ;;  %v6432_v11 = vld [vmem:[%s12653_s5 + $0x58] sm:$0xff]  }
 0x7db   : > { %v10272_v59 = vpop.permute.xlu1 %3678 }
 0x7de   : > { %3741 = vperm.xlu0 %6314, %v10167_v52   ;;  %3713 = vperm.xlu1 %6315, %v6014_v14   ;;  %v6433_v14 = vld [vmem:[%s12653_s5 + $0x60] sm:$0xff]  }
 0x7e2   : > { %3749 = vperm.xlu0 %6314, %v10084_v63   ;;  %3745 = vperm.xlu1 %6315, %v10078_v33  }
 0x7e6   : > { %3757 = vperm.xlu0 %6314, %v10090_v61   ;;  %3753 = vperm.xlu1 %6315, %v10176_v5  }
 0x7ea   : > { %3765 = vperm.xlu0 %6314, %v10096_v23   ;;  %3761 = vperm.xlu1 %6315, %v10183_v49  }
 0x7ee   : > { %3769 = vperm.xlu1 %6315, %v10189_v8   ;;  %6336 = vset.pattern.permute.xlu0 %v13889_v26 }
 0x7ef   : > { %3805 = vperm.xlu0 %6336, %v10167_v52  }
 0x7f2   : > { %6337 = vset.pattern.permute.xlu1 %v13889_v26  ;;  %v6434_v26 = vld [vmem:[%s12653_s5 + $0x68] sm:$0xff]  }
 0x7f3   : > { %3809 = vperm.xlu1 %6337, %v10078_v33   ;;  %3817 = vperm.xlu0 %6336, %v10176_v5  }
 0x7f7   : > { %3813 = vperm.xlu1 %6337, %v10084_v63   ;;  %3825 = vperm.xlu0 %6336, %v10183_v49  }
 0x7fb   : > { %3821 = vperm.xlu1 %6337, %v10090_v61   ;;  %3833 = vperm.xlu0 %6336, %v10189_v8  }
 0x7ff   : > { %3829 = vperm.xlu1 %6337, %v10096_v23   ;;  %6339 = vset.pattern.permute.xlu0 %v13890_v2 }
 0x800   : > { %3873 = vperm.xlu0 %6339, %v10078_v33  }
 0x803   : > { %6338 = vset.pattern.permute.xlu1 %v13890_v2  ;;  %v6435_v2 = vld [vmem:[%s12653_s5 + $0x70] sm:$0xff]  }
 0x804   : > { %3869 = vperm.xlu1 %6338, %v10167_v52   ;;  %3885 = vperm.xlu0 %6339, %v10090_v61  }
 0x808   : > { %3877 = vperm.xlu1 %6338, %v10084_v63   ;;  %3893 = vperm.xlu0 %6339, %v10096_v23  }
 0x80c   : > { %3881 = vperm.xlu1 %6338, %v10176_v5   ;;  %6340 = vset.pattern.permute.xlu0 %v13891_v16 }
 0x80d   : > { %3933 = vperm.xlu0 %6340, %v10167_v52  }
 0x810   : > { %3889 = vperm.xlu1 %6338, %v10183_v49  }
 0x811   : > { %3945 = vperm.xlu0 %6340, %v10176_v5  }
 0x814   : > { %3897 = vperm.xlu1 %6338, %v10189_v8  }
 0x815   : > { %3953 = vperm.xlu0 %6340, %v10183_v49  }
 0x818   : > { %6341 = vset.pattern.permute.xlu1 %v13891_v16  ;;  %v13901_v16 = vmov 9  }
 0x819   : > { %3937 = vperm.xlu1 %6341, %v10078_v33   ;;  %3961 = vperm.xlu0 %6340, %v10189_v8  }
 0x81d   : > { %3941 = vperm.xlu1 %6341, %v10084_v63   ;;  %6343 = vset.pattern.permute.xlu0 %v13892_v41 }
 0x81e   : > { %4001 = vperm.xlu0 %6343, %v10078_v33  }
 0x821   : > { %3949 = vperm.xlu1 %6341, %v10090_v61  }
 0x822   : > { %4013 = vperm.xlu0 %6343, %v10090_v61  }
 0x825   : > { %3957 = vperm.xlu1 %6341, %v10096_v23  }
 0x826   : > { %4021 = vperm.xlu0 %6343, %v10096_v23  }
 0x829   : > { %6342 = vset.pattern.permute.xlu1 %v13892_v41  ;;  %v6436_v41 = vld [vmem:[%s12653_s5 + $0x78] sm:$0xff]  }
 0x82a   : > { %3997 = vperm.xlu1 %6342, %v10167_v52   ;;  %6344 = vset.pattern.permute.xlu0 %v13895_v36 }
 0x82b   : > { %4061 = vperm.xlu0 %6344, %v10167_v52  }
 0x82e   : > { %4005 = vperm.xlu1 %6342, %v10084_v63  }
 0x82f   : > { %4073 = vperm.xlu0 %6344, %v10176_v5  }
 0x832   : > { %4009 = vperm.xlu1 %6342, %v10176_v5  }
 0x833   : > { %4081 = vperm.xlu0 %6344, %v10183_v49  }
 0x836   : > { %4017 = vperm.xlu1 %6342, %v10183_v49  }
 0x837   : > { %4089 = vperm.xlu0 %6344, %v10189_v8  }
 0x83a   : > { %4025 = vperm.xlu1 %6342, %v10189_v8  }
 0x83b   : > { %6347 = vset.pattern.permute.xlu0 %v13897_v53 }
 0x83c   : > { %v6323_v12 = vpop.permute.xlu1 %6322  ;;  %v6318_v47 = vpop.permute.xlu0 %6317  ;;  %4129 = vperm.xlu0 %6347, %v10078_v33  }
 0x83d   : > { %v6325_v42 = vunpack.i.h.bf16 %v6323_v12  ;;  %v6324_v20 = vunpack.i.l.bf16 %v6323_v12  ;;  %v6320_v37 = vunpack.i.h.bf16 %v6318_v47  ;;  %v6319_v57 = vunpack.i.l.bf16 %v6318_v47 }
 0x83e   : > { %6345 = vset.pattern.permute.xlu1 %v13895_v36  ;;  %v13902_v36 = vmov 10  }
 0x83f   : > { %v3282_v32 = vpack.c.bf16 %v6320_v37, %v6319_v57  ;;  %4065 = vperm.xlu1 %6345, %v10078_v33   ;;  %v3283_v30 = vpack.c.bf16 %v6325_v42, %v6324_v20 }
 0x840   : > { %4141 = vperm.xlu0 %6347, %v10090_v61   ;;  %v6328_v3 = vpop.permute.xlu0 %6327  ;;  %v6333_v48 = vpop.permute.xlu1 %6332 }
 0x841   : > { %6120 = vmatprep.subr.bf16.mxu0 %v3282_v32  ;;  %v6330_v28 = vunpack.i.h.bf16 %v6328_v3  ;;  %v6329_v21 = vunpack.i.l.bf16 %v6328_v3  ;;  %v6335_v38 = vunpack.i.h.bf16 %v6333_v48  ;;  %v6334_v31 = vunpack.i.l.bf16 %v6333_v48 }
 0x842   : > { %6121 = vmatpush3.bf16.msra.mxu0 %v3282_v32 }
 0x843   : > { %6122 = vmatprep.subr.bf16.mxu0 %v3283_v30  ;;  %4069 = vperm.xlu1 %6345, %v10084_v63   ;;  %v3286_v10 = vpack.c.bf16 %v6330_v28, %v6329_v21 }
 0x844   : > { %4149 = vperm.xlu0 %6347, %v10096_v23  }
 0x846   : > { %6123 = vmatpush3.bf16.msra.mxu0 %v3283_v30 }
 0x847   : > { %6124 = vmatprep.subr.msk.bf16.mxu0 %vm7323_vm3, %v10131_v13  ;;  %4077 = vperm.xlu1 %6345, %v10090_v61  }
 0x848   : > { %6348 = vset.pattern.permute.xlu0 %v13899_v24 }
 0x849   : > { %4189 = vperm.xlu0 %6348, %v10167_v52  }
 0x84a   : > { %6125 = vmatpush3.bf16.msk.msra.mxu0 %vm7323_vm3, %v10131_v13  ;;  %v3287_v13 = vpack.c.bf16 %v6335_v38, %v6334_v31 }
 0x84b   : > { %6126 = vmatprep.subr.msk.bf16.mxu0 %vm7323_vm3, %v10133_v19  ;;  %4085 = vperm.xlu1 %6345, %v10096_v23  }
 0x84d   : > { %4201 = vperm.xlu0 %6348, %v10176_v5  }
 0x84e   : > { %6127 = vmatpush3.bf16.msk.msra.mxu0 %vm7323_vm3, %v10133_v19  ;;  %v6431_v19 = vld [vmem:[%s12653_s5 + $0x50] sm:$0xff]  }
 0x84f   : > { %6128 = vmatprep.subr.bf16.mxu0 %v3286_v10  ;;  %6346 = vset.pattern.permute.xlu1 %v13897_v53  ;;  %v13903_v53 = vmov 11  }
 0x850   : > { %4125 = vperm.xlu1 %6346, %v10167_v52  }
 0x851   : > { %4209 = vperm.xlu0 %6348, %v10183_v49   ;;  %v10369_v12 = vpop.permute.xlu1 %3688  ;;  %v10396_v32 = vpop.permute.xlu0 %3683 }
 0x852   : > { %6129 = vmatpush3.bf16.msra.mxu0 %v3286_v10  ;;  %13904 = vst [vmem:[#allocation182_spill] sm:$0xff] %v10369_v12  ;;  %13914 = vst [vmem:[#allocation187_spill] sm:$0xff] %v10396_v32 }
 0x853   : > { %6130 = vmatprep.subr.bf16.mxu0 %v3287_v13 }
 0x854   : > { %4133 = vperm.xlu1 %6346, %v10084_v63  }
 0x855   : > { %4217 = vperm.xlu0 %6348, %v10189_v8   ;;  %v10373_v47 = vpop.permute.xlu1 %3693  ;;  %v10400_v3 = vpop.permute.xlu0 %3698 }
 0x856   : > { %6131 = vmatpush3.bf16.msra.mxu0 %v3287_v13  ;;  %13905 = vst [vmem:[#allocation95_spill] sm:$0xff] %v10373_v47 }
 0x858   : > { %4137 = vperm.xlu1 %6346, %v10176_v5  }
 0x859   : > { %6133 = vmatmul.mubr.msk.bf16.vlgmr.msra.gmra.mrb[4].mxu0 %vm757_vm2, %v6430_v25  ;;  %6351 = vset.pattern.permute.xlu0 %v13900_v54  ;;  %v10377_v42 = vpop.permute.xlu1 %3703 }
 0x85a   : > { %6136 = vmatprep.mubr.msk.bf16.mxu0 %vm757_vm2, %v6431_v19  ;;  %4257 = vperm.xlu0 %6351, %v10078_v33   ;;  %13906 = vst [vmem:[#allocation183_spill] sm:$0xff] %v10377_v42 }
 0x85c   : > { %4145 = vperm.xlu1 %6346, %v10183_v49  }
 0x85e   : > { %4269 = vperm.xlu0 %6351, %v10090_v61  }
 0x860   : > { %4153 = vperm.xlu1 %6346, %v10189_v8  }
 0x861   : > { %6137 = vmatmul.mubr.msk.bf16.gmra.mrb[8].mxu0 %vm757_vm2, %v6432_v11 }
 0x862   : > { %6140 = vmatprep.mubr.msk.bf16.mxu0 %vm757_vm2, %v6433_v14  ;;  %4277 = vperm.xlu0 %6351, %v10096_v23  }
 0x864   : > { %6349 = vset.pattern.permute.xlu1 %v13899_v24  ;;  %v10404_v24 = vpop.permute.xlu0 %3708 }
 0x865   : > { %4193 = vperm.xlu1 %6349, %v10078_v33   ;;  %13916 = vst [vmem:[#allocation188_spill] sm:$0xff] %v10404_v24 }
 0x866   : > { %6352 = vset.pattern.permute.xlu0 %v13901_v16 }
 0x867   : > { %4317 = vperm.xlu0 %6352, %v10167_v52  }
 0x868   : > { %v10408_v21 = vpop.permute.xlu0 %3741 }
 0x869   : > { %6141 = vmatmul.mubr.msk.bf16.gmra.mrb[12].mxu0 %vm757_vm2, %v6434_v26  ;;  %4197 = vperm.xlu1 %6349, %v10084_v63  }
 0x86a   : > { %6144 = vmatprep.mubr.msk.bf16.mxu0 %vm757_vm2, %v6435_v2 }
 0x86b   : > { %4329 = vperm.xlu0 %6352, %v10176_v5  }
 0x86c   : > { %v10412_v38 = vpop.permute.xlu0 %3749 }
 0x86d   : > { %4205 = vperm.xlu1 %6349, %v10090_v61   ;;  %13918 = vst [vmem:[#allocation190_spill] sm:$0xff] %v10412_v38 }
 0x86f   : > { %4337 = vperm.xlu0 %6352, %v10183_v49  }
 0x870   : > { %v10416_v10 = vpop.permute.xlu0 %3757 }
 0x871   : > { %6145 = vmatmul.mubr.msk.bf16.gmra.mrb[16].mxu0 %vm757_vm2, %v6436_v41  ;;  %4213 = vperm.xlu1 %6349, %v10096_v23  }
 0x873   : > { %4345 = vperm.xlu0 %6352, %v10189_v8  }
 0x874   : > { %v10420_v25 = vpop.permute.xlu0 %3765 }
 0x875   : > { %6350 = vset.pattern.permute.xlu1 %v13900_v54  ;;  %13921 = vst [vmem:[#allocation25_spill] sm:$0xff] %v10420_v25 }
 0x876   : > { %4253 = vperm.xlu1 %6350, %v10167_v52  }
 0x877   : > { %6355 = vset.pattern.permute.xlu0 %v13902_v36 }
 0x878   : > { %4385 = vperm.xlu0 %6355, %v10078_v33   ;;  %v10424_v54 = vpop.permute.xlu0 %3805 }
 0x87a   : > { %4261 = vperm.xlu1 %6350, %v10084_v63  }
 0x87c   : > { %4397 = vperm.xlu0 %6355, %v10090_v61   ;;  %v10428_v14 = vpop.permute.xlu0 %3817 }
 0x87d   : > { %13924 = vst [vmem:[#allocation193_spill] sm:$0xff] %v10428_v14 }
 0x87e   : > { %4265 = vperm.xlu1 %6350, %v10176_v5  }
 0x880   : > { %4405 = vperm.xlu0 %6355, %v10096_v23   ;;  %v10432_v2 = vpop.permute.xlu0 %3825 }
 0x881   : > { %13926 = vst [vmem:[#allocation194_spill] sm:$0xff] %v10432_v2 }
 0x882   : > { %4273 = vperm.xlu1 %6350, %v10183_v49  }
 0x884   : > { %6356 = vset.pattern.permute.xlu0 %v13903_v53  ;;  %v10436_v41 = vpop.permute.xlu0 %3833 }
 0x885   : > { %13927 = vst [vmem:[#allocation63_spill] sm:$0xff] %v10436_v41 }
 0x886   : > { %4281 = vperm.xlu1 %6350, %v10189_v8  }
 0x88a   : > { %6353 = vset.pattern.permute.xlu1 %v13901_v16 }
 0x88b   : > { %4321 = vperm.xlu1 %6353, %v10078_v33   ;;  %v10380_v33 = vpop.permute.xlu1 %3713 }
 0x88c   : > { %13907 = vst [vmem:[#allocation97_spill] sm:$0xff] %v10380_v33 }
 0x88f   : > { %4325 = vperm.xlu1 %6353, %v10084_v63  }
 0x893   : > { %4333 = vperm.xlu1 %6353, %v10090_v61   ;;  %v10384_v61 = vpop.permute.xlu1 %3745 }
 0x894   : > { %13908 = vst [vmem:[#allocation184_spill] sm:$0xff] %v10384_v61 }
 0x897   : > { %4341 = vperm.xlu1 %6353, %v10096_v23   ;;  %v10386_v23 = vpop.permute.xlu1 %3753 }
 0x898   : > { %13909 = vst [vmem:[#allocation113_spill] sm:$0xff] %v10386_v23 }
 0x89b   : > { %6354 = vset.pattern.permute.xlu1 %v13902_v36  ;;  %v10388_v20 = vpop.permute.xlu1 %3761 }
 0x89c   : > { %4381 = vperm.xlu1 %6354, %v10167_v52   ;;  %13910 = vst [vmem:[#allocation185_spill] sm:$0xff] %v10388_v20 }
 0x89f   : > { %v10390_v37 = vpop.permute.xlu1 %3769 }
 0x8a0   : > { %4389 = vperm.xlu1 %6354, %v10084_v63   ;;  %13911 = vst [vmem:[#allocation109_spill] sm:$0xff] %v10390_v37 }
 0x8a3   : > { %v10392_v63 = vpop.permute.xlu1 %3809 }
 0x8a4   : > { %4393 = vperm.xlu1 %6354, %v10176_v5   ;;  %13912 = vst [vmem:[#allocation186_spill] sm:$0xff] %v10392_v63 }
 0x8a7   : > { %v10394_v57 = vpop.permute.xlu1 %3813 }
 0x8a8   : > { %4401 = vperm.xlu1 %6354, %v10183_v49   ;;  %13913 = vst [vmem:[#allocation128_spill] sm:$0xff] %v10394_v57 }
 0x8ab   : > { %v10398_v30 = vpop.permute.xlu1 %3821 }
 0x8ac   : > { %4409 = vperm.xlu1 %6354, %v10189_v8  }
 0x8af   : > { %v10402_v34 = vpop.permute.xlu1 %3829 }
 0x8b0   : > { %6357 = vset.pattern.permute.xlu1 %v13903_v53  ;;  %13915 = vst [vmem:[#allocation123_spill] sm:$0xff] %v10402_v34  ;;  %v10440_v53 = vpop.permute.xlu0 %3873 }
 0x8b1   : > { %13929 = vst [vmem:[#allocation53_spill] sm:$0xff] %v10440_v53  ;;  %v11034_v53 = vld [vmem:[%s12655_s7 + $0x68] sm:$0xff] }
 0x8b3   : > { %v10406_v28 = vpop.permute.xlu1 %3869 }
 0x8b4   : > { %v10444_v51 = vpop.permute.xlu0 %3885 }
 0x8b7   : > { %v10410_v48 = vpop.permute.xlu1 %3877 }
 0x8b8   : > { %13917 = vst [vmem:[#allocation19_spill] sm:$0xff] %v10410_v48  ;;  %v10448_v1 = vpop.permute.xlu0 %3893 }
 0x8b9   : > { %13931 = vst [vmem:[#allocation77_spill] sm:$0xff] %v10448_v1 }
 0x8bb   : > { %v10414_v31 = vpop.permute.xlu1 %3881 }
 0x8bc   : > { %13919 = vst [vmem:[#allocation33_spill] sm:$0xff] %v10414_v31  ;;  %v10452_v33 = vpop.permute.xlu0 %3933 }
 0x8bf   : > { %v10418_v13 = vpop.permute.xlu1 %3889 }
 0x8c0   : > { %13920 = vst [vmem:[#allocation191_spill] sm:$0xff] %v10418_v13  ;;  %v10458_v41 = vpop.permute.xlu0 %3945 }
 0x8c1   : > { %13934 = vst [vmem:[#allocation198_spill] sm:$0xff] %v10458_v41 }
 0x8c3   : > { %v10422_v19 = vpop.permute.xlu1 %3897 }
 0x8c4   : > { %13922 = vst [vmem:[#allocation192_spill] sm:$0xff] %v10422_v19  ;;  %v10470_v1 = vpop.permute.xlu0 %3953 }
 0x8c5   : > { %13937 = vst [vmem:[#allocation199_spill] sm:$0xff] %v10470_v1 }
 0x8c7   : > { %v10426_v11 = vpop.permute.xlu1 %3937 }
 0x8c8   : > { %13923 = vst [vmem:[#allocation48_spill] sm:$0xff] %v10426_v11  ;;  %v10482_v41 = vpop.permute.xlu0 %3961 }
 0x8c9   : > { %13939 = vst [vmem:[#allocation200_spill] sm:$0xff] %v10482_v41 }
 0x8cb   : > { %v10430_v26 = vpop.permute.xlu1 %3941 }
 0x8cc   : > { %13925 = vst [vmem:[#allocation39_spill] sm:$0xff] %v10430_v26 }
 0x8cf   : > { %v10434_v16 = vpop.permute.xlu1 %3949 }
 0x8d3   : > { %v10438_v36 = vpop.permute.xlu1 %3957 }
 0x8d4   : > { %13928 = vst [vmem:[#allocation195_spill] sm:$0xff] %v10438_v36 }
 0x8d7   : > { %v10442_v22 = vpop.permute.xlu1 %3997 }
 0x8db   : > { %v10446_v15 = vpop.permute.xlu1 %4005 }
 0x8dc   : > { %13930 = vst [vmem:[#allocation196_spill] sm:$0xff] %v10446_v15  ;;  %v10488_v15 = vpop.permute.xlu0 %4001 }
 0x8dd   : > { %13941 = vst [vmem:[#allocation201_spill] sm:$0xff] %v10488_v15  ;;  %v10939_v15 = vld [vmem:[%s12655_s7 + $0x50] sm:$0xff] }
 0x8df   : > { %v10450_v19 = vpop.permute.xlu1 %4009 }
 0x8e0   : > { %13932 = vst [vmem:[#allocation197_spill] sm:$0xff] %v10450_v19 }
 0x8e3   : > { %v10454_v37 = vpop.permute.xlu1 %4017 }
 0x8e4   : > { %13933 = vst [vmem:[#allocation66_spill] sm:$0xff] %v10454_v37 }
 0x8e7   : > { %v10462_v24 = vpop.permute.xlu1 %4025 }
 0x8e8   : > { %13935 = vst [vmem:[#allocation101_spill] sm:$0xff] %v10462_v24 }
 0x8eb   : > { %v10468_v13 = vpop.permute.xlu1 %4065 }
 0x8ec   : > { %13936 = vst [vmem:[#allocation5_spill] sm:$0xff] %v10468_v13 }
 0x8ef   : > { %v10480_v19 = vpop.permute.xlu1 %4069 }
 0x8f0   : > { %13938 = vst [vmem:[#allocation79_spill] sm:$0xff] %v10480_v19 }
 0x8f3   : > { %v10485_v47 = vpop.permute.xlu1 %4077 }
 0x8f4   : > { %13940 = vst [vmem:[#allocation114_spill] sm:$0xff] %v10485_v47 }
 0x92c   : > { %v10456_v34 = vpop.f32.mrb[4].mxu0 }
 0x92d   : > { %v10460_v36 = vpop.f32.mrb[5].mxu0 }
 0x92e   : > { %v10464_v25 = vpop.f32.mrb[6].mxu0 }
 0x92f   : > { %v10466_v45 = vpop.f32.mrb[7].mxu0 }
 0x934   : > { %v10472_v2 = vpop.f32.mrb[8].mxu0 }
 0x935   : > { %v10474_v42 = vpop.f32.mrb[9].mxu0 }
 0x936   : > { %v10476_v37 = vpop.f32.mrb[10].mxu0 }
 0x937   : > { %v10478_v20 = vpop.f32.mrb[11].mxu0 }
 0x93c   : > { %v6142_v24 = vpop.f32.mrb[12].mxu0 }
 0x93d   : > { %v3524_v31 = vadd.f32 %v6142_v24, %v10260_v27  ;;  %v3515_v14 = vpop.f32.mrb[13].mxu0  ;;  %v10492_v27 = vpop.permute.xlu1 %4085 }
 0x93e   : > { %v3516_v1 = vadd.f32 %v3515_v14, %v10251_v9  ;;  %v6143_v23 = vpop.f32.mrb[14].mxu0  ;;  %13942 = vst [vmem:[#allocation88_spill] sm:$0xff] %v10492_v27  ;;  %v10494_v9 = vpop.permute.xlu0 %4013 }
 0x93f   : > { %v5993_v26 = vmul.f32 -1.442695, %v3524_v31  ;;  %v3527_v48 = vadd.f32 %v6143_v23, %v10224_v29  ;;  %v3518_v57 = vpop.f32.mrb[15].mxu0 }
 0x940   : > { %v5991_v12 = vmul.f32 -1.442695, %v3516_v1  ;;  %v3519_v19 = vadd.f32 %v3518_v57, %v10217_v39 }
 0x941   : > { %6491 = vpow2.f32 %v5993_v26  ;;  %v5994_v41 = vmul.f32 -1.442695, %v3527_v48  ;;  %v10500_v26 = vpop.permute.xlu1 %4125 }
 0x942   : > { %6493 = vpow2.f32 %v5991_v12  ;;  %v5992_v38 = vmul.f32 -1.442695, %v3519_v19 }
 0x943   : > { %6495 = vpow2.f32 %v5994_v41  ;;  %v10502_v41 = vpop.permute.xlu0 %4021 }
 0x944   : > { %6497 = vpow2.f32 %v5992_v38  ;;  %v6146_v24 = vpop.f32.mrb[16].mxu0  ;;  %13943 = vst [vmem:[#allocation202_spill] sm:$0xff] %v10502_v41 }
 0x945   : > { %v3540_v14 = vadd.f32 %v6146_v24, %v10276_v43  ;;  %v3531_v31 = vpop.f32.mrb[17].mxu0 }
 0x946   : > { %v3532_v29 = vadd.f32 %v3531_v31, %v10266_v40  ;;  %v6147_v23 = vpop.f32.mrb[18].mxu0 }
 0x947   : > { %v5997_v1 = vmul.f32 -1.442695, %v3540_v14  ;;  %v3543_v39 = vadd.f32 %v6147_v23, %v10239_v62  ;;  %v3534_v57 = vpop.f32.mrb[19].mxu0  ;;  %v10504_v23 = vpop.permute.xlu1 %4133 }
 0x948   : > { %v5995_v48 = vmul.f32 -1.442695, %v3532_v29  ;;  %v3535_v12 = vadd.f32 %v3534_v57, %v10232_v6  ;;  %13944 = vst [vmem:[#allocation127_spill] sm:$0xff] %v10504_v23 }
 0x949   : > { %6499 = vpow2.f32 %v5997_v1  ;;  %v5998_v19 = vmul.f32 -1.442695, %v3543_v39  ;;  %v10506_v1 = vpop.permute.xlu0 %4061 }
 0x94a   : > { %6501 = vpow2.f32 %v5995_v48  ;;  %v5996_v38 = vmul.f32 -1.442695, %v3535_v12 }
 0x94b   : > { %v6492_v43 = vpop.eup %6491  ;;  %6503 = vpow2.f32 %v5998_v19 }
 0x94c   : > { %v6494_v24 = vpop.eup %6493  ;;  %v3572_v40 = vadd.f32 1.0, %v6492_v43  ;;  %6505 = vpow2.f32 %v5996_v38 }
 0x94d   : > { %v6496_v14 = vpop.eup %6495  ;;  %v3570_v31 = vadd.f32 1.0, %v6494_v24  ;;  %v10508_v24 = vpop.permute.xlu1 %4137 }
 0x94e   : > { %v6498_v62 = vpop.eup %6497  ;;  %6507 = vrcp.f32 %v3572_v40  ;;  %v3573_v29 = vadd.f32 1.0, %v6496_v14  ;;  %13945 = vst [vmem:[#allocation203_spill] sm:$0xff] %v10508_v24  ;;  %v10510_v40 = vpop.permute.xlu0 %4073  ;;  %v3492_v14 = vadd.f32 %v10456_v34, %v10228_v55 }
 0x94f   : > { %6509 = vrcp.f32 %v3570_v31  ;;  %v3571_v6 = vadd.f32 1.0, %v6498_v62  ;;  %13946 = vst [vmem:[#allocation100_spill] sm:$0xff] %v10510_v40 }
 0x950   : > { %6511 = vrcp.f32 %v3573_v29  ;;  %v3484_v29 = vadd.f32 %v10460_v36, %v10222_v60 }
 0x951   : > { %6513 = vrcp.f32 %v3571_v6 }
 0x952   : > { %v10532_v60 = vpop.permute.xlu0 %4081 }
 0x953   : > { %v6500_v39 = vpop.eup %6499  ;;  %13950 = vst [vmem:[#allocation15_spill] sm:$0xff] %v10532_v60 }
 0x954   : > { %v6502_v57 = vpop.eup %6501  ;;  %v3576_v48 = vadd.f32 1.0, %v6500_v39  ;;  %v3495_v39 = vadd.f32 %v10464_v25, %v10201_v0  ;;  %v10530_v0 = vpop.permute.xlu1 %4145  ;;  %v3500_v25 = vadd.f32 %v10474_v42, %v10237_v7 }
 0x955   : > { %v6504_v12 = vpop.eup %6503  ;;  %v3574_v19 = vadd.f32 1.0, %v6502_v57  ;;  %13949 = vst [vmem:[#allocation204_spill] sm:$0xff] %v10530_v0 }
 0x956   : > { %v6506_v43 = vpop.eup %6505  ;;  %6515 = vrcp.f32 %v3576_v48  ;;  %v3577_v38 = vadd.f32 1.0, %v6504_v12  ;;  %v3487_v12 = vadd.f32 %v10466_v45, %v10194_v46  ;;  %v3508_v46 = vadd.f32 %v10472_v2, %v10244_v4  ;;  %v10552_v7 = vpop.permute.xlu0 %4089 }
 0x957   : > { %6517 = vrcp.f32 %v3574_v19  ;;  %v3575_v31 = vadd.f32 1.0, %v6506_v43  ;;  %v3503_v4 = vadd.f32 %v10478_v20, %v10205_v17  ;;  %13954 = vst [vmem:[#allocation118_spill] sm:$0xff] %v10552_v7 }
 0x958   : > { %v6508_v62 = vpop.eup %6507  ;;  %6519 = vrcp.f32 %v3577_v38 }
 0x959   : > { %v6510_v6 = vpop.eup %6509  ;;  %v3596_v57 = vmul.f32 %v6508_v62, %v3492_v14  ;;  %6521 = vrcp.f32 %v3575_v31  ;;  %v10550_v14 = vpop.permute.xlu1 %4153 }
 0x95a   : > { %v6512_v48 = vpop.eup %6511  ;;  %v3594_v27 = vmul.f32 %v6510_v6, %v3484_v29  ;;  %13953 = vst [vmem:[#allocation205_spill] sm:$0xff] %v10550_v14  ;;  %v10568_v17 = vpop.permute.xlu0 %4129 }
 0x95b   : > { %v6514_v41 = vpop.eup %6513  ;;  %v10522_v55 = vsel %vm390_vm1, %v3596_v57, 0.0  ;;  %v3597_v34 = vmul.f32 %v6512_v48, %v3495_v39  ;;  %13958 = vst [vmem:[#allocation30_spill] sm:$0xff] %v10568_v17 }
 0x95c   : > { %v10524_v19 = vmul.f32 %v6514_v41, %v3487_v12  ;;  %3856 = vrot.lane.b32.xlu1 %v10522_v55, %s13947_s27  ;;  %3728 = vrot.lane.b32.xlu0 %v10522_v55, %s13948_s28  ;;  %v3511_v41 = vadd.f32 %v10476_v37, %v10211_v44  ;;  %v10580_v29 = vsel %vm390_vm1, %v3594_v27, 0.0 }
 0x95d   : > { %v10562_v44 = vpop.permute.xlu1 %4193  ;;  %13962 = vst [vmem:[#allocation208_spill] sm:$0xff] %v10580_v29 }
 0x95e   : > { %13955 = vst [vmem:[#allocation206_spill] sm:$0xff] %v10562_v44  ;;  %v10576_v37 = vpop.permute.xlu0 %4141 }
 0x95f   : > { %13961 = vst [vmem:[#allocation133_spill] sm:$0xff] %v10576_v37 }
 0x960   : > { %v6516_v45 = vpop.eup %6515  ;;  %3984 = vrot.lane.b32.xlu1 %v10522_v55, %s13951_s26  ;;  %3792 = vrot.lane.b32.xlu0 %v10522_v55, %s13952_s14 }
 0x961   : > { %v6518_v36 = vpop.eup %6517  ;;  %v10544_v43 = vmul.f32 %v6516_v45, %v3508_v46  ;;  %v10574_v20 = vpop.permute.xlu1 %4197  ;;  %v10616_v46 = vsel %vm390_vm1, %v3597_v34, 0.0 }
 0x962   : > { %v6520_v38 = vpop.eup %6519  ;;  %v10548_v2 = vmul.f32 %v6518_v36, %v3500_v25  ;;  %13960 = vst [vmem:[#allocation207_spill] sm:$0xff] %v10574_v20  ;;  %v10592_v39 = vpop.permute.xlu0 %4149 }
 0x963   : > { %v6522_v42 = vpop.eup %6521  ;;  %v10554_v31 = vmul.f32 %v6520_v38, %v3511_v41  ;;  %13964 = vst [vmem:[#allocation210_spill] sm:$0xff] %v10592_v39 }
 0x964   : > { %v10556_v62 = vmul.f32 %v6522_v42, %v3503_v4  ;;  %4112 = vrot.lane.b32.xlu1 %v10522_v55, %s12986_s19  ;;  %3920 = vrot.lane.b32.xlu0 %v10522_v55, %s12965_s12  ;;  %v10761_v24 = vsel %vm390_vm1, %v10548_v2, 0.0 }
 0x965   : > { %v10586_v6 = vpop.permute.xlu1 %4205 }
 0x966   : > { %13963 = vst [vmem:[#allocation46_spill] sm:$0xff] %v10586_v6  ;;  %v10600_v57 = vpop.permute.xlu0 %4189 }
 0x968   : > { %4240 = vrot.lane.b32.xlu1 %v10522_v55, %s13956_s22  ;;  %4048 = vrot.lane.b32.xlu0 %v10522_v55, %s13957_s16 }
 0x969   : > { %v10598_v27 = vpop.permute.xlu1 %4213 }
 0x96a   : > { %13965 = vst [vmem:[#allocation61_spill] sm:$0xff] %v10598_v27  ;;  %v10612_v12 = vpop.permute.xlu0 %4201 }
 0x96b   : > { %13966 = vst [vmem:[#allocation240_spill] sm:$0xff] %v10612_v12 }
 0x96c   : > { %4368 = vrot.lane.b32.xlu1 %v10522_v55, %s13959_s29  ;;  %4176 = vrot.lane.b32.xlu0 %v10522_v55, %s13003_s30 }
 0x96d   : > { %v10606_v48 = vpop.permute.xlu1 %4253 }
 0x96e   : > { %v10624_v25 = vpop.permute.xlu0 %4209 }
 0x96f   : > { %13968 = vst [vmem:[#allocation7_spill] sm:$0xff] %v10624_v25 }
 0x970   : > { %4304 = vrot.lane.b32.xlu0 %v10522_v55, %s12950_s13  ;;  %3852 = vrot.lane.b32.xlu1 %v10580_v29, %s13947_s27 }
 0x971   : > { %v10622_v45 = vpop.permute.xlu1 %4261 }
 0x972   : > { %13967 = vst [vmem:[#allocation17_spill] sm:$0xff] %v10622_v45  ;;  %v10636_v34 = vpop.permute.xlu0 %4217 }
 0x973   : > { %13970 = vst [vmem:[#allocation24_spill] sm:$0xff] %v10636_v34 }
 0x974   : > { %4432 = vrot.lane.b32.xlu0 %v10522_v55, %s12926_s24  ;;  %3980 = vrot.lane.b32.xlu1 %v10580_v29, %s13951_s26 }
 0x975   : > { %v10630_v36 = vpop.permute.xlu1 %4265 }
 0x976   : > { %13969 = vst [vmem:[#allocation211_spill] sm:$0xff] %v10630_v36  ;;  %v10644_v38 = vpop.permute.xlu0 %4257 }
 0x977   : > { %13972 = vst [vmem:[#allocation76_spill] sm:$0xff] %v10644_v38  ;;  %v10867_v38 = vsel %vm390_vm1, %v10556_v62, 0.0 }
 0x978   : > { %4108 = vrot.lane.b32.xlu1 %v10580_v29, %s12986_s19  ;;  %3724 = vrot.lane.b32.xlu0 %v10580_v29, %s13948_s28 }
 0x979   : > { %v10642_v41 = vpop.permute.xlu1 %4273 }
 0x97a   : > { %13971 = vst [vmem:[#allocation212_spill] sm:$0xff] %v10642_v41  ;;  %v10656_v42 = vpop.permute.xlu0 %4269 }
 0x97b   : > { %13974 = vst [vmem:[#allocation36_spill] sm:$0xff] %v10656_v42 }
 0x97c   : > { %4236 = vrot.lane.b32.xlu1 %v10580_v29, %s13956_s22  ;;  %3788 = vrot.lane.b32.xlu0 %v10580_v29, %s13952_s14 }
 0x97d   : > { %v10650_v4 = vpop.permute.xlu1 %4281 }
 0x97e   : > { %13973 = vst [vmem:[#allocation213_spill] sm:$0xff] %v10650_v4  ;;  %v10664_v14 = vpop.permute.xlu0 %4277  ;;  %v10669_v4 = vsel %vm390_vm1, %v10524_v19, 0.0 }
 0x97f   : > { %13976 = vst [vmem:[#allocation99_spill] sm:$0xff] %v10664_v14 }
 0x980   : > { %4364 = vrot.lane.b32.xlu1 %v10580_v29, %s13959_s29  ;;  %3916 = vrot.lane.b32.xlu0 %v10580_v29, %s12965_s12 }
 0x981   : > { %v10658_v34 = vpop.permute.xlu1 %4321 }
 0x982   : > { %13975 = vst [vmem:[#allocation214_spill] sm:$0xff] %v10658_v34  ;;  %v10681_v14 = vpop.permute.xlu0 %4317 }
 0x984   : > { %3730 = vrot.lane.b32.xlu1 %v10616_v46, %s13948_s28  ;;  %4044 = vrot.lane.b32.xlu0 %v10580_v29, %s13957_s16 }
 0x985   : > { %v10675_v7 = vpop.permute.xlu1 %4325 }
 0x986   : > { %13977 = vst [vmem:[#allocation242_spill] sm:$0xff] %v10675_v7  ;;  %v10689_v19 = vpop.permute.xlu0 %4329 }
 0x987   : > { %13979 = vst [vmem:[#allocation215_spill] sm:$0xff] %v10689_v19 }
 0x988   : > { %3794 = vrot.lane.b32.xlu1 %v10616_v46, %s13952_s14  ;;  %4172 = vrot.lane.b32.xlu0 %v10580_v29, %s13003_s30 }
 0x989   : > { %v10683_v27 = vpop.permute.xlu1 %4333 }
 0x98a   : > { %13978 = vst [vmem:[#allocation6_spill] sm:$0xff] %v10683_v27  ;;  %v10701_v41 = vpop.permute.xlu0 %4337 }
 0x98b   : > { %13981 = vst [vmem:[#allocation216_spill] sm:$0xff] %v10701_v41  ;;  %v10720_v41 = vsel %vm390_vm1, %v10544_v43, 0.0 }
 0x98c   : > { %3922 = vrot.lane.b32.xlu1 %v10616_v46, %s12965_s12  ;;  %4300 = vrot.lane.b32.xlu0 %v10580_v29, %s12950_s13  ;;  %13984 = vst [vmem:[#allocation64_spill] sm:$0xff] %v10720_v41 }
 0x98d   : > { %v10695_v39 = vpop.permute.xlu1 %4341 }
 0x98e   : > { %13980 = vst [vmem:[#allocation51_spill] sm:$0xff] %v10695_v39  ;;  %v10709_v0 = vpop.permute.xlu0 %4345 }
 0x98f   : > { %13982 = vst [vmem:[#allocation112_spill] sm:$0xff] %v10709_v0 }
 0x990   : > { %4050 = vrot.lane.b32.xlu1 %v10616_v46, %s13957_s16  ;;  %4428 = vrot.lane.b32.xlu0 %v10580_v29, %s12926_s24 }
 0x991   : > { %v10703_v25 = vpop.permute.xlu1 %4381 }
 0x992   : > { %v10726_v0 = vpop.permute.xlu0 %4385 }
 0x993   : > { %13985 = vst [vmem:[#allocation220_spill] sm:$0xff] %v10726_v0 }
 0x994   : > { %4178 = vrot.lane.b32.xlu1 %v10616_v46, %s13003_s30  ;;  %3858 = vrot.lane.b32.xlu0 %v10616_v46, %s13947_s27 }
 0x995   : > { %v10715_v39 = vpop.permute.xlu1 %4389 }
 0x996   : > { %13983 = vst [vmem:[#allocation217_spill] sm:$0xff] %v10715_v39  ;;  %v10734_v19 = vpop.permute.xlu0 %4397 }
 0x997   : > { %13987 = vst [vmem:[#allocation245_spill] sm:$0xff] %v10734_v19 }
 0x998   : > { %4306 = vrot.lane.b32.xlu1 %v10616_v46, %s12950_s13  ;;  %3986 = vrot.lane.b32.xlu0 %v10616_v46, %s13951_s26 }
 0x999   : > { %v10728_v60 = vpop.permute.xlu1 %4393 }
 0x99a   : > { %13986 = vst [vmem:[#allocation20_spill] sm:$0xff] %v10728_v60  ;;  %v10746_v60 = vpop.permute.xlu0 %4405 }
 0x99b   : > { %13989 = vst [vmem:[#allocation9_spill] sm:$0xff] %v10746_v60 }
 0x99c   : > { %4434 = vrot.lane.b32.xlu1 %v10616_v46, %s12926_s24  ;;  %4114 = vrot.lane.b32.xlu0 %v10616_v46, %s12986_s19 }
 0x99d   : > { %v10736_v43 = vpop.permute.xlu1 %4401 }
 0x99e   : > { %13988 = vst [vmem:[#allocation31_spill] sm:$0xff] %v10736_v43 }
 0x9a0   : > { %3726 = vrot.lane.b32.xlu1 %v10669_v4, %s13948_s28  ;;  %4242 = vrot.lane.b32.xlu0 %v10616_v46, %s13956_s22 }
 0x9a1   : > { %v10748_v36 = vpop.permute.xlu1 %4409 }
 0x9a2   : > { %13990 = vst [vmem:[#allocation218_spill] sm:$0xff] %v10748_v36 }
 0x9a4   : > { %3790 = vrot.lane.b32.xlu1 %v10669_v4, %s13952_s14  ;;  %4370 = vrot.lane.b32.xlu0 %v10616_v46, %s13959_s29 }
 0x9a8   : > { %3918 = vrot.lane.b32.xlu1 %v10669_v4, %s12965_s12  ;;  %3854 = vrot.lane.b32.xlu0 %v10669_v4, %s13947_s27 }
 0x9ac   : > { %4046 = vrot.lane.b32.xlu1 %v10669_v4, %s13957_s16  ;;  %3982 = vrot.lane.b32.xlu0 %v10669_v4, %s13951_s26 }
 0x9b0   : > { %4174 = vrot.lane.b32.xlu1 %v10669_v4, %s13003_s30  ;;  %4110 = vrot.lane.b32.xlu0 %v10669_v4, %s12986_s19 }
 0x9b4   : > { %4302 = vrot.lane.b32.xlu1 %v10669_v4, %s12950_s13  ;;  %4238 = vrot.lane.b32.xlu0 %v10669_v4, %s13956_s22 }
 0x9b8   : > { %4430 = vrot.lane.b32.xlu1 %v10669_v4, %s12926_s24  ;;  %4366 = vrot.lane.b32.xlu0 %v10669_v4, %s13959_s29 }
 0x9bc   : > { %3864 = vrot.lane.b32.xlu1 %v10720_v41, %s13947_s27  ;;  %3736 = vrot.lane.b32.xlu0 %v10720_v41, %s13948_s28 }
 0x9c0   : > { %3992 = vrot.lane.b32.xlu1 %v10720_v41, %s13951_s26  ;;  %3800 = vrot.lane.b32.xlu0 %v10720_v41, %s13952_s14 }
 0x9c4   : > { %4120 = vrot.lane.b32.xlu1 %v10720_v41, %s12986_s19  ;;  %3928 = vrot.lane.b32.xlu0 %v10720_v41, %s12965_s12 }
 0x9c8   : > { %4248 = vrot.lane.b32.xlu1 %v10720_v41, %s13956_s22  ;;  %4056 = vrot.lane.b32.xlu0 %v10720_v41, %s13957_s16 }
 0x9cc   : > { %4376 = vrot.lane.b32.xlu1 %v10720_v41, %s13959_s29  ;;  %4184 = vrot.lane.b32.xlu0 %v10720_v41, %s13003_s30 }
 0x9ce   : > { %v10754_v43 = vpop.permute.xlu1 %3856  ;;  %v10756_v12 = vpop.permute.xlu0 %3728 }
 0x9cf   : > { %13991 = vst [vmem:[#allocation125_spill] sm:$0xff] %v10754_v43  ;;  %13992 = vst [vmem:[#allocation219_spill] sm:$0xff] %v10756_v12 }
 0x9d0   : > { %3860 = vrot.lane.b32.xlu1 %v10761_v24, %s13947_s27  ;;  %4312 = vrot.lane.b32.xlu0 %v10720_v41, %s12950_s13 }
 0x9d2   : > { %v10767_v36 = vpop.permute.xlu1 %3984  ;;  %v10769_v60 = vpop.permute.xlu0 %3792 }
 0x9d3   : > { %13993 = vst [vmem:[#allocation78_spill] sm:$0xff] %v10767_v36  ;;  %13994 = vst [vmem:[#allocation221_spill] sm:$0xff] %v10769_v60 }
 0x9d4   : > { %3988 = vrot.lane.b32.xlu1 %v10761_v24, %s13951_s26  ;;  %4440 = vrot.lane.b32.xlu0 %v10720_v41, %s12926_s24 }
 0x9d6   : > { %v10775_v40 = vpop.permute.xlu1 %4112  ;;  %v10777_v2 = vpop.permute.xlu0 %3920 }
 0x9d7   : > { %13995 = vst [vmem:[#allocation87_spill] sm:$0xff] %v10775_v40  ;;  %13996 = vst [vmem:[#allocation222_spill] sm:$0xff] %v10777_v2  ;;  %v10806_v40 = vsel %vm390_vm1, %v10554_v31, 0.0 }
 0x9d8   : > { %4116 = vrot.lane.b32.xlu1 %v10761_v24, %s12986_s19  ;;  %3732 = vrot.lane.b32.xlu0 %v10761_v24, %s13948_s28 }
 0x9da   : > { %v10783_v39 = vpop.permute.xlu1 %4240  ;;  %v10785_v7 = vpop.permute.xlu0 %4048 }
 0x9db   : > { %13997 = vst [vmem:[#allocation8_spill] sm:$0xff] %v10783_v39  ;;  %13998 = vst [vmem:[#allocation244_spill] sm:$0xff] %v10785_v7 }
 0x9dc   : > { %4244 = vrot.lane.b32.xlu1 %v10761_v24, %s13956_s22  ;;  %3796 = vrot.lane.b32.xlu0 %v10761_v24, %s13952_s14 }
 0x9de   : > { %v10791_v45 = vpop.permute.xlu1 %4368  ;;  %v10793_v20 = vpop.permute.xlu0 %4176 }
 0x9df   : > { %13999 = vst [vmem:[#allocation26_spill] sm:$0xff] %v10791_v45  ;;  %14000 = vst [vmem:[#allocation223_spill] sm:$0xff] %v10793_v20 }
 0x9e0   : > { %4372 = vrot.lane.b32.xlu1 %v10761_v24, %s13959_s29  ;;  %3924 = vrot.lane.b32.xlu0 %v10761_v24, %s12965_s12 }
 0x9e2   : > { %v10799_v23 = vpop.permute.xlu0 %4304  ;;  %v10801_v39 = vpop.permute.xlu1 %3852 }
 0x9e3   : > { %14001 = vst [vmem:[#allocation98_spill] sm:$0xff] %v10799_v23 }
 0x9e4   : > { %3738 = vrot.lane.b32.xlu1 %v10806_v40, %s13948_s28  ;;  %4052 = vrot.lane.b32.xlu0 %v10761_v24, %s13957_s16 }
 0x9e6   : > { %v10812_v45 = vpop.permute.xlu0 %4432  ;;  %v10814_v20 = vpop.permute.xlu1 %3980 }
 0x9e7   : > { %14002 = vst [vmem:[#allocation224_spill] sm:$0xff] %v10812_v45 }
 0x9e8   : > { %3802 = vrot.lane.b32.xlu1 %v10806_v40, %s13952_s14  ;;  %4180 = vrot.lane.b32.xlu0 %v10761_v24, %s13003_s30 }
 0x9ea   : > { %v10820_v23 = vpop.permute.xlu1 %4108  ;;  %v10822_v31 = vpop.permute.xlu0 %3724 }
 0x9ec   : > { %3930 = vrot.lane.b32.xlu1 %v10806_v40, %s12965_s12  ;;  %4308 = vrot.lane.b32.xlu0 %v10761_v24, %s12950_s13 }
 0x9ee   : > { %v10828_v7 = vpop.permute.xlu1 %4236  ;;  %v10830_v45 = vpop.permute.xlu0 %3788 }
 0x9f0   : > { %4058 = vrot.lane.b32.xlu1 %v10806_v40, %s13957_s16  ;;  %4436 = vrot.lane.b32.xlu0 %v10761_v24, %s12926_s24 }
 0x9f2   : > { %v10836_v36 = vpop.permute.xlu1 %4364  ;;  %v10838_v2 = vpop.permute.xlu0 %3916 }
 0x9f4   : > { %4186 = vrot.lane.b32.xlu1 %v10806_v40, %s13003_s30  ;;  %3866 = vrot.lane.b32.xlu0 %v10806_v40, %s13947_s27 }
 0x9f6   : > { %v10844_v43 = vpop.permute.xlu1 %3730  ;;  %v10846_v0 = vpop.permute.xlu0 %4044 }
 0x9f7   : > { %14003 = vst [vmem:[#allocation27_spill] sm:$0xff] %v10844_v43 }
 0x9f8   : > { %4314 = vrot.lane.b32.xlu1 %v10806_v40, %s12950_s13  ;;  %3994 = vrot.lane.b32.xlu0 %v10806_v40, %s13951_s26 }
 0x9fa   : > { %v10852_v34 = vpop.permute.xlu1 %3794  ;;  %v10854_v60 = vpop.permute.xlu0 %4172 }
 0x9fb   : > { %14004 = vst [vmem:[#allocation225_spill] sm:$0xff] %v10852_v34 }
 0x9fc   : > { %4442 = vrot.lane.b32.xlu1 %v10806_v40, %s12926_s24  ;;  %4122 = vrot.lane.b32.xlu0 %v10806_v40, %s12986_s19 }
 0x9fe   : > { %v10860_v12 = vpop.permute.xlu1 %3922  ;;  %v10862_v43 = vpop.permute.xlu0 %4300 }
 0x9ff   : > { %14005 = vst [vmem:[#allocation116_spill] sm:$0xff] %v10860_v12 }
 0xa00   : > { %3734 = vrot.lane.b32.xlu1 %v10867_v38, %s13948_s28  ;;  %4250 = vrot.lane.b32.xlu0 %v10806_v40, %s13956_s22  ;;  %s14211_s28 = smov 118  }
 0xa02   : > { %v10873_v34 = vpop.permute.xlu1 %4050  ;;  %v10875_v18 = vpop.permute.xlu0 %4428 }
 0xa03   : > { %14006 = vst [vmem:[#allocation229_spill] sm:$0xff] %v10873_v34 }
 0xa04   : > { %3798 = vrot.lane.b32.xlu1 %v10867_v38, %s13952_s14  ;;  %4378 = vrot.lane.b32.xlu0 %v10806_v40, %s13959_s29  ;;  %s14226_s14 = smov 116  }
 0xa06   : > { %v10881_v12 = vpop.permute.xlu1 %4178  ;;  %v10883_v58 = vpop.permute.xlu0 %3858 }
 0xa07   : > { %14007 = vst [vmem:[#allocation32_spill] sm:$0xff] %v10881_v12  ;;  %14008 = vst [vmem:[#allocation247_spill] sm:$0xff] %v10883_v58 }
 0xa08   : > { %3926 = vrot.lane.b32.xlu1 %v10867_v38, %s12965_s12  ;;  %3862 = vrot.lane.b32.xlu0 %v10867_v38, %s13947_s27  ;;  %s14027_s27 = smov 3   ;;  %s14041_s12 = smov 2  }
 0xa0a   : > { %v10889_v62 = vpop.permute.xlu1 %4306  ;;  %v10891_v34 = vpop.permute.xlu0 %3986 }
 0xa0b   : > { %14009 = vst [vmem:[#allocation45_spill] sm:$0xff] %v10889_v62  ;;  %14010 = vst [vmem:[#allocation226_spill] sm:$0xff] %v10891_v34 }
 0xa0c   : > { %4054 = vrot.lane.b32.xlu1 %v10867_v38, %s13957_s16  ;;  %3990 = vrot.lane.b32.xlu0 %v10867_v38, %s13951_s26  ;;  %s14214_s26 = smov 117   ;;  %s14253_s16 = smov 114  }
 0xa0e   : > { %v10897_v44 = vpop.permute.xlu1 %4434  ;;  %v10899_v12 = vpop.permute.xlu0 %4114 }
 0xa0f   : > { %14011 = vst [vmem:[#allocation42_spill] sm:$0xff] %v10897_v44  ;;  %14012 = vst [vmem:[#allocation227_spill] sm:$0xff] %v10899_v12  ;;  %v10920_v12 = vld [vmem:[%s12655_s7 + $0x48] sm:$0xff] }
 0xa10   : > { %4182 = vrot.lane.b32.xlu1 %v10867_v38, %s13003_s30  ;;  %4118 = vrot.lane.b32.xlu0 %v10867_v38, %s12986_s19  ;;  %s14147_s19 = smov 122  }
 0xa12   : > { %v10905_v58 = vpop.permute.xlu1 %3726  ;;  %v10907_v62 = vpop.permute.xlu0 %4242 }
 0xa13   : > { %14013 = vst [vmem:[#allocation131_spill] sm:$0xff] %v10905_v58  ;;  %14014 = vst [vmem:[#allocation228_spill] sm:$0xff] %v10907_v62 }
 0xa14   : > { %4310 = vrot.lane.b32.xlu1 %v10867_v38, %s12950_s13  ;;  %4246 = vrot.lane.b32.xlu0 %v10867_v38, %s13956_s22  ;;  %s14113_s13 = smov 124   ;;  %s14240_s22 = smov 115  }
 0xa16   : > { %v10913_v34 = vpop.permute.xlu1 %3790  ;;  %v10915_v44 = vpop.permute.xlu0 %4370 }
 0xa17   : > { %14015 = vst [vmem:[#allocation56_spill] sm:$0xff] %v10913_v34  ;;  %14016 = vst [vmem:[#allocation246_spill] sm:$0xff] %v10915_v44 }
 0xa18   : > { %4449 = vperm.xlu1 %6357, %v10920_v12   ;;  %4374 = vrot.lane.b32.xlu0 %v10867_v38, %s13959_s29  ;;  %s14266_s29 = smov 113  }
 0xa1a   : > { %v10925_v62 = vpop.permute.xlu1 %3918  ;;  %v10927_v17 = vpop.permute.xlu0 %3854 }
 0xa1b   : > { %14017 = vst [vmem:[#allocation40_spill] sm:$0xff] %v10925_v62  ;;  %14018 = vst [vmem:[#allocation230_spill] sm:$0xff] %v10927_v17 }
 0xa1c   : > { %4438 = vrot.lane.b32.xlu1 %v10867_v38, %s12926_s24  ;;  %4445 = vperm.xlu0 %6356, %v10167_v52   ;;  %v10950_v52 = vld [vmem:[%s12655_s7 + $0x60] sm:$0xff]  ;;  %s14129_s24 = smov 123  }
 0xa1e   : > { %v10932_v44 = vpop.permute.xlu1 %4046  ;;  %v10934_v13 = vpop.permute.xlu0 %3982 }
 0xa1f   : > { %14019 = vst [vmem:[#allocation71_spill] sm:$0xff] %v10932_v44  ;;  %14020 = vst [vmem:[#allocation231_spill] sm:$0xff] %v10934_v13 }
 0xa20   : > { %4453 = vperm.xlu1 %6357, %v10939_v15   ;;  %4457 = vperm.xlu0 %6356, %v10176_v5   ;;  %v10961_v5 = vld [vmem:[%s12655_s7 + $0x70] sm:$0xff] }
 0xa22   : > { %v10943_v11 = vpop.permute.xlu1 %4174  ;;  %v10945_v62 = vpop.permute.xlu0 %4110 }
 0xa23   : > { %14021 = vst [vmem:[#allocation47_spill] sm:$0xff] %v10943_v11  ;;  %14022 = vst [vmem:[#allocation232_spill] sm:$0xff] %v10945_v62 }
 0xa24   : > { %4461 = vperm.xlu1 %6357, %v10950_v52   ;;  %4465 = vperm.xlu0 %6356, %v10183_v49   ;;  %v14028_v49 = vmov 12  }
 0xa26   : > { %v10954_v44 = vpop.permute.xlu1 %4302  ;;  %v10956_v13 = vpop.permute.xlu0 %4238 }
 0xa27   : > { %14023 = vst [vmem:[#allocation96_spill] sm:$0xff] %v10954_v44  ;;  %14024 = vst [vmem:[#allocation233_spill] sm:$0xff] %v10956_v13 }
 0xa28   : > { %4469 = vperm.xlu1 %6357, %v10961_v5   ;;  %4473 = vperm.xlu0 %6356, %v10189_v8  }
 0xa2a   : > { %v10965_v11 = vpop.permute.xlu1 %4430  ;;  %v10967_v62 = vpop.permute.xlu0 %4366 }
 0xa2b   : > { %14025 = vst [vmem:[#allocation60_spill] sm:$0xff] %v10965_v11  ;;  %14026 = vst [vmem:[#allocation249_spill] sm:$0xff] %v10967_v62  ;;  %v11023_v62 = vld [vmem:[%s12655_s7 + $0x58] sm:$0xff] }
 0xa2c   : > { %4492 = vrot.lane.b32.xlu1 %v10580_v29, %s14027_s27  ;;  %4494 = vrot.lane.b32.xlu0 %v10669_v4, %s14027_s27 }
 0xa2d   : > { %6358 = vset.pattern.permute.xlu1 %v14028_v49  ;;  %6359 = vset.pattern.permute.xlu0 %v14028_v49 }
 0xa2e   : > { %v10975_v44 = vpop.permute.xlu1 %3864  ;;  %v10977_v13 = vpop.permute.xlu0 %3736 }
 0xa2f   : > { %14029 = vst [vmem:[#allocation59_spill] sm:$0xff] %v10975_v44  ;;  %14030 = vst [vmem:[#allocation234_spill] sm:$0xff] %v10977_v13 }
 0xa30   : > { %4496 = vrot.lane.b32.xlu1 %v10522_v55, %s14027_s27  ;;  %4498 = vrot.lane.b32.xlu0 %v10616_v46, %s14027_s27 }
 0xa32   : > { %v10983_v8 = vpop.permute.xlu1 %3992  ;;  %v10985_v11 = vpop.permute.xlu0 %3800 }
 0xa33   : > { %14031 = vst [vmem:[#allocation108_spill] sm:$0xff] %v10983_v8  ;;  %14032 = vst [vmem:[#allocation235_spill] sm:$0xff] %v10985_v11  ;;  %v11006_v11 = vld [vmem:[%s12655_s7 + $0x40] sm:$0xff] }
 0xa34   : > { %4500 = vrot.lane.b32.xlu1 %v10761_v24, %s14027_s27  ;;  %4502 = vrot.lane.b32.xlu0 %v10867_v38, %s14027_s27 }
 0xa36   : > { %v10991_v49 = vpop.permute.xlu1 %4120  ;;  %v10993_v44 = vpop.permute.xlu0 %3928 }
 0xa37   : > { %14033 = vst [vmem:[#allocation74_spill] sm:$0xff] %v10991_v49  ;;  %14034 = vst [vmem:[#allocation236_spill] sm:$0xff] %v10993_v44 }
 0xa38   : > { %4504 = vrot.lane.b32.xlu1 %v10720_v41, %s14027_s27  ;;  %4506 = vrot.lane.b32.xlu0 %v10806_v40, %s14027_s27  ;;  %s14197_s27 = smov 119  }
 0xa3a   : > { %v10999_v13 = vpop.permute.xlu1 %4248  ;;  %v11001_v8 = vpop.permute.xlu0 %4056 }
 0xa3b   : > { %14035 = vst [vmem:[#allocation121_spill] sm:$0xff] %v10999_v13  ;;  %14036 = vst [vmem:[#allocation237_spill] sm:$0xff] %v11001_v8 }
 0xa3c   : > { %4509 = vperm.xlu1 %6358, %v11006_v11   ;;  %4513 = vperm.xlu0 %6359, %v10920_v12  }
 0xa3e   : > { %v11010_v49 = vpop.permute.xlu1 %4376  ;;  %v11012_v44 = vpop.permute.xlu0 %4184 }
 0xa3f   : > { %14037 = vst [vmem:[#allocation84_spill] sm:$0xff] %v11010_v49  ;;  %14038 = vst [vmem:[#allocation248_spill] sm:$0xff] %v11012_v44 }
 0xa40   : > { %4517 = vperm.xlu1 %6358, %v10939_v15   ;;  %4525 = vperm.xlu0 %6359, %v10950_v52  }
 0xa42   : > { %v11016_v13 = vpop.permute.xlu1 %3860  ;;  %v11018_v8 = vpop.permute.xlu0 %4312 }
 0xa43   : > { %14039 = vst [vmem:[#allocation54_spill] sm:$0xff] %v11018_v8  ;;  %v14042_v8 = vmov 13  }
 0xa44   : > { %4521 = vperm.xlu1 %6358, %v11023_v62   ;;  %4533 = vperm.xlu0 %6359, %v10961_v5  }
 0xa46   : > { %v11027_v49 = vpop.permute.xlu1 %3988  ;;  %v11029_v44 = vpop.permute.xlu0 %4440 }
 0xa47   : > { %14040 = vst [vmem:[#allocation238_spill] sm:$0xff] %v11029_v44  ;;  %v11047_v44 = vld [vmem:[%s12655_s7 + $0x78] sm:$0xff] }
 0xa48   : > { %4529 = vperm.xlu1 %6358, %v11034_v53   ;;  %4556 = vrot.lane.b32.xlu0 %v10580_v29, %s14041_s12 }
 0xa49   : > { %6360 = vset.pattern.permute.xlu0 %v14042_v8 }
 0xa4a   : > { %v11040_v17 = vpop.permute.xlu1 %4116  ;;  %v11042_v63 = vpop.permute.xlu0 %3732 }
 0xa4b   : > { %14043 = vst [vmem:[#allocation134_spill] sm:$0xff] %v11040_v17 }
 0xa4c   : > { %4537 = vperm.xlu1 %6358, %v11047_v44   ;;  %4560 = vrot.lane.b32.xlu0 %v10522_v55, %s14041_s12 }
 0xa4e   : > { %v11052_v34 = vpop.permute.xlu1 %4244  ;;  %v11054_v32 = vpop.permute.xlu0 %3796 }
 0xa4f   : > { %14044 = vst [vmem:[#allocation239_spill] sm:$0xff] %v11052_v34 }
 0xa50   : > { %4558 = vrot.lane.b32.xlu1 %v10669_v4, %s14041_s12  ;;  %4564 = vrot.lane.b32.xlu0 %v10761_v24, %s14041_s12 }
 0xa51   : > { %6361 = vset.pattern.permute.xlu1 %v14042_v8 }
 0xa52   : > { %v11061_v61 = vpop.permute.xlu1 %4372  ;;  %v11063_v58 = vpop.permute.xlu0 %3924 }
 0xa53   : > { %14045 = vst [vmem:[#allocation93_spill] sm:$0xff] %v11061_v61 }
 0xa54   : > { %4562 = vrot.lane.b32.xlu1 %v10616_v46, %s14041_s12  ;;  %4568 = vrot.lane.b32.xlu0 %v10720_v41, %s14041_s12 }
 0xa56   : > { %v11069_v35 = vpop.permute.xlu1 %3738  ;;  %v11071_v19 = vpop.permute.xlu0 %4052 }
 0xa57   : > { %14046 = vst [vmem:[#allocation241_spill] sm:$0xff] %v11069_v35  ;;  %14047 = vst [vmem:[#allocation110_spill] sm:$0xff] %v11071_v19 }
 0xa58   : > { %4566 = vrot.lane.b32.xlu1 %v10867_v38, %s14041_s12  ;;  %4573 = vperm.xlu0 %6360, %v11006_v11  }
 0xa5a   : > { %v11076_v8 = vpop.permute.xlu1 %3802  ;;  %v11078_v61 = vpop.permute.xlu0 %4180 }
 0xa5b   : > { %14048 = vst [vmem:[#allocation243_spill] sm:$0xff] %v11076_v8  ;;  %14049 = vst [vmem:[#allocation126_spill] sm:$0xff] %v11078_v61 }
 0xa5c   : > { %4570 = vrot.lane.b32.xlu1 %v10806_v40, %s14041_s12  ;;  %4585 = vperm.xlu0 %6360, %v11023_v62  }
 0xa5e   : > { %v11083_v27 = vpop.permute.xlu1 %3930  ;;  %v11085_v42 = vpop.permute.xlu0 %4308 }
 0xa5f   : > { %14050 = vst [vmem:[#allocation251_spill] sm:$0xff] %v11083_v27  ;;  %14051 = vst [vmem:[#allocation72_spill] sm:$0xff] %v11085_v42  ;;  %v14056_v27 = vmov 14  }
 0xa60   : > { %4577 = vperm.xlu1 %6361, %v10920_v12   ;;  %4593 = vperm.xlu0 %6360, %v11034_v53  }
 0xa62   : > { %v11089_v35 = vpop.permute.xlu1 %4058  ;;  %v11091_v34 = vpop.permute.xlu0 %4436 }
 0xa63   : > { %14052 = vst [vmem:[#allocation250_spill] sm:$0xff] %v11089_v35  ;;  %14053 = vst [vmem:[#allocation69_spill] sm:$0xff] %v11091_v34 }
 0xa64   : > { %4581 = vperm.xlu1 %6361, %v10939_v15   ;;  %4601 = vperm.xlu0 %6360, %v11047_v44  }
 0xa66   : > { %v11095_v8 = vpop.permute.xlu1 %4186  ;;  %v11097_v56 = vpop.permute.xlu0 %3866 }
 0xa67   : > { %14054 = vst [vmem:[#allocation252_spill] sm:$0xff] %v11095_v8  ;;  %14055 = vst [vmem:[#allocation94_spill] sm:$0xff] %v11097_v56  ;;  %v14068_v56 = vmov 16  }
 0xa68   : > { %4589 = vperm.xlu1 %6361, %v10950_v52   ;;  %4622 = vrot.lane.b32.xlu0 %v10669_v4, %s12939_s25 }
 0xa69   : > { %6363 = vset.pattern.permute.xlu0 %v14056_v27 }
 0xa6a   : > { %v11103_v42 = vpop.permute.xlu1 %4314  ;;  %v11105_v35 = vpop.permute.xlu0 %3994 }
 0xa6b   : > { %14057 = vst [vmem:[#allocation253_spill] sm:$0xff] %v11103_v42  ;;  %14058 = vst [vmem:[#allocation83_spill] sm:$0xff] %v11105_v35 }
 0xa6c   : > { %4597 = vperm.xlu1 %6361, %v10961_v5   ;;  %4626 = vrot.lane.b32.xlu0 %v10616_v46, %s12939_s25 }
 0xa6e   : > { %v11110_v34 = vpop.permute.xlu0 %4122  ;;  %v11112_v8 = vpop.permute.xlu1 %4442 }
 0xa6f   : > { %14059 = vst [vmem:[#allocation254_spill] sm:$0xff] %v11110_v34  ;;  %14060 = vst [vmem:[#allocation106_spill] sm:$0xff] %v11112_v8 }
 0xa70   : > { %4620 = vrot.lane.b32.xlu1 %v10580_v29, %s12939_s25  ;;  %4630 = vrot.lane.b32.xlu0 %v10867_v38, %s12939_s25 }
 0xa71   : > { %6362 = vset.pattern.permute.xlu1 %v14056_v27 }
 0xa72   : > { %v11119_v42 = vpop.permute.xlu0 %4250  ;;  %v11125_v35 = vpop.permute.xlu1 %3734 }
 0xa73   : > { %14061 = vst [vmem:[#allocation255_spill] sm:$0xff] %v11119_v42  ;;  %14062 = vst [vmem:[#allocation91_spill] sm:$0xff] %v11125_v35 }
 0xa74   : > { %4624 = vrot.lane.b32.xlu1 %v10522_v55, %s12939_s25  ;;  %4634 = vrot.lane.b32.xlu0 %v10806_v40, %s12939_s25 }
 0xa76   : > { %v11130_v8 = vpop.permute.xlu0 %4378  ;;  %v11132_v34 = vpop.permute.xlu1 %3798 }
 0xa77   : > { %14063 = vst [vmem:[#allocation256_spill] sm:$0xff] %v11130_v8  ;;  %14064 = vst [vmem:[#allocation119_spill] sm:$0xff] %v11132_v34 }
 0xa78   : > { %4628 = vrot.lane.b32.xlu1 %v10761_v24, %s12939_s25  ;;  %4641 = vperm.xlu0 %6363, %v10920_v12  }
 0xa7a   : > { %v11137_v27 = vpop.permute.xlu0 %3862  ;;  %v11141_v42 = vpop.permute.xlu1 %3926 }
 0xa7b   : > { %14065 = vst [vmem:[#allocation257_spill] sm:$0xff] %v11137_v27  ;;  %14066 = vst [vmem:[#allocation107_spill] sm:$0xff] %v11141_v42 }
 0xa7c   : > { %4632 = vrot.lane.b32.xlu1 %v10720_v41, %s12939_s25  ;;  %4653 = vperm.xlu0 %6363, %v10950_v52   ;;  %s14081_s25 = smov 126  }
 0xa7e   : > { %v11146_v8 = vpop.permute.xlu0 %3990  ;;  %v11149_v34 = vpop.permute.xlu1 %4054 }
 0xa7f   : > { %14067 = vst [vmem:[#allocation258_spill] sm:$0xff] %v11146_v8  ;;  %14069 = vst [vmem:[#allocation132_spill] sm:$0xff] %v11149_v34 }
 0xa80   : > { %4637 = vperm.xlu1 %6362, %v11006_v11   ;;  %4661 = vperm.xlu0 %6363, %v10961_v5  }
 0xa82   : > { %v11154_v27 = vpop.permute.xlu0 %4118  ;;  %v11159_v42 = vpop.permute.xlu1 %4182 }
 0xa83   : > { %14070 = vst [vmem:[#allocation259_spill] sm:$0xff] %v11154_v27  ;;  %14071 = vst [vmem:[#allocation124_spill] sm:$0xff] %v11159_v42 }
 0xa84   : > { %4645 = vperm.xlu1 %6362, %v10939_v15   ;;  %4684 = vrot.lane.b32.xlu0 %v10580_v29, %s12943_s21 }
 0xa85   : > { %6364 = vset.pattern.permute.xlu0 %v14068_v56 }
 0xa86   : > { %v11164_v34 = vpop.permute.xlu0 %4246  ;;  %v11166_v8 = vpop.permute.xlu1 %4310 }
 0xa87   : > { %14072 = vst [vmem:[#allocation261_spill] sm:$0xff] %v11164_v34  ;;  %14073 = vst [vmem:[#allocation267_spill] sm:$0xff] %v11166_v8 }
 0xa88   : > { %4649 = vperm.xlu1 %6362, %v11023_v62   ;;  %4688 = vrot.lane.b32.xlu0 %v10522_v55, %s12943_s21 }
 0xa8a   : > { %v11172_v27 = vpop.permute.xlu0 %4374 }
 0xa8b   : > { %14074 = vst [vmem:[#allocation260_spill] sm:$0xff] %v11172_v27 }
 0xa8c   : > { %4657 = vperm.xlu1 %6362, %v11034_v53   ;;  %4692 = vrot.lane.b32.xlu0 %v10761_v24, %s12943_s21 }
 0xa90   : > { %4665 = vperm.xlu1 %6362, %v11047_v44   ;;  %4696 = vrot.lane.b32.xlu0 %v10720_v41, %s12943_s21 }
 0xa94   : > { %4686 = vrot.lane.b32.xlu1 %v10669_v4, %s12943_s21  ;;  %4701 = vperm.xlu0 %6364, %v11006_v11  }
 0xa95   : > { %6365 = vset.pattern.permute.xlu1 %v14068_v56 }
 0xa97   : > { %v11174_v35 = vpop.permute.xlu1 %4449 }
 0xa98   : > { %14075 = vst [vmem:[#allocation268_spill] sm:$0xff] %v11174_v35  ;;  %4690 = vrot.lane.b32.xlu1 %v10616_v46, %s12943_s21  ;;  %4713 = vperm.xlu0 %6364, %v11023_v62  }
 0xa9b   : > { %v11179_v42 = vpop.permute.xlu1 %4438  ;;  %v11181_v34 = vpop.permute.xlu0 %4445 }
 0xa9c   : > { %14076 = vst [vmem:[#allocation264_spill] sm:$0xff] %v11179_v42  ;;  %4694 = vrot.lane.b32.xlu1 %v10867_v38, %s12943_s21  ;;  %4721 = vperm.xlu0 %6364, %v11034_v53   ;;  %v14082_v42 = vmov 17  }
 0xa9f   : > { %v11186_v8 = vpop.permute.xlu1 %4453  ;;  %v11188_v56 = vpop.permute.xlu0 %4457 }
 0xaa0   : > { %14077 = vst [vmem:[#allocation269_spill] sm:$0xff] %v11186_v8  ;;  %14078 = vst [vmem:[#allocation262_spill] sm:$0xff] %v11188_v56  ;;  %4698 = vrot.lane.b32.xlu1 %v10806_v40, %s12943_s21  ;;  %4729 = vperm.xlu0 %6364, %v11047_v44   ;;  %s14095_s21 = smov 125  }
 0xaa3   : > { %v11193_v27 = vpop.permute.xlu1 %4461  ;;  %v11195_v35 = vpop.permute.xlu0 %4465 }
 0xaa4   : > { %14079 = vst [vmem:[#allocation270_spill] sm:$0xff] %v11193_v27  ;;  %14080 = vst [vmem:[#allocation266_spill] sm:$0xff] %v11195_v35  ;;  %4705 = vperm.xlu1 %6365, %v10920_v12   ;;  %4750 = vrot.lane.b32.xlu0 %v10669_v4, %s14081_s25 }
 0xaa5   : > { %6367 = vset.pattern.permute.xlu0 %v14082_v42 }
 0xaa7   : > { %v11201_v6 = vpop.permute.xlu1 %4469  ;;  %v11203_v8 = vpop.permute.xlu0 %4473 }
 0xaa8   : > { %14083 = vst [vmem:[#allocation271_spill] sm:$0xff] %v11201_v6  ;;  %14084 = vst [vmem:[#allocation263_spill] sm:$0xff] %v11203_v8  ;;  %4709 = vperm.xlu1 %6365, %v10939_v15   ;;  %4754 = vrot.lane.b32.xlu0 %v10616_v46, %s14081_s25 }
 0xaab   : > { %v11208_v56 = vpop.permute.xlu1 %4492  ;;  %v11210_v27 = vpop.permute.xlu0 %4494 }
 0xaac   : > { %14085 = vst [vmem:[#allocation272_spill] sm:$0xff] %v11210_v27  ;;  %4717 = vperm.xlu1 %6365, %v10950_v52   ;;  %4758 = vrot.lane.b32.xlu0 %v10867_v38, %s14081_s25 }
 0xaaf   : > { %v11215_v35 = vpop.permute.xlu1 %4496  ;;  %v11217_v61 = vpop.permute.xlu0 %4498 }
 0xab0   : > { %14086 = vst [vmem:[#allocation265_spill] sm:$0xff] %v11215_v35  ;;  %14087 = vst [vmem:[#allocation276_spill] sm:$0xff] %v11217_v61  ;;  %4725 = vperm.xlu1 %6365, %v10961_v5   ;;  %4762 = vrot.lane.b32.xlu0 %v10806_v40, %s14081_s25 }
 0xab3   : > { %v11222_v8 = vpop.permute.xlu1 %4500  ;;  %v11224_v6 = vpop.permute.xlu0 %4502 }
 0xab4   : > { %14088 = vst [vmem:[#allocation279_spill] sm:$0xff] %v11222_v8  ;;  %14089 = vst [vmem:[#allocation274_spill] sm:$0xff] %v11224_v6  ;;  %4748 = vrot.lane.b32.xlu1 %v10580_v29, %s14081_s25  ;;  %4769 = vperm.xlu0 %6367, %v10920_v12  }
 0xab5   : > { %6366 = vset.pattern.permute.xlu1 %v14082_v42 }
 0xab7   : > { %v11230_v27 = vpop.permute.xlu1 %4504  ;;  %v11232_v35 = vpop.permute.xlu0 %4506 }
 0xab8   : > { %14090 = vst [vmem:[#allocation273_spill] sm:$0xff] %v11230_v27  ;;  %14091 = vst [vmem:[#allocation283_spill] sm:$0xff] %v11232_v35  ;;  %4752 = vrot.lane.b32.xlu1 %v10522_v55, %s14081_s25  ;;  %4781 = vperm.xlu0 %6367, %v10950_v52   ;;  %v14096_v35 = vmov 18  }
 0xabb   : > { %v11237_v61 = vpop.permute.xlu1 %4509  ;;  %v11239_v8 = vpop.permute.xlu0 %4513 }
 0xabc   : > { %14092 = vst [vmem:[#allocation280_spill] sm:$0xff] %v11239_v8  ;;  %4756 = vrot.lane.b32.xlu1 %v10761_v24, %s14081_s25  ;;  %4789 = vperm.xlu0 %6367, %v10961_v5  }
 0xabf   : > { %v11244_v6 = vpop.permute.xlu1 %4517  ;;  %v11246_v42 = vpop.permute.xlu0 %4525 }
 0xac0   : > { %14093 = vst [vmem:[#allocation285_spill] sm:$0xff] %v11244_v6  ;;  %14094 = vst [vmem:[#allocation278_spill] sm:$0xff] %v11246_v42  ;;  %4760 = vrot.lane.b32.xlu1 %v10720_v41, %s14081_s25  ;;  %4812 = vrot.lane.b32.xlu0 %v10580_v29, %s14095_s21 }
 0xac1   : > { %6368 = vset.pattern.permute.xlu0 %v14096_v35 }
 0xac3   : > { %v11253_v27 = vpop.permute.xlu1 %4521  ;;  %v11255_v8 = vpop.permute.xlu0 %4533 }
 0xac4   : > { %14097 = vst [vmem:[#allocation286_spill] sm:$0xff] %v11253_v27  ;;  %14098 = vst [vmem:[#allocation282_spill] sm:$0xff] %v11255_v8  ;;  %4765 = vperm.xlu1 %6366, %v11006_v11   ;;  %4816 = vrot.lane.b32.xlu0 %v10522_v55, %s14095_s21 }
 0xac7   : > { %v11260_v6 = vpop.permute.xlu1 %4529  ;;  %v11262_v42 = vpop.permute.xlu0 %4556 }
 0xac8   : > { %14099 = vst [vmem:[#allocation287_spill] sm:$0xff] %v11260_v6  ;;  %14100 = vst [vmem:[#allocation275_spill] sm:$0xff] %v11262_v42  ;;  %4773 = vperm.xlu1 %6366, %v10939_v15   ;;  %4820 = vrot.lane.b32.xlu0 %v10761_v24, %s14095_s21 }
 0xacb   : > { %v11267_v37 = vpop.permute.xlu1 %4537  ;;  %v11269_v17 = vpop.permute.xlu0 %4560 }
 0xacc   : > { %14101 = vst [vmem:[#allocation288_spill] sm:$0xff] %v11267_v37  ;;  %14102 = vst [vmem:[#allocation284_spill] sm:$0xff] %v11269_v17  ;;  %4777 = vperm.xlu1 %6366, %v11023_v62   ;;  %4824 = vrot.lane.b32.xlu0 %v10720_v41, %s14095_s21 }
 0xacf   : > { %v11274_v8 = vpop.permute.xlu1 %4558  ;;  %v11276_v27 = vpop.permute.xlu0 %4564 }
 0xad0   : > { %14103 = vst [vmem:[#allocation289_spill] sm:$0xff] %v11274_v8  ;;  %14104 = vst [vmem:[#allocation277_spill] sm:$0xff] %v11276_v27  ;;  %4785 = vperm.xlu1 %6366, %v11034_v53   ;;  %4829 = vperm.xlu0 %6368, %v11006_v11  }
 0xad3   : > { %v11280_v6 = vpop.permute.xlu1 %4562  ;;  %v11282_v42 = vpop.permute.xlu0 %4568 }
 0xad4   : > { %14105 = vst [vmem:[#allocation290_spill] sm:$0xff] %v11280_v6  ;;  %14106 = vst [vmem:[#allocation281_spill] sm:$0xff] %v11282_v42  ;;  %4793 = vperm.xlu1 %6366, %v11047_v44   ;;  %4841 = vperm.xlu0 %6368, %v11023_v62  }
 0xad7   : > { %v11286_v37 = vpop.permute.xlu1 %4566  ;;  %v11288_v17 = vpop.permute.xlu0 %4573 }
 0xad8   : > { %14107 = vst [vmem:[#allocation292_spill] sm:$0xff] %v11286_v37  ;;  %14108 = vst [vmem:[#allocation291_spill] sm:$0xff] %v11288_v17  ;;  %4814 = vrot.lane.b32.xlu1 %v10669_v4, %s14095_s21  ;;  %4849 = vperm.xlu0 %6368, %v11034_v53  }
 0xad9   : > { %6369 = vset.pattern.permute.xlu1 %v14096_v35  ;;  %v14114_v35 = vmov 19  }
 0xadb   : > { %v11294_v8 = vpop.permute.xlu1 %4570  ;;  %v11296_v6 = vpop.permute.xlu0 %4585 }
 0xadc   : > { %14109 = vst [vmem:[#allocation299_spill] sm:$0xff] %v11294_v8  ;;  %14110 = vst [vmem:[#allocation298_spill] sm:$0xff] %v11296_v6  ;;  %4818 = vrot.lane.b32.xlu1 %v10616_v46, %s14095_s21  ;;  %4857 = vperm.xlu0 %6368, %v11047_v44  }
 0xadf   : > { %v11301_v42 = vpop.permute.xlu1 %4577  ;;  %v11303_v37 = vpop.permute.xlu0 %4593 }
 0xae0   : > { %14111 = vst [vmem:[#allocation301_spill] sm:$0xff] %v11301_v42  ;;  %14112 = vst [vmem:[#allocation294_spill] sm:$0xff] %v11303_v37  ;;  %4822 = vrot.lane.b32.xlu1 %v10867_v38, %s14095_s21  ;;  %4878 = vrot.lane.b32.xlu0 %v10669_v4, %s14113_s13 }
 0xae1   : > { %6371 = vset.pattern.permute.xlu0 %v14114_v35 }
 0xae3   : > { %v11310_v8 = vpop.permute.xlu1 %4581  ;;  %v11312_v6 = vpop.permute.xlu0 %4601 }
 0xae4   : > { %14115 = vst [vmem:[#allocation302_spill] sm:$0xff] %v11310_v8  ;;  %14116 = vst [vmem:[#allocation300_spill] sm:$0xff] %v11312_v6  ;;  %4826 = vrot.lane.b32.xlu1 %v10806_v40, %s14095_s21  ;;  %4882 = vrot.lane.b32.xlu0 %v10616_v46, %s14113_s13 }
 0xae7   : > { %v11318_v42 = vpop.permute.xlu1 %4589  ;;  %v11320_v37 = vpop.permute.xlu0 %4622 }
 0xae8   : > { %14117 = vst [vmem:[#allocation303_spill] sm:$0xff] %v11318_v42  ;;  %14118 = vst [vmem:[#allocation296_spill] sm:$0xff] %v11320_v37  ;;  %4833 = vperm.xlu1 %6369, %v10920_v12   ;;  %4886 = vrot.lane.b32.xlu0 %v10867_v38, %s14113_s13 }
 0xaeb   : > { %v11325_v27 = vpop.permute.xlu1 %4597  ;;  %v11327_v8 = vpop.permute.xlu0 %4626 }
 0xaec   : > { %14119 = vst [vmem:[#allocation304_spill] sm:$0xff] %v11325_v27  ;;  %14120 = vst [vmem:[#allocation293_spill] sm:$0xff] %v11327_v8  ;;  %4837 = vperm.xlu1 %6369, %v10939_v15   ;;  %4890 = vrot.lane.b32.xlu0 %v10806_v40, %s14113_s13 }
 0xaef   : > { %v11332_v6 = vpop.permute.xlu1 %4620  ;;  %v11334_v17 = vpop.permute.xlu0 %4630 }
 0xaf0   : > { %14121 = vst [vmem:[#allocation306_spill] sm:$0xff] %v11332_v6  ;;  %14122 = vst [vmem:[#allocation295_spill] sm:$0xff] %v11334_v17  ;;  %4845 = vperm.xlu1 %6369, %v10950_v52   ;;  %4897 = vperm.xlu0 %6371, %v10920_v12  }
 0xaf3   : > { %v11338_v37 = vpop.permute.xlu1 %4624  ;;  %v11340_v42 = vpop.permute.xlu0 %4634 }
 0xaf4   : > { %14123 = vst [vmem:[#allocation308_spill] sm:$0xff] %v11338_v37  ;;  %14124 = vst [vmem:[#allocation297_spill] sm:$0xff] %v11340_v42  ;;  %4853 = vperm.xlu1 %6369, %v10961_v5   ;;  %4909 = vperm.xlu0 %6371, %v10950_v52   ;;  %v14130_v42 = vmov 20  }
 0xaf7   : > { %v11344_v27 = vpop.permute.xlu1 %4628  ;;  %v11346_v8 = vpop.permute.xlu0 %4641 }
 0xaf8   : > { %14125 = vst [vmem:[#allocation310_spill] sm:$0xff] %v11344_v27  ;;  %14126 = vst [vmem:[#allocation111_spill] sm:$0xff] %v11346_v8  ;;  %4876 = vrot.lane.b32.xlu1 %v10580_v29, %s14113_s13  ;;  %4917 = vperm.xlu0 %6371, %v10961_v5  }
 0xaf9   : > { %6370 = vset.pattern.permute.xlu1 %v14114_v35 }
 0xafb   : > { %v11352_v17 = vpop.permute.xlu1 %4632  ;;  %v11354_v37 = vpop.permute.xlu0 %4653 }
 0xafc   : > { %14127 = vst [vmem:[#allocation305_spill] sm:$0xff] %v11352_v17  ;;  %14128 = vst [vmem:[#allocation313_spill] sm:$0xff] %v11354_v37  ;;  %4880 = vrot.lane.b32.xlu1 %v10522_v55, %s14113_s13  ;;  %4940 = vrot.lane.b32.xlu0 %v10580_v29, %s14129_s24 }
 0xafd   : > { %6372 = vset.pattern.permute.xlu0 %v14130_v42 }
 0xaff   : > { %v11361_v8 = vpop.permute.xlu1 %4637  ;;  %v11363_v27 = vpop.permute.xlu0 %4661 }
 0xb00   : > { %14131 = vst [vmem:[#allocation314_spill] sm:$0xff] %v11361_v8  ;;  %14132 = vst [vmem:[#allocation315_spill] sm:$0xff] %v11363_v27  ;;  %4884 = vrot.lane.b32.xlu1 %v10761_v24, %s14113_s13  ;;  %4944 = vrot.lane.b32.xlu0 %v10522_v55, %s14129_s24 }
 0xb03   : > { %v11369_v35 = vpop.permute.xlu1 %4645  ;;  %v11371_v17 = vpop.permute.xlu0 %4684 }
 0xb04   : > { %14133 = vst [vmem:[#allocation316_spill] sm:$0xff] %v11369_v35  ;;  %14134 = vst [vmem:[#allocation317_spill] sm:$0xff] %v11371_v17  ;;  %4888 = vrot.lane.b32.xlu1 %v10720_v41, %s14113_s13  ;;  %4948 = vrot.lane.b32.xlu0 %v10761_v24, %s14129_s24 }
 0xb07   : > { %v11377_v37 = vpop.permute.xlu1 %4649  ;;  %v11379_v8 = vpop.permute.xlu0 %4688 }
 0xb08   : > { %14135 = vst [vmem:[#allocation318_spill] sm:$0xff] %v11377_v37  ;;  %14136 = vst [vmem:[#allocation319_spill] sm:$0xff] %v11379_v8  ;;  %4893 = vperm.xlu1 %6370, %v11006_v11   ;;  %4952 = vrot.lane.b32.xlu0 %v10720_v41, %s14129_s24 }
 0xb0b   : > { %v11384_v27 = vpop.permute.xlu1 %4657  ;;  %v11386_v35 = vpop.permute.xlu0 %4692 }
 0xb0c   : > { %14137 = vst [vmem:[#allocation312_spill] sm:$0xff] %v11384_v27  ;;  %14138 = vst [vmem:[#allocation320_spill] sm:$0xff] %v11386_v35  ;;  %4901 = vperm.xlu1 %6370, %v10939_v15   ;;  %4957 = vperm.xlu0 %6372, %v11006_v11  }
 0xb0f   : > { %v11390_v17 = vpop.permute.xlu1 %4665  ;;  %v11392_v6 = vpop.permute.xlu0 %4696 }
 0xb10   : > { %14139 = vst [vmem:[#allocation307_spill] sm:$0xff] %v11390_v17  ;;  %14140 = vst [vmem:[#allocation322_spill] sm:$0xff] %v11392_v6  ;;  %4905 = vperm.xlu1 %6370, %v11023_v62   ;;  %4969 = vperm.xlu0 %6372, %v11023_v62  }
 0xb13   : > { %v11396_v37 = vpop.permute.xlu1 %4686  ;;  %v11398_v8 = vpop.permute.xlu0 %4701 }
 0xb14   : > { %14141 = vst [vmem:[#allocation309_spill] sm:$0xff] %v11396_v37  ;;  %14142 = vst [vmem:[#allocation324_spill] sm:$0xff] %v11398_v8  ;;  %4913 = vperm.xlu1 %6370, %v11034_v53   ;;  %4977 = vperm.xlu0 %6372, %v11034_v53   ;;  %v14148_v37 = vmov 21  }
 0xb17   : > { %v11402_v27 = vpop.permute.xlu1 %4690  ;;  %v11404_v35 = vpop.permute.xlu0 %4713 }
 0xb18   : > { %14143 = vst [vmem:[#allocation311_spill] sm:$0xff] %v11402_v27  ;;  %14144 = vst [vmem:[#allocation326_spill] sm:$0xff] %v11404_v35  ;;  %4921 = vperm.xlu1 %6370, %v11047_v44   ;;  %4985 = vperm.xlu0 %6372, %v11047_v44  }
 0xb1b   : > { %v11408_v17 = vpop.permute.xlu1 %4694  ;;  %v11410_v6 = vpop.permute.xlu0 %4721 }
 0xb1c   : > { %14145 = vst [vmem:[#allocation3_spill] sm:$0xff] %v11408_v17  ;;  %14146 = vst [vmem:[#allocation137_spill] sm:$0xff] %v11410_v6  ;;  %4942 = vrot.lane.b32.xlu1 %v10669_v4, %s14129_s24  ;;  %5006 = vrot.lane.b32.xlu0 %v10669_v4, %s14147_s19 }
 0xb1d   : > { %6373 = vset.pattern.permute.xlu1 %v14130_v42  ;;  %6375 = vset.pattern.permute.xlu0 %v14148_v37 }
 0xb1f   : > { %v11418_v27 = vpop.permute.xlu1 %4698  ;;  %v11420_v35 = vpop.permute.xlu0 %4729 }
 0xb20   : > { %14149 = vst [vmem:[#allocation321_spill] sm:$0xff] %v11418_v27  ;;  %14150 = vst [vmem:[#allocation329_spill] sm:$0xff] %v11420_v35  ;;  %4946 = vrot.lane.b32.xlu1 %v10616_v46, %s14129_s24  ;;  %5010 = vrot.lane.b32.xlu0 %v10616_v46, %s14147_s19 }
 0xb23   : > { %v11426_v6 = vpop.permute.xlu1 %4705  ;;  %v11428_v17 = vpop.permute.xlu0 %4750 }
 0xb24   : > { %14151 = vst [vmem:[#allocation332_spill] sm:$0xff] %v11426_v6  ;;  %14152 = vst [vmem:[#allocation331_spill] sm:$0xff] %v11428_v17  ;;  %4950 = vrot.lane.b32.xlu1 %v10867_v38, %s14129_s24  ;;  %5014 = vrot.lane.b32.xlu0 %v10867_v38, %s14147_s19 }
 0xb27   : > { %v11434_v42 = vpop.permute.xlu1 %4709  ;;  %v11436_v27 = vpop.permute.xlu0 %4754 }
 0xb28   : > { %14153 = vst [vmem:[#allocation334_spill] sm:$0xff] %v11434_v42  ;;  %14154 = vst [vmem:[#allocation333_spill] sm:$0xff] %v11436_v27  ;;  %4954 = vrot.lane.b32.xlu1 %v10806_v40, %s14129_s24  ;;  %5018 = vrot.lane.b32.xlu0 %v10806_v40, %s14147_s19 }
 0xb2b   : > { %v11442_v35 = vpop.permute.xlu1 %4717  ;;  %v11444_v6 = vpop.permute.xlu0 %4758 }
 0xb2c   : > { %14155 = vst [vmem:[#allocation328_spill] sm:$0xff] %v11442_v35  ;;  %14156 = vst [vmem:[#allocation336_spill] sm:$0xff] %v11444_v6  ;;  %4961 = vperm.xlu1 %6373, %v10920_v12   ;;  %5025 = vperm.xlu0 %6375, %v10920_v12  }
 0xb2f   : > { %v11448_v17 = vpop.permute.xlu1 %4725  ;;  %v11450_v8 = vpop.permute.xlu0 %4762 }
 0xb30   : > { %14157 = vst [vmem:[#allocation330_spill] sm:$0xff] %v11448_v17  ;;  %14158 = vst [vmem:[#allocation338_spill] sm:$0xff] %v11450_v8  ;;  %4965 = vperm.xlu1 %6373, %v10939_v15   ;;  %5037 = vperm.xlu0 %6375, %v10950_v52   ;;  %v14164_v8 = vmov 22  }
 0xb33   : > { %v11454_v27 = vpop.permute.xlu1 %4748  ;;  %v11456_v42 = vpop.permute.xlu0 %4769 }
 0xb34   : > { %14159 = vst [vmem:[#allocation323_spill] sm:$0xff] %v11454_v27  ;;  %14160 = vst [vmem:[#allocation340_spill] sm:$0xff] %v11456_v42  ;;  %4973 = vperm.xlu1 %6373, %v10950_v52   ;;  %5045 = vperm.xlu0 %6375, %v10961_v5  }
 0xb37   : > { %v11460_v6 = vpop.permute.xlu1 %4752  ;;  %v11462_v35 = vpop.permute.xlu0 %4781 }
 0xb38   : > { %14161 = vst [vmem:[#allocation325_spill] sm:$0xff] %v11460_v6  ;;  %14162 = vst [vmem:[#allocation342_spill] sm:$0xff] %v11462_v35  ;;  %4981 = vperm.xlu1 %6373, %v10961_v5   ;;  %5068 = vrot.lane.b32.xlu0 %v10580_v29, %s14163_s23 }
 0xb39   : > { %6376 = vset.pattern.permute.xlu0 %v14164_v8 }
 0xb3b   : > { %v11468_v17 = vpop.permute.xlu1 %4756  ;;  %v11470_v27 = vpop.permute.xlu0 %4789 }
 0xb3c   : > { %14165 = vst [vmem:[#allocation135_spill] sm:$0xff] %v11468_v17  ;;  %14166 = vst [vmem:[#allocation335_spill] sm:$0xff] %v11470_v27  ;;  %5004 = vrot.lane.b32.xlu1 %v10580_v29, %s14147_s19  ;;  %5072 = vrot.lane.b32.xlu0 %v10522_v55, %s14163_s23 }
 0xb3d   : > { %6374 = vset.pattern.permute.xlu1 %v14148_v37 }
 0xb3f   : > { %v11477_v6 = vpop.permute.xlu1 %4760  ;;  %v11479_v42 = vpop.permute.xlu0 %4812 }
 0xb40   : > { %14167 = vst [vmem:[#allocation343_spill] sm:$0xff] %v11477_v6  ;;  %14168 = vst [vmem:[#allocation327_spill] sm:$0xff] %v11479_v42  ;;  %5008 = vrot.lane.b32.xlu1 %v10522_v55, %s14147_s19  ;;  %5076 = vrot.lane.b32.xlu0 %v10761_v24, %s14163_s23 }
 0xb43   : > { %v11485_v35 = vpop.permute.xlu1 %4765  ;;  %v11487_v27 = vpop.permute.xlu0 %4816 }
 0xb44   : > { %14169 = vst [vmem:[#allocation344_spill] sm:$0xff] %v11485_v35  ;;  %14170 = vst [vmem:[#allocation348_spill] sm:$0xff] %v11487_v27  ;;  %5012 = vrot.lane.b32.xlu1 %v10761_v24, %s14147_s19  ;;  %5080 = vrot.lane.b32.xlu0 %v10720_v41, %s14163_s23 }
 0xb47   : > { %v11493_v37 = vpop.permute.xlu1 %4773  ;;  %v11495_v6 = vpop.permute.xlu0 %4820 }
 0xb48   : > { %14171 = vst [vmem:[#allocation345_spill] sm:$0xff] %v11493_v37  ;;  %14172 = vst [vmem:[#allocation350_spill] sm:$0xff] %v11495_v6  ;;  %5016 = vrot.lane.b32.xlu1 %v10720_v41, %s14147_s19  ;;  %5085 = vperm.xlu0 %6376, %v11006_v11  }
 0xb4b   : > { %v11500_v17 = vpop.permute.xlu1 %4777  ;;  %v11502_v42 = vpop.permute.xlu0 %4824 }
 0xb4c   : > { %14173 = vst [vmem:[#allocation347_spill] sm:$0xff] %v11500_v17  ;;  %14174 = vst [vmem:[#allocation352_spill] sm:$0xff] %v11502_v42  ;;  %5021 = vperm.xlu1 %6374, %v11006_v11   ;;  %5097 = vperm.xlu0 %6376, %v11023_v62  }
 0xb4f   : > { %v11506_v27 = vpop.permute.xlu1 %4785  ;;  %v11508_v35 = vpop.permute.xlu0 %4829 }
 0xb50   : > { %14175 = vst [vmem:[#allocation349_spill] sm:$0xff] %v11506_v27  ;;  %14176 = vst [vmem:[#allocation139_spill] sm:$0xff] %v11508_v35  ;;  %5029 = vperm.xlu1 %6374, %v10939_v15   ;;  %5105 = vperm.xlu0 %6376, %v11034_v53   ;;  %v14182_v27 = vmov 23  }
 0xb53   : > { %v11512_v37 = vpop.permute.xlu1 %4793  ;;  %v11514_v6 = vpop.permute.xlu0 %4841 }
 0xb54   : > { %14177 = vst [vmem:[#allocation433_spill] sm:$0xff] %v11512_v37  ;;  %14178 = vst [vmem:[#allocation209_spill] sm:$0xff] %v11514_v6  ;;  %5033 = vperm.xlu1 %6374, %v11023_v62   ;;  %5113 = vperm.xlu0 %6376, %v11047_v44  }
 0xb57   : > { %v11518_v42 = vpop.permute.xlu1 %4814  ;;  %v11520_v17 = vpop.permute.xlu0 %4849 }
 0xb58   : > { %14179 = vst [vmem:[#allocation346_spill] sm:$0xff] %v11518_v42  ;;  %14180 = vst [vmem:[#allocation354_spill] sm:$0xff] %v11520_v17  ;;  %5041 = vperm.xlu1 %6374, %v11034_v53   ;;  %5134 = vrot.lane.b32.xlu0 %v10669_v4, %s14181_s20 }
 0xb59   : > { %6379 = vset.pattern.permute.xlu0 %v14182_v27 }
 0xb5b   : > { %v11526_v35 = vpop.permute.xlu1 %4818  ;;  %v11528_v37 = vpop.permute.xlu0 %4857 }
 0xb5c   : > { %14183 = vst [vmem:[#allocation337_spill] sm:$0xff] %v11526_v35  ;;  %14184 = vst [vmem:[#allocation356_spill] sm:$0xff] %v11528_v37  ;;  %5049 = vperm.xlu1 %6374, %v11047_v44   ;;  %5138 = vrot.lane.b32.xlu0 %v10616_v46, %s14181_s20 }
 0xb5f   : > { %v11533_v6 = vpop.permute.xlu1 %4822  ;;  %v11535_v42 = vpop.permute.xlu0 %4878 }
 0xb60   : > { %14185 = vst [vmem:[#allocation339_spill] sm:$0xff] %v11533_v6  ;;  %14186 = vst [vmem:[#allocation358_spill] sm:$0xff] %v11535_v42  ;;  %5070 = vrot.lane.b32.xlu1 %v10669_v4, %s14163_s23  ;;  %5142 = vrot.lane.b32.xlu0 %v10867_v38, %s14181_s20 }
 0xb61   : > { %6377 = vset.pattern.permute.xlu1 %v14164_v8 }
 0xb63   : > { %v11542_v17 = vpop.permute.xlu1 %4826  ;;  %v11544_v37 = vpop.permute.xlu0 %4882 }
 0xb64   : > { %14187 = vst [vmem:[#allocation146_spill] sm:$0xff] %v11542_v17  ;;  %14188 = vst [vmem:[#allocation41_spill] sm:$0xff] %v11544_v37  ;;  %5074 = vrot.lane.b32.xlu1 %v10616_v46, %s14163_s23  ;;  %5146 = vrot.lane.b32.xlu0 %v10806_v40, %s14181_s20 }
 0xb67   : > { %v11550_v6 = vpop.permute.xlu1 %4833  ;;  %v11552_v35 = vpop.permute.xlu0 %4886 }
 0xb68   : > { %14189 = vst [vmem:[#allocation429_spill] sm:$0xff] %v11550_v6  ;;  %14190 = vst [vmem:[#allocation351_spill] sm:$0xff] %v11552_v35  ;;  %5078 = vrot.lane.b32.xlu1 %v10867_v38, %s14163_s23  ;;  %5153 = vperm.xlu0 %6379, %v10920_v12  }
 0xb6b   : > { %v11557_v8 = vpop.permute.xlu1 %4837  ;;  %v11559_v17 = vpop.permute.xlu0 %4890 }
 0xb6c   : > { %14191 = vst [vmem:[#allocation359_spill] sm:$0xff] %v11557_v8  ;;  %14192 = vst [vmem:[#allocation341_spill] sm:$0xff] %v11559_v17  ;;  %5082 = vrot.lane.b32.xlu1 %v10806_v40, %s14163_s23  ;;  %5165 = vperm.xlu0 %6379, %v10950_v52   ;;  %v14198_v17 = vmov 24  }
 0xb6f   : > { %v11564_v37 = vpop.permute.xlu1 %4845  ;;  %v11566_v42 = vpop.permute.xlu0 %4897 }
 0xb70   : > { %14193 = vst [vmem:[#allocation360_spill] sm:$0xff] %v11564_v37  ;;  %14194 = vst [vmem:[#allocation50_spill] sm:$0xff] %v11566_v42  ;;  %5089 = vperm.xlu1 %6377, %v10920_v12   ;;  %5173 = vperm.xlu0 %6379, %v10961_v5  }
 0xb73   : > { %v11570_v35 = vpop.permute.xlu1 %4853  ;;  %v11572_v6 = vpop.permute.xlu0 %4909 }
 0xb74   : > { %14195 = vst [vmem:[#allocation140_spill] sm:$0xff] %v11570_v35  ;;  %14196 = vst [vmem:[#allocation435_spill] sm:$0xff] %v11572_v6  ;;  %5093 = vperm.xlu1 %6377, %v10939_v15   ;;  %5196 = vrot.lane.b32.xlu0 %v10580_v29, %s14197_s27 }
 0xb75   : > { %6381 = vset.pattern.permute.xlu0 %v14198_v17 }
 0xb77   : > { %v11578_v8 = vpop.permute.xlu1 %4876  ;;  %v11580_v37 = vpop.permute.xlu0 %4917 }
 0xb78   : > { %14199 = vst [vmem:[#allocation161_spill] sm:$0xff] %v11578_v8  ;;  %14200 = vst [vmem:[#allocation366_spill] sm:$0xff] %v11580_v37  ;;  %5101 = vperm.xlu1 %6377, %v10950_v52   ;;  %5200 = vrot.lane.b32.xlu0 %v10522_v55, %s14197_s27 }
 0xb7b   : > { %v11585_v42 = vpop.permute.xlu1 %4880  ;;  %v11587_v35 = vpop.permute.xlu0 %4940 }
 0xb7c   : > { %14201 = vst [vmem:[#allocation361_spill] sm:$0xff] %v11585_v42  ;;  %14202 = vst [vmem:[#allocation432_spill] sm:$0xff] %v11587_v35  ;;  %5109 = vperm.xlu1 %6377, %v10961_v5   ;;  %5204 = vrot.lane.b32.xlu0 %v10761_v24, %s14197_s27 }
 0xb7f   : > { %v11592_v6 = vpop.permute.xlu1 %4884  ;;  %v11594_v47 = vpop.permute.xlu0 %4944 }
 0xb80   : > { %14203 = vst [vmem:[#allocation189_spill] sm:$0xff] %v11592_v6  ;;  %14204 = vst [vmem:[#allocation147_spill] sm:$0xff] %v11594_v47  ;;  %5132 = vrot.lane.b32.xlu1 %v10580_v29, %s14181_s20  ;;  %5217 = vperm.xlu0 %6381, %v10920_v12  }
 0xb81   : > { %6378 = vset.pattern.permute.xlu1 %v14182_v27 }
 0xb83   : > { %v11600_v37 = vpop.permute.xlu1 %4888  ;;  %v11602_v42 = vpop.permute.xlu0 %4948 }
 0xb84   : > { %14205 = vst [vmem:[#allocation136_spill] sm:$0xff] %v11600_v37  ;;  %14206 = vst [vmem:[#allocation430_spill] sm:$0xff] %v11602_v42  ;;  %5136 = vrot.lane.b32.xlu1 %v10522_v55, %s14181_s20  ;;  %5221 = vperm.xlu0 %6381, %v10939_v15  }
 0xb87   : > { %v11607_v35 = vpop.permute.xlu1 %4893  ;;  %v11609_v6 = vpop.permute.xlu0 %4952 }
 0xb88   : > { %14207 = vst [vmem:[#allocation29_spill] sm:$0xff] %v11607_v35  ;;  %14208 = vst [vmem:[#allocation368_spill] sm:$0xff] %v11609_v6  ;;  %5140 = vrot.lane.b32.xlu1 %v10761_v24, %s14181_s20  ;;  %5229 = vperm.xlu0 %6381, %v10950_v52  }
 0xb8b   : > { %v11614_v47 = vpop.permute.xlu1 %4901  ;;  %v11616_v27 = vpop.permute.xlu0 %4957 }
 0xb8c   : > { %14209 = vst [vmem:[#allocation363_spill] sm:$0xff] %v11614_v47  ;;  %14210 = vst [vmem:[#allocation120_spill] sm:$0xff] %v11616_v27  ;;  %5144 = vrot.lane.b32.xlu1 %v10720_v41, %s14181_s20  ;;  %5260 = vrot.lane.b32.xlu0 %v10580_v29, %s14211_s28  ;;  %s6030_s20 = sshll.u32 %s14634_s18, 5 }
 0xb8d   : > { %s386_s30 = scalar_lea.vmem %s12659_s11, %s6030_s20 }
 0xb8f   : > { %v11622_v37 = vpop.permute.xlu1 %4905  ;;  %v11624_v42 = vpop.permute.xlu0 %4969 }
 0xb90   : > { %14212 = vst [vmem:[#allocation141_spill] sm:$0xff] %v11622_v37  ;;  %14213 = vst [vmem:[#allocation437_spill] sm:$0xff] %v11624_v42  ;;  %5149 = vperm.xlu1 %6378, %v11006_v11   ;;  %5324 = vrot.lane.b32.xlu0 %v10580_v29, %s14214_s26  ;;  %v14219_v42 = vmov 25  }
 0xb93   : > { %v11629_v6 = vpop.permute.xlu1 %4913  ;;  %v11631_v47 = vpop.permute.xlu0 %4977 }
 0xb94   : > { %14215 = vst [vmem:[#allocation162_spill] sm:$0xff] %v11629_v6  ;;  %14216 = vst [vmem:[#allocation362_spill] sm:$0xff] %v11631_v47  ;;  %5157 = vperm.xlu1 %6378, %v10939_v15   ;;  %5237 = vperm.xlu0 %6381, %v10961_v5  }
 0xb97   : > { %v11635_v27 = vpop.permute.xlu1 %4921  ;;  %v11637_v41 = vpop.permute.xlu0 %4985 }
 0xb98   : > { %14217 = vst [vmem:[#allocation370_spill] sm:$0xff] %v11635_v27  ;;  %14218 = vst [vmem:[#allocation364_spill] sm:$0xff] %v11637_v41  ;;  %5161 = vperm.xlu1 %6378, %v11023_v62   ;;  %6393 = vset.pattern.permute.xlu0 %v14219_v42 }
 0xb99   : > { %5289 = vperm.xlu0 %6393, %v11023_v62  }
 0xb9b   : > { %v11642_v37 = vpop.permute.xlu1 %4942  ;;  %v11644_v35 = vpop.permute.xlu0 %5006 }
 0xb9c   : > { %14220 = vst [vmem:[#allocation372_spill] sm:$0xff] %v11642_v37  ;;  %14221 = vst [vmem:[#allocation151_spill] sm:$0xff] %v11644_v35  ;;  %5169 = vperm.xlu1 %6378, %v11034_v53  }
 0xb9d   : > { %5293 = vperm.xlu0 %6393, %v10950_v52  }
 0xb9f   : > { %v11648_v47 = vpop.permute.xlu1 %4946  ;;  %v11650_v6 = vpop.permute.xlu0 %5010 }
 0xba0   : > { %14222 = vst [vmem:[#allocation148_spill] sm:$0xff] %v11648_v47  ;;  %14223 = vst [vmem:[#allocation55_spill] sm:$0xff] %v11650_v6  ;;  %5177 = vperm.xlu1 %6378, %v11047_v44   ;;  %v14231_v47 = vmov 26  }
 0xba1   : > { %5266 = vrot.lane.b32.xlu0 %v10616_v46, %s14211_s28 }
 0xba3   : > { %v11655_v41 = vpop.permute.xlu1 %4950  ;;  %v11657_v27 = vpop.permute.xlu0 %5014 }
 0xba4   : > { %14224 = vst [vmem:[#allocation434_spill] sm:$0xff] %v11655_v41  ;;  %14225 = vst [vmem:[#allocation67_spill] sm:$0xff] %v11657_v27  ;;  %5198 = vrot.lane.b32.xlu1 %v10669_v4, %s14197_s27 }
 0xba5   : > { %5390 = vrot.lane.b32.xlu0 %v10669_v4, %s14226_s14  ;;  %6380 = vset.pattern.permute.xlu1 %v14198_v17 }
 0xba7   : > { %v11664_v52 = vpop.permute.xlu1 %4954  ;;  %v11666_v6 = vpop.permute.xlu0 %5018 }
 0xba8   : > { %14227 = vst [vmem:[#allocation365_spill] sm:$0xff] %v11664_v52  ;;  %14228 = vst [vmem:[#allocation373_spill] sm:$0xff] %v11666_v6  ;;  %5202 = vrot.lane.b32.xlu1 %v10616_v46, %s14197_s27 }
 0xba9   : > { %5305 = vperm.xlu0 %6393, %v11047_v44  }
 0xbab   : > { %v11671_v41 = vpop.permute.xlu1 %4961  ;;  %v11673_v27 = vpop.permute.xlu0 %5025 }
 0xbac   : > { %14229 = vst [vmem:[#allocation150_spill] sm:$0xff] %v11671_v41  ;;  %14230 = vst [vmem:[#allocation65_spill] sm:$0xff] %v11673_v27  ;;  %5213 = vperm.xlu1 %6380, %v11006_v11  }
 0xbad   : > { %6399 = vset.pattern.permute.xlu0 %v14231_v47 }
 0xbae   : > { %5341 = vperm.xlu0 %6399, %v11006_v11  }
 0xbaf   : > { %v11678_v35 = vpop.permute.xlu1 %4965  ;;  %v11680_v52 = vpop.permute.xlu0 %5037 }
 0xbb0   : > { %14232 = vst [vmem:[#allocation142_spill] sm:$0xff] %v11678_v35  ;;  %14233 = vst [vmem:[#allocation439_spill] sm:$0xff] %v11680_v52  ;;  %6382 = vset.pattern.permute.xlu1 %v14219_v42 }
 0xbb1   : > { %5277 = vperm.xlu1 %6382, %v11006_v11  }
 0xbb2   : > { %5353 = vperm.xlu0 %6399, %v11023_v62  }
 0xbb3   : > { %v11685_v6 = vpop.permute.xlu1 %4973  ;;  %v11687_v41 = vpop.permute.xlu0 %5045 }
 0xbb4   : > { %14234 = vst [vmem:[#allocation163_spill] sm:$0xff] %v11685_v6  ;;  %14235 = vst [vmem:[#allocation353_spill] sm:$0xff] %v11687_v41 }
 0xbb5   : > { %5281 = vperm.xlu1 %6382, %v10920_v12  }
 0xbb6   : > { %5361 = vperm.xlu0 %6399, %v11034_v53  }
 0xbb7   : > { %v11691_v27 = vpop.permute.xlu1 %4981  ;;  %v11693_v37 = vpop.permute.xlu0 %5068 }
 0xbb8   : > { %14236 = vst [vmem:[#allocation374_spill] sm:$0xff] %v11691_v27  ;;  %14237 = vst [vmem:[#allocation355_spill] sm:$0xff] %v11693_v37 }
 0xbb9   : > { %6383 = vset.pattern.permute.xlu1 %v14198_v17 }
 0xbba   : > { %5225 = vperm.xlu1 %6383, %v11023_v62   ;;  %5328 = vrot.lane.b32.xlu0 %v10522_v55, %s14214_s26 }
 0xbbb   : > { %v11699_v35 = vpop.permute.xlu1 %5004  ;;  %v11701_v52 = vpop.permute.xlu0 %5072 }
 0xbbc   : > { %14238 = vst [vmem:[#allocation376_spill] sm:$0xff] %v11699_v35  ;;  %14239 = vst [vmem:[#allocation152_spill] sm:$0xff] %v11701_v52  ;;  %v14245_v52 = vmov 27  }
 0xbbe   : > { %6384 = vset.pattern.permute.xlu1 %v14231_v47  ;;  %5452 = vrot.lane.b32.xlu0 %v10580_v29, %s14240_s22 }
 0xbbf   : > { %5345 = vperm.xlu1 %6384, %v10920_v12   ;;  %v11707_v41 = vpop.permute.xlu1 %5008  ;;  %v11709_v27 = vpop.permute.xlu0 %5076 }
 0xbc0   : > { %14241 = vst [vmem:[#allocation149_spill] sm:$0xff] %v11707_v41  ;;  %14242 = vst [vmem:[#allocation68_spill] sm:$0xff] %v11709_v27 }
 0xbc2   : > { %5365 = vperm.xlu0 %6399, %v10961_v5  }
 0xbc3   : > { %6385 = vset.pattern.permute.xlu1 %v14219_v42  ;;  %v11713_v6 = vpop.permute.xlu1 %5012  ;;  %v11715_v37 = vpop.permute.xlu0 %5080 }
 0xbc4   : > { %14243 = vst [vmem:[#allocation436_spill] sm:$0xff] %v11713_v6  ;;  %14244 = vst [vmem:[#allocation44_spill] sm:$0xff] %v11715_v37  ;;  %5285 = vperm.xlu1 %6385, %v10939_v15  }
 0xbc6   : > { %6402 = vset.pattern.permute.xlu0 %v14245_v52 }
 0xbc7   : > { %v11719_v35 = vpop.permute.xlu1 %5016  ;;  %5417 = vperm.xlu0 %6402, %v11023_v62   ;;  %v11722_v8 = vpop.permute.xlu0 %5085 }
 0xbc8   : > { %14246 = vst [vmem:[#allocation357_spill] sm:$0xff] %v11719_v35  ;;  %14247 = vst [vmem:[#allocation378_spill] sm:$0xff] %v11722_v8  ;;  %6386 = vset.pattern.permute.xlu1 %v14245_v52 }
 0xbc9   : > { %5405 = vperm.xlu1 %6386, %v11006_v11  }
 0xbcb   : > { %v11726_v41 = vpop.permute.xlu1 %5021  ;;  %5268 = vrot.lane.b32.xlu0 %v10761_v24, %s14211_s28  ;;  %v11730_v37 = vpop.permute.xlu0 %5097 }
 0xbcc   : > { %14248 = vst [vmem:[#allocation4_spill] sm:$0xff] %v11726_v41  ;;  %14249 = vst [vmem:[#allocation12_spill] sm:$0xff] %v11730_v37 }
 0xbcd   : > { %5409 = vperm.xlu1 %6386, %v10920_v12  }
 0xbcf   : > { %v11733_v27 = vpop.permute.xlu1 %5029  ;;  %5392 = vrot.lane.b32.xlu0 %v10522_v55, %s14226_s14  ;;  %v11737_v62 = vpop.permute.xlu0 %5105 }
 0xbd0   : > { %14250 = vst [vmem:[#allocation89_spill] sm:$0xff] %v11733_v27  ;;  %14251 = vst [vmem:[#allocation441_spill] sm:$0xff] %v11737_v62  ;;  %v14257_v27 = vmov 28  }
 0xbd1   : > { %6387 = vset.pattern.permute.xlu1 %v14198_v17 }
 0xbd2   : > { %5233 = vperm.xlu1 %6387, %v11034_v53  }
 0xbd3   : > { %v11741_v35 = vpop.permute.xlu1 %5033  ;;  %5516 = vrot.lane.b32.xlu0 %v10580_v29, %s14253_s16  ;;  %v11745_v6 = vpop.permute.xlu0 %5113 }
 0xbd4   : > { %14252 = vst [vmem:[#allocation164_spill] sm:$0xff] %v11741_v35  ;;  %14254 = vst [vmem:[#allocation382_spill] sm:$0xff] %v11745_v6 }
 0xbd6   : > { %6388 = vset.pattern.permute.xlu1 %v14231_v47 }
 0xbd7   : > { %5349 = vperm.xlu1 %6388, %v10939_v15   ;;  %v11749_v37 = vpop.permute.xlu1 %5041  ;;  %5429 = vperm.xlu0 %6402, %v10961_v5   ;;  %v11752_v62 = vpop.permute.xlu0 %5134 }
 0xbd8   : > { %14255 = vst [vmem:[#allocation375_spill] sm:$0xff] %v11749_v37  ;;  %14256 = vst [vmem:[#allocation384_spill] sm:$0xff] %v11752_v62 }
 0xbdb   : > { %6389 = vset.pattern.permute.xlu1 %v14257_v27  ;;  %v11755_v8 = vpop.permute.xlu1 %5049  ;;  %6406 = vset.pattern.permute.xlu0 %v14257_v27  ;;  %v11758_v35 = vpop.permute.xlu0 %5138 }
 0xbdc   : > { %14258 = vst [vmem:[#allocation377_spill] sm:$0xff] %v11755_v8  ;;  %14259 = vst [vmem:[#allocation153_spill] sm:$0xff] %v11758_v35  ;;  %5469 = vperm.xlu1 %6389, %v11006_v11   ;;  %5489 = vperm.xlu0 %6406, %v11034_v53  }
 0xbdf   : > { %v11762_v6 = vpop.permute.xlu1 %5070  ;;  %v11764_v41 = vpop.permute.xlu0 %5142 }
 0xbe0   : > { %14260 = vst [vmem:[#allocation2_spill] sm:$0xff] %v11762_v6  ;;  %14261 = vst [vmem:[#allocation438_spill] sm:$0xff] %v11764_v41  ;;  %5473 = vperm.xlu1 %6389, %v10920_v12   ;;  %5332 = vrot.lane.b32.xlu0 %v10761_v24, %s14214_s26  ;;  %v14267_v12 = vld [vmem:[#allocation130_spill] sm:$0xff] }
 0xbe3   : > { %v11769_v37 = vpop.permute.xlu1 %5074  ;;  %v11771_v8 = vpop.permute.xlu0 %5146 }
 0xbe4   : > { %14262 = vst [vmem:[#allocation92_spill] sm:$0xff] %v11769_v37  ;;  %14263 = vst [vmem:[#allocation386_spill] sm:$0xff] %v11771_v8  ;;  %5262 = vrot.lane.b32.xlu1 %v10669_v4, %s14211_s28  ;;  %5456 = vrot.lane.b32.xlu0 %v10522_v55, %s14240_s22  ;;  %v3659_v8 = vmul.f32 %v14267_v12, %v10580_v29  ;;  %v3772_v37 = vmul.f32 %v10408_v21, %v10822_v31  ;;  %v14270_v21 = vmov 29  }
 0xbe5   : > { %6390 = vset.pattern.permute.xlu1 %v14219_v42 }
 0xbe7   : > { %v11778_v35 = vpop.permute.xlu1 %5078  ;;  %v11780_v41 = vpop.permute.xlu0 %5153 }
 0xbe8   : > { %14264 = vst [vmem:[#allocation379_spill] sm:$0xff] %v11778_v35  ;;  %14265 = vst [vmem:[#allocation103_spill] sm:$0xff] %v11780_v41  ;;  %5297 = vperm.xlu1 %6390, %v11034_v53   ;;  %5580 = vrot.lane.b32.xlu0 %v10580_v29, %s14266_s29  ;;  %v3716_v35 = vadd.f32 %v10272_v59, %v3659_v8  ;;  %v3836_v41 = vmul.f32 %v10424_v54, %v10830_v45 }
 0xbe9   : > { %v3900_v59 = vmul.f32 %v10406_v28, %v10801_v39  ;;  %v4092_v8 = vmul.f32 %v10506_v1, %v10846_v0  ;;  %v4156_v1 = vmul.f32 %v10500_v26, %v10820_v23  ;;  %v3663_v0 = vmul.f32 %v10262_v50, %v10761_v24 }
 0xbea   : > { %v3780_v19 = vadd.f32 %v3772_v37, %v3716_v35  ;;  %v3964_v35 = vmul.f32 %v10452_v33, %v10838_v2  ;;  %v4028_v33 = vmul.f32 %v10442_v22, %v10814_v20  ;;  %v11842_v22 = vld [vmem:[%s12655_s7 + $0x70] sm:$0xff]  ;;  %v3776_v26 = vmul.f32 %v10416_v10, %v11042_v63 }
 0xbeb   : > { %v11789_v62 = vpop.permute.xlu1 %5082  ;;  %v11791_v6 = vpop.permute.xlu0 %5165  ;;  %v14272_v50 = vmov 30   ;;  %v3720_v23 = vadd.f32 %v10400_v3, %v3663_v0  ;;  %v11877_v63 = vld [vmem:[%s12655_s7 + $0x50] sm:$0xff] }
 0xbec   : > { %14268 = vst [vmem:[#allocation143_spill] sm:$0xff] %v11789_v62  ;;  %6391 = vset.pattern.permute.xlu1 %v14245_v52  ;;  %5493 = vperm.xlu0 %6406, %v10961_v5   ;;  %v3844_v31 = vadd.f32 %v3836_v41, %v3780_v19  ;;  %v6559_v41 = vld [vmem:[%s12655_s7 + $0x48] sm:$0xff] }
 0xbed   : > { %5413 = vperm.xlu1 %6391, %v10939_v15  }
 0xbee   : > { %v3908_v5 = vadd.f32 %v3900_v59, %v3844_v31 }
 0xbef   : > { %v11799_v12 = vpop.permute.xlu1 %5089  ;;  %v11801_v29 = vpop.permute.xlu0 %5173 }
 0xbf0   : > { %14269 = vst [vmem:[#allocation443_spill] sm:$0xff] %v11801_v29  ;;  %6409 = vset.pattern.permute.xlu0 %v14270_v21  ;;  %v3972_v37 = vadd.f32 %v3964_v35, %v3908_v5 }
 0xbf1   : > { %6392 = vset.pattern.permute.xlu1 %v14270_v21  ;;  %5541 = vperm.xlu0 %6409, %v10939_v15  }
 0xbf2   : > { %5533 = vperm.xlu1 %6392, %v11006_v11   ;;  %v4036_v2 = vadd.f32 %v4028_v33, %v3972_v37  ;;  %v4220_v33 = vmul.f32 %v10600_v57, %v10854_v60  ;;  %v11890_v57 = vld [vmem:[%s12655_s7 + $0x58] sm:$0xff] }
 0xbf3   : > { %v11809_v54 = vpop.permute.xlu1 %5093  ;;  %v11811_v45 = vpop.permute.xlu0 %5196 }
 0xbf4   : > { %v4100_v5 = vadd.f32 %v4092_v8, %v4036_v2  ;;  %v3840_v2 = vmul.f32 %v10398_v30, %v11054_v32  ;;  %v4284_v32 = vmul.f32 %v10606_v48, %v10828_v7  ;;  %v3968_v48 = vmul.f32 %v10434_v16, %v11063_v58 }
 0xbf5   : > { %5553 = vperm.xlu0 %6409, %v11034_v53   ;;  %v4032_v58 = vmul.f32 %v10494_v9, %v11027_v49 }
 0xbf6   : > { %5537 = vperm.xlu1 %6392, %v6559_v41   ;;  %v4164_v37 = vadd.f32 %v4156_v1, %v4100_v5  ;;  %v4348_v1 = vmul.f32 %v10681_v14, %v10862_v43  ;;  %v4476_v14 = vmul.f32 %v11181_v34, %v10875_v18 }
 0xbf7   : > { %v11819_v15 = vpop.permute.xlu1 %5101  ;;  %v5201_v19 = vpop.permute.xlu0 %5200 }
 0xbf8   : > { %v4228_v10 = vadd.f32 %v4220_v33, %v4164_v37 }
 0xbf9   : > { %5396 = vrot.lane.b32.xlu0 %v10761_v24, %s14226_s14 }
 0xbfa   : > { %5326 = vrot.lane.b32.xlu1 %v10669_v4, %s14214_s26 }
 0xbfb   : > { %v11827_v28 = vpop.permute.xlu1 %5109  ;;  %v5205_v39 = vpop.permute.xlu0 %5204  ;;  %6394 = vset.pattern.permute.xlu1 %v14198_v17 }
 0xbfc   : > { %14271 = vst [vmem:[#allocation165_spill] sm:$0xff] %v11827_v28  ;;  %v14404_v28 = vld [vmem:[#allocation151_spill] sm:$0xff] }
 0xbfd   : > { %5520 = vrot.lane.b32.xlu0 %v10522_v55, %s14253_s16 }
 0xbfe   : > { %5241 = vperm.xlu1 %6394, %v11047_v44   ;;  %v11853_v44 = vld [vmem:[%s12655_s7 + $0x60] sm:$0xff] }
 0xbff   : > { %v11835_v31 = vpop.permute.xlu1 %5132  ;;  %v11837_v59 = vpop.permute.xlu0 %5217 }
 0xc01   : > { %5557 = vperm.xlu0 %6409, %v11842_v22  }
 0xc02   : > { %6395 = vset.pattern.permute.xlu1 %v14231_v47 }
 0xc03   : > { %5357 = vperm.xlu1 %6395, %v11853_v44   ;;  %v11856_v17 = vpop.permute.xlu1 %5136  ;;  %v5222_v20 = vpop.permute.xlu0 %5221 }
 0xc04   : > { %v11858_v35 = vmul.f32 %v5222_v20, %v5201_v19 }
 0xc05   : > { %6412 = vset.pattern.permute.xlu0 %v14272_v50 }
 0xc06   : > { %5597 = vperm.xlu0 %6412, %v11006_v11   ;;  %v3784_v11 = vadd.f32 %v3776_v26, %v3720_v23  ;;  %v14277_v23 = vld [vmem:[#allocation275_spill] sm:$0xff] }
 0xc07   : > { %6396 = vset.pattern.permute.xlu1 %v14257_v27  ;;  %v11870_v19 = vpop.permute.xlu1 %5140  ;;  %v5230_v8 = vpop.permute.xlu0 %5229 }
 0xc08   : > { %v11872_v5 = vmul.f32 %v5230_v8, %v5205_v39  ;;  %5477 = vperm.xlu1 %6396, %v11877_v63   ;;  %v3848_v30 = vadd.f32 %v3840_v2, %v3784_v11  ;;  %v4292_v39 = vadd.f32 %v4284_v32, %v4228_v10  ;;  %v14278_v2 = vld [vmem:[#allocation291_spill] sm:$0xff]  ;;  %v14280_v10 = vld [vmem:[#allocation314_spill] sm:$0xff]  ;;  %v14281_v32 = vld [vmem:[#allocation208_spill] sm:$0xff] }
 0xc09   : > { %v4604_v9 = vmul.f32 %v14278_v2, %v14277_v23  ;;  %v14290_v2 = vld [vmem:[#allocation327_spill] sm:$0xff] }
 0xc0a   : > { %5617 = vperm.xlu0 %6412, %v11034_v53   ;;  %v3904_v53 = vmul.f32 %v10444_v51, %v11016_v13  ;;  %v4356_v37 = vadd.f32 %v4348_v1, %v4292_v39  ;;  %v4412_v51 = vmul.f32 %v10703_v25, %v10836_v36  ;;  %v14275_v25 = vld [vmem:[#allocation110_spill] sm:$0xff]  ;;  %v14282_v1 = vld [vmem:[#allocation317_spill] sm:$0xff] }
 0xc0b   : > { %v11883_v3 = vpop.permute.xlu1 %5144  ;;  %v11885_v60 = vpop.permute.xlu0 %5260  ;;  %v14276_v36 = vld [vmem:[#allocation114_spill] sm:$0xff] }
 0xc0c   : > { %14273 = vst [vmem:[#allocation380_spill] sm:$0xff] %v11883_v3  ;;  %5481 = vperm.xlu1 %6396, %v11890_v57   ;;  %v3912_v7 = vadd.f32 %v3904_v53, %v3848_v30  ;;  %v4420_v33 = vadd.f32 %v4412_v51, %v4356_v37  ;;  %v4096_v34 = vmul.f32 %v14276_v36, %v14275_v25  ;;  %v14283_v53 = vld [vmem:[#allocation324_spill] sm:$0xff]  ;;  %v14284_v51 = vld [vmem:[#allocation134_spill] sm:$0xff] }
 0xc0d   : > { %v14288_v36 = vld [vmem:[#allocation126_spill] sm:$0xff] }
 0xc0e   : > { %5338 = vrot.lane.b32.xlu0 %v10806_v40, %s14214_s26  ;;  %v3976_v13 = vadd.f32 %v3968_v48, %v3912_v7  ;;  %v4484_v26 = vadd.f32 %v4476_v14, %v4420_v33  ;;  %v4732_v7 = vmul.f32 %v14283_v53, %v14282_v1  ;;  %v14286_v33 = vld [vmem:[#allocation323_spill] sm:$0xff]  ;;  %v14295_v1 = vld [vmem:[#allocation29_spill] sm:$0xff] }
 0xc0f   : > { %v11901_v0 = vpop.permute.xlu1 %5149  ;;  %v11903_v20 = vpop.permute.xlu0 %5324 }
 0xc10   : > { %6397 = vset.pattern.permute.xlu1 %v14272_v50  ;;  %v4040_v18 = vadd.f32 %v4032_v58, %v3976_v13  ;;  %v14285_v13 = vld [vmem:[#allocation133_spill] sm:$0xff] }
 0xc11   : > { %5601 = vperm.xlu1 %6397, %v6559_v41   ;;  %v4540_v41 = vmul.f32 %v11237_v61, %v11208_v56  ;;  %v14279_v56 = vld [vmem:[#allocation306_spill] sm:$0xff]  ;;  %v4160_v14 = vmul.f32 %v14285_v13, %v14284_v51 }
 0xc12   : > { %5462 = vrot.lane.b32.xlu0 %v10867_v38, %s14240_s22  ;;  %v4668_v11 = vmul.f32 %v14280_v10, %v14279_v56  ;;  %v4104_v30 = vadd.f32 %v4096_v34, %v4040_v18  ;;  %v14289_v34 = vld [vmem:[#allocation46_spill] sm:$0xff]  ;;  %v14293_v10 = vmov 0  }
 0xc13   : > { %v11912_v43 = vpop.permute.xlu1 %5157  ;;  %v11914_v16 = vpop.permute.xlu0 %5237  ;;  %v4548_v61 = vadd.f32 %v4540_v41, %v4484_v26  ;;  %v14287_v41 = vld [vmem:[#allocation344_spill] sm:$0xff]  ;;  %v4224_v26 = vmul.f32 %v14289_v34, %v14288_v36  ;;  %v14299_v36 = vld [vmem:[#allocation239_spill] sm:$0xff] }
 0xc14   : > { %14274 = vst [vmem:[#allocation388_spill] sm:$0xff] %v11914_v16  ;;  %v4796_v25 = vmul.f32 %v14287_v41, %v14286_v33  ;;  %v4168_v18 = vadd.f32 %v4160_v14, %v4104_v30  ;;  %v14296_v30 = vld [vmem:[#allocation64_spill] sm:$0xff] }
 0xc15   : > { %5264 = vrot.lane.b32.xlu1 %v10522_v55, %s14211_s28  ;;  %v4612_v39 = vadd.f32 %v4604_v9, %v4548_v61  ;;  %v14291_v9 = vld [vmem:[#allocation139_spill] sm:$0xff]  ;;  %v14297_v14 = vld [vmem:[#allocation432_spill] sm:$0xff] }
 0xc16   : > { %5586 = vrot.lane.b32.xlu0 %v10616_v46, %s14266_s29  ;;  %6398 = vset.pattern.permute.xlu1 %v14219_v42  ;;  %v11938_v42 = vld [vmem:[%s12655_s7 + $0x78] sm:$0xff]  ;;  %v4860_v61 = vmul.f32 %v14291_v9, %v14290_v2  ;;  %v14300_v34 = vld [vmem:[#allocation36_spill] sm:$0xff] }
 0xc17   : > { %v11929_v49 = vpop.permute.xlu1 %5161  ;;  %v4676_v58 = vadd.f32 %v4668_v11, %v4612_v39  ;;  %v14294_v39 = vld [vmem:[#allocation161_spill] sm:$0xff]  ;;  %v14301_v2 = vld [vmem:[#allocation376_spill] sm:$0xff] }
 0xc18   : > { %v5290_v8 = vpop.permute.xlu0 %5289  ;;  %v4924_v53 = vmul.f32 %v14295_v1, %v14294_v39  ;;  %v14302_v9 = vld [vmem:[#allocation4_spill] sm:$0xff]  ;;  %v6565_v39 = vld [vmem:[%s12655_s7 + $0x68] sm:$0xff] }
 0xc19   : > { %5388 = vrot.lane.b32.xlu1 %v14281_v32, %s14226_s14  ;;  %v4740_v23 = vadd.f32 %v4732_v7, %v4676_v58  ;;  %v4232_v7 = vadd.f32 %v4224_v26, %v4168_v18  ;;  %v14298_v58 = vld [vmem:[#allocation120_spill] sm:$0xff] }
 0xc1a   : > { %5625 = vperm.xlu0 %6412, %v11938_v42   ;;  %v4988_v33 = vmul.f32 %v14298_v58, %v14297_v14  ;;  %v14303_v26 = vld [vmem:[#allocation72_spill] sm:$0xff] }
 0xc1b   : > { %v11943_v48 = vpop.permute.xlu1 %5169  ;;  %v4804_v32 = vadd.f32 %v4796_v25, %v4740_v23 }
 0xc1c   : > { %v11945_v37 = vpop.permute.xlu0 %5293 }
 0xc1d   : > { %5301 = vperm.xlu1 %6398, %v11842_v22   ;;  %v4868_v13 = vadd.f32 %v4860_v61, %v4804_v32  ;;  %v14304_v61 = vld [vmem:[#allocation6_spill] sm:$0xff] }
 0xc1e   : > { %5524 = vrot.lane.b32.xlu0 %v10761_v24, %s14253_s16  ;;  %v4352_v32 = vmul.f32 %v14304_v61, %v14303_v26 }
 0xc1f   : > { %v11958_v56 = vpop.permute.xlu1 %5177  ;;  %6415 = vset.pattern.permute.xlu0 %v14293_v10  ;;  %v4932_v23 = vadd.f32 %v4924_v53, %v4868_v13 }
 0xc20   : > { %14292 = vst [vmem:[#allocation381_spill] sm:$0xff] %v11958_v56  ;;  %v5267_v11 = vpop.permute.xlu0 %5266 }
 0xc21   : > { %v11963_v51 = vmul.f32 %v5290_v8, %v5267_v11  ;;  %6400 = vset.pattern.permute.xlu1 %v14245_v52  ;;  %v4288_v8 = vmul.f32 %v14300_v34, %v14299_v36  ;;  %v5052_v11 = vmul.f32 %v14302_v9, %v14301_v2  ;;  %v4996_v1 = vadd.f32 %v4988_v33, %v4932_v23  ;;  %v14306_v36 = vld [vmem:[#allocation355_spill] sm:$0xff]  ;;  %v14307_v34 = vld [vmem:[#allocation378_spill] sm:$0xff]  ;;  %v14309_v23 = vld [vmem:[#allocation245_spill] sm:$0xff] }
 0xc22   : > { %5421 = vperm.xlu1 %6400, %v11853_v44   ;;  %5464 = vrot.lane.b32.xlu0 %v14296_v30, %s14240_s22  ;;  %v5116_v2 = vmul.f32 %v14307_v34, %v14306_v36 }
 0xc23   : > { %v11971_v41 = vpop.permute.xlu1 %5198  ;;  %v4296_v18 = vadd.f32 %v4288_v8, %v4232_v7  ;;  %v5060_v53 = vadd.f32 %v5052_v11, %v4996_v1  ;;  %v5180_v7 = vmul.f32 %v11901_v0, %v11835_v31  ;;  %v14308_v8 = vld [vmem:[#allocation93_spill] sm:$0xff]  ;;  %v14311_v11 = vld [vmem:[#allocation270_spill] sm:$0xff]  ;;  %v14312_v31 = vld [vmem:[#allocation279_spill] sm:$0xff] }
 0xc24   : > { %v11973_v25 = vpop.permute.xlu0 %5390  ;;  %v4416_v9 = vmul.f32 %v14309_v23, %v14308_v8  ;;  %v14313_v0 = vld [vmem:[#allocation278_spill] sm:$0xff] }
 0xc25   : > { %v4360_v13 = vadd.f32 %v4352_v32, %v4296_v18  ;;  %v5124_v61 = vadd.f32 %v5116_v2, %v5060_v53  ;;  %v4544_v36 = vmul.f32 %v14313_v0, %v14312_v31  ;;  %v14314_v8 = vld [vmem:[#allocation86_spill] sm:$0xff]  ;;  %v14315_v2 = vld [vmem:[#allocation277_spill] sm:$0xff] }
 0xc26   : > { %5425 = vperm.xlu1 %6400, %v6565_v39   ;;  %5588 = vrot.lane.b32.xlu0 %v10761_v24, %s14266_s29  ;;  %v14310_v39 = vld [vmem:[#allocation69_spill] sm:$0xff]  ;;  %v3660_v23 = vmul.f32 %v14314_v8, %v10669_v4  ;;  %v14319_v31 = vld [vmem:[#allocation310_spill] sm:$0xff] }
 0xc27   : > { %v11986_v14 = vpop.permute.xlu1 %5202  ;;  %v4480_v26 = vmul.f32 %v14311_v11, %v14310_v39  ;;  %v4424_v32 = vadd.f32 %v4416_v9, %v4360_v13  ;;  %v5188_v34 = vadd.f32 %v5180_v7, %v5124_v61  ;;  %v14317_v39 = vld [vmem:[#allocation131_spill] sm:$0xff]  ;;  %v14318_v7 = vld [vmem:[#allocation184_spill] sm:$0xff]  ;;  %v14320_v0 = vld [vmem:[#allocation313_spill] sm:$0xff] }
 0xc28   : > { %v11988_v58 = vpop.permute.xlu0 %5305  ;;  %v3773_v11 = vmul.f32 %v14318_v7, %v14317_v39  ;;  %v4672_v56 = vmul.f32 %v14320_v0, %v14319_v31  ;;  %v14329_v0 = vld [vmem:[#allocation135_spill] sm:$0xff] }
 0xc29   : > { %14305 = vst [vmem:[#allocation389_spill] sm:$0xff] %v11988_v58 }
 0xc2a   : > { %6401 = vset.pattern.permute.xlu1 %v14270_v21  ;;  %5528 = vrot.lane.b32.xlu0 %v14296_v30, %s14253_s16 }
 0xc2b   : > { %5545 = vperm.xlu1 %6401, %v11890_v57   ;;  %v5214_v33 = vpop.permute.xlu1 %5213 }
 0xc2c   : > { %v5244_v1 = vmul.f32 %v5214_v33, %v11811_v45  ;;  %v4488_v45 = vadd.f32 %v4480_v26, %v4424_v32  ;;  %v14322_v32 = vld [vmem:[#allocation56_spill] sm:$0xff] }
 0xc2d   : > { %v5342_v58 = vpop.permute.xlu0 %5341 }
 0xc2e   : > { %v5372_v18 = vmul.f32 %v5342_v58, %v11903_v20  ;;  %5592 = vrot.lane.b32.xlu0 %v14296_v30, %s14266_s29  ;;  %v14316_v20 = vld [vmem:[#allocation303_spill] sm:$0xff]  ;;  %v5252_v33 = vadd.f32 %v5244_v1, %v5188_v34  ;;  %v4552_v61 = vadd.f32 %v4544_v36, %v4488_v45 }
 0xc2f   : > { %5206 = vrot.lane.b32.xlu1 %v10867_v38, %s14197_s27  ;;  %v4608_v58 = vmul.f32 %v14316_v20, %v14315_v2  ;;  %v14323_v2 = vld [vmem:[#allocation186_spill] sm:$0xff]  ;;  %v14325_v20 = vld [vmem:[#allocation328_spill] sm:$0xff] }
 0xc30   : > { %v5278_v53 = vpop.permute.xlu1 %5277  ;;  %6403 = vset.pattern.permute.xlu1 %v14231_v47  ;;  %v14321_v47 = vld [vmem:[#allocation187_spill] sm:$0xff]  ;;  %v3837_v1 = vmul.f32 %v14323_v2, %v14322_v32  ;;  %v14332_v2 = vld [vmem:[#allocation360_spill] sm:$0xff] }
 0xc31   : > { %v5308_v13 = vmul.f32 %v5278_v53, %v11885_v60  ;;  %v12016_v9 = vpop.permute.xlu0 %5353  ;;  %v3717_v26 = vadd.f32 %v14321_v47, %v3660_v23  ;;  %v4616_v60 = vadd.f32 %v4608_v58, %v4552_v61  ;;  %v14324_v53 = vld [vmem:[#allocation320_spill] sm:$0xff]  ;;  %v14330_v23 = vld [vmem:[#allocation342_spill] sm:$0xff] }
 0xc32   : > { %v4736_v62 = vmul.f32 %v14325_v20, %v14324_v53  ;;  %v4800_v47 = vmul.f32 %v14330_v23, %v14329_v0  ;;  %v14331_v61 = vld [vmem:[#allocation350_spill] sm:$0xff] }
 0xc33   : > { %v5316_v8 = vadd.f32 %v5308_v13, %v5252_v33  ;;  %5330 = vrot.lane.b32.xlu1 %v10616_v46, %s14214_s26  ;;  %v3781_v45 = vadd.f32 %v3773_v11, %v3717_v26  ;;  %v14327_v33 = vld [vmem:[#allocation230_spill] sm:$0xff]  ;;  %v14328_v13 = vld [vmem:[#allocation53_spill] sm:$0xff]  ;;  %v4680_v31 = vadd.f32 %v4672_v56, %v4616_v60  ;;  %v4864_v53 = vmul.f32 %v14332_v2, %v14331_v61  ;;  %v14335_v60 = vld [vmem:[#allocation40_spill] sm:$0xff] }
 0xc34   : > { %v12027_v34 = vpop.permute.xlu1 %5281  ;;  %v3901_v7 = vmul.f32 %v14328_v13, %v14327_v33  ;;  %v14333_v26 = vld [vmem:[#allocation189_spill] sm:$0xff]  ;;  %v14334_v33 = vld [vmem:[#allocation435_spill] sm:$0xff]  ;;  %v14336_v13 = vld [vmem:[#allocation48_spill] sm:$0xff] }
 0xc35   : > { %v12031_v39 = vpop.permute.xlu0 %5361  ;;  %v12033_v36 = vadd.f32 %v5372_v18, %v5316_v8  ;;  %v3845_v32 = vadd.f32 %v3837_v1, %v3781_v45  ;;  %v4744_v58 = vadd.f32 %v4736_v62, %v4680_v31  ;;  %v4928_v56 = vmul.f32 %v14334_v33, %v14333_v26  ;;  %v14337_v1 = vld [vmem:[#allocation430_spill] sm:$0xff]  ;;  %v14338_v62 = vld [vmem:[#allocation163_spill] sm:$0xff] }
 0xc36   : > { %14326 = vst [vmem:[#allocation154_spill] sm:$0xff] %v12031_v39  ;;  %v3965_v0 = vmul.f32 %v14336_v13, %v14335_v60  ;;  %v4992_v45 = vmul.f32 %v14338_v62, %v14337_v1  ;;  %v14339_v2 = vld [vmem:[#allocation231_spill] sm:$0xff]  ;;  %v14340_v39 = vld [vmem:[#allocation201_spill] sm:$0xff] }
 0xc37   : > { %5454 = vrot.lane.b32.xlu1 %v10669_v4, %s14240_s22  ;;  %v3909_v11 = vadd.f32 %v3901_v7, %v3845_v32  ;;  %v4808_v8 = vadd.f32 %v4800_v47, %v4744_v58  ;;  %v4029_v16 = vmul.f32 %v14340_v39, %v14339_v2  ;;  %v14341_v32 = vld [vmem:[#allocation436_spill] sm:$0xff]  ;;  %v14342_v58 = vld [vmem:[#allocation439_spill] sm:$0xff]  ;;  %v5184_v39 = vmul.f32 %v11791_v6, %v11870_v19 }
 0xc38   : > { %v5056_v26 = vmul.f32 %v14342_v58, %v14341_v32  ;;  %v14347_v2 = vld [vmem:[#allocation232_spill] sm:$0xff] }
 0xc39   : > { %v12043_v20 = vpop.permute.xlu1 %5225  ;;  %v12045_v18 = vpop.permute.xlu0 %5328  ;;  %v4872_v23 = vadd.f32 %v4864_v53, %v4808_v8  ;;  %v3973_v61 = vadd.f32 %v3965_v0, %v3909_v11  ;;  %v14343_v8 = vld [vmem:[#allocation68_spill] sm:$0xff] }
 0xc3a   : > { %v5120_v33 = vmul.f32 %v11819_v15, %v14343_v8  ;;  %v14348_v15 = vld [vmem:[#allocation30_spill] sm:$0xff] }
 0xc3b   : > { %5369 = vperm.xlu1 %6403, %v11938_v42   ;;  %v4936_v47 = vadd.f32 %v4928_v56, %v4872_v23  ;;  %v4037_v11 = vadd.f32 %v4029_v16, %v3973_v61  ;;  %v14345_v56 = vld [vmem:[#allocation71_spill] sm:$0xff]  ;;  %v14346_v23 = vld [vmem:[#allocation5_spill] sm:$0xff]  ;;  %v14351_v8 = vld [vmem:[#allocation206_spill] sm:$0xff] }
 0xc3c   : > { %v4093_v1 = vmul.f32 %v14346_v23, %v14345_v56  ;;  %v14354_v23 = vld [vmem:[#allocation76_spill] sm:$0xff] }
 0xc3d   : > { %v12054_v31 = vpop.permute.xlu0 %5452  ;;  %v5000_v53 = vadd.f32 %v4992_v45, %v4936_v47  ;;  %v4157_v47 = vmul.f32 %v14348_v15, %v14347_v2  ;;  %v14358_v15 = vld [vmem:[#allocation221_spill] sm:$0xff] }
 0xc3e   : > { %v12058_v7 = vpop.permute.xlu1 %5345  ;;  %v4101_v45 = vadd.f32 %v4093_v1, %v4037_v11  ;;  %v14352_v11 = vld [vmem:[#allocation181_spill] sm:$0xff] }
 0xc3f   : > { %6404 = vset.pattern.permute.xlu1 %v14257_v27  ;;  %v5064_v13 = vadd.f32 %v5056_v26, %v5000_v53  ;;  %v14350_v53 = vld [vmem:[#allocation47_spill] sm:$0xff] }
 0xc40   : > { %5485 = vperm.xlu1 %6404, %v11853_v44   ;;  %v4165_v6 = vadd.f32 %v4157_v47, %v4101_v45  ;;  %v14357_v45 = vld [vmem:[#allocation182_spill] sm:$0xff]  ;;  %v14359_v47 = vld [vmem:[#allocation128_spill] sm:$0xff] }
 0xc41   : > { %v12066_v60 = vpop.permute.xlu0 %5365  ;;  %v5128_v62 = vadd.f32 %v5120_v33, %v5064_v13  ;;  %v3661_v13 = vmul.f32 %v14352_v11, %v10522_v55  ;;  %v14363_v11 = vld [vmem:[#allocation249_spill] sm:$0xff] }
 0xc42   : > { %14344 = vst [vmem:[#allocation81_spill] sm:$0xff] %v12066_v60  ;;  %v14374_v60 = vld [vmem:[#allocation301_spill] sm:$0xff] }
 0xc43   : > { %v12070_v0 = vpop.permute.xlu1 %5285  ;;  %v5192_v16 = vadd.f32 %v5184_v39, %v5128_v62  ;;  %v14353_v39 = vld [vmem:[#allocation233_spill] sm:$0xff]  ;;  %v3718_v2 = vadd.f32 %v14357_v45, %v3661_v13  ;;  %v14364_v13 = vld [vmem:[#allocation220_spill] sm:$0xff] }
 0xc44   : > { %6405 = vset.pattern.permute.xlu1 %v14272_v50  ;;  %v4285_v1 = vmul.f32 %v14354_v23, %v14353_v39  ;;  %v4413_v39 = vmul.f32 %v14364_v13, %v14363_v11  ;;  %v14373_v13 = vld [vmem:[#allocation289_spill] sm:$0xff] }
 0xc45   : > { %5605 = vperm.xlu1 %6405, %v11877_v63   ;;  %v5256_v58 = vadd.f32 %v11872_v5, %v5192_v16  ;;  %v4221_v63 = vmul.f32 %v14351_v8, %v14350_v53  ;;  %v14355_v5 = vld [vmem:[#allocation219_spill] sm:$0xff]  ;;  %v3838_v16 = vmul.f32 %v14359_v47, %v14358_v15  ;;  %v14362_v53 = vld [vmem:[#allocation214_spill] sm:$0xff]  ;;  %v14367_v15 = vld [vmem:[#allocation60_spill] sm:$0xff]  ;;  %v4605_v29 = vmul.f32 %v14374_v60, %v14373_v13 }
 0xc46   : > { %v12078_v32 = vpop.permute.xlu0 %5417  ;;  %v14368_v47 = vld [vmem:[#allocation268_spill] sm:$0xff] }
 0xc47   : > { %14349 = vst [vmem:[#allocation440_spill] sm:$0xff] %v12078_v32  ;;  %v14382_v60 = vld [vmem:[#allocation244_spill] sm:$0xff] }
 0xc48   : > { %v12080_v61 = vpop.permute.xlu1 %5405 }
 0xc49   : > { %5609 = vperm.xlu1 %6405, %v11890_v57   ;;  %v4229_v57 = vadd.f32 %v4221_v63, %v4165_v6 }
 0xc4a   : > { %v5269_v19 = vpop.permute.xlu0 %5268 }
 0xc4b   : > { %v5312_v26 = vmul.f32 %v11945_v37, %v5269_v19  ;;  %v14356_v37 = vld [vmem:[#allocation190_spill] sm:$0xff] }
 0xc4c   : > { %v12087_v33 = vpop.permute.xlu1 %5409  ;;  %v3774_v62 = vmul.f32 %v14356_v37, %v14355_v5  ;;  %v14365_v5 = vld [vmem:[#allocation125_spill] sm:$0xff]  ;;  %v14366_v37 = vld [vmem:[#allocation19_spill] sm:$0xff] }
 0xc4d   : > { %v12091_v56 = vadd.f32 %v5312_v26, %v5256_v58  ;;  %5270 = vrot.lane.b32.xlu1 %v10867_v38, %s14211_s28  ;;  %v4293_v58 = vadd.f32 %v4285_v1, %v4229_v57  ;;  %v14361_v26 = vld [vmem:[#allocation96_spill] sm:$0xff]  ;;  %v3902_v45 = vmul.f32 %v14366_v37, %v14365_v5  ;;  %v4477_v57 = vmul.f32 %v14368_v47, %v14367_v15  ;;  %v14377_v47 = vld [vmem:[#allocation78_spill] sm:$0xff] }
 0xc4e   : > { %6407 = vset.pattern.permute.xlu1 %v14245_v52  ;;  %v3782_v6 = vadd.f32 %v3774_v62, %v3718_v2  ;;  %v4349_v8 = vmul.f32 %v14362_v53, %v14361_v26  ;;  %v14369_v62 = vld [vmem:[#allocation222_spill] sm:$0xff]  ;;  %v14370_v2 = vld [vmem:[#allocation39_spill] sm:$0xff] }
 0xc4f   : > { %v3966_v26 = vmul.f32 %v14370_v2, %v14369_v62 }
 0xc50   : > { %v3846_v63 = vadd.f32 %v3838_v16, %v3782_v6  ;;  %v4357_v52 = vadd.f32 %v4349_v8, %v4293_v58  ;;  %v14371_v6 = vld [vmem:[#allocation272_spill] sm:$0xff] }
 0xc51   : > { %5394 = vrot.lane.b32.xlu1 %v10616_v46, %s14226_s14  ;;  %v12105_v19 = vpop.permute.xlu1 %5233  ;;  %v14372_v58 = vld [vmem:[#allocation280_spill] sm:$0xff] }
 0xc52   : > { %14360 = vst [vmem:[#allocation57_spill] sm:$0xff] %v12105_v19  ;;  %v3910_v1 = vadd.f32 %v3902_v45, %v3846_v63  ;;  %v4421_v16 = vadd.f32 %v4413_v39, %v4357_v52  ;;  %v4541_v53 = vmul.f32 %v14372_v58, %v14371_v6  ;;  %v14375_v63 = vld [vmem:[#allocation296_spill] sm:$0xff]  ;;  %v14376_v45 = vld [vmem:[#allocation111_spill] sm:$0xff]  ;;  %v14380_v6 = vld [vmem:[#allocation309_spill] sm:$0xff] }
 0xc53   : > { %v4669_v15 = vmul.f32 %v14376_v45, %v14375_v63  ;;  %v14378_v52 = vld [vmem:[#allocation196_spill] sm:$0xff] }
 0xc54   : > { %v4485_v11 = vadd.f32 %v4477_v57, %v4421_v16  ;;  %v3974_v5 = vadd.f32 %v3966_v26, %v3910_v1  ;;  %v4030_v39 = vmul.f32 %v14378_v52, %v14377_v47  ;;  %v14381_v57 = vld [vmem:[#allocation332_spill] sm:$0xff]  ;;  %v14383_v1 = vld [vmem:[#allocation79_spill] sm:$0xff]  ;;  %v14386_v47 = vld [vmem:[#allocation346_spill] sm:$0xff] }
 0xc55   : > { %5518 = vrot.lane.b32.xlu1 %v10669_v4, %s14253_s16  ;;  %v4733_v16 = vmul.f32 %v14381_v57, %v14380_v6  ;;  %v4094_v26 = vmul.f32 %v14383_v1, %v14382_v60  ;;  %v12147_v6 = vpop.permute.xlu0 %5392  ;;  %v14389_v57 = vld [vmem:[#allocation50_spill] sm:$0xff]  ;;  %v14391_v60 = vld [vmem:[#allocation127_spill] sm:$0xff] }
 0xc56   : > { %v12113_v23 = vpop.permute.xlu1 %5349  ;;  %v4549_v37 = vadd.f32 %v4541_v53, %v4485_v11  ;;  %v4038_v58 = vadd.f32 %v4030_v39, %v3974_v5  ;;  %v14384_v53 = vld [vmem:[#allocation331_spill] sm:$0xff]  ;;  %v14385_v11 = vld [vmem:[#allocation340_spill] sm:$0xff]  ;;  %v14388_v39 = vld [vmem:[#allocation358_spill] sm:$0xff] }
 0xc57   : > { %v4797_v3 = vmul.f32 %v14385_v11, %v14384_v53 }
 0xc58   : > { %v4613_v2 = vadd.f32 %v4605_v29, %v4549_v37  ;;  %v14387_v29 = vld [vmem:[#allocation429_spill] sm:$0xff]  ;;  %v4102_v52 = vadd.f32 %v4094_v26, %v4038_v58  ;;  %v14395_v58 = vld [vmem:[#allocation223_spill] sm:$0xff] }
 0xc59   : > { %5433 = vperm.xlu1 %6407, %v11938_v42   ;;  %v4861_v37 = vmul.f32 %v14387_v29, %v14386_v47  ;;  %v14396_v26 = vld [vmem:[#allocation207_spill] sm:$0xff] }
 0xc5a   : > { %v4677_v13 = vadd.f32 %v4669_v15, %v4613_v2  ;;  %v4925_v15 = vmul.f32 %v14389_v57, %v14388_v39  ;;  %v14390_v2 = vld [vmem:[#allocation87_spill] sm:$0xff]  ;;  %v4222_v29 = vmul.f32 %v14396_v26, %v14395_v58  ;;  %v12165_v57 = vpop.permute.xlu0 %5516  ;;  %v14403_v58 = vld [vmem:[#allocation193_spill] sm:$0xff] }
 0xc5b   : > { %v12124_v8 = vpop.permute.xlu1 %5469  ;;  %v4158_v1 = vmul.f32 %v14391_v60, %v14390_v2  ;;  %14398 = vst [vmem:[#allocation23_spill] sm:$0xff] %v12165_v57  ;;  %v14399_v2 = vld [vmem:[#allocation27_spill] sm:$0xff]  ;;  %v14400_v60 = vld [vmem:[#allocation113_spill] sm:$0xff]  ;;  %v14407_v57 = vld [vmem:[#allocation8_spill] sm:$0xff] }
 0xc5c   : > { %v4741_v45 = vadd.f32 %v4733_v16, %v4677_v13  ;;  %v14393_v16 = vld [vmem:[#allocation372_spill] sm:$0xff]  ;;  %v14394_v13 = vld [vmem:[#allocation150_spill] sm:$0xff] }
 0xc5d   : > { %6408 = vset.pattern.permute.xlu1 %v14270_v21  ;;  %v4989_v11 = vmul.f32 %v14394_v13, %v14393_v16  ;;  %v4166_v47 = vadd.f32 %v4158_v1, %v4102_v52  ;;  %v14401_v52 = vld [vmem:[#allocation95_spill] sm:$0xff]  ;;  %v14402_v13 = vld [vmem:[#allocation225_spill] sm:$0xff] }
 0xc5e   : > { %5549 = vperm.xlu1 %6408, %v11853_v44   ;;  %v4805_v5 = vadd.f32 %v4797_v3, %v4741_v45  ;;  %v14397_v3 = vld [vmem:[#allocation11_spill] sm:$0xff]  ;;  %v3839_v26 = vmul.f32 %v14403_v58, %v14402_v13  ;;  %v14412_v13 = vld [vmem:[#allocation242_spill] sm:$0xff]  ;;  %v12186_v19 = vpop.permute.xlu0 %5429 }
 0xc5f   : > { %v12134_v62 = vpop.permute.xlu1 %5473  ;;  %v3662_v45 = vmul.f32 %v14397_v3, %v10616_v46  ;;  %v4230_v16 = vadd.f32 %v4222_v29, %v4166_v47  ;;  %v14405_v3 = vld [vmem:[#allocation65_spill] sm:$0xff] }
 0xc60   : > { %14379 = vst [vmem:[#allocation367_spill] sm:$0xff] %v12134_v62  ;;  %v3775_v62 = vmul.f32 %v14400_v60, %v14399_v2  ;;  %v14408_v2 = vld [vmem:[#allocation17_spill] sm:$0xff]  ;;  %v14409_v60 = vld [vmem:[#allocation247_spill] sm:$0xff] }
 0xc61   : > { %v3719_v1 = vadd.f32 %v14401_v52, %v3662_v45  ;;  %v14410_v47 = vld [vmem:[#allocation33_spill] sm:$0xff] }
 0xc62   : > { %5208 = vrot.lane.b32.xlu1 %v14296_v30, %s14197_s27  ;;  %v3903_v29 = vmul.f32 %v14410_v47, %v14409_v60  ;;  %v14419_v47 = vld [vmem:[#allocation224_spill] sm:$0xff] }
 0xc63   : > { %v5263_v63 = vpop.permute.xlu1 %5262  ;;  %6410 = vset.pattern.permute.xlu1 %v14257_v27  ;;  %v4869_v27 = vadd.f32 %v4861_v37, %v4805_v5 }
 0xc65   : > { %v4933_v39 = vadd.f32 %v4925_v15, %v4869_v27  ;;  %v5053_v15 = vmul.f32 %v14405_v3, %v14404_v28  ;;  %v14406_v27 = vld [vmem:[#allocation2_spill] sm:$0xff] }
 0xc66   : > { %5210 = vrot.lane.b32.xlu1 %v10806_v40, %s14197_s27  ;;  %v5117_v32 = vmul.f32 %v11799_v12, %v14406_v27 }
 0xc67   : > { %v12155_v53 = vpop.permute.xlu1 %5297  ;;  %v4997_v37 = vadd.f32 %v4989_v11, %v4933_v39  ;;  %v4286_v11 = vmul.f32 %v14408_v2, %v14407_v57  ;;  %v3783_v39 = vadd.f32 %v3775_v62, %v3719_v1  ;;  %v14413_v57 = vld [vmem:[#allocation384_spill] sm:$0xff]  ;;  %v14414_v62 = vld [vmem:[#allocation103_spill] sm:$0xff]  ;;  %v14416_v2 = vld [vmem:[#allocation198_spill] sm:$0xff] }
 0xc68   : > { %14392 = vst [vmem:[#allocation390_spill] sm:$0xff] %v12155_v53  ;;  %v14411_v53 = vld [vmem:[#allocation98_spill] sm:$0xff]  ;;  %v5181_v1 = vmul.f32 %v14414_v62, %v14413_v57  ;;  %v14423_v62 = vld [vmem:[#allocation265_spill] sm:$0xff] }
 0xc69   : > { %v5061_v45 = vadd.f32 %v5053_v15, %v4997_v37  ;;  %v4294_v52 = vadd.f32 %v4286_v11, %v4230_v16  ;;  %v4350_v58 = vmul.f32 %v14412_v13, %v14411_v53  ;;  %v3847_v12 = vadd.f32 %v3839_v26, %v3783_v39  ;;  %v14415_v53 = vld [vmem:[#allocation116_spill] sm:$0xff]  ;;  %v12206_v13 = vpop.permute.xlu0 %5489 }
 0xc6a   : > { %5334 = vrot.lane.b32.xlu1 %v10867_v38, %s14214_s26  ;;  %v5245_v37 = vmul.f32 %v11837_v59, %v11971_v41  ;;  %v3967_v11 = vmul.f32 %v14416_v2, %v14415_v53  ;;  %v5309_v26 = vmul.f32 %v12027_v34, %v5263_v63  ;;  %v14421_v41 = vld [vmem:[#allocation226_spill] sm:$0xff] }
 0xc6b   : > { %v5125_v3 = vadd.f32 %v5117_v32, %v5061_v45  ;;  %v3911_v27 = vadd.f32 %v3903_v29, %v3847_v12  ;;  %v4358_v16 = vadd.f32 %v4350_v58, %v4294_v52  ;;  %v14417_v32 = vld [vmem:[#allocation26_spill] sm:$0xff]  ;;  %v14420_v29 = vld [vmem:[#allocation269_spill] sm:$0xff] }
 0xc6c   : > { %v12169_v5 = vpop.permute.xlu1 %5413  ;;  %v4478_v45 = vmul.f32 %v14420_v29, %v14419_v47  ;;  %v14422_v52 = vld [vmem:[#allocation197_spill] sm:$0xff] }
 0xc6d   : > { %v5189_v60 = vadd.f32 %v5181_v1, %v5125_v3  ;;  %v3975_v59 = vadd.f32 %v3967_v11, %v3911_v27  ;;  %v4031_v58 = vmul.f32 %v14422_v52, %v14421_v41  ;;  %v14424_v3 = vld [vmem:[#allocation285_spill] sm:$0xff]  ;;  %v14430_v52 = vld [vmem:[#allocation100_spill] sm:$0xff] }
 0xc6e   : > { %5458 = vrot.lane.b32.xlu1 %v10616_v46, %s14240_s22  ;;  %v4542_v1 = vmul.f32 %v14424_v3, %v14423_v62  ;;  %v14431_v62 = vld [vmem:[#allocation319_spill] sm:$0xff] }
 0xc6f   : > { %v5253_v12 = vadd.f32 %v5245_v37, %v5189_v60  ;;  %v4039_v27 = vadd.f32 %v4031_v58, %v3975_v59  ;;  %v5437_v37 = vmul.f32 %v12087_v33, %v11973_v25  ;;  %v14427_v60 = vld [vmem:[#allocation308_spill] sm:$0xff]  ;;  %v14433_v33 = vld [vmem:[#allocation227_spill] sm:$0xff] }
 0xc70   : > { %v14434_v58 = vld [vmem:[#allocation203_spill] sm:$0xff] }
 0xc71   : > { %v12188_v28 = vpop.permute.xlu1 %5533  ;;  %v5317_v63 = vadd.f32 %v5309_v26, %v5253_v12  ;;  %v5333_v26 = vpop.permute.xlu0 %5332  ;;  %v4159_v3 = vmul.f32 %v14434_v58, %v14433_v33 }
 0xc72   : > { %5582 = vrot.lane.b32.xlu1 %v10669_v4, %s14266_s29  ;;  %v14418_v4 = vld [vmem:[#allocation217_spill] sm:$0xff] }
 0xc73   : > { %v4414_v39 = vmul.f32 %v14418_v4, %v14417_v32  ;;  %v14425_v32 = vld [vmem:[#allocation284_spill] sm:$0xff]  ;;  %v14426_v4 = vld [vmem:[#allocation302_spill] sm:$0xff] }
 0xc74   : > { %v4606_v47 = vmul.f32 %v14426_v4, %v14425_v32  ;;  %v14437_v4 = vld [vmem:[#allocation348_spill] sm:$0xff] }
 0xc75   : > { %v12196_v15 = vpop.permute.xlu1 %5537  ;;  %v4422_v57 = vadd.f32 %v4414_v39, %v4358_v16  ;;  %v14428_v39 = vld [vmem:[#allocation316_spill] sm:$0xff] }
 0xc76   : > { %5497 = vperm.xlu1 %6410, %v11938_v42   ;;  %v4670_v29 = vmul.f32 %v14428_v39, %v14427_v60  ;;  %v14439_v39 = vld [vmem:[#allocation361_spill] sm:$0xff] }
 0xc77   : > { %v4486_v2 = vadd.f32 %v4478_v45, %v4422_v57 }
 0xc79   : > { %v5327_v34 = vpop.permute.xlu1 %5326  ;;  %v4550_v11 = vadd.f32 %v4542_v1, %v4486_v2 }
 0xc7a   : > { %v5373_v53 = vmul.f32 %v12058_v7, %v5327_v34  ;;  %6411 = vset.pattern.permute.xlu1 %v14272_v50  ;;  %v14429_v7 = vld [vmem:[#allocation229_spill] sm:$0xff] }
 0xc7b   : > { %5613 = vperm.xlu1 %6411, %v11853_v44   ;;  %v4095_v45 = vmul.f32 %v14430_v52, %v14429_v7  ;;  %v4614_v57 = vadd.f32 %v4606_v47, %v4550_v11  ;;  %v14432_v44 = vld [vmem:[#allocation334_spill] sm:$0xff]  ;;  %v14435_v34 = vld [vmem:[#allocation325_spill] sm:$0xff]  ;;  %v14438_v47 = vld [vmem:[#allocation359_spill] sm:$0xff] }
 0xc7c   : > { %v5381_v16 = vadd.f32 %v5373_v53, %v5317_v63  ;;  %v4734_v59 = vmul.f32 %v14432_v44, %v14431_v62  ;;  %v14436_v63 = vld [vmem:[#allocation345_spill] sm:$0xff]  ;;  %v14440_v7 = vld [vmem:[#allocation363_spill] sm:$0xff] }
 0xc7d   : > { %v12221_v41 = vpop.permute.xlu1 %5241  ;;  %v4103_v25 = vadd.f32 %v4095_v45, %v4039_v27  ;;  %v4678_v1 = vadd.f32 %v4670_v29, %v4614_v57  ;;  %v4798_v53 = vmul.f32 %v14436_v63, %v14435_v34  ;;  %v4926_v52 = vmul.f32 %v14440_v7, %v14439_v39  ;;  %v14441_v29 = vld [vmem:[#allocation32_spill] sm:$0xff]  ;;  %v14443_v44 = vld [vmem:[#allocation147_spill] sm:$0xff]  ;;  %v14447_v34 = vld [vmem:[#allocation105_spill] sm:$0xff] }
 0xc7e   : > { %v12225_v12 = vadd.f32 %v5437_v37, %v5381_v16  ;;  %v4862_v37 = vmul.f32 %v14438_v47, %v14437_v4  ;;  %v5457_v16 = vpop.permute.xlu0 %5456  ;;  %v14442_v45 = vld [vmem:[#allocation240_spill] sm:$0xff]  ;;  %v3664_v63 = vmul.f32 %v14447_v34, %v10867_v38 }
 0xc7f   : > { %5272 = vrot.lane.b32.xlu1 %v14296_v30, %s14211_s28  ;;  %v4742_v32 = vadd.f32 %v4734_v59, %v4678_v1  ;;  %v4167_v27 = vadd.f32 %v4159_v3, %v4103_v25  ;;  %v4223_v57 = vmul.f32 %v14442_v45, %v14441_v29  ;;  %v14444_v59 = vld [vmem:[#allocation142_spill] sm:$0xff]  ;;  %v14445_v25 = vld [vmem:[#allocation228_spill] sm:$0xff]  ;;  %v14446_v3 = vld [vmem:[#allocation211_spill] sm:$0xff] }
 0xc80   : > { %6413 = vset.pattern.permute.xlu1 %v14270_v21  ;;  %v4990_v33 = vmul.f32 %v14444_v59, %v14443_v44  ;;  %v4287_v1 = vmul.f32 %v14446_v3, %v14445_v25  ;;  %v14452_v7 = vld [vmem:[#allocation152_spill] sm:$0xff]  ;;  %v14456_v25 = vld [vmem:[#allocation45_spill] sm:$0xff] }
 0xc81   : > { %v4806_v60 = vadd.f32 %v4798_v53, %v4742_v32  ;;  %v4231_v58 = vadd.f32 %v4223_v57, %v4167_v27  ;;  %v14449_v32 = vld [vmem:[#allocation89_spill] sm:$0xff]  ;;  %v5118_v27 = vmul.f32 %v11809_v54, %v14452_v7  ;;  %v14454_v57 = vld [vmem:[#allocation119_spill] sm:$0xff]  ;;  %v14463_v7 = vld [vmem:[#allocation262_spill] sm:$0xff] }
 0xc82   : > { %v5358_v2 = vpop.permute.xlu1 %5357  ;;  %v12257_v47 = vpop.permute.xlu0 %5580  ;;  %v14458_v54 = vld [vmem:[#allocation257_spill] sm:$0xff] }
 0xc83   : > { %v5376_v11 = vmul.f32 %v5358_v2, %v5333_v26  ;;  %5274 = vrot.lane.b32.xlu1 %v10806_v40, %s14211_s28  ;;  %v4870_v62 = vadd.f32 %v4862_v37, %v4806_v60  ;;  %v14448_v2 = vld [vmem:[#allocation149_spill] sm:$0xff]  ;;  %v14450_v37 = vld [vmem:[#allocation91_spill] sm:$0xff]  ;;  %v4295_v45 = vadd.f32 %v4287_v1, %v4231_v58  ;;  %v14460_v1 = vld [vmem:[#allocation246_spill] sm:$0xff] }
 0xc84   : > { %v5054_v4 = vmul.f32 %v14449_v32, %v14448_v2 }
 0xc85   : > { %v12243_v21 = vadd.f32 %v5376_v11, %v12091_v56  ;;  %v4934_v53 = vadd.f32 %v4926_v52, %v4870_v62  ;;  %v14451_v11 = vld [vmem:[#allocation185_spill] sm:$0xff]  ;;  %v14455_v62 = vld [vmem:[#allocation194_spill] sm:$0xff] }
 0xc86   : > { %v3777_v60 = vmul.f32 %v14451_v11, %v14450_v37  ;;  %v3841_v44 = vmul.f32 %v14455_v62, %v14454_v57  ;;  %v12276_v32 = vpop.permute.xlu0 %5493 }
 0xc87   : > { %5398 = vrot.lane.b32.xlu1 %v10867_v38, %s14226_s14  ;;  %v5478_v26 = vpop.permute.xlu1 %5477  ;;  %v4998_v39 = vadd.f32 %v4990_v33, %v4934_v53  ;;  %v14457_v33 = vld [vmem:[#allocation215_spill] sm:$0xff] }
 0xc88   : > { %v5502_v56 = vmul.f32 %v5478_v26, %v5457_v16  ;;  %v14453_v16 = vld [vmem:[#allocation183_spill] sm:$0xff]  ;;  %v5182_v26 = vmul.f32 %v11912_v43, %v11856_v17  ;;  %v4351_v3 = vmul.f32 %v14457_v33, %v14456_v25 }
 0xc89   : > { %v3721_v52 = vadd.f32 %v14453_v16, %v3664_v63  ;;  %v5062_v59 = vadd.f32 %v5054_v4, %v4998_v39  ;;  %v14459_v53 = vld [vmem:[#allocation191_spill] sm:$0xff]  ;;  %v14461_v63 = vld [vmem:[#allocation20_spill] sm:$0xff]  ;;  %v14462_v39 = vld [vmem:[#allocation42_spill] sm:$0xff] }
 0xc8a   : > { %v3905_v2 = vmul.f32 %v14459_v53, %v14458_v54  ;;  %v4359_v58 = vadd.f32 %v4351_v3, %v4295_v45  ;;  %v4415_v37 = vmul.f32 %v14461_v63, %v14460_v1  ;;  %v14464_v16 = vld [vmem:[#allocation107_spill] sm:$0xff]  ;;  %v14467_v45 = vld [vmem:[#allocation286_spill] sm:$0xff]  ;;  %v5374_v1 = vmul.f32 %v12113_v23, %v12045_v18 }
 0xc8b   : > { %5522 = vrot.lane.b32.xlu1 %v10616_v46, %s14253_s16  ;;  %v12265_v29 = vpop.permute.xlu1 %5481  ;;  %v3785_v34 = vadd.f32 %v3777_v60, %v3721_v52  ;;  %v5126_v46 = vadd.f32 %v5118_v27, %v5062_v59  ;;  %v4479_v60 = vmul.f32 %v14463_v7, %v14462_v39  ;;  %v14465_v52 = vld [vmem:[#allocation199_spill] sm:$0xff]  ;;  %v14468_v3 = vld [vmem:[#allocation258_spill] sm:$0xff]  ;;  %v5500_v23 = vmul.f32 %v12124_v8, %v12054_v31  ;;  %v14480_v8 = vld [vmem:[#allocation73_spill] sm:$0xff] }
 0xc8c   : > { %v4423_v27 = vadd.f32 %v4415_v37, %v4359_v58  ;;  %v3969_v57 = vmul.f32 %v14465_v52, %v14464_v16  ;;  %v14475_v16 = vld [vmem:[#allocation326_spill] sm:$0xff] }
 0xc8d   : > { %v3849_v4 = vadd.f32 %v3841_v44, %v3785_v34  ;;  %v5190_v17 = vadd.f32 %v5182_v26, %v5126_v46  ;;  %v12292_v44 = vpop.permute.xlu0 %5541  ;;  %v14469_v34 = vld [vmem:[#allocation66_spill] sm:$0xff] }
 0xc8e   : > { %v4033_v54 = vmul.f32 %v14469_v34, %v14468_v3  ;;  %v4487_v53 = vadd.f32 %v4479_v60, %v4423_v27  ;;  %v14471_v46 = vld [vmem:[#allocation298_spill] sm:$0xff]  ;;  %v14474_v27 = vld [vmem:[#allocation311_spill] sm:$0xff]  ;;  %v14482_v34 = vld [vmem:[#allocation204_spill] sm:$0xff] }
 0xc8f   : > { %5561 = vperm.xlu1 %6413, %v11938_v42   ;;  %v3913_v43 = vadd.f32 %v3905_v2, %v3849_v4  ;;  %v14466_v42 = vld [vmem:[#allocation276_spill] sm:$0xff]  ;;  %v5254_v26 = vadd.f32 %v11858_v35, %v5190_v17  ;;  %v14470_v2 = vld [vmem:[#allocation290_spill] sm:$0xff]  ;;  %v14472_v35 = vld [vmem:[#allocation293_spill] sm:$0xff]  ;;  %v5438_v17 = vmul.f32 %v12169_v5, %v12147_v6  ;;  %v4735_v18 = vmul.f32 %v14475_v16, %v14474_v27 }
 0xc90   : > { %v12281_v11 = vpop.permute.xlu1 %5601  ;;  %v4543_v62 = vmul.f32 %v14467_v45, %v14466_v42  ;;  %v4607_v58 = vmul.f32 %v14471_v46, %v14470_v2  ;;  %v14473_v4 = vld [vmem:[#allocation318_spill] sm:$0xff]  ;;  %v14476_v6 = vld [vmem:[#allocation132_spill] sm:$0xff]  ;;  %v14477_v5 = vld [vmem:[#allocation15_spill] sm:$0xff] }
 0xc91   : > { %v3977_v33 = vadd.f32 %v3969_v57, %v3913_v43  ;;  %v4097_v42 = vmul.f32 %v14477_v5, %v14476_v6  ;;  %v14481_v3 = vld [vmem:[#allocation259_spill] sm:$0xff]  ;;  %v14484_v2 = vld [vmem:[#allocation209_spill] sm:$0xff]  ;;  %v14494_v5 = vld [vmem:[#allocation124_spill] sm:$0xff] }
 0xc93   : > { %5336 = vrot.lane.b32.xlu1 %v14296_v30, %s14214_s26  ;;  %v4041_v7 = vadd.f32 %v4033_v54, %v3977_v33  ;;  %v3665_v33 = vmul.f32 %v14480_v8, %v14296_v30 }
 0xc94   : > { %v5265_v59 = vpop.permute.xlu1 %5264  ;;  %6414 = vset.pattern.permute.xlu1 %v14272_v50  ;;  %v4551_v50 = vadd.f32 %v4543_v62, %v4487_v53  ;;  %v14478_v62 = vld [vmem:[#allocation333_spill] sm:$0xff] }
 0xc95   : > { %v5310_v25 = vmul.f32 %v12070_v0, %v5265_v59  ;;  %v4671_v0 = vmul.f32 %v14473_v4, %v14472_v35  ;;  %v14479_v59 = vld [vmem:[#allocation347_spill] sm:$0xff]  ;;  %v14483_v53 = vld [vmem:[#allocation337_spill] sm:$0xff] }
 0xc96   : > { %v4615_v60 = vadd.f32 %v4607_v58, %v4551_v50  ;;  %v4863_v46 = vmul.f32 %v14484_v2, %v14483_v53  ;;  %v14485_v58 = vld [vmem:[#allocation234_spill] sm:$0xff]  ;;  %v14500_v53 = vld [vmem:[#allocation92_spill] sm:$0xff] }
 0xc97   : > { %v5318_v63 = vadd.f32 %v5310_v25, %v5254_v26  ;;  %5460 = vrot.lane.b32.xlu1 %v10761_v24, %s14240_s22  ;;  %v12313_v24 = vpop.permute.xlu0 %5553  ;;  %v4799_v26 = vmul.f32 %v14479_v59, %v14478_v62  ;;  %v14496_v59 = vld [vmem:[#allocation55_spill] sm:$0xff] }
 0xc98   : > { %v5389_v37 = vpop.permute.xlu1 %5388  ;;  %v4679_v45 = vadd.f32 %v4671_v0, %v4615_v60 }
 0xc99   : > { %v5382_v43 = vadd.f32 %v5374_v1, %v5318_v63  ;;  %v5436_v39 = vmul.f32 %v12080_v61, %v5389_v37  ;;  %v14486_v1 = vld [vmem:[#allocation25_spill] sm:$0xff] }
 0xc9a   : > { %v4743_v54 = vadd.f32 %v4735_v18, %v4679_v45  ;;  %v3778_v63 = vmul.f32 %v14486_v1, %v14485_v58  ;;  %v14487_v37 = vld [vmem:[#allocation41_spill] sm:$0xff] }
 0xc9b   : > { %v5446_v52 = vadd.f32 %v5438_v17, %v5382_v43  ;;  %v5444_v57 = vadd.f32 %v5436_v39, %v12033_v36  ;;  %5584 = vrot.lane.b32.xlu1 %v10522_v55, %s14266_s29  ;;  %v4105_v36 = vadd.f32 %v4097_v42, %v4041_v7  ;;  %v4161_v55 = vmul.f32 %v14482_v34, %v14481_v3  ;;  %v5397_v4 = vpop.permute.xlu0 %5396  ;;  %v14489_v17 = vld [vmem:[#allocation188_spill] sm:$0xff]  ;;  %v14490_v39 = vld [vmem:[#allocation235_spill] sm:$0xff]  ;;  %v14498_v34 = vld [vmem:[#allocation261_spill] sm:$0xff] }
 0xc9c   : > { %v12320_v61 = vpop.permute.xlu1 %5301  ;;  %v4807_v50 = vadd.f32 %v4799_v26, %v4743_v54  ;;  %v3722_v43 = vadd.f32 %v14489_v17, %v3665_v33  ;;  %v14491_v7 = vld [vmem:[#allocation123_spill] sm:$0xff]  ;;  %v14497_v26 = vld [vmem:[#allocation164_spill] sm:$0xff] }
 0xc9d   : > { %v12324_v25 = vadd.f32 %v5500_v23, %v5444_v57  ;;  %v12326_v31 = vadd.f32 %v5502_v56, %v5446_v52  ;;  %v14488_v56 = vld [vmem:[#allocation141_spill] sm:$0xff]  ;;  %v3842_v60 = vmul.f32 %v14491_v7, %v14490_v39  ;;  %v4169_v16 = vadd.f32 %v4161_v55, %v4105_v36  ;;  %v14492_v23 = vld [vmem:[#allocation148_spill] sm:$0xff]  ;;  %v14495_v42 = vld [vmem:[#allocation7_spill] sm:$0xff] }
 0xc9e   : > { %v4927_v35 = vmul.f32 %v14488_v56, %v14487_v37  ;;  %v4871_v18 = vadd.f32 %v4863_v46, %v4807_v50  ;;  %v14493_v52 = vld [vmem:[#allocation437_spill] sm:$0xff]  ;;  %v3786_v57 = vadd.f32 %v3778_v63, %v3722_v43  ;;  %v4225_v45 = vmul.f32 %v14495_v42, %v14494_v5  ;;  %v14499_v55 = vld [vmem:[#allocation212_spill] sm:$0xff]  ;;  %v14507_v7 = vld [vmem:[#allocation267_spill] sm:$0xff] }
 0xc9f   : > { %5621 = vperm.xlu1 %6414, %v11842_v22   ;;  %v4991_v22 = vmul.f32 %v14493_v52, %v14492_v23  ;;  %v5055_v8 = vmul.f32 %v14497_v26, %v14496_v59  ;;  %v14503_v46 = vld [vmem:[#allocation77_spill] sm:$0xff]  ;;  %v14505_v56 = vld [vmem:[#allocation236_spill] sm:$0xff]  ;;  %v5247_v39 = vmul.f32 %v12043_v20, %v11986_v14  ;;  %v14512_v14 = vld [vmem:[#allocation202_spill] sm:$0xff] }
 0xca0   : > { %v4935_v62 = vadd.f32 %v4927_v35, %v4871_v18  ;;  %v3850_v36 = vadd.f32 %v3842_v60, %v3786_v57  ;;  %v4233_v3 = vadd.f32 %v4225_v45, %v4169_v16  ;;  %v14504_v63 = vld [vmem:[#allocation153_spill] sm:$0xff]  ;;  %v14506_v35 = vld [vmem:[#allocation195_spill] sm:$0xff]  ;;  %v14508_v60 = vld [vmem:[#allocation216_spill] sm:$0xff] }
 0xca1   : > { %v5422_v0 = vpop.permute.xlu1 %5421  ;;  %v5183_v50 = vmul.f32 %v11929_v49, %v14504_v63  ;;  %v14509_v52 = vld [vmem:[#allocation260_spill] sm:$0xff] }
 0xca2   : > { %v5440_v27 = vmul.f32 %v5422_v0, %v5397_v4  ;;  %v4999_v54 = vadd.f32 %v4991_v22, %v4935_v62  ;;  %v3970_v4 = vmul.f32 %v14506_v35, %v14505_v56  ;;  %v14510_v22 = vld [vmem:[#allocation31_spill] sm:$0xff]  ;;  %v14511_v42 = vld [vmem:[#allocation108_spill] sm:$0xff]  ;;  %v14514_v62 = vld [vmem:[#allocation266_spill] sm:$0xff] }
 0xca3   : > { %5400 = vrot.lane.b32.xlu1 %v14296_v30, %s14226_s14  ;;  %v4289_v30 = vmul.f32 %v14499_v55, %v14498_v34  ;;  %v4417_v57 = vmul.f32 %v14510_v22, %v14509_v52  ;;  %v4034_v20 = vmul.f32 %v14512_v14, %v14511_v42  ;;  %v14513_v45 = vld [vmem:[#allocation264_spill] sm:$0xff]  ;;  %v14521_v35 = vld [vmem:[#allocation295_spill] sm:$0xff] }
 0xca4   : > { %v12347_v6 = vadd.f32 %v5440_v27, %v12243_v21  ;;  %6416 = vset.pattern.permute.xlu1 %v14293_v10  ;;  %v14501_v21 = vld [vmem:[#allocation12_spill] sm:$0xff]  ;;  %v14502_v10 = vld [vmem:[#allocation59_spill] sm:$0xff]  ;;  %v5063_v1 = vadd.f32 %v5055_v8, %v4999_v54  ;;  %v4353_v27 = vmul.f32 %v14508_v60, %v14507_v7  ;;  %v4481_v59 = vmul.f32 %v14514_v62, %v14513_v45  ;;  %v14515_v8 = vld [vmem:[#allocation237_spill] sm:$0xff] }
 0xca5   : > { %v12354_v33 = vpop.permute.xlu1 %5425  ;;  %v5119_v2 = vmul.f32 %v14501_v21, %v14500_v53  ;;  %v3906_v58 = vmul.f32 %v14503_v46, %v14502_v10  ;;  %v4297_v17 = vadd.f32 %v4289_v30, %v4233_v3  ;;  %v14517_v30 = vld [vmem:[#allocation274_spill] sm:$0xff]  ;;  %v14518_v54 = vld [vmem:[#allocation287_spill] sm:$0xff]  ;;  %v14519_v46 = vld [vmem:[#allocation292_spill] sm:$0xff] }
 0xca6   : > { %v4545_v53 = vmul.f32 %v14518_v54, %v14517_v30  ;;  %v14526_v7 = vld [vmem:[#allocation137_spill] sm:$0xff]  ;;  %v14532_v45 = vld [vmem:[#allocation354_spill] sm:$0xff] }
 0xca7   : > { %5402 = vrot.lane.b32.xlu1 %v10806_v40, %s14226_s14  ;;  %v3914_v37 = vadd.f32 %v3906_v58, %v3850_v36  ;;  %v5127_v43 = vadd.f32 %v5119_v2, %v5063_v1  ;;  %v4361_v23 = vadd.f32 %v4353_v27, %v4297_v17  ;;  %v14516_v36 = vld [vmem:[#allocation88_spill] sm:$0xff]  ;;  %v14520_v58 = vld [vmem:[#allocation294_spill] sm:$0xff]  ;;  %v14536_v54 = vld [vmem:[#allocation121_spill] sm:$0xff] }
 0xca8   : > { %v4098_v3 = vmul.f32 %v14516_v36, %v14515_v8  ;;  %v4609_v1 = vmul.f32 %v14520_v58, %v14519_v46 }
 0xca9   : > { %v5191_v16 = vadd.f32 %v5183_v50, %v5127_v43  ;;  %v3978_v18 = vadd.f32 %v3970_v4, %v3914_v37  ;;  %v4425_v55 = vadd.f32 %v4417_v57, %v4361_v23  ;;  %v14522_v4 = vld [vmem:[#allocation312_spill] sm:$0xff] }
 0xcaa   : > { %v12368_v0 = vpop.permute.xlu1 %5545  ;;  %v4673_v17 = vmul.f32 %v14522_v4, %v14521_v35  ;;  %v14529_v57 = vld [vmem:[#allocation336_spill] sm:$0xff]  ;;  %v14542_v4 = vld [vmem:[#allocation54_spill] sm:$0xff] }
 0xcab   : > { %5526 = vrot.lane.b32.xlu1 %v10867_v38, %s14253_s16  ;;  %v5255_v5 = vadd.f32 %v5247_v39, %v5191_v16  ;;  %v4042_v26 = vadd.f32 %v4034_v20, %v3978_v18  ;;  %v4489_v10 = vadd.f32 %v4481_v59, %v4425_v55  ;;  %v14525_v39 = vld [vmem:[#allocation3_spill] sm:$0xff]  ;;  %v14527_v16 = vld [vmem:[#allocation248_spill] sm:$0xff]  ;;  %v14528_v18 = vld [vmem:[#allocation61_spill] sm:$0xff] }
 0xcac   : > { %v4737_v60 = vmul.f32 %v14526_v7, %v14525_v39  ;;  %v4226_v23 = vmul.f32 %v14528_v18, %v14527_v16  ;;  %v14531_v20 = vld [vmem:[#allocation339_spill] sm:$0xff] }
 0xcad   : > { %v5319_v21 = vadd.f32 %v11963_v51, %v5255_v5  ;;  %v4106_v50 = vadd.f32 %v4098_v3, %v4042_v26  ;;  %v4553_v56 = vadd.f32 %v4545_v53, %v4489_v10  ;;  %v14523_v51 = vld [vmem:[#allocation74_spill] sm:$0xff]  ;;  %v14530_v5 = vld [vmem:[#allocation349_spill] sm:$0xff]  ;;  %v4865_v62 = vmul.f32 %v14532_v45, %v14531_v20  ;;  %v14534_v3 = vld [vmem:[#allocation351_spill] sm:$0xff] }
 0xcae   : > { %v12376_v49 = vpop.permute.xlu1 %5206  ;;  %v4801_v42 = vmul.f32 %v14530_v5, %v14529_v57  ;;  %v14533_v26 = vld [vmem:[#allocation21_spill] sm:$0xff]  ;;  %v14537_v53 = vld [vmem:[#allocation99_spill] sm:$0xff]  ;;  %v14550_v57 = vld [vmem:[#allocation192_spill] sm:$0xff] }
 0xcaf   : > { %5466 = vrot.lane.b32.xlu1 %v10806_v40, %s14240_s22  ;;  %v3666_v8 = vmul.f32 %v14533_v26, %v10806_v40  ;;  %v14539_v10 = vld [vmem:[#allocation109_spill] sm:$0xff] }
 0xcb0   : > { %v14552_v20 = vld [vmem:[#allocation441_spill] sm:$0xff] }
 0xcb2   : > { %v5331_v34 = vpop.permute.xlu1 %5330 }
 0xcb3   : > { %v5375_v2 = vmul.f32 %v12016_v9, %v5331_v34  ;;  %5590 = vrot.lane.b32.xlu1 %v10867_v38, %s14266_s29  ;;  %v14524_v9 = vld [vmem:[#allocation210_spill] sm:$0xff]  ;;  %v4617_v38 = vadd.f32 %v4609_v1, %v4553_v56 }
 0xcb4   : > { %v4162_v43 = vmul.f32 %v14524_v9, %v14523_v51  ;;  %v14535_v34 = vld [vmem:[#allocation162_spill] sm:$0xff]  ;;  %v14544_v51 = vld [vmem:[#allocation97_spill] sm:$0xff] }
 0xcb5   : > { %v12396_v63 = vadd.f32 %v5375_v2, %v5319_v21  ;;  %v4681_v22 = vadd.f32 %v4673_v17, %v4617_v38  ;;  %v4929_v55 = vmul.f32 %v14535_v34, %v14534_v3  ;;  %v4290_v21 = vmul.f32 %v14537_v53, %v14536_v54  ;;  %v14538_v2 = vld [vmem:[#allocation241_spill] sm:$0xff]  ;;  %v14540_v1 = vld [vmem:[#allocation434_spill] sm:$0xff]  ;;  %v14543_v17 = vld [vmem:[#allocation51_spill] sm:$0xff] }
 0xcb6   : > { %v12398_v37 = vpop.permute.xlu1 %5454  ;;  %v4170_v27 = vadd.f32 %v4162_v43, %v4106_v50  ;;  %v3779_v46 = vmul.f32 %v14539_v10, %v14538_v2  ;;  %v14541_v50 = vld [vmem:[#allocation362_spill] sm:$0xff]  ;;  %v3723_v9 = vadd.f32 %v14544_v51, %v3666_v8  ;;  %v14545_v43 = vld [vmem:[#allocation243_spill] sm:$0xff]  ;;  %v14554_v3 = vld [vmem:[#allocation84_spill] sm:$0xff] }
 0xcb7   : > { %5530 = vrot.lane.b32.xlu1 %v10806_v40, %s14253_s16  ;;  %v4745_v14 = vadd.f32 %v4737_v60, %v4681_v22  ;;  %v4993_v56 = vmul.f32 %v14541_v50, %v14540_v1  ;;  %v14546_v38 = vld [vmem:[#allocation63_spill] sm:$0xff]  ;;  %v14549_v22 = vld [vmem:[#allocation94_spill] sm:$0xff]  ;;  %v14555_v34 = vld [vmem:[#allocation9_spill] sm:$0xff] }
 0xcb8   : > { %v4234_v59 = vadd.f32 %v4226_v23, %v4170_v27  ;;  %v3843_v39 = vmul.f32 %v14546_v38, %v14545_v43  ;;  %v14547_v60 = vld [vmem:[#allocation67_spill] sm:$0xff]  ;;  %v3787_v23 = vadd.f32 %v3779_v46, %v3723_v9  ;;  %v3907_v5 = vmul.f32 %v14550_v57, %v14549_v22  ;;  %v14553_v8 = vld [vmem:[#allocation438_spill] sm:$0xff]  ;;  %v14563_v43 = vld [vmem:[#allocation281_spill] sm:$0xff] }
 0xcb9   : > { %v4809_v36 = vadd.f32 %v4801_v42, %v4745_v14  ;;  %v14548_v27 = vld [vmem:[#allocation375_spill] sm:$0xff]  ;;  %v14556_v54 = vld [vmem:[#allocation238_spill] sm:$0xff]  ;;  %v14564_v38 = vld [vmem:[#allocation304_spill] sm:$0xff] }
 0xcba   : > { %v12410_v52 = vpop.permute.xlu1 %5369  ;;  %v4298_v35 = vadd.f32 %v4290_v21, %v4234_v59  ;;  %v5057_v16 = vmul.f32 %v14548_v27, %v14547_v60  ;;  %v14551_v14 = vld [vmem:[#allocation379_spill] sm:$0xff]  ;;  %v3851_v59 = vadd.f32 %v3843_v39, %v3787_v23  ;;  %v4610_v39 = vmul.f32 %v14564_v38, %v14563_v43  ;;  %v14567_v57 = vld [vmem:[#allocation390_spill] sm:$0xff]  ;;  %v14580_v43 = vld [vmem:[#allocation205_spill] sm:$0xff] }
 0xcbb   : > { %5594 = vrot.lane.b32.xlu1 %v10806_v40, %s14266_s29  ;;  %v4873_v58 = vadd.f32 %v4865_v62, %v4809_v36  ;;  %v4354_v40 = vmul.f32 %v14543_v17, %v14542_v4  ;;  %v5121_v45 = vmul.f32 %v14552_v20, %v14551_v14  ;;  %v5185_v36 = vmul.f32 %v11943_v48, %v14553_v8  ;;  %v14557_v53 = vld [vmem:[#allocation271_spill] sm:$0xff] }
 0xcbc   : > { %v4482_v21 = vmul.f32 %v14557_v53, %v14556_v54  ;;  %v3915_v10 = vadd.f32 %v3907_v5, %v3851_v59  ;;  %v14561_v17 = vld [vmem:[#allocation251_spill] sm:$0xff]  ;;  %v14570_v59 = vld [vmem:[#allocation322_spill] sm:$0xff] }
 0xcbd   : > { %v4937_v7 = vadd.f32 %v4929_v55, %v4873_v58  ;;  %v4362_v62 = vadd.f32 %v4354_v40, %v4298_v35  ;;  %v4418_v55 = vmul.f32 %v14555_v34, %v14554_v3  ;;  %v14558_v58 = vld [vmem:[#allocation57_spill] sm:$0xff]  ;;  %v14560_v35 = vld [vmem:[#allocation282_spill] sm:$0xff]  ;;  %v14562_v40 = vld [vmem:[#allocation200_spill] sm:$0xff] }
 0xcbe   : > { %v5249_v1 = vmul.f32 %v14558_v58, %v12376_v49  ;;  %v3971_v48 = vmul.f32 %v14562_v40, %v14561_v17  ;;  %v14565_v27 = vld [vmem:[#allocation83_spill] sm:$0xff]  ;;  %v14572_v34 = vld [vmem:[#allocation440_spill] sm:$0xff]  ;;  %v14576_v58 = vld [vmem:[#allocation118_spill] sm:$0xff] }
 0xcbf   : > { %v12422_v30 = vpop.permute.xlu1 %5485  ;;  %v5001_v42 = vadd.f32 %v4993_v56, %v4937_v7  ;;  %v4426_v50 = vadd.f32 %v4418_v55, %v4362_v62  ;;  %v14559_v56 = vld [vmem:[#allocation273_spill] sm:$0xff]  ;;  %v14569_v14 = vld [vmem:[#allocation315_spill] sm:$0xff]  ;;  %v14578_v17 = vld [vmem:[#allocation140_spill] sm:$0xff] }
 0xcc0   : > { %v4546_v4 = vmul.f32 %v14560_v35, %v14559_v56  ;;  %v3979_v60 = vadd.f32 %v3971_v48, %v3915_v10  ;;  %v14573_v53 = vld [vmem:[#allocation343_spill] sm:$0xff] }
 0xcc1   : > { %v5065_v26 = vadd.f32 %v5057_v16, %v5001_v42  ;;  %v4490_v9 = vadd.f32 %v4482_v21, %v4426_v50  ;;  %v14566_v16 = vld [vmem:[#allocation101_spill] sm:$0xff]  ;;  %v14574_v21 = vld [vmem:[#allocation335_spill] sm:$0xff]  ;;  %v12473_v50 = vpop.permute.xlu0 %5520 }
 0xcc2   : > { %v4035_v23 = vmul.f32 %v14566_v16, %v14565_v27  ;;  %v14568_v42 = vld [vmem:[#allocation305_spill] sm:$0xff]  ;;  %v4802_v10 = vmul.f32 %v14574_v21, %v14573_v53  ;;  %v14591_v21 = vld [vmem:[#allocation255_spill] sm:$0xff] }
 0xcc3   : > { %v5129_v46 = vadd.f32 %v5121_v45, %v5065_v26  ;;  %v4554_v5 = vadd.f32 %v4546_v4, %v4490_v9  ;;  %v4674_v20 = vmul.f32 %v14569_v14, %v14568_v42  ;;  %v14571_v26 = vld [vmem:[#allocation330_spill] sm:$0xff]  ;;  %v14577_v4 = vld [vmem:[#allocation352_spill] sm:$0xff]  ;;  %v14585_v14 = vld [vmem:[#allocation357_spill] sm:$0xff] }
 0xcc4   : > { %v12437_v18 = vpop.permute.xlu1 %5605  ;;  %v4738_v8 = vmul.f32 %v14571_v26, %v14570_v59  ;;  %v4043_v3 = vadd.f32 %v4035_v23, %v3979_v60  ;;  %v4866_v40 = vmul.f32 %v14578_v17, %v14577_v4  ;;  %v14579_v9 = vld [vmem:[#allocation254_spill] sm:$0xff]  ;;  %v14583_v23 = vld [vmem:[#allocation368_spill] sm:$0xff]  ;;  %v14594_v4 = vld [vmem:[#allocation443_spill] sm:$0xff] }
 0xcc5   : > { %v5193_v51 = vadd.f32 %v5185_v36, %v5129_v46  ;;  %v4618_v62 = vadd.f32 %v4610_v39, %v4554_v5  ;;  %v14575_v46 = vld [vmem:[#allocation250_spill] sm:$0xff]  ;;  %v4163_v38 = vmul.f32 %v14580_v43, %v14579_v9  ;;  %v12488_v5 = vpop.permute.xlu0 %5557  ;;  %v14587_v59 = vld [vmem:[#allocation252_spill] sm:$0xff]  ;;  %v6024_v9 = vld [vmem:[%s12658_s10 + $0x28] sm:$0xff] }
 0xcc6   : > { %v14582_v60 = vld [vmem:[#allocation366_spill] sm:$0xff]  ;;  %v14588_v26 = vld [vmem:[#allocation24_spill] sm:$0xff]  ;;  %5806 = vperm.xlu1 %6416, %v6024_v9  }
 0xcc7   : > { %v5257_v22 = vadd.f32 %v5249_v1, %v5193_v51  ;;  %v4682_v54 = vadd.f32 %v4674_v20, %v4618_v62  ;;  %v4099_v1 = vmul.f32 %v14576_v58, %v14575_v46  ;;  %v14586_v20 = vld [vmem:[#allocation353_spill] sm:$0xff]  ;;  %v6023_v43 = vld [vmem:[%s12658_s10 + $0x20] sm:$0xff] }
 0xcc8   : > { %v12449_v2 = vpop.permute.xlu1 %5609  ;;  %v5058_v62 = vmul.f32 %v14586_v20, %v14585_v14  ;;  %5801 = vperm.xlu0 %6415, %v6023_v43   ;;  %v14598_v14 = vld [vmem:[#allocation112_spill] sm:$0xff]  ;;  %v14608_v43 = vld [vmem:[#allocation367_spill] sm:$0xff] }
 0xcc9   : > { %v4746_v35 = vadd.f32 %v4738_v8, %v4682_v54  ;;  %v4107_v51 = vadd.f32 %v4099_v1, %v4043_v3  ;;  %v4227_v8 = vmul.f32 %v14588_v26, %v14587_v59  ;;  %v14599_v26 = vld [vmem:[#allocation256_spill] sm:$0xff] }
 0xccb   : > { %v4810_v39 = vadd.f32 %v4802_v10, %v4746_v35  ;;  %v14592_v10 = vld [vmem:[#allocation213_spill] sm:$0xff]  ;;  %v14593_v35 = vld [vmem:[#allocation380_spill] sm:$0xff] }
 0xccc   : > { %v5271_v7 = vpop.permute.xlu1 %5270  ;;  %v4291_v46 = vmul.f32 %v14592_v10, %v14591_v21  ;;  %v5186_v17 = vmul.f32 %v14594_v4, %v14593_v35  ;;  %v14603_v21 = vld [vmem:[#allocation283_spill] sm:$0xff]  ;;  %v14604_v10 = vld [vmem:[#allocation288_spill] sm:$0xff]  ;;  %v14605_v35 = vld [vmem:[#allocation154_spill] sm:$0xff] }
 0xccd   : > { %v5313_v49 = vmul.f32 %v14567_v57, %v5271_v7  ;;  %v14581_v7 = vld [vmem:[#allocation136_spill] sm:$0xff]  ;;  %v4874_v16 = vadd.f32 %v4866_v40, %v4810_v39  ;;  %v14595_v40 = vld [vmem:[#allocation23_spill] sm:$0xff] }
 0xcce   : > { %v4930_v27 = vmul.f32 %v14582_v60, %v14581_v7  ;;  %v6025_v60 = vld [vmem:[%s12658_s10 + $0x30] sm:$0xff] }
 0xccf   : > { %v12464_v45 = vadd.f32 %v5313_v49, %v5257_v22  ;;  %v14584_v22 = vld [vmem:[#allocation374_spill] sm:$0xff]  ;;  %5811 = vperm.xlu1 %6416, %v6025_v60  }
 0xcd0   : > { %v5395_v36 = vpop.permute.xlu1 %5394  ;;  %v4994_v57 = vmul.f32 %v14584_v22, %v14583_v23  ;;  %v4938_v42 = vadd.f32 %v4930_v27, %v4874_v16 }
 0xcd1   : > { %v5439_v55 = vmul.f32 %v14572_v34, %v5395_v36  ;;  %v6437_v36 = vld [vmem:[%s12657_s9 + $0x10] sm:$0xff]  }
 0xcd2   : > { %v5002_v3 = vadd.f32 %v4994_v57, %v4938_v42  ;;  %v14589_v34 = vld [vmem:[#allocation44_spill] sm:$0xff]  ;;  %6156 = vmatprep.mubr.msk.bf16.mxu1 %vm3065_vm4, %v6437_v36  ;;  %v14597_v42 = vld [vmem:[#allocation253_spill] sm:$0xff] }
 0xcd3   : > { %v12476_v56 = vadd.f32 %v5439_v55, %v12396_v63  ;;  %v4171_v63 = vadd.f32 %v4163_v38, %v4107_v51  ;;  %v14590_v55 = vld [vmem:[#allocation165_spill] sm:$0xff]  ;;  %v5564_v51 = vmul.f32 %v12188_v28, %v14595_v40  ;;  %v5598_v38 = vpop.permute.xlu0 %5597  ;;  %v14596_v57 = vld [vmem:[#allocation388_spill] sm:$0xff]  ;;  %v4355_v20 = vmul.f32 %v14598_v14, %v14597_v42  ;;  %v14606_v40 = vld [vmem:[#allocation299_spill] sm:$0xff] }
 0xcd4   : > { %v5519_v48 = vpop.permute.xlu1 %5518  ;;  %v5122_v54 = vmul.f32 %v14590_v55, %v14589_v34  ;;  %v5066_v1 = vadd.f32 %v5058_v62, %v5002_v3  ;;  %v6026_v28 = vld [vmem:[%s12658_s10 + $0x38] sm:$0xff]  ;;  %v5628_v22 = vmul.f32 %v5598_v38, %v12257_v47  ;;  %v14601_v34 = vld [vmem:[#allocation106_spill] sm:$0xff]  ;;  %v14602_v55 = vld [vmem:[#allocation263_spill] sm:$0xff]  ;;  %v5501_v38 = vmul.f32 %v14608_v43, %v12398_v37 }
 0xcd5   : > { %v4235_v53 = vadd.f32 %v4227_v8, %v4171_v63  ;;  %v5572_v7 = vadd.f32 %v5564_v51, %v12324_v25  ;;  %5816 = vperm.xlu0 %6415, %v6026_v28   ;;  %v14600_v8 = vld [vmem:[#allocation218_spill] sm:$0xff]  ;;  %v14607_v51 = vld [vmem:[#allocation300_spill] sm:$0xff]  ;;  %v14609_v28 = vld [vmem:[#allocation297_spill] sm:$0xff] }
 0xcd6   : > { %v5130_v39 = vadd.f32 %v5122_v54, %v5066_v1  ;;  %v4419_v36 = vmul.f32 %v14600_v8, %v14599_v26  ;;  %v4483_v54 = vmul.f32 %v14602_v55, %v14601_v34  ;;  %v4611_v9 = vmul.f32 %v14607_v51, %v14606_v40  ;;  %v14612_v42 = vld [vmem:[#allocation329_spill] sm:$0xff]  ;;  %v14613_v26 = vld [vmem:[#allocation338_spill] sm:$0xff] }
 0xcd7   : > { %v4299_v27 = vadd.f32 %v4291_v46, %v4235_v53  ;;  %v12525_v25 = vadd.f32 %v5628_v22, %v5572_v7  ;;  %v4547_v46 = vmul.f32 %v14604_v10, %v14603_v21  ;;  %v5565_v22 = vmul.f32 %v12196_v15, %v5519_v48  ;;  %v12555_v48 = vpop.permute.xlu0 %5617  ;;  %v14619_v51 = vld [vmem:[#allocation365_spill] sm:$0xff] }
 0xcd8   : > { %v12486_v49 = vpop.permute.xlu1 %5433  ;;  %v5194_v23 = vadd.f32 %v5186_v17, %v5130_v39 }
 0xcd9   : > { %v4363_v59 = vadd.f32 %v4355_v20, %v4299_v27  ;;  %v5652_v47 = vmul.f32 0.044715, %v12525_v25  ;;  %v14610_v27 = vld [vmem:[#allocation307_spill] sm:$0xff]  ;;  %v5509_v20 = vadd.f32 %v5501_v38, %v12225_v12 }
 0xcdb   : > { %v4427_v53 = vadd.f32 %v4419_v36, %v4363_v59  ;;  %v5660_v7 = vmul.f32 %v5652_v47, %v12525_v25  ;;  %v5573_v34 = vadd.f32 %v5565_v22, %v5509_v20  ;;  %v14615_v47 = vld [vmem:[#allocation146_spill] sm:$0xff] }
 0xcdd   : > { %v12501_v58 = vpop.permute.xlu1 %5549  ;;  %v4491_v17 = vadd.f32 %v4483_v54, %v4427_v53  ;;  %v5668_v59 = vmul.f32 %v5660_v7, %v12525_v25  ;;  %v14616_v53 = vld [vmem:[#allocation356_spill] sm:$0xff] }
 0xcde   : > { %v4867_v15 = vmul.f32 %v14616_v53, %v14615_v47 }
 0xcdf   : > { %v4555_v60 = vadd.f32 %v4547_v46, %v4491_v17  ;;  %v5676_v10 = vadd.f32 %v5668_v59, %v12525_v25  ;;  %v14617_v46 = vld [vmem:[#allocation341_spill] sm:$0xff] }
 0xce1   : > { %v5209_v16 = vpop.permute.xlu1 %5208  ;;  %v5684_v38 = vmul.f32 0.7978846, %v5676_v10 }
 0xce2   : > { %v5250_v63 = vmul.f32 %v14596_v57, %v5209_v16  ;;  %v4675_v16 = vmul.f32 %v14610_v27, %v14609_v28  ;;  %v4619_v57 = vadd.f32 %v4611_v9, %v4555_v60  ;;  %v14620_v9 = vld [vmem:[#allocation364_spill] sm:$0xff]  ;;  %v14621_v60 = vld [vmem:[#allocation373_spill] sm:$0xff] }
 0xce3   : > { %v14622_v28 = vld [vmem:[#allocation377_spill] sm:$0xff]  ;;  %6523 = vtanh.f32 %v5684_v38 }
 0xce4   : > { %v12527_v62 = vadd.f32 %v5250_v63, %v5194_v23  ;;  %v14611_v63 = vld [vmem:[#allocation321_spill] sm:$0xff]  ;;  %v4683_v37 = vadd.f32 %v4675_v16, %v4619_v57  ;;  %v5059_v27 = vmul.f32 %v14622_v28, %v14621_v60  ;;  %v5339_v16 = vpop.permute.xlu0 %5338 }
 0xce5   : > { %v5211_v3 = vpop.permute.xlu1 %5210  ;;  %v4739_v14 = vmul.f32 %v14612_v42, %v14611_v63  ;;  %v14623_v42 = vld [vmem:[#allocation143_spill] sm:$0xff] }
 0xce7   : > { %v4747_v54 = vadd.f32 %v4739_v14, %v4683_v37  ;;  %v14624_v14 = vld [vmem:[#allocation382_spill] sm:$0xff] }
 0xce8   : > { %v5123_v20 = vmul.f32 %v14624_v14, %v14623_v42  ;;  %v5463_v47 = vpop.permute.xlu0 %5462 }
 0xce9   : > { %v5335_v1 = vpop.permute.xlu1 %5334 }
 0xcea   : > { %v5377_v4 = vmul.f32 %v14605_v35, %v5335_v1  ;;  %v14618_v1 = vld [vmem:[#allocation370_spill] sm:$0xff] }
 0xceb   : > { %v4931_v35 = vmul.f32 %v14618_v1, %v14617_v46  ;;  %v5379_v1 = vmul.f32 %v12410_v52, %v5339_v16  ;;  %v5644_v52 = vmul.f32 0.5, %v12525_v25 }
 0xcec   : > { %v5385_v39 = vadd.f32 %v5377_v4, %v12464_v45  ;;  %v14614_v45 = vld [vmem:[#allocation433_spill] sm:$0xff] }
 0xced   : > { %v5459_v23 = vpop.permute.xlu1 %5458  ;;  %v4803_v8 = vmul.f32 %v14614_v45, %v14613_v26  ;;  %v14625_v26 = vld [vmem:[#allocation386_spill] sm:$0xff]  ;;  %v14626_v45 = vld [vmem:[#allocation381_spill] sm:$0xff] }
 0xcef   : > { %v4811_v12 = vadd.f32 %v4803_v8, %v4747_v54  ;;  %v5187_v8 = vmul.f32 %v14626_v45, %v14625_v26  ;;  %v5251_v54 = vmul.f32 %v12221_v41, %v5211_v3  ;;  %v5505_v41 = vmul.f32 %v12206_v13, %v5463_v47 }
 0xcf0   : > { %v5566_v26 = vmul.f32 %v12292_v44, %v12473_v50  ;;  %v14628_v44 = vld [vmem:[#allocation81_spill] sm:$0xff] }
 0xcf1   : > { %v5583_v36 = vpop.permute.xlu1 %5582  ;;  %v4875_v40 = vadd.f32 %v4867_v15, %v4811_v12  ;;  %v14627_v12 = vld [vmem:[#allocation389_spill] sm:$0xff] }
 0xcf2   : > { %v5629_v55 = vmul.f32 %v12281_v11, %v5583_v36  ;;  %v4995_v11 = vmul.f32 %v14620_v9, %v14619_v51  ;;  %v5503_v51 = vmul.f32 %v12265_v29, %v5459_v23  ;;  %v5574_v47 = vadd.f32 %v5566_v26, %v12326_v31 }
 0xcf3   : > { %v4939_v7 = vadd.f32 %v4931_v35, %v4875_v40  ;;  %v5587_v40 = vpop.permute.xlu0 %5586 }
 0xcf4   : > { %v5637_v21 = vadd.f32 %v5629_v55, %v5573_v34  ;;  %v5511_v60 = vadd.f32 %v5503_v51, %v12476_v56 }
 0xcf5   : > { %v12560_v4 = vpop.permute.xlu1 %5497  ;;  %v5003_v63 = vadd.f32 %v4995_v11, %v4939_v7 }
 0xcf6   : > { %v5653_v17 = vmul.f32 0.044715, %v5637_v21  ;;  %v5645_v16 = vmul.f32 0.5, %v5637_v21 }
 0xcf7   : > { %v5067_v37 = vadd.f32 %v5059_v27, %v5003_v63  ;;  %v12585_v23 = vpop.permute.xlu0 %5625 }
 0xcf8   : > { %v5661_v43 = vmul.f32 %v5653_v17, %v5637_v21  ;;  %v6524_v17 = vpop.eup %6523 }
 0xcf9   : > { %v5131_v55 = vadd.f32 %v5123_v20, %v5067_v37  ;;  %v5700_v38 = vadd.f32 1.0, %v6524_v17 }
 0xcfa   : > { %v12566_v22 = vpop.permute.xlu1 %5613  ;;  %v5669_v57 = vmul.f32 %v5661_v43, %v5637_v21 }
 0xcfb   : > { %v5195_v53 = vadd.f32 %v5187_v8, %v5131_v55  ;;  %v5708_v13 = vmul.f32 %v5700_v38, %v5644_v52 }
 0xcfc   : > { %v5677_v59 = vadd.f32 %v5669_v57, %v5637_v21 }
 0xcfd   : > { %v5259_v10 = vadd.f32 %v5251_v54, %v5195_v53 }
 0xcfe   : > { %v5273_v36 = vpop.permute.xlu1 %5272  ;;  %v5685_v34 = vmul.f32 0.7978846, %v5677_v59 }
 0xd00   : > { %6525 = vtanh.f32 %v5685_v34 }
 0xd02   : > { %v5275_v15 = vpop.permute.xlu1 %5274 }
 0xd03   : > { %v5315_v46 = vmul.f32 %v14627_v12, %v5275_v15  ;;  %v5314_v15 = vmul.f32 %v12320_v61, %v5273_v36 }
 0xd05   : > { %v5323_v35 = vadd.f32 %v5315_v46, %v5259_v10 }
 0xd06   : > { %v5399_v9 = vpop.permute.xlu1 %5398 }
 0xd07   : > { %v5441_v11 = vmul.f32 %v12354_v33, %v5399_v9  ;;  %v12577_v43 = vadd.f32 %v5379_v1, %v5323_v35  ;;  %v5631_v33 = vmul.f32 %v12449_v2, %v5587_v40 }
 0xd09   : > { %v5449_v3 = vadd.f32 %v5441_v11, %v5385_v39 }
 0xd0a   : > { %v6526_v7 = vpop.eup %6525  ;;  %v5523_v28 = vpop.permute.xlu1 %5522 }
 0xd0b   : > { %v5567_v27 = vmul.f32 %v12368_v0, %v5523_v28  ;;  %v5701_v57 = vadd.f32 1.0, %v6526_v7  ;;  %v12583_v29 = vadd.f32 %v5505_v41, %v5449_v3  ;;  %v5525_v0 = vpop.permute.xlu0 %5524 }
 0xd0c   : > { %v5568_v45 = vmul.f32 %v12501_v58, %v5525_v0 }
 0xd0d   : > { %v5575_v63 = vadd.f32 %v5567_v27, %v5511_v60  ;;  %v5709_v39 = vmul.f32 %v5701_v57, %v5645_v16 }
 0xd0e   : > { %v12588_v42 = vpop.permute.xlu1 %5561 }
 0xd0f   : > { %v12590_v14 = vadd.f32 %v5631_v33, %v5575_v63  ;;  %v5721_v56 = vpack.c.bf16 %v5709_v39, %v5708_v13  ;;  %v5465_v2 = vpop.permute.xlu0 %5464 }
 0xd10   : > { %v5506_v61 = vmul.f32 %v12276_v32, %v5465_v2 }
 0xd11   : > { %v5655_v25 = vmul.f32 0.044715, %v12590_v14  ;;  %6148 = vmatprep.subr.bf16.mxu1 %v5721_v56  ;;  %v5647_v2 = vmul.f32 0.5, %v12590_v14 }
 0xd12   : > { %v5337_v21 = vpop.permute.xlu1 %5336  ;;  %6149 = vmatpush3.bf16.msra.mxu1 %v5721_v56 }
 0xd13   : > { %v5663_v20 = vmul.f32 %v5655_v25, %v12590_v14  ;;  %v5589_v12 = vpop.permute.xlu0 %5588  ;;  %v5378_v50 = vmul.f32 %v14628_v44, %v5337_v21 }
 0xd14   : > { %v5632_v40 = vmul.f32 %v12566_v22, %v5589_v12 }
 0xd15   : > { %v5671_v34 = vmul.f32 %v5663_v20, %v12590_v14 }
 0xd16   : > { %v5461_v59 = vpop.permute.xlu1 %5460 }
 0xd17   : > { %v5504_v37 = vmul.f32 %v12422_v30, %v5461_v59  ;;  %v5679_v30 = vadd.f32 %v5671_v34, %v12590_v14  ;;  %v5529_v36 = vpop.permute.xlu0 %5528 }
 0xd19   : > { %v5512_v8 = vadd.f32 %v5504_v37, %v12347_v6  ;;  %v5322_v6 = vadd.f32 %v5314_v15, %v12527_v62  ;;  %v5687_v35 = vmul.f32 0.7978846, %v5679_v30  ;;  %v5570_v62 = vmul.f32 %v12488_v5, %v5529_v36 }
 0xd1a   : > { %v5585_v55 = vpop.permute.xlu1 %5584 }
 0xd1b   : > { %v5576_v54 = vadd.f32 %v5568_v45, %v5512_v8  ;;  %v5630_v53 = vmul.f32 %v12437_v18, %v5585_v55  ;;  %v5386_v31 = vadd.f32 %v5378_v50, %v5322_v6  ;;  %6527 = vtanh.f32 %v5687_v35  ;;  %v5593_v28 = vpop.permute.xlu0 %5592 }
 0xd1d   : > { %v5638_v10 = vadd.f32 %v5630_v53, %v5574_v47  ;;  %v12609_v9 = vadd.f32 %v5632_v40, %v5576_v54 }
 0xd1e   : > { %v5622_v46 = vpop.permute.xlu1 %5621 }
 0xd1f   : > { %v5654_v58 = vmul.f32 0.044715, %v5638_v10  ;;  %v5656_v22 = vmul.f32 0.044715, %v12609_v9  ;;  %v5634_v52 = vmul.f32 %v5622_v46, %v5593_v28  ;;  %v5646_v37 = vmul.f32 0.5, %v5638_v10 }
 0xd21   : > { %v5662_v1 = vmul.f32 %v5654_v58, %v5638_v10  ;;  %v5664_v16 = vmul.f32 %v5656_v22, %v12609_v9 }
 0xd22   : > { %v5401_v17 = vpop.permute.xlu1 %5400 }
 0xd23   : > { %v5442_v18 = vmul.f32 %v12186_v19, %v5401_v17  ;;  %v5670_v51 = vmul.f32 %v5662_v1, %v5638_v10  ;;  %v5672_v56 = vmul.f32 %v5664_v16, %v12609_v9 }
 0xd25   : > { %v5450_v11 = vadd.f32 %v5442_v18, %v5386_v31  ;;  %v5678_v41 = vadd.f32 %v5670_v51, %v5638_v10  ;;  %v6528_v33 = vpop.eup %6527  ;;  %v5648_v18 = vmul.f32 0.5, %v12609_v9 }
 0xd26   : > { %v5403_v3 = vpop.permute.xlu1 %5402  ;;  %v5703_v21 = vadd.f32 1.0, %v6528_v33 }
 0xd27   : > { %v5514_v38 = vadd.f32 %v5506_v61, %v5450_v11  ;;  %v5686_v7 = vmul.f32 0.7978846, %v5678_v41  ;;  %v5443_v32 = vmul.f32 %v12486_v49, %v5403_v3 }
 0xd28   : > { %v5711_v34 = vmul.f32 %v5703_v21, %v5647_v2 }
 0xd29   : > { %v5578_v60 = vadd.f32 %v5570_v62, %v5514_v38  ;;  %6529 = vtanh.f32 %v5686_v7  ;;  %v5451_v63 = vadd.f32 %v5443_v32, %v12577_v43 }
 0xd2a   : > { %v5527_v19 = vpop.permute.xlu1 %5526 }
 0xd2b   : > { %v12614_v27 = vadd.f32 %v5634_v52, %v5578_v60  ;;  %v5569_v5 = vmul.f32 %v12313_v24, %v5527_v19  ;;  %v5680_v24 = vadd.f32 %v5672_v56, %v12609_v9  ;;  %v6438_v9 = vld [vmem:[%s12657_s9 + $0x18] sm:$0xff]  }
 0xd2d   : > { %v5658_v25 = vmul.f32 0.044715, %v12614_v27  ;;  %v5577_v20 = vadd.f32 %v5569_v5, %v12583_v29  ;;  %v5688_v29 = vmul.f32 0.7978846, %v5680_v24  ;;  %v5650_v7 = vmul.f32 0.5, %v12614_v27 }
 0xd2e   : > { %v5467_v57 = vpop.permute.xlu1 %5466 }
 0xd2f   : > { %v5507_v13 = vmul.f32 %v12560_v4, %v5467_v57  ;;  %v5666_v4 = vmul.f32 %v5658_v25, %v12614_v27  ;;  %6531 = vtanh.f32 %v5688_v29 }
 0xd31   : > { %v5515_v39 = vadd.f32 %v5507_v13, %v5451_v63  ;;  %v14629_v63 = vld [vmem:[#allocation58_spill] sm:$0xff]  ;;  %v14630_v13 = vld [vmem:[#allocation75_spill] sm:$0xff] }
 0xd32   : > { %v5591_v0 = vpop.permute.xlu1 %5590 }
 0xd33   : > { %v6530_v49 = vpop.eup %6529  ;;  %v5633_v59 = vmul.f32 %v12555_v48, %v5591_v0  ;;  %v5674_v48 = vmul.f32 %v5666_v4, %v12614_v27  ;;  %v14631_v0 = vld [vmem:[#allocation180_spill] sm:$0xff] }
 0xd34   : > { %v5702_v43 = vadd.f32 1.0, %v6530_v49 }
 0xd35   : > { %v5641_v26 = vadd.f32 %v5633_v59, %v5577_v20  ;;  %v5682_v44 = vadd.f32 %v5674_v48, %v12614_v27  ;;  %v14632_v59 = vld [vmem:[#allocation179_spill] sm:$0xff] }
 0xd36   : > { %v5531_v45 = vpop.permute.xlu1 %5530  ;;  %v5710_v8 = vmul.f32 %v5702_v43, %v5646_v37 }
 0xd37   : > { %v5657_v55 = vmul.f32 0.044715, %v5641_v26  ;;  %v5571_v54 = vmul.f32 %v12588_v42, %v5531_v45  ;;  %v5690_v6 = vmul.f32 0.7978846, %v5682_v44  ;;  %v5649_v51 = vmul.f32 0.5, %v5641_v26 }
 0xd38   : > { %v5722_v47 = vpack.c.bf16 %v5711_v34, %v5710_v8 }
 0xd39   : > { %v5665_v53 = vmul.f32 %v5657_v55, %v5641_v26  ;;  %v5579_v14 = vadd.f32 %v5571_v54, %v5515_v39  ;;  %v6532_v17 = vpop.eup %6531 }
 0xd3a   : > { %v5595_v15 = vpop.permute.xlu1 %5594  ;;  %6150 = vmatprep.subr.bf16.mxu1 %v5722_v47  ;;  %v5704_v31 = vadd.f32 1.0, %v6532_v17 }
 0xd3b   : > { %v5635_v10 = vmul.f32 %v12585_v23, %v5595_v15  ;;  %6151 = vmatpush3.bf16.msra.mxu1 %v5722_v47  ;;  %v5673_v30 = vmul.f32 %v5665_v53, %v5641_v26 }
 0xd3c   : > { %v5712_v36 = vmul.f32 %v5704_v31, %v5648_v18 }
 0xd3d   : > { %v5643_v12 = vadd.f32 %v5635_v10, %v5579_v14  ;;  %v5681_v46 = vadd.f32 %v5673_v30, %v5641_v26 }
 0xd3f   : > { %v5659_v50 = vmul.f32 0.044715, %v5643_v12  ;;  %v5689_v58 = vmul.f32 0.7978846, %v5681_v46  ;;  %v5651_v60 = vmul.f32 0.5, %v5643_v12 }
 0xd41   : > { %v5667_v42 = vmul.f32 %v5659_v50, %v5643_v12  ;;  %6533 = vtanh.f32 %v5689_v58 }
 0xd42   : > { %6535 = vtanh.f32 %v5690_v6 }
 0xd43   : > { %v5675_v1 = vmul.f32 %v5667_v42, %v5643_v12 }
 0xd45   : > { %v5683_v35 = vadd.f32 %v5675_v1, %v5643_v12  ;;  %v5807_v32 = vpop.permute.xlu1 %5806 }
 0xd47   : > { %v5691_v40 = vmul.f32 0.7978846, %v5683_v35  ;;  %v5802_v16 = vpop.permute.xlu0 %5801 }
 0xd49   : > { %6537 = vtanh.f32 %v5691_v40 }
 0xd4b   : > { %v6534_v23 = vpop.eup %6533 }
 0xd4c   : > { %v5705_v61 = vadd.f32 1.0, %v6534_v23  ;;  %v6536_v41 = vpop.eup %6535 }
 0xd4d   : > { %v5706_v62 = vadd.f32 1.0, %v6536_v41 }
 0xd4e   : > { %v5713_v11 = vmul.f32 %v5705_v61, %v5649_v51  ;;  %v5812_v33 = vpop.permute.xlu1 %5811 }
 0xd4f   : > { %v5714_v28 = vmul.f32 %v5706_v62, %v5650_v7 }
 0xd50   : > { %v5723_v3 = vpack.c.bf16 %v5713_v11, %v5712_v36 }
 0xd52   : > { %6152 = vmatprep.subr.bf16.mxu1 %v5723_v3 }
 0xd53   : > { %v6538_v38 = vpop.eup %6537  ;;  %6153 = vmatpush3.bf16.msra.mxu1 %v5723_v3 }
 0xd54   : > { %v5707_v22 = vadd.f32 1.0, %v6538_v38  ;;  %v5817_v2 = vpop.permute.xlu0 %5816 }
 0xd56   : > { %v5715_v19 = vmul.f32 %v5707_v22, %v5651_v60 }
 0xd58   : > { %v5724_v52 = vpack.c.bf16 %v5715_v19, %v5714_v28 }
 0xd5a   : > { %6154 = vmatprep.subr.bf16.mxu1 %v5724_v52 }
 0xd5b   : > { %6155 = vmatpush3.bf16.msra.mxu1 %v5724_v52 }
 0xd5e   : > { %6157 = vmatmul.mubr.msk.bf16.vlgmr.msra.gmra.mrb[20].mxu1 %vm3065_vm4, %v6438_v9 }
 0xe31   : > { %v6158_v57 = vpop.f32.mrb[20].mxu1 }
 0xe32   : > { %v5792_v27 = vadd.f32 %v6158_v57, %v14629_v63  ;;  %v5775_v5 = vpop.f32.mrb[21].mxu1 }
 0xe33   : > { %v5790_v39 = vadd.f32 %v5775_v5, %v14630_v13  ;;  %v6159_v56 = vpop.f32.mrb[22].mxu1 }
 0xe34   : > { %v5821_v25 = vadd.f32 %v5812_v33, %v5792_v27  ;;  %v5793_v21 = vadd.f32 %v6159_v56, %v14631_v0  ;;  %v5778_v49 = vpop.f32.mrb[23].mxu1 }
 0xe35   : > { %v5819_v20 = vadd.f32 %v5802_v16, %v5790_v39  ;;  %v5791_v37 = vadd.f32 %v5778_v49, %v14632_v59 }
 0xe36   : > { %5825 = vst [vmem:[%s386_s30 + $0x10] sm:$0xff] %v5821_v25  ;;  %v5822_v43 = vadd.f32 %v5817_v2, %v5793_v21 }
 0xe37   : > { %5823 = vst [vmem:[%s386_s30] sm:$0xff] %v5819_v20  ;;  %v5820_v26 = vadd.f32 %v5807_v32, %v5791_v37 }
 0xe38   : > { %5826 = vst [vmem:[%s386_s30 + $0x18] sm:$0xff] %v5822_v43 }
 0xe39   : > { %5824 = vst [vmem:[%s386_s30 + $0x8] sm:$0xff] %v5820_v26 }
 0xe3a PF: > { %s21_s17 = sadd.s32 1, %s6572_s17  }
 0xe3b   : > { %p18_p4 = scmp.ge.s32.totalorder %s21_s17, 4  }
 0xe3d   :  { %20 = sbr.rel (!%p18_p4) target bundleno = 1 (0x1), region = 102 }

</bundles_post_ra>
